<compile_context>
chip_gen: v6e
topology: v6e:2x2x1
jax: 0.10.0
libtpu: 0.0.40
codegen_flags: <defaults>
</compile_context>

<pallas_src>
import jax
import jax.numpy as jnp
from jax.experimental import pallas as pl
from jax.experimental.pallas import tpu as pltpu

EPS = 1e-5  # PyTorch LayerNorm default eps


# ----------------------------------------------------------------------------
# Kernel 1: conv (im2col matmul, lane-dense) + bias + ReLU + 4x4 max-pool
# ----------------------------------------------------------------------------
def _conv_pool_kernel(patches_ref, w_ref, b_ref, o_ref):
    # patches_ref: (1, 16, 128, 640) bf16   [pool-offset, k=(ci,kh,kw), s=(ph,pw)]
    # w_ref:       (8, 128) bf16            [co, k]
    # b_ref:       (8, 1)   f32             [co]
    # o_ref:       (1, 8, 640) f32          [co, s]
    n_off = patches_ref.shape[1]
    w = w_ref[...]
    acc = jnp.dot(w, patches_ref[0, 0], preferred_element_type=jnp.float32)
    for p in range(1, n_off):
        z = jnp.dot(w, patches_ref[0, p], preferred_element_type=jnp.float32)
        acc = jnp.maximum(acc, z)
    # relu(maxpool(conv + b)) == maxpool(relu(conv + b)) since relu is monotonic,
    # and max_p(x_p) + b == max_p(x_p + b).
    o_ref[0] = jnp.maximum(acc + b_ref[...], 0.0)


def conv_relu_pool(patches, w_mat, b_vec):
    # patches: (B, 16, 128, 640) bf16, w_mat: (8, 128) bf16, b_vec: (8, 1) f32
    # -> (B, 8, 640) f32  (channel-major pooled features, 15 garbage pad columns)
    B, P, K, S = patches.shape
    CO = w_mat.shape[0]
    flops = 2 * B * P * CO * K * S
    bytes_acc = (patches.size * patches.dtype.itemsize
                 + w_mat.size * w_mat.dtype.itemsize
                 + b_vec.size * b_vec.dtype.itemsize
                 + B * CO * S * 4)
    return pl.pallas_call(
        _conv_pool_kernel,
        out_shape=jax.ShapeDtypeStruct((B, CO, S), jnp.float32),
        grid_spec=pltpu.PrefetchScalarGridSpec(
            num_scalar_prefetch=0,
            grid=(B,),
            in_specs=[
                pl.BlockSpec((1, P, K, S), lambda b: (b, 0, 0, 0)),
                pl.BlockSpec((CO, K), lambda b: (0, 0)),
                pl.BlockSpec((CO, 1), lambda b: (0, 0)),
            ],
            out_specs=pl.BlockSpec((1, CO, S), lambda b: (b, 0, 0)),
        ),
        compiler_params=pltpu.CompilerParams(dimension_semantics=("parallel",)),
        cost_estimate=pl.CostEstimate(
            flops=int(flops), transcendentals=0, bytes_accessed=int(bytes_acc)),
    )(patches, w_mat, b_vec)


# ----------------------------------------------------------------------------
# Kernel 2: fused MLP head (layernorms + tanh/relu + all linear layers)
# ----------------------------------------------------------------------------
def _ln(x, g, b):
    mu = jnp.mean(x, axis=-1, keepdims=True)
    var = jnp.mean(jnp.square(x - mu), axis=-1, keepdims=True)
    return (x - mu) * jax.lax.rsqrt(var + EPS) * g + b


def _mlp_kernel(img_ref, info_ref, act_ref,
                g_img_ref, b_img_ref,
                w_info_ref, b_info_ref, g_info_ref, be_info_ref,
                w_act_ref, b_act_ref, g_act_ref, be_act_ref,
                w_f_img_ref, w_f_info_ref, w_f_act_ref, b_f_ref, g_f_ref, be_f_ref,
                w_d_ref, b_d_ref,
                o_ref):
    img_f = _ln(img_ref[...], g_img_ref[...], b_img_ref[...])

    info_h = jnp.dot(info_ref[...], w_info_ref[...],
                     preferred_element_type=jnp.float32) + b_info_ref[...]
    info_f = jnp.tanh(_ln(info_h, g_info_ref[...], be_info_ref[...]))

    act_h = jnp.dot(act_ref[...], w_act_ref[...],
                    preferred_element_type=jnp.float32) + b_act_ref[...]
    act_f = jnp.tanh(_ln(act_h, g_act_ref[...], be_act_ref[...]))

    # concat(img_f, info_f, act_f) @ W_feature  ==  sum of split-weight matmuls.
    # Large weights are bf16; cast activations to bf16 for the native MXU path,
    # accumulate in f32.
    feat_h = (jnp.dot(img_f.astype(jnp.bfloat16), w_f_img_ref[...],
                      preferred_element_type=jnp.float32)
              + jnp.dot(info_f.astype(jnp.bfloat16), w_f_info_ref[...],
                        preferred_element_type=jnp.float32)
              + jnp.dot(act_f.astype(jnp.bfloat16), w_f_act_ref[...],
                        preferred_element_type=jnp.float32)
              + b_f_ref[...])
    feat = jnp.maximum(_ln(feat_h, g_f_ref[...], be_f_ref[...]), 0.0)

    # decision head: (B,256)->(B,1) as a VPU multiply + lane-reduce (no MXU pass,
    # no (256,1) operand).
    o_ref[...] = jnp.sum(feat * w_d_ref[...], axis=-1, keepdims=True) + b_d_ref[...]


def mlp_head(img_flat, info, act, p):
    B = img_flat.shape[0]
    A = act.shape[1]
    args = (img_flat, info, act,
            p["g_img"], p["b_img"],
            p["w_info"], p["b_info"], p["g_info"], p["be_info"],
            p["w_act"], p["b_act"], p["g_act"], p["be_act"],
            p["w_f_img"], p["w_f_info"], p["w_f_act"], p["b_f"], p["g_f"], p["be_f"],
            p["w_d"], p["b_d"])
    vmem = lambda: pl.BlockSpec(memory_space=pltpu.MemorySpace.VMEM)
    flops = 2 * B * (5000 * 256 + 64 * 256 + 128 * 256 + 3 * 64 + A * 128 + 256)
    bytes_acc = sum(int(a.size) * a.dtype.itemsize for a in args) + B * 4
    return pl.pallas_call(
        _mlp_kernel,
        out_shape=jax.ShapeDtypeStruct((B, 1), jnp.float32),
        in_specs=[vmem() for _ in args],
        out_specs=vmem(),
        cost_estimate=pl.CostEstimate(
            flops=int(flops), transcendentals=int(B * (64 + 128)),
            bytes_accessed=int(bytes_acc)),
    )(*args)


# ----------------------------------------------------------------------------
# JAX glue: im2col layout plumbing (bf16, lane-dense, pool-offset-major)
# ----------------------------------------------------------------------------
def im2col_pool_patches(img):
    # img: (B, 5, 100, 100) f32 -> (B, 16, 128, 640) bf16
    #   dim1: pool offset p = 4*i + j            (i, j in [0,4))
    #   dim2: contraction k = ci*25 + kh*5 + kw  (padded 125 -> 128 with zeros)
    #   dim3: pixel s = ph*25 + pw               (padded 625 -> 640 with zeros)
    B = img.shape[0]
    x = jnp.pad(img, ((0, 0), (0, 0), (2, 2), (2, 2)))          # conv padding=2
    shifts = [x[:, :, kh:kh + 100, kw:kw + 100]
              for kh in range(5) for kw in range(5)]
    cols = jnp.stack(shifts, axis=2)                             # (B, 5, 25, 100, 100)
    cols = cols.reshape(B, 5, 5, 5, 25, 4, 25, 4)                # (b,ci,kh,kw,ph,i,pw,j)
    patches = cols.transpose(0, 5, 7, 1, 2, 3, 4, 6)             # (b,i,j,ci,kh,kw,ph,pw)
    patches = patches.reshape(B, 16, 125, 625)
    patches = jnp.pad(patches, ((0, 0), (0, 0), (0, 3), (0, 15)))
    return patches.astype(jnp.bfloat16)


def net_fighter_sq_forward(params, img, info, act):
    B = img.shape[0]
    patches = im2col_pool_patches(img)
    pooled = conv_relu_pool(patches, params["w_conv_mat"], params["b_conv"])  # (B,8,640)
    # channel-major flatten, matching torch (B,8,25,25).view(B,-1); drop pad columns.
    img_flat = pooled[:, :, :625].reshape(B, 8 * 625)
    return mlp_head(img_flat, info, act, params)


# ----------------------------------------------------------------------------
# Deterministic parameter init (synthetic; mirrors module shapes / kernel layouts)
# ----------------------------------------------------------------------------
def init_params(key, agent_num=2, init_w=0.003):
    ks = jax.random.split(key, 12)
    unif = lambda k, shape, b: jax.random.uniform(k, shape, jnp.float32, -b, b)
    A = 4 * agent_num
    w_conv = unif(ks[0], (8, 5, 5, 5), 1.0 / (125 ** 0.5))       # (co, ci, kh, kw)
    w_conv_mat = jnp.pad(w_conv.reshape(8, 125), ((0, 0), (0, 3)))  # (8, 128)
    return dict(
        w_conv_mat=w_conv_mat.astype(jnp.bfloat16),
        b_conv=unif(ks[1], (8, 1), 1.0 / (125 ** 0.5)),
        g_img=jnp.ones((1, 5000), jnp.float32),
        b_img=jnp.zeros((1, 5000), jnp.float32),
        w_info=unif(ks[2], (3, 64), 1.0 / (3 ** 0.5)),
        b_info=unif(ks[3], (1, 64), 1.0 / (3 ** 0.5)),
        g_info=jnp.ones((1, 64), jnp.float32),
        be_info=jnp.zeros((1, 64), jnp.float32),
        w_act=unif(ks[4], (A, 128), 1.0 / (A ** 0.5)),
        b_act=unif(ks[5], (1, 128), 1.0 / (A ** 0.5)),
        g_act=jnp.ones((1, 128), jnp.float32),
        be_act=jnp.zeros((1, 128), jnp.float32),
        w_f_img=unif(ks[6], (5000, 256), 1.0 / (5192 ** 0.5)).astype(jnp.bfloat16),
        w_f_info=unif(ks[7], (64, 256), 1.0 / (5192 ** 0.5)).astype(jnp.bfloat16),
        w_f_act=unif(ks[8], (128, 256), 1.0 / (5192 ** 0.5)).astype(jnp.bfloat16),
        b_f=unif(ks[9], (1, 256), 1.0 / (5192 ** 0.5)),
        g_f=jnp.ones((1, 256), jnp.float32),
        be_f=jnp.zeros((1, 256), jnp.float32),
        w_d=unif(ks[10], (1, 256), init_w),
        b_d=unif(ks[11], (1, 1), init_w),
    )


# ----------------------------------------------------------------------------
# Pure-JAX f32 reference for verification (uses the same bf16-rounded weights)
# ----------------------------------------------------------------------------
def reference_forward(p, img, info, act):
    B = img.shape[0]
    f32 = lambda x: x.astype(jnp.float32)
    w_conv = f32(p["w_conv_mat"])[:, :125].reshape(8, 5, 5, 5)
    conv = jax.lax.conv_general_dilated(
        img, w_conv, window_strides=(1, 1), padding=((2, 2), (2, 2)),
        dimension_numbers=("NCHW", "OIHW", "NCHW")) + p["b_conv"].reshape(1, 8, 1, 1)
    conv = jnp.maximum(conv, 0.0)
    pooled = jax.lax.reduce_window(conv, -jnp.inf, jax.lax.max,
                                   (1, 1, 4, 4), (1, 1, 4, 4), "VALID")
    img_flat = pooled.reshape(B, -1)

    def ln(x, g, b):
        mu = jnp.mean(x, -1, keepdims=True)
        var = jnp.mean((x - mu) ** 2, -1, keepdims=True)
        return (x - mu) / jnp.sqrt(var + EPS) * g + b

    img_f = ln(img_flat, p["g_img"], p["b_img"])
    info_f = jnp.tanh(ln(info @ p["w_info"] + p["b_info"], p["g_info"], p["be_info"]))
    act_f = jnp.tanh(ln(act @ p["w_act"] + p["b_act"], p["g_act"], p["be_act"]))
    comb = jnp.concatenate([img_f, info_f, act_f], axis=1)
    w_f = jnp.concatenate([f32(p["w_f_img"]), f32(p["w_f_info"]), f32(p["w_f_act"])],
                          axis=0)
    feat = jnp.maximum(ln(comb @ w_f + p["b_f"], p["g_f"], p["be_f"]), 0.0)
    return feat @ p["w_d"].T + p["b_d"]


if __name__ == "__main__":
    key = jax.random.PRNGKey(0)
    k_img, k_info, k_act, k_p = jax.random.split(key, 4)
    agent_num, B = 2, 2
    img = jax.random.normal(k_img, (B, 5, 100, 100), jnp.float32)
    info = jax.random.normal(k_info, (B, 3), jnp.float32)
    act = jax.random.normal(k_act, (B, 4 * agent_num), jnp.float32)
    params = init_params(k_p, agent_num=agent_num)

    fwd = jax.jit(net_fighter_sq_forward)
    q = fwd(params, img, info, act)
    jax.block_until_ready(q)

    q_ref = reference_forward(params, img, info, act)
    assert q.shape == (B, 1)
    # bf16 matmul operands (f32 accumulation) -> slightly looser atol than pure f32.
    assert jnp.allclose(q, q_ref, rtol=5e-2, atol=5e-3), (q, q_ref)
    print("KERNEL_OK")
</pallas_src>

<mosaic_0001>
module attributes {stable_mosaic.version = 11 : i64} {
  func.func @_conv_pool_kernel(%arg0: i32, %arg1: memref<1x16x128x640xbf16, #tpu.memory_space<vmem>>, %arg2: memref<8x128xbf16, #tpu.memory_space<vmem>>, %arg3: memref<8x1xf32, #tpu.memory_space<vmem>>, %arg4: memref<1x8x640xf32, #tpu.memory_space<vmem>>) attributes {dimension_semantics = [#tpu.dimension_semantics<parallel>], iteration_bounds = array<i64: 2>, scalar_prefetch = 0 : i64, scratch_operands = 0 : i64, tpu.core_type = #tpu.core_type<tc>, window_params = [{transform_indices = @transform_0, window_bounds = array<i64: 1, 16, 128, 640>}, {pipeline_mode = #tpu.pipeline_mode<synchronous>, transform_indices = @transform_1, window_bounds = array<i64: 8, 128>}, {pipeline_mode = #tpu.pipeline_mode<synchronous>, transform_indices = @transform_2, window_bounds = array<i64: 8, 1>}, {transform_indices = @transform_3, window_bounds = array<i64: 1, 8, 640>}]} {
    %c0 = arith.constant 0 : index
    %c0_0 = arith.constant 0 : index
    %0 = vector.load %arg2[%c0, %c0_0] : memref<8x128xbf16, #tpu.memory_space<vmem>>, vector<8x128xbf16>
    %c0_1 = arith.constant 0 : index
    %c0_2 = arith.constant 0 : index
    %c0_3 = arith.constant 0 : index
    %c0_4 = arith.constant 0 : index
    %1 = vector.load %arg1[%c0_1, %c0_2, %c0_3, %c0_4] : memref<1x16x128x640xbf16, #tpu.memory_space<vmem>>, vector<1x1x128x640xbf16>
    %2 = vector.shape_cast %1 : vector<1x1x128x640xbf16> to vector<128x640xbf16>
    %cst = arith.constant dense<0.000000e+00> : vector<8x640xf32>
    %3 = tpu.matmul %0, %2, %cst {dimension_numbers = #tpu.dot_dimension_numbers<[1], [0], [0], [1], [0, 0, 1, 1], [], []>} : vector<8x128xbf16>, vector<128x640xbf16>, vector<8x640xf32> -> vector<8x640xf32>
    %c0_5 = arith.constant 0 : index
    %c1 = arith.constant 1 : index
    %c0_6 = arith.constant 0 : index
    %c0_7 = arith.constant 0 : index
    %4 = vector.load %arg1[%c0_5, %c1, %c0_6, %c0_7] : memref<1x16x128x640xbf16, #tpu.memory_space<vmem>>, vector<1x1x128x640xbf16>
    %5 = vector.shape_cast %4 : vector<1x1x128x640xbf16> to vector<128x640xbf16>
    %cst_8 = arith.constant dense<0.000000e+00> : vector<8x640xf32>
    %6 = tpu.matmul %0, %5, %cst_8 {dimension_numbers = #tpu.dot_dimension_numbers<[1], [0], [0], [1], [0, 0, 1, 1], [], []>} : vector<8x128xbf16>, vector<128x640xbf16>, vector<8x640xf32> -> vector<8x640xf32>
    %7 = arith.maximumf %3, %6 : vector<8x640xf32>
    %c0_9 = arith.constant 0 : index
    %c2 = arith.constant 2 : index
    %c0_10 = arith.constant 0 : index
    %c0_11 = arith.constant 0 : index
    %8 = vector.load %arg1[%c0_9, %c2, %c0_10, %c0_11] : memref<1x16x128x640xbf16, #tpu.memory_space<vmem>>, vector<1x1x128x640xbf16>
    %9 = vector.shape_cast %8 : vector<1x1x128x640xbf16> to vector<128x640xbf16>
    %cst_12 = arith.constant dense<0.000000e+00> : vector<8x640xf32>
    %10 = tpu.matmul %0, %9, %cst_12 {dimension_numbers = #tpu.dot_dimension_numbers<[1], [0], [0], [1], [0, 0, 1, 1], [], []>} : vector<8x128xbf16>, vector<128x640xbf16>, vector<8x640xf32> -> vector<8x640xf32>
    %11 = arith.maximumf %7, %10 : vector<8x640xf32>
    %c0_13 = arith.constant 0 : index
    %c3 = arith.constant 3 : index
    %c0_14 = arith.constant 0 : index
    %c0_15 = arith.constant 0 : index
    %12 = vector.load %arg1[%c0_13, %c3, %c0_14, %c0_15] : memref<1x16x128x640xbf16, #tpu.memory_space<vmem>>, vector<1x1x128x640xbf16>
    %13 = vector.shape_cast %12 : vector<1x1x128x640xbf16> to vector<128x640xbf16>
    %cst_16 = arith.constant dense<0.000000e+00> : vector<8x640xf32>
    %14 = tpu.matmul %0, %13, %cst_16 {dimension_numbers = #tpu.dot_dimension_numbers<[1], [0], [0], [1], [0, 0, 1, 1], [], []>} : vector<8x128xbf16>, vector<128x640xbf16>, vector<8x640xf32> -> vector<8x640xf32>
    %15 = arith.maximumf %11, %14 : vector<8x640xf32>
    %c0_17 = arith.constant 0 : index
    %c4 = arith.constant 4 : index
    %c0_18 = arith.constant 0 : index
    %c0_19 = arith.constant 0 : index
    %16 = vector.load %arg1[%c0_17, %c4, %c0_18, %c0_19] : memref<1x16x128x640xbf16, #tpu.memory_space<vmem>>, vector<1x1x128x640xbf16>
    %17 = vector.shape_cast %16 : vector<1x1x128x640xbf16> to vector<128x640xbf16>
    %cst_20 = arith.constant dense<0.000000e+00> : vector<8x640xf32>
    %18 = tpu.matmul %0, %17, %cst_20 {dimension_numbers = #tpu.dot_dimension_numbers<[1], [0], [0], [1], [0, 0, 1, 1], [], []>} : vector<8x128xbf16>, vector<128x640xbf16>, vector<8x640xf32> -> vector<8x640xf32>
    %19 = arith.maximumf %15, %18 : vector<8x640xf32>
    %c0_21 = arith.constant 0 : index
    %c5 = arith.constant 5 : index
    %c0_22 = arith.constant 0 : index
    %c0_23 = arith.constant 0 : index
    %20 = vector.load %arg1[%c0_21, %c5, %c0_22, %c0_23] : memref<1x16x128x640xbf16, #tpu.memory_space<vmem>>, vector<1x1x128x640xbf16>
    %21 = vector.shape_cast %20 : vector<1x1x128x640xbf16> to vector<128x640xbf16>
    %cst_24 = arith.constant dense<0.000000e+00> : vector<8x640xf32>
    %22 = tpu.matmul %0, %21, %cst_24 {dimension_numbers = #tpu.dot_dimension_numbers<[1], [0], [0], [1], [0, 0, 1, 1], [], []>} : vector<8x128xbf16>, vector<128x640xbf16>, vector<8x640xf32> -> vector<8x640xf32>
    %23 = arith.maximumf %19, %22 : vector<8x640xf32>
    %c0_25 = arith.constant 0 : index
    %c6 = arith.constant 6 : index
    %c0_26 = arith.constant 0 : index
    %c0_27 = arith.constant 0 : index
    %24 = vector.load %arg1[%c0_25, %c6, %c0_26, %c0_27] : memref<1x16x128x640xbf16, #tpu.memory_space<vmem>>, vector<1x1x128x640xbf16>
    %25 = vector.shape_cast %24 : vector<1x1x128x640xbf16> to vector<128x640xbf16>
    %cst_28 = arith.constant dense<0.000000e+00> : vector<8x640xf32>
    %26 = tpu.matmul %0, %25, %cst_28 {dimension_numbers = #tpu.dot_dimension_numbers<[1], [0], [0], [1], [0, 0, 1, 1], [], []>} : vector<8x128xbf16>, vector<128x640xbf16>, vector<8x640xf32> -> vector<8x640xf32>
    %27 = arith.maximumf %23, %26 : vector<8x640xf32>
    %c0_29 = arith.constant 0 : index
    %c7 = arith.constant 7 : index
    %c0_30 = arith.constant 0 : index
    %c0_31 = arith.constant 0 : index
    %28 = vector.load %arg1[%c0_29, %c7, %c0_30, %c0_31] : memref<1x16x128x640xbf16, #tpu.memory_space<vmem>>, vector<1x1x128x640xbf16>
    %29 = vector.shape_cast %28 : vector<1x1x128x640xbf16> to vector<128x640xbf16>
    %cst_32 = arith.constant dense<0.000000e+00> : vector<8x640xf32>
    %30 = tpu.matmul %0, %29, %cst_32 {dimension_numbers = #tpu.dot_dimension_numbers<[1], [0], [0], [1], [0, 0, 1, 1], [], []>} : vector<8x128xbf16>, vector<128x640xbf16>, vector<8x640xf32> -> vector<8x640xf32>
    %31 = arith.maximumf %27, %30 : vector<8x640xf32>
    %c0_33 = arith.constant 0 : index
    %c8 = arith.constant 8 : index
    %c0_34 = arith.constant 0 : index
    %c0_35 = arith.constant 0 : index
    %32 = vector.load %arg1[%c0_33, %c8, %c0_34, %c0_35] : memref<1x16x128x640xbf16, #tpu.memory_space<vmem>>, vector<1x1x128x640xbf16>
    %33 = vector.shape_cast %32 : vector<1x1x128x640xbf16> to vector<128x640xbf16>
    %cst_36 = arith.constant dense<0.000000e+00> : vector<8x640xf32>
    %34 = tpu.matmul %0, %33, %cst_36 {dimension_numbers = #tpu.dot_dimension_numbers<[1], [0], [0], [1], [0, 0, 1, 1], [], []>} : vector<8x128xbf16>, vector<128x640xbf16>, vector<8x640xf32> -> vector<8x640xf32>
    %35 = arith.maximumf %31, %34 : vector<8x640xf32>
    %c0_37 = arith.constant 0 : index
    %c9 = arith.constant 9 : index
    %c0_38 = arith.constant 0 : index
    %c0_39 = arith.constant 0 : index
    %36 = vector.load %arg1[%c0_37, %c9, %c0_38, %c0_39] : memref<1x16x128x640xbf16, #tpu.memory_space<vmem>>, vector<1x1x128x640xbf16>
    %37 = vector.shape_cast %36 : vector<1x1x128x640xbf16> to vector<128x640xbf16>
    %cst_40 = arith.constant dense<0.000000e+00> : vector<8x640xf32>
    %38 = tpu.matmul %0, %37, %cst_40 {dimension_numbers = #tpu.dot_dimension_numbers<[1], [0], [0], [1], [0, 0, 1, 1], [], []>} : vector<8x128xbf16>, vector<128x640xbf16>, vector<8x640xf32> -> vector<8x640xf32>
    %39 = arith.maximumf %35, %38 : vector<8x640xf32>
    %c0_41 = arith.constant 0 : index
    %c10 = arith.constant 10 : index
    %c0_42 = arith.constant 0 : index
    %c0_43 = arith.constant 0 : index
    %40 = vector.load %arg1[%c0_41, %c10, %c0_42, %c0_43] : memref<1x16x128x640xbf16, #tpu.memory_space<vmem>>, vector<1x1x128x640xbf16>
    %41 = vector.shape_cast %40 : vector<1x1x128x640xbf16> to vector<128x640xbf16>
    %cst_44 = arith.constant dense<0.000000e+00> : vector<8x640xf32>
    %42 = tpu.matmul %0, %41, %cst_44 {dimension_numbers = #tpu.dot_dimension_numbers<[1], [0], [0], [1], [0, 0, 1, 1], [], []>} : vector<8x128xbf16>, vector<128x640xbf16>, vector<8x640xf32> -> vector<8x640xf32>
    %43 = arith.maximumf %39, %42 : vector<8x640xf32>
    %c0_45 = arith.constant 0 : index
    %c11 = arith.constant 11 : index
    %c0_46 = arith.constant 0 : index
    %c0_47 = arith.constant 0 : index
    %44 = vector.load %arg1[%c0_45, %c11, %c0_46, %c0_47] : memref<1x16x128x640xbf16, #tpu.memory_space<vmem>>, vector<1x1x128x640xbf16>
    %45 = vector.shape_cast %44 : vector<1x1x128x640xbf16> to vector<128x640xbf16>
    %cst_48 = arith.constant dense<0.000000e+00> : vector<8x640xf32>
    %46 = tpu.matmul %0, %45, %cst_48 {dimension_numbers = #tpu.dot_dimension_numbers<[1], [0], [0], [1], [0, 0, 1, 1], [], []>} : vector<8x128xbf16>, vector<128x640xbf16>, vector<8x640xf32> -> vector<8x640xf32>
    %47 = arith.maximumf %43, %46 : vector<8x640xf32>
    %c0_49 = arith.constant 0 : index
    %c12 = arith.constant 12 : index
    %c0_50 = arith.constant 0 : index
    %c0_51 = arith.constant 0 : index
    %48 = vector.load %arg1[%c0_49, %c12, %c0_50, %c0_51] : memref<1x16x128x640xbf16, #tpu.memory_space<vmem>>, vector<1x1x128x640xbf16>
    %49 = vector.shape_cast %48 : vector<1x1x128x640xbf16> to vector<128x640xbf16>
    %cst_52 = arith.constant dense<0.000000e+00> : vector<8x640xf32>
    %50 = tpu.matmul %0, %49, %cst_52 {dimension_numbers = #tpu.dot_dimension_numbers<[1], [0], [0], [1], [0, 0, 1, 1], [], []>} : vector<8x128xbf16>, vector<128x640xbf16>, vector<8x640xf32> -> vector<8x640xf32>
    %51 = arith.maximumf %47, %50 : vector<8x640xf32>
    %c0_53 = arith.constant 0 : index
    %c13 = arith.constant 13 : index
    %c0_54 = arith.constant 0 : index
    %c0_55 = arith.constant 0 : index
    %52 = vector.load %arg1[%c0_53, %c13, %c0_54, %c0_55] : memref<1x16x128x640xbf16, #tpu.memory_space<vmem>>, vector<1x1x128x640xbf16>
    %53 = vector.shape_cast %52 : vector<1x1x128x640xbf16> to vector<128x640xbf16>
    %cst_56 = arith.constant dense<0.000000e+00> : vector<8x640xf32>
    %54 = tpu.matmul %0, %53, %cst_56 {dimension_numbers = #tpu.dot_dimension_numbers<[1], [0], [0], [1], [0, 0, 1, 1], [], []>} : vector<8x128xbf16>, vector<128x640xbf16>, vector<8x640xf32> -> vector<8x640xf32>
    %55 = arith.maximumf %51, %54 : vector<8x640xf32>
    %c0_57 = arith.constant 0 : index
    %c14 = arith.constant 14 : index
    %c0_58 = arith.constant 0 : index
    %c0_59 = arith.constant 0 : index
    %56 = vector.load %arg1[%c0_57, %c14, %c0_58, %c0_59] : memref<1x16x128x640xbf16, #tpu.memory_space<vmem>>, vector<1x1x128x640xbf16>
    %57 = vector.shape_cast %56 : vector<1x1x128x640xbf16> to vector<128x640xbf16>
    %cst_60 = arith.constant dense<0.000000e+00> : vector<8x640xf32>
    %58 = tpu.matmul %0, %57, %cst_60 {dimension_numbers = #tpu.dot_dimension_numbers<[1], [0], [0], [1], [0, 0, 1, 1], [], []>} : vector<8x128xbf16>, vector<128x640xbf16>, vector<8x640xf32> -> vector<8x640xf32>
    %59 = arith.maximumf %55, %58 : vector<8x640xf32>
    %c0_61 = arith.constant 0 : index
    %c15 = arith.constant 15 : index
    %c0_62 = arith.constant 0 : index
    %c0_63 = arith.constant 0 : index
    %60 = vector.load %arg1[%c0_61, %c15, %c0_62, %c0_63] : memref<1x16x128x640xbf16, #tpu.memory_space<vmem>>, vector<1x1x128x640xbf16>
    %61 = vector.shape_cast %60 : vector<1x1x128x640xbf16> to vector<128x640xbf16>
    %cst_64 = arith.constant dense<0.000000e+00> : vector<8x640xf32>
    %62 = tpu.matmul %0, %61, %cst_64 {dimension_numbers = #tpu.dot_dimension_numbers<[1], [0], [0], [1], [0, 0, 1, 1], [], []>} : vector<8x128xbf16>, vector<128x640xbf16>, vector<8x640xf32> -> vector<8x640xf32>
    %63 = arith.maximumf %59, %62 : vector<8x640xf32>
    %c0_65 = arith.constant 0 : index
    %c0_66 = arith.constant 0 : index
    %64 = vector.load %arg3[%c0_65, %c0_66] : memref<8x1xf32, #tpu.memory_space<vmem>>, vector<8x1xf32>
    %65 = vector.broadcast %64 : vector<8x1xf32> to vector<8x640xf32>
    %66 = arith.addf %63, %65 : vector<8x640xf32>
    %cst_67 = arith.constant 0.000000e+00 : f32
    %67 = vector.broadcast %cst_67 : f32 to vector<8x640xf32>
    %68 = arith.maximumf %66, %67 : vector<8x640xf32>
    %c0_68 = arith.constant 0 : index
    %c0_69 = arith.constant 0 : index
    %c0_70 = arith.constant 0 : index
    %69 = vector.load %arg4[%c0_68, %c0_69, %c0_70] : memref<1x8x640xf32, #tpu.memory_space<vmem>>, vector<1x8x640xf32>
    %70 = vector.shape_cast %69 : vector<1x8x640xf32> to vector<8x640xf32>
    %71 = vector.shape_cast %68 : vector<8x640xf32> to vector<1x8x640xf32>
    tpu.vector_store %arg4[%c0_68, %c0_69, %c0_70], %71 {strides = array<i32>} : memref<1x8x640xf32, #tpu.memory_space<vmem>>, vector<1x8x640xf32>,
    return
  }
  func.func @transform_0(%arg0: i32) -> (i32, i32, i32, i32) {
    %c0_i32 = arith.constant 0 : i32
    %c0_i32_0 = arith.constant 0 : i32
    %c0_i32_1 = arith.constant 0 : i32
    %c0_i32_2 = arith.constant 0 : i32
    return %arg0, %c0_i32, %c0_i32_0, %c0_i32_1 : i32, i32, i32, i32
  }
  func.func @transform_1(%arg0: i32) -> (i32, i32) {
    %c0_i32 = arith.constant 0 : i32
    %c0_i32_0 = arith.constant 0 : i32
    %c0_i32_1 = arith.constant 0 : i32
    return %c0_i32, %c0_i32_0 : i32, i32
  }
  func.func @transform_2(%arg0: i32) -> (i32, i32) {
    %c0_i32 = arith.constant 0 : i32
    %c0_i32_0 = arith.constant 0 : i32
    %c0_i32_1 = arith.constant 0 : i32
    return %c0_i32, %c0_i32_0 : i32, i32
  }
  func.func @transform_3(%arg0: i32) -> (i32, i32, i32) {
    %c0_i32 = arith.constant 0 : i32
    %c0_i32_0 = arith.constant 0 : i32
    %c0_i32_1 = arith.constant 0 : i32
    return %arg0, %c0_i32, %c0_i32_0 : i32, i32, i32
  }
}

module attributes {stable_mosaic.version = 11 : i64} {
  func.func @_mlp_kernel(%arg0: memref<2x5000xf32, #tpu.memory_space<vmem>>, %arg1: memref<2x3xf32, #tpu.memory_space<vmem>>, %arg2: memref<2x8xf32, #tpu.memory_space<vmem>>, %arg3: memref<1x5000xf32, #tpu.memory_space<vmem>>, %arg4: memref<1x5000xf32, #tpu.memory_space<vmem>>, %arg5: memref<3x64xf32, #tpu.memory_space<vmem>>, %arg6: memref<1x64xf32, #tpu.memory_space<vmem>>, %arg7: memref<1x64xf32, #tpu.memory_space<vmem>>, %arg8: memref<1x64xf32, #tpu.memory_space<vmem>>, %arg9: memref<8x128xf32, #tpu.memory_space<vmem>>, %arg10: memref<1x128xf32, #tpu.memory_space<vmem>>, %arg11: memref<1x128xf32, #tpu.memory_space<vmem>>, %arg12: memref<1x128xf32, #tpu.memory_space<vmem>>, %arg13: memref<5000x256xbf16, #tpu.memory_space<vmem>>, %arg14: memref<64x256xbf16, #tpu.memory_space<vmem>>, %arg15: memref<128x256xbf16, #tpu.memory_space<vmem>>, %arg16: memref<1x256xf32, #tpu.memory_space<vmem>>, %arg17: memref<1x256xf32, #tpu.memory_space<vmem>>, %arg18: memref<1x256xf32, #tpu.memory_space<vmem>>, %arg19: memref<1x256xf32, #tpu.memory_space<vmem>>, %arg20: memref<1x1xf32, #tpu.memory_space<vmem>>, %arg21: memref<2x1xf32, #tpu.memory_space<vmem>>) attributes {dimension_semantics = [], scalar_prefetch = 0 : i64, scratch_operands = 0 : i64, tpu.core_type = #tpu.core_type<tc>} {
    %c0 = arith.constant 0 : index
    %c0_0 = arith.constant 0 : index
    %0 = vector.load %arg0[%c0, %c0_0] : memref<2x5000xf32, #tpu.memory_space<vmem>>, vector<2x5000xf32>
    %c0_1 = arith.constant 0 : index
    %c0_2 = arith.constant 0 : index
    %1 = vector.load %arg3[%c0_1, %c0_2] : memref<1x5000xf32, #tpu.memory_space<vmem>>, vector<1x5000xf32>
    %c0_3 = arith.constant 0 : index
    %c0_4 = arith.constant 0 : index
    %2 = vector.load %arg4[%c0_3, %c0_4] : memref<1x5000xf32, #tpu.memory_space<vmem>>, vector<1x5000xf32>
    %cst = arith.constant dense<0.000000e+00> : vector<2xf32>
    %3 = vector.multi_reduction <add>, %0, %cst [1] : vector<2x5000xf32> to vector<2xf32>
    %4 = vector.shape_cast %3 : vector<2xf32> to vector<2x1xf32>
    %cst_5 = arith.constant 5.000000e+03 : f32
    %5 = vector.broadcast %cst_5 : f32 to vector<2x1xf32>
    %6 = arith.divf %4, %5 : vector<2x1xf32>
    %7 = vector.broadcast %6 : vector<2x1xf32> to vector<2x5000xf32>
    %8 = arith.subf %0, %7 : vector<2x5000xf32>
    %9 = arith.mulf %8, %8 : vector<2x5000xf32>
    %cst_6 = arith.constant dense<0.000000e+00> : vector<2xf32>
    %10 = vector.multi_reduction <add>, %9, %cst_6 [1] : vector<2x5000xf32> to vector<2xf32>
    %11 = vector.shape_cast %10 : vector<2xf32> to vector<2x1xf32>
    %cst_7 = arith.constant 5.000000e+03 : f32
    %12 = vector.broadcast %cst_7 : f32 to vector<2x1xf32>
    %13 = arith.divf %11, %12 : vector<2x1xf32>
    %14 = vector.broadcast %6 : vector<2x1xf32> to vector<2x5000xf32>
    %15 = arith.subf %0, %14 : vector<2x5000xf32>
    %cst_8 = arith.constant 9.99999974E-6 : f32
    %16 = vector.broadcast %cst_8 : f32 to vector<2x1xf32>
    %17 = arith.addf %13, %16 : vector<2x1xf32>
    %18 = math.rsqrt %17 : vector<2x1xf32>
    %19 = vector.broadcast %18 : vector<2x1xf32> to vector<2x5000xf32>
    %20 = arith.mulf %15, %19 : vector<2x5000xf32>
    %21 = vector.broadcast %1 : vector<1x5000xf32> to vector<2x5000xf32>
    %22 = arith.mulf %20, %21 : vector<2x5000xf32>
    %23 = vector.broadcast %2 : vector<1x5000xf32> to vector<2x5000xf32>
    %24 = arith.addf %22, %23 : vector<2x5000xf32>
    %c0_9 = arith.constant 0 : index
    %c0_10 = arith.constant 0 : index
    %25 = vector.load %arg1[%c0_9, %c0_10] : memref<2x3xf32, #tpu.memory_space<vmem>>, vector<2x3xf32>
    %c0_11 = arith.constant 0 : index
    %c0_12 = arith.constant 0 : index
    %26 = vector.load %arg5[%c0_11, %c0_12] : memref<3x64xf32, #tpu.memory_space<vmem>>, vector<3x64xf32>
    %cst_13 = arith.constant dense<0.000000e+00> : vector<2x64xf32>
    %27 = tpu.matmul %25, %26, %cst_13 {dimension_numbers = #tpu.dot_dimension_numbers<[1], [0], [0], [1], [0, 0, 1, 1], [], []>} : vector<2x3xf32>, vector<3x64xf32>, vector<2x64xf32> -> vector<2x64xf32>
    %c0_14 = arith.constant 0 : index
    %c0_15 = arith.constant 0 : index
    %28 = vector.load %arg6[%c0_14, %c0_15] : memref<1x64xf32, #tpu.memory_space<vmem>>, vector<1x64xf32>
    %29 = vector.broadcast %28 : vector<1x64xf32> to vector<2x64xf32>
    %30 = arith.addf %27, %29 : vector<2x64xf32>
    %c0_16 = arith.constant 0 : index
    %c0_17 = arith.constant 0 : index
    %31 = vector.load %arg7[%c0_16, %c0_17] : memref<1x64xf32, #tpu.memory_space<vmem>>, vector<1x64xf32>
    %c0_18 = arith.constant 0 : index
    %c0_19 = arith.constant 0 : index
    %32 = vector.load %arg8[%c0_18, %c0_19] : memref<1x64xf32, #tpu.memory_space<vmem>>, vector<1x64xf32>
    %cst_20 = arith.constant dense<0.000000e+00> : vector<2xf32>
    %33 = vector.multi_reduction <add>, %30, %cst_20 [1] : vector<2x64xf32> to vector<2xf32>
    %34 = vector.shape_cast %33 : vector<2xf32> to vector<2x1xf32>
    %cst_21 = arith.constant 6.400000e+01 : f32
    %35 = vector.broadcast %cst_21 : f32 to vector<2x1xf32>
    %36 = arith.divf %34, %35 : vector<2x1xf32>
    %37 = vector.broadcast %36 : vector<2x1xf32> to vector<2x64xf32>
    %38 = arith.subf %30, %37 : vector<2x64xf32>
    %39 = arith.mulf %38, %38 : vector<2x64xf32>
    %cst_22 = arith.constant dense<0.000000e+00> : vector<2xf32>
    %40 = vector.multi_reduction <add>, %39, %cst_22 [1] : vector<2x64xf32> to vector<2xf32>
    %41 = vector.shape_cast %40 : vector<2xf32> to vector<2x1xf32>
    %cst_23 = arith.constant 6.400000e+01 : f32
    %42 = vector.broadcast %cst_23 : f32 to vector<2x1xf32>
    %43 = arith.divf %41, %42 : vector<2x1xf32>
    %44 = vector.broadcast %36 : vector<2x1xf32> to vector<2x64xf32>
    %45 = arith.subf %30, %44 : vector<2x64xf32>
    %cst_24 = arith.constant 9.99999974E-6 : f32
    %46 = vector.broadcast %cst_24 : f32 to vector<2x1xf32>
    %47 = arith.addf %43, %46 : vector<2x1xf32>
    %48 = math.rsqrt %47 : vector<2x1xf32>
    %49 = vector.broadcast %48 : vector<2x1xf32> to vector<2x64xf32>
    %50 = arith.mulf %45, %49 : vector<2x64xf32>
    %51 = vector.broadcast %31 : vector<1x64xf32> to vector<2x64xf32>
    %52 = arith.mulf %50, %51 : vector<2x64xf32>
    %53 = vector.broadcast %32 : vector<1x64xf32> to vector<2x64xf32>
    %54 = arith.addf %52, %53 : vector<2x64xf32>
    %55 = math.tanh %54 : vector<2x64xf32>
    %c0_25 = arith.constant 0 : index
    %c0_26 = arith.constant 0 : index
    %56 = vector.load %arg2[%c0_25, %c0_26] : memref<2x8xf32, #tpu.memory_space<vmem>>, vector<2x8xf32>
    %c0_27 = arith.constant 0 : index
    %c0_28 = arith.constant 0 : index
    %57 = vector.load %arg9[%c0_27, %c0_28] : memref<8x128xf32, #tpu.memory_space<vmem>>, vector<8x128xf32>
    %cst_29 = arith.constant dense<0.000000e+00> : vector<2x128xf32>
    %58 = tpu.matmul %56, %57, %cst_29 {dimension_numbers = #tpu.dot_dimension_numbers<[1], [0], [0], [1], [0, 0, 1, 1], [], []>} : vector<2x8xf32>, vector<8x128xf32>, vector<2x128xf32> -> vector<2x128xf32>
    %c0_30 = arith.constant 0 : index
    %c0_31 = arith.constant 0 : index
    %59 = vector.load %arg10[%c0_30, %c0_31] : memref<1x128xf32, #tpu.memory_space<vmem>>, vector<1x128xf32>
    %60 = vector.broadcast %59 : vector<1x128xf32> to vector<2x128xf32>
    %61 = arith.addf %58, %60 : vector<2x128xf32>
    %c0_32 = arith.constant 0 : index
    %c0_33 = arith.constant 0 : index
    %62 = vector.load %arg11[%c0_32, %c0_33] : memref<1x128xf32, #tpu.memory_space<vmem>>, vector<1x128xf32>
    %c0_34 = arith.constant 0 : index
    %c0_35 = arith.constant 0 : index
    %63 = vector.load %arg12[%c0_34, %c0_35] : memref<1x128xf32, #tpu.memory_space<vmem>>, vector<1x128xf32>
    %cst_36 = arith.constant dense<0.000000e+00> : vector<2xf32>
    %64 = vector.multi_reduction <add>, %61, %cst_36 [1] : vector<2x128xf32> to vector<2xf32>
    %65 = vector.shape_cast %64 : vector<2xf32> to vector<2x1xf32>
    %cst_37 = arith.constant 1.280000e+02 : f32
    %66 = vector.broadcast %cst_37 : f32 to vector<2x1xf32>
    %67 = arith.divf %65, %66 : vector<2x1xf32>
    %68 = vector.broadcast %67 : vector<2x1xf32> to vector<2x128xf32>
    %69 = arith.subf %61, %68 : vector<2x128xf32>
    %70 = arith.mulf %69, %69 : vector<2x128xf32>
    %cst_38 = arith.constant dense<0.000000e+00> : vector<2xf32>
    %71 = vector.multi_reduction <add>, %70, %cst_38 [1] : vector<2x128xf32> to vector<2xf32>
    %72 = vector.shape_cast %71 : vector<2xf32> to vector<2x1xf32>
    %cst_39 = arith.constant 1.280000e+02 : f32
    %73 = vector.broadcast %cst_39 : f32 to vector<2x1xf32>
    %74 = arith.divf %72, %73 : vector<2x1xf32>
    %75 = vector.broadcast %67 : vector<2x1xf32> to vector<2x128xf32>
    %76 = arith.subf %61, %75 : vector<2x128xf32>
    %cst_40 = arith.constant 9.99999974E-6 : f32
    %77 = vector.broadcast %cst_40 : f32 to vector<2x1xf32>
    %78 = arith.addf %74, %77 : vector<2x1xf32>
    %79 = math.rsqrt %78 : vector<2x1xf32>
    %80 = vector.broadcast %79 : vector<2x1xf32> to vector<2x128xf32>
    %81 = arith.mulf %76, %80 : vector<2x128xf32>
    %82 = vector.broadcast %62 : vector<1x128xf32> to vector<2x128xf32>
    %83 = arith.mulf %81, %82 : vector<2x128xf32>
    %84 = vector.broadcast %63 : vector<1x128xf32> to vector<2x128xf32>
    %85 = arith.addf %83, %84 : vector<2x128xf32>
    %86 = math.tanh %85 : vector<2x128xf32>
    %87 = arith.truncf %24 : vector<2x5000xf32> to vector<2x5000xbf16>
    %c0_41 = arith.constant 0 : index
    %c0_42 = arith.constant 0 : index
    %88 = vector.load %arg13[%c0_41, %c0_42] : memref<5000x256xbf16, #tpu.memory_space<vmem>>, vector<5000x256xbf16>
    %cst_43 = arith.constant dense<0.000000e+00> : vector<2x256xf32>
    %89 = tpu.matmul %87, %88, %cst_43 {dimension_numbers = #tpu.dot_dimension_numbers<[1], [0], [0], [1], [0, 0, 1, 1], [], []>} : vector<2x5000xbf16>, vector<5000x256xbf16>, vector<2x256xf32> -> vector<2x256xf32>
    %90 = arith.truncf %55 : vector<2x64xf32> to vector<2x64xbf16>
    %c0_44 = arith.constant 0 : index
    %c0_45 = arith.constant 0 : index
    %91 = vector.load %arg14[%c0_44, %c0_45] : memref<64x256xbf16, #tpu.memory_space<vmem>>, vector<64x256xbf16>
    %cst_46 = arith.constant dense<0.000000e+00> : vector<2x256xf32>
    %92 = tpu.matmul %90, %91, %cst_46 {dimension_numbers = #tpu.dot_dimension_numbers<[1], [0], [0], [1], [0, 0, 1, 1], [], []>} : vector<2x64xbf16>, vector<64x256xbf16>, vector<2x256xf32> -> vector<2x256xf32>
    %93 = arith.addf %89, %92 : vector<2x256xf32>
    %94 = arith.truncf %86 : vector<2x128xf32> to vector<2x128xbf16>
    %c0_47 = arith.constant 0 : index
    %c0_48 = arith.constant 0 : index
    %95 = vector.load %arg15[%c0_47, %c0_48] : memref<128x256xbf16, #tpu.memory_space<vmem>>, vector<128x256xbf16>
    %cst_49 = arith.constant dense<0.000000e+00> : vector<2x256xf32>
    %96 = tpu.matmul %94, %95, %cst_49 {dimension_numbers = #tpu.dot_dimension_numbers<[1], [0], [0], [1], [0, 0, 1, 1], [], []>} : vector<2x128xbf16>, vector<128x256xbf16>, vector<2x256xf32> -> vector<2x256xf32>
    %97 = arith.addf %93, %96 : vector<2x256xf32>
    %c0_50 = arith.constant 0 : index
    %c0_51 = arith.constant 0 : index
    %98 = vector.load %arg16[%c0_50, %c0_51] : memref<1x256xf32, #tpu.memory_space<vmem>>, vector<1x256xf32>
    %99 = vector.broadcast %98 : vector<1x256xf32> to vector<2x256xf32>
    %100 = arith.addf %97, %99 : vector<2x256xf32>
    %c0_52 = arith.constant 0 : index
    %c0_53 = arith.constant 0 : index
    %101 = vector.load %arg17[%c0_52, %c0_53] : memref<1x256xf32, #tpu.memory_space<vmem>>, vector<1x256xf32>
    %c0_54 = arith.constant 0 : index
    %c0_55 = arith.constant 0 : index
    %102 = vector.load %arg18[%c0_54, %c0_55] : memref<1x256xf32, #tpu.memory_space<vmem>>, vector<1x256xf32>
    %cst_56 = arith.constant dense<0.000000e+00> : vector<2xf32>
    %103 = vector.multi_reduction <add>, %100, %cst_56 [1] : vector<2x256xf32> to vector<2xf32>
    %104 = vector.shape_cast %103 : vector<2xf32> to vector<2x1xf32>
    %cst_57 = arith.constant 2.560000e+02 : f32
    %105 = vector.broadcast %cst_57 : f32 to vector<2x1xf32>
    %106 = arith.divf %104, %105 : vector<2x1xf32>
    %107 = vector.broadcast %106 : vector<2x1xf32> to vector<2x256xf32>
    %108 = arith.subf %100, %107 : vector<2x256xf32>
    %109 = arith.mulf %108, %108 : vector<2x256xf32>
    %cst_58 = arith.constant dense<0.000000e+00> : vector<2xf32>
    %110 = vector.multi_reduction <add>, %109, %cst_58 [1] : vector<2x256xf32> to vector<2xf32>
    %111 = vector.shape_cast %110 : vector<2xf32> to vector<2x1xf32>
    %cst_59 = arith.constant 2.560000e+02 : f32
    %112 = vector.broadcast %cst_59 : f32 to vector<2x1xf32>
    %113 = arith.divf %111, %112 : vector<2x1xf32>
    %114 = vector.broadcast %106 : vector<2x1xf32> to vector<2x256xf32>
    %115 = arith.subf %100, %114 : vector<2x256xf32>
    %cst_60 = arith.constant 9.99999974E-6 : f32
    %116 = vector.broadcast %cst_60 : f32 to vector<2x1xf32>
    %117 = arith.addf %113, %116 : vector<2x1xf32>
    %118 = math.rsqrt %117 : vector<2x1xf32>
    %119 = vector.broadcast %118 : vector<2x1xf32> to vector<2x256xf32>
    %120 = arith.mulf %115, %119 : vector<2x256xf32>
    %121 = vector.broadcast %101 : vector<1x256xf32> to vector<2x256xf32>
    %122 = arith.mulf %120, %121 : vector<2x256xf32>
    %123 = vector.broadcast %102 : vector<1x256xf32> to vector<2x256xf32>
    %124 = arith.addf %122, %123 : vector<2x256xf32>
    %cst_61 = arith.constant 0.000000e+00 : f32
    %125 = vector.broadcast %cst_61 : f32 to vector<2x256xf32>
    %126 = arith.maximumf %124, %125 : vector<2x256xf32>
    %c0_62 = arith.constant 0 : index
    %c0_63 = arith.constant 0 : index
    %127 = vector.load %arg19[%c0_62, %c0_63] : memref<1x256xf32, #tpu.memory_space<vmem>>, vector<1x256xf32>
    %128 = vector.broadcast %127 : vector<1x256xf32> to vector<2x256xf32>
    %129 = arith.mulf %126, %128 : vector<2x256xf32>
    %cst_64 = arith.constant dense<0.000000e+00> : vector<2xf32>
    %130 = vector.multi_reduction <add>, %129, %cst_64 [1] : vector<2x256xf32> to vector<2xf32>
    %131 = vector.shape_cast %130 : vector<2xf32> to vector<2x1xf32>
    %c0_65 = arith.constant 0 : index
    %c0_66 = arith.constant 0 : index
    %132 = vector.load %arg20[%c0_65, %c0_66] : memref<1x1xf32, #tpu.memory_space<vmem>>, vector<1x1xf32>
    %133 = vector.broadcast %132 : vector<1x1xf32> to vector<2x1xf32>
    %134 = arith.addf %131, %133 : vector<2x1xf32>
    %c0_67 = arith.constant 0 : index
    %c0_68 = arith.constant 0 : index
    %135 = vector.load %arg21[%c0_67, %c0_68] : memref<2x1xf32, #tpu.memory_space<vmem>>, vector<2x1xf32>
    tpu.vector_store %arg21[%c0_67, %c0_68], %134 {strides = array<i32>} : memref<2x1xf32, #tpu.memory_space<vmem>>, vector<2x1xf32>,
    return
  }
}

</mosaic_0001>

<bundles_post_ra>
// kernel: net_fighter_sq_forward.2
= control target key start
LH: loop header
LB: loop body
LE: loop exit
PB: predicated region body
PF: predicated region fallthrough
CT: control target
= control target key end

     0   :  { %s9165_s12 = smov 0   ;;  %s10356_s0 = inlined_call_operand.vmem [shape: bf16[2,16,128,640], index: 0, kind: input, shape index: {}]   ;;  %s10357_s1 = inlined_call_operand.vmem [shape: bf16[8,128], index: 1, kind: input, shape index: {}]   ;;  %s10358_s2 = inlined_call_operand.vmem [shape: f32[8,1], index: 2, kind: input, shape index: {}]   ;;  %s10359_s3 = inlined_call_operand.vmem [shape: f32[2,8,640], index: 3, kind: output, shape index: {}]  }
   0x1 LB: > { %s6387_s13 = sadd.s32 4294967295, %s9140_s12   ;;  %p6391_p0 = scmp.ge.s32.totalorder %s9140_s12, 1  ;;  %s9140_s12 = sphi %s9165_s12, %s13_s12  }
   0x2   : > { %p137_p1 = scmp.lt.s32.totalorder %s9140_s12, 3 }
   0x4   : > { %p138_p2 = pnand %p6391_p0, %p137_p1 }
   0x5   : > { %p161_p3 = scmp.lt.s32.totalorder (!%p138_p2), %s6387_s13, 1 }
   0x6   : > { %141 = sbr.rel (%p138_p2) target bundleno = 986 (0x3da), region = 32 }
   0xb   : > { %v9142_v0 = vmov 0   ;;  %s10361_s13 = smov (!%p161_p3, %s6387_s13), 1  ;;  %v9220_v34 = vld [vmem:[%s10357_s1] sm:$0xf]  ;;  %v9143_v37 = vmov 0.0   ;;  %vm9144_vm0 = vmmov 0  }
   0xc   : > { %461 = vmatprep.mubr.bf16.mxu0 %v9142_v0  ;;  %502 = vmatprep.mubr.bf16.mxu1 %v9142_v0  ;;  %s8220_s14 = smul.u32 5120, %s10361_s13 }
   0xd   : > { %8233 = vset.pattern.permute.xlu0 %v9142_v0  ;;  %s8221_s30 = smul.u32 40, %s10361_s13 }
   0xe   : > { %s9182_s17 = scalar_lea.vmem %s10356_s0, %s8220_s14 }
   0xf   : > { %v8234_v1 = vld [vmem:[%s9182_s17 + $0x11c] ss:$20 sps:$4 sm:$0xff]   ;;  %v8236_v2 = vld [vmem:[%s9182_s17 + $0x124] ss:$20 sps:$4 sm:$0xff]   ;;  %v8239_v4 = vld [vmem:[%s9182_s17 + $0x120] ss:$20 sps:$4 sm:$0xff]   ;;  %s10346_s6 = scalar_lea.vmem %s10359_s3, %s8221_s30 }
  0x10   : > { %429 = vmatprep.subr.bf16.mxu0 %v8234_v1  ;;  %v8238_v3 = vld [vmem:[%s9182_s17 + $0x118] ss:$20 sps:$4 sm:$0xff]   ;;  %470 = vmatprep.subr.bf16.mxu1 %v8236_v2  ;;  %v8240_v5 = vld [vmem:[%s9182_s17 + $0xf4] ss:$20 sps:$4 sm:$0xff]   ;;  %v8242_v6 = vld [vmem:[%s9182_s17 + $0xfc] ss:$20 sps:$4 sm:$0xff]  }
  0x11   : > { %430 = vmatpush1.bf16.msra.mxu0 %v8238_v3  ;;  %471 = vmatpush1.bf16.msra.mxu1 %v8239_v4  ;;  %v8244_v7 = vld [vmem:[%s9182_s17 + $0xf0] ss:$20 sps:$4 sm:$0xff]   ;;  %v8245_v8 = vld [vmem:[%s9182_s17 + $0xf8] ss:$20 sps:$4 sm:$0xff]   ;;  %v8248_v10 = vld [vmem:[%s9182_s17 + $0xd4] ss:$20 sps:$4 sm:$0xff]  }
  0x12   : > { %431 = vmatprep.subr.bf16.mxu0 %v8240_v5  ;;  %472 = vmatprep.subr.bf16.mxu1 %v8242_v6  ;;  %v8246_v9 = vld [vmem:[%s9182_s17 + $0xcc] ss:$20 sps:$4 sm:$0xff]   ;;  %v8250_v11 = vld [vmem:[%s9182_s17 + $0xc8] ss:$20 sps:$4 sm:$0xff]   ;;  %v8251_v12 = vld [vmem:[%s9182_s17 + $0xd0] ss:$20 sps:$4 sm:$0xff]  }
  0x13   : > { %v8252_v13 = vld [vmem:[%s9182_s17 + $0xa4] ss:$20 sps:$4 sm:$0xff]   ;;  %v8254_v14 = vld [vmem:[%s9182_s17 + $0xac] ss:$20 sps:$4 sm:$0xff]   ;;  %v8257_v16 = vld [vmem:[%s9182_s17 + $0xa8] ss:$20 sps:$4 sm:$0xff]  }
  0x14   : > { %v8256_v15 = vld [vmem:[%s9182_s17 + $0xa0] ss:$20 sps:$4 sm:$0xff]   ;;  %v8258_v17 = vld [vmem:[%s9182_s17 + $0x7c] ss:$20 sps:$4 sm:$0xff]   ;;  %v8260_v18 = vld [vmem:[%s9182_s17 + $0x84] ss:$20 sps:$4 sm:$0xff]  }
  0x15   : > { %432 = vmatpush1.bf16.msra.mxu0 %v8244_v7  ;;  %473 = vmatpush1.bf16.msra.mxu1 %v8245_v8  ;;  %v8262_v19 = vld [vmem:[%s9182_s17 + $0x78] ss:$20 sps:$4 sm:$0xff]   ;;  %v8263_v20 = vld [vmem:[%s9182_s17 + $0x80] ss:$20 sps:$4 sm:$0xff]   ;;  %v8266_v22 = vld [vmem:[%s9182_s17 + $0x5c] ss:$20 sps:$4 sm:$0xff]  }
  0x16   : > { %433 = vmatprep.subr.bf16.mxu0 %v8246_v9  ;;  %474 = vmatprep.subr.bf16.mxu1 %v8248_v10  ;;  %v8264_v21 = vld [vmem:[%s9182_s17 + $0x54] ss:$20 sps:$4 sm:$0xff]   ;;  %v8268_v23 = vld [vmem:[%s9182_s17 + $0x50] ss:$20 sps:$4 sm:$0xff]   ;;  %v8269_v24 = vld [vmem:[%s9182_s17 + $0x58] ss:$20 sps:$4 sm:$0xff]  }
  0x17   : > { %v8270_v25 = vld [vmem:[%s9182_s17 + $0x2c] ss:$20 sps:$4 sm:$0xff]   ;;  %v8272_v26 = vld [vmem:[%s9182_s17 + $0x34] ss:$20 sps:$4 sm:$0xff]   ;;  %v8275_v28 = vld [vmem:[%s9182_s17 + $0x30] ss:$20 sps:$4 sm:$0xff]  }
  0x18   : > { %v8274_v27 = vld [vmem:[%s9182_s17 + $0x28] ss:$20 sps:$4 sm:$0xff]   ;;  %v8276_v29 = vld [vmem:[%s9182_s17 + $0x4] ss:$20 sps:$4 sm:$0xff]   ;;  %v8278_v30 = vld [vmem:[%s9182_s17 + $0xc] ss:$20 sps:$4 sm:$0xff]  }
  0x19   : > { %434 = vmatpush1.bf16.msra.mxu0 %v8250_v11  ;;  %475 = vmatpush1.bf16.msra.mxu1 %v8251_v12  ;;  %v8280_v31 = vld [vmem:[%s9182_s17] ss:$20 sps:$4 sm:$0xff]   ;;  %v8281_v32 = vld [vmem:[%s9182_s17 + $0x8] ss:$20 sps:$4 sm:$0xff]   ;;  %v8282_v35 = vld [vmem:[%s9182_s17 + $0x258] ss:$20 sps:$4 sm:$0xff]  }
  0x1a   : > { %435 = vmatprep.subr.bf16.mxu0 %v8252_v13  ;;  %476 = vmatprep.subr.bf16.mxu1 %v8254_v14  ;;  %v8284_v33 = vld [vmem:[%s9182_s17 + $0x25c] ss:$20 sps:$4 sm:$0xff]   ;;  %v8288_v38 = vld [vmem:[%s9182_s17 + $0x234] ss:$20 sps:$4 sm:$0xff]   ;;  %v8292_v41 = vld [vmem:[%s9182_s17 + $0x20c] ss:$20 sps:$4 sm:$0xff]  }
  0x1b   : > { %v8285_v36 = vld [vmem:[%s9182_s17 + $0x128] ss:$20 sps:$4 sm:$0xff]   ;;  %v8286_v39 = vld [vmem:[%s9182_s17 + $0x230] ss:$20 sps:$4 sm:$0xff]   ;;  %v8289_v40 = vld [vmem:[%s9182_s17 + $0x100] ss:$20 sps:$4 sm:$0xff]  }
  0x1c   : > { %v8290_v42 = vld [vmem:[%s9182_s17 + $0x208] ss:$20 sps:$4 sm:$0xff]   ;;  %v8293_v43 = vld [vmem:[%s9182_s17 + $0xd8] ss:$20 sps:$4 sm:$0xff]   ;;  %v8294_v45 = vld [vmem:[%s9182_s17 + $0x1e0] ss:$20 sps:$4 sm:$0xff]  }
  0x1d   : > { %436 = vmatpush1.bf16.msra.mxu0 %v8256_v15  ;;  %477 = vmatpush1.bf16.msra.mxu1 %v8257_v16  ;;  %v8296_v44 = vld [vmem:[%s9182_s17 + $0x1e4] ss:$20 sps:$4 sm:$0xff]   ;;  %v8300_v47 = vld [vmem:[%s9182_s17 + $0x1bc] ss:$20 sps:$4 sm:$0xff]   ;;  %v8304_v50 = vld [vmem:[%s9182_s17 + $0x194] ss:$20 sps:$4 sm:$0xff]  }
  0x1e   : > { %437 = vmatprep.subr.bf16.mxu0 %v8258_v17  ;;  %478 = vmatprep.subr.bf16.mxu1 %v8260_v18  ;;  %v8297_v46 = vld [vmem:[%s9182_s17 + $0xb0] ss:$20 sps:$4 sm:$0xff]   ;;  %v8298_v48 = vld [vmem:[%s9182_s17 + $0x1b8] ss:$20 sps:$4 sm:$0xff]   ;;  %v8301_v49 = vld [vmem:[%s9182_s17 + $0x88] ss:$20 sps:$4 sm:$0xff]  }
  0x1f   : > { %v8302_v51 = vld [vmem:[%s9182_s17 + $0x190] ss:$20 sps:$4 sm:$0xff]   ;;  %v8305_v52 = vld [vmem:[%s9182_s17 + $0x60] ss:$20 sps:$4 sm:$0xff]   ;;  %v8306_v54 = vld [vmem:[%s9182_s17 + $0x168] ss:$20 sps:$4 sm:$0xff]  }
  0x20   : > { %v8308_v53 = vld [vmem:[%s9182_s17 + $0x16c] ss:$20 sps:$4 sm:$0xff]   ;;  %v8312_v56 = vld [vmem:[%s9182_s17 + $0x144] ss:$20 sps:$4 sm:$0xff]   ;;  %v8317_v61 = vld [vmem:[%s9182_s17 + $0x268] ss:$20 sps:$4 sm:$0xff]  }
  0x21   : > { %438 = vmatpush1.bf16.msra.mxu0 %v8262_v19  ;;  %479 = vmatpush1.bf16.msra.mxu1 %v8263_v20  ;;  %v8309_v55 = vld [vmem:[%s9182_s17 + $0x38] ss:$20 sps:$4 sm:$0xff]   ;;  %v8310_v57 = vld [vmem:[%s9182_s17 + $0x140] ss:$20 sps:$4 sm:$0xff]   ;;  %v8313_v58 = vld [vmem:[%s9182_s17 + $0x10] ss:$20 sps:$4 sm:$0xff]  }
  0x22   : > { %439 = vmatprep.subr.bf16.mxu0 %v8264_v21  ;;  %480 = vmatprep.subr.bf16.mxu1 %v8266_v22  ;;  %v8316_v59 = vld [vmem:[%s9182_s17 + $0x264] ss:$20 sps:$4 sm:$0xff]   ;;  %v8314_v60 = vld [vmem:[%s9182_s17 + $0x260] ss:$20 sps:$4 sm:$0xff]   ;;  %v8320_v62 = vld [vmem:[%s9182_s17 + $0x23c] ss:$20 sps:$4 sm:$0xff]  }
  0x23   : > { %v8318_v63 = vld [vmem:[%s9182_s17 + $0x238] ss:$20 sps:$4 sm:$0xff]   ;;  %v8321_v1 = vld [vmem:[%s9182_s17 + $0x240] ss:$20 sps:$4 sm:$0xff]   ;;  %v8322_v3 = vld [vmem:[%s9182_s17 + $0x210] ss:$20 sps:$4 sm:$0xff]  }
  0x24   : > { %v8324_v2 = vld [vmem:[%s9182_s17 + $0x214] ss:$20 sps:$4 sm:$0xff]   ;;  %v8325_v4 = vld [vmem:[%s9182_s17 + $0x218] ss:$20 sps:$4 sm:$0xff]   ;;  %v8329_v7 = vld [vmem:[%s9182_s17 + $0x1f0] ss:$20 sps:$4 sm:$0xff]  }
  0x25   : > { %440 = vmatpush1.bf16.msra.mxu0 %v8268_v23  ;;  %481 = vmatpush1.bf16.msra.mxu1 %v8269_v24  ;;  %v8328_v5 = vld [vmem:[%s9182_s17 + $0x1ec] ss:$20 sps:$4 sm:$0xff]   ;;  %v8326_v6 = vld [vmem:[%s9182_s17 + $0x1e8] ss:$20 sps:$4 sm:$0xff]   ;;  %v8332_v8 = vld [vmem:[%s9182_s17 + $0x1c4] ss:$20 sps:$4 sm:$0xff]  }
  0x26   : > { %441 = vmatprep.subr.bf16.mxu0 %v8270_v25  ;;  %482 = vmatprep.subr.bf16.mxu1 %v8272_v26  ;;  %v8330_v9 = vld [vmem:[%s9182_s17 + $0x1c0] ss:$20 sps:$4 sm:$0xff]   ;;  %v8333_v10 = vld [vmem:[%s9182_s17 + $0x1c8] ss:$20 sps:$4 sm:$0xff]   ;;  %v8334_v12 = vld [vmem:[%s9182_s17 + $0x198] ss:$20 sps:$4 sm:$0xff]  }
  0x27   : > { %v8336_v11 = vld [vmem:[%s9182_s17 + $0x19c] ss:$20 sps:$4 sm:$0xff]   ;;  %v8337_v13 = vld [vmem:[%s9182_s17 + $0x1a0] ss:$20 sps:$4 sm:$0xff]   ;;  %v8341_v16 = vld [vmem:[%s9182_s17 + $0x178] ss:$20 sps:$4 sm:$0xff]  }
  0x28   : > { %v8340_v14 = vld [vmem:[%s9182_s17 + $0x174] ss:$20 sps:$4 sm:$0xff]   ;;  %v8338_v15 = vld [vmem:[%s9182_s17 + $0x170] ss:$20 sps:$4 sm:$0xff]   ;;  %v8344_v17 = vld [vmem:[%s9182_s17 + $0x14c] ss:$20 sps:$4 sm:$0xff]  }
  0x29   : > { %442 = vmatpush1.bf16.msra.mxu0 %v8274_v27  ;;  %483 = vmatpush1.bf16.msra.mxu1 %v8275_v28  ;;  %v8342_v18 = vld [vmem:[%s9182_s17 + $0x148] ss:$20 sps:$4 sm:$0xff]   ;;  %v8345_v19 = vld [vmem:[%s9182_s17 + $0x150] ss:$20 sps:$4 sm:$0xff]   ;;  %v8346_v22 = vld [vmem:[%s9182_s17 + $0x398] ss:$20 sps:$4 sm:$0xff]  }
  0x2a   : > { %443 = vmatprep.subr.bf16.mxu0 %v8276_v29  ;;  %484 = vmatprep.subr.bf16.mxu1 %v8278_v30  ;;  %v8348_v20 = vld [vmem:[%s9182_s17 + $0x39c] ss:$20 sps:$4 sm:$0xff]   ;;  %v8351_v21 = vld [vmem:[%s9182_s17 + $0x3a4] ss:$20 sps:$4 sm:$0xff]   ;;  %v8349_v23 = vld [vmem:[%s9182_s17 + $0x3a0] ss:$20 sps:$4 sm:$0xff]  }
  0x2b   : > { %v8354_v24 = vld [vmem:[%s9182_s17 + $0x374] ss:$20 sps:$4 sm:$0xff]   ;;  %v8357_v25 = vld [vmem:[%s9182_s17 + $0x37c] ss:$20 sps:$4 sm:$0xff]   ;;  %v8355_v27 = vld [vmem:[%s9182_s17 + $0x378] ss:$20 sps:$4 sm:$0xff]  }
  0x2c   : > { %v8352_v26 = vld [vmem:[%s9182_s17 + $0x370] ss:$20 sps:$4 sm:$0xff]   ;;  %v8360_v28 = vld [vmem:[%s9182_s17 + $0x34c] ss:$20 sps:$4 sm:$0xff]   ;;  %v8363_v29 = vld [vmem:[%s9182_s17 + $0x354] ss:$20 sps:$4 sm:$0xff]  }
  0x2d   : > { %444 = vmatpush1.bf16.msra.mxu0 %v8280_v31  ;;  %485 = vmatpush1.bf16.msra.mxu1 %v8281_v32  ;;  %v8358_v30 = vld [vmem:[%s9182_s17 + $0x348] ss:$20 sps:$4 sm:$0xff]   ;;  %v8361_v31 = vld [vmem:[%s9182_s17 + $0x350] ss:$20 sps:$4 sm:$0xff]  }
  0x2e   : > { %7900 = vmatprep.subr.bf16.mxu0 %v9143_v37  ;;  %808 = vmatprep.subr.bf16.mxu1 %v8284_v33  ;;  %v8366_v32 = vld [vmem:[%s9182_s17 + $0x324] ss:$20 sps:$4 sm:$0xff]   ;;  %v8369_v33 = vld [vmem:[%s9182_s17 + $0x32c] ss:$20 sps:$4 sm:$0xff]  }
  0x30   : > { %462 = vmatmul.mubr.bf16.vlgmr.msra.gmra.mxu0 %v9220_v34  ;;  %503 = vmatmul.mubr.bf16.vlgmr.msra.gmra.mxu1 %v9220_v34 }
  0x31   : > { %7901 = vmatpush3.bf16.msra.mxu0 %v8285_v36  ;;  %809 = vmatpush1.bf16.msra.mxu1 %v8282_v35  ;;  %v8364_v35 = vld [vmem:[%s9182_s17 + $0x320] ss:$20 sps:$4 sm:$0xff]   ;;  %v8367_v36 = vld [vmem:[%s9182_s17 + $0x328] ss:$20 sps:$4 sm:$0xff]  }
  0x32   : > { %7902 = vmatprep.subr.bf16.mxu0 %v9143_v37  ;;  %810 = vmatprep.subr.bf16.mxu1 %v8288_v38  ;;  %v8372_v38 = vld [vmem:[%s9182_s17 + $0x2fc] ss:$20 sps:$4 sm:$0xff]  }
  0x33   : > { %7916 = vmatprep.mubr.msk.bf16.mxu0 %vm9144_vm0, %v9143_v37  ;;  %840 = vmatprep.mubr.bf16.mxu1 %v9142_v0 }
  0x35   : > { %7903 = vmatpush3.bf16.msra.mxu0 %v8289_v40  ;;  %811 = vmatpush1.bf16.msra.mxu1 %v8286_v39  ;;  %v8375_v39 = vld [vmem:[%s9182_s17 + $0x304] ss:$20 sps:$4 sm:$0xff]  }
  0x36   : > { %7904 = vmatprep.subr.bf16.mxu0 %v9143_v37  ;;  %812 = vmatprep.subr.bf16.mxu1 %v8292_v41  ;;  %v8370_v40 = vld [vmem:[%s9182_s17 + $0x2f8] ss:$20 sps:$4 sm:$0xff]   ;;  %v8373_v41 = vld [vmem:[%s9182_s17 + $0x300] ss:$20 sps:$4 sm:$0xff]  }
  0x39   : > { %7905 = vmatpush3.bf16.msra.mxu0 %v8293_v43  ;;  %813 = vmatpush1.bf16.msra.mxu1 %v8290_v42  ;;  %v8378_v42 = vld [vmem:[%s9182_s17 + $0x2d4] ss:$20 sps:$4 sm:$0xff]   ;;  %v8381_v43 = vld [vmem:[%s9182_s17 + $0x2dc] ss:$20 sps:$4 sm:$0xff]  }
  0x3a   : > { %7906 = vmatprep.subr.bf16.mxu0 %v9143_v37  ;;  %814 = vmatprep.subr.bf16.mxu1 %v8296_v44  ;;  %v8376_v44 = vld [vmem:[%s9182_s17 + $0x2d0] ss:$20 sps:$4 sm:$0xff]  }
  0x3d   : > { %7907 = vmatpush3.bf16.msra.mxu0 %v8297_v46  ;;  %815 = vmatpush1.bf16.msra.mxu1 %v8294_v45  ;;  %v8379_v45 = vld [vmem:[%s9182_s17 + $0x2d8] ss:$20 sps:$4 sm:$0xff]  }
  0x3e   : > { %7908 = vmatprep.subr.bf16.mxu0 %v9143_v37  ;;  %816 = vmatprep.subr.bf16.mxu1 %v8300_v47  ;;  %v8384_v46 = vld [vmem:[%s9182_s17 + $0x2ac] ss:$20 sps:$4 sm:$0xff]   ;;  %v8387_v47 = vld [vmem:[%s9182_s17 + $0x2b4] ss:$20 sps:$4 sm:$0xff]  }
  0x41   : > { %7909 = vmatpush3.bf16.msra.mxu0 %v8301_v49  ;;  %817 = vmatpush1.bf16.msra.mxu1 %v8298_v48  ;;  %v8382_v48 = vld [vmem:[%s9182_s17 + $0x2a8] ss:$20 sps:$4 sm:$0xff]   ;;  %v8385_v49 = vld [vmem:[%s9182_s17 + $0x2b0] ss:$20 sps:$4 sm:$0xff]  }
  0x42   : > { %7910 = vmatprep.subr.bf16.mxu0 %v9143_v37  ;;  %818 = vmatprep.subr.bf16.mxu1 %v8304_v50  ;;  %v8390_v50 = vld [vmem:[%s9182_s17 + $0x284] ss:$20 sps:$4 sm:$0xff]  }
  0x45   : > { %7911 = vmatpush3.bf16.msra.mxu0 %v8305_v52  ;;  %819 = vmatpush1.bf16.msra.mxu1 %v8302_v51  ;;  %v8393_v51 = vld [vmem:[%s9182_s17 + $0x28c] ss:$20 sps:$4 sm:$0xff]  }
  0x46   : > { %7912 = vmatprep.subr.bf16.mxu0 %v9143_v37  ;;  %820 = vmatprep.subr.bf16.mxu1 %v8308_v53  ;;  %v8388_v52 = vld [vmem:[%s9182_s17 + $0x280] ss:$20 sps:$4 sm:$0xff]   ;;  %v8391_v53 = vld [vmem:[%s9182_s17 + $0x288] ss:$20 sps:$4 sm:$0xff]  }
  0x49   : > { %7913 = vmatpush3.bf16.msra.mxu0 %v8309_v55  ;;  %821 = vmatpush1.bf16.msra.mxu1 %v8306_v54  ;;  %v8396_v54 = vld [vmem:[%s9182_s17 + $0x4dc] ss:$20 sps:$4 sm:$0xff]   ;;  %v8394_v55 = vld [vmem:[%s9182_s17 + $0x4d8] ss:$20 sps:$4 sm:$0xff]  }
  0x4a   : > { %7914 = vmatprep.subr.bf16.mxu0 %v9143_v37  ;;  %822 = vmatprep.subr.bf16.mxu1 %v8312_v56  ;;  %v8397_v56 = vld [vmem:[%s9182_s17 + $0x3a8] ss:$20 sps:$4 sm:$0xff]  }
  0x4d   : > { %7915 = vmatpush3.bf16.msra.mxu0 %v8313_v58  ;;  %823 = vmatpush1.bf16.msra.mxu1 %v8310_v57  ;;  %v8400_v57 = vld [vmem:[%s9182_s17 + $0x4b4] ss:$20 sps:$4 sm:$0xff]   ;;  %v8398_v58 = vld [vmem:[%s9182_s17 + $0x4b0] ss:$20 sps:$4 sm:$0xff]  }
  0x4e   : > { %849 = vmatprep.subr.bf16.mxu0 %v8316_v59  ;;  %7920 = vmatprep.subr.bf16.mxu1 %v9143_v37  ;;  %v8401_v59 = vld [vmem:[%s9182_s17 + $0x380] ss:$20 sps:$4 sm:$0xff]  }
  0x50   : > { %7917 = vmatmul.mubr.bf16.vlgmr.msra.gmra.mxu0 %v9220_v34  ;;  %841 = vmatmul.mubr.bf16.vlgmr.msra.gmra.mxu1 %v9220_v34 }
  0x51   : > { %850 = vmatpush1.bf16.msra.mxu0 %v8314_v60  ;;  %7921 = vmatpush3.bf16.msra.mxu1 %v8317_v61  ;;  %v8404_v60 = vld [vmem:[%s9182_s17 + $0x48c] ss:$20 sps:$4 sm:$0xff]   ;;  %v8402_v61 = vld [vmem:[%s9182_s17 + $0x488] ss:$20 sps:$4 sm:$0xff]  }
  0x52   : > { %851 = vmatprep.subr.bf16.mxu0 %v8320_v62  ;;  %7922 = vmatprep.subr.bf16.mxu1 %v9143_v37  ;;  %v8405_v62 = vld [vmem:[%s9182_s17 + $0x358] ss:$20 sps:$4 sm:$0xff]  }
  0x53   : > { %881 = vmatprep.mubr.bf16.mxu0 %v9142_v0  ;;  %7936 = vmatprep.mubr.msk.bf16.mxu1 %vm9144_vm0, %v9143_v37 }
  0x55   : > { %852 = vmatpush1.bf16.msra.mxu0 %v8318_v63  ;;  %7923 = vmatpush3.bf16.msra.mxu1 %v8321_v1  ;;  %v8408_v63 = vld [vmem:[%s9182_s17 + $0x464] ss:$20 sps:$4 sm:$0xff]   ;;  %v8406_v1 = vld [vmem:[%s9182_s17 + $0x460] ss:$20 sps:$4 sm:$0xff]  }
  0x56   : > { %853 = vmatprep.subr.bf16.mxu0 %v8324_v2  ;;  %7924 = vmatprep.subr.bf16.mxu1 %v9143_v37  ;;  %v8409_v2 = vld [vmem:[%s9182_s17 + $0x330] ss:$20 sps:$4 sm:$0xff]  }
  0x59   : > { %854 = vmatpush1.bf16.msra.mxu0 %v8322_v3  ;;  %7925 = vmatpush3.bf16.msra.mxu1 %v8325_v4  ;;  %v8412_v3 = vld [vmem:[%s9182_s17 + $0x43c] ss:$20 sps:$4 sm:$0xff]   ;;  %v8410_v4 = vld [vmem:[%s9182_s17 + $0x438] ss:$20 sps:$4 sm:$0xff]  }
  0x5a   : > { %855 = vmatprep.subr.bf16.mxu0 %v8328_v5  ;;  %7926 = vmatprep.subr.bf16.mxu1 %v9143_v37  ;;  %v8413_v5 = vld [vmem:[%s9182_s17 + $0x308] ss:$20 sps:$4 sm:$0xff]  }
  0x5d   : > { %856 = vmatpush1.bf16.msra.mxu0 %v8326_v6  ;;  %7927 = vmatpush3.bf16.msra.mxu1 %v8329_v7  ;;  %v8416_v6 = vld [vmem:[%s9182_s17 + $0x414] ss:$20 sps:$4 sm:$0xff]   ;;  %v8414_v7 = vld [vmem:[%s9182_s17 + $0x410] ss:$20 sps:$4 sm:$0xff]  }
  0x5e   : > { %857 = vmatprep.subr.bf16.mxu0 %v8332_v8  ;;  %7928 = vmatprep.subr.bf16.mxu1 %v9143_v37  ;;  %v8417_v8 = vld [vmem:[%s9182_s17 + $0x2e0] ss:$20 sps:$4 sm:$0xff]  }
  0x61   : > { %858 = vmatpush1.bf16.msra.mxu0 %v8330_v9  ;;  %7929 = vmatpush3.bf16.msra.mxu1 %v8333_v10  ;;  %v8420_v9 = vld [vmem:[%s9182_s17 + $0x3ec] ss:$20 sps:$4 sm:$0xff]   ;;  %v8418_v10 = vld [vmem:[%s9182_s17 + $0x3e8] ss:$20 sps:$4 sm:$0xff]  }
  0x62   : > { %859 = vmatprep.subr.bf16.mxu0 %v8336_v11  ;;  %7930 = vmatprep.subr.bf16.mxu1 %v9143_v37  ;;  %v8421_v11 = vld [vmem:[%s9182_s17 + $0x2b8] ss:$20 sps:$4 sm:$0xff]  }
  0x65   : > { %860 = vmatpush1.bf16.msra.mxu0 %v8334_v12  ;;  %7931 = vmatpush3.bf16.msra.mxu1 %v8337_v13  ;;  %v8424_v12 = vld [vmem:[%s9182_s17 + $0x3c4] ss:$20 sps:$4 sm:$0xff]   ;;  %v8422_v13 = vld [vmem:[%s9182_s17 + $0x3c0] ss:$20 sps:$4 sm:$0xff]  }
  0x66   : > { %861 = vmatprep.subr.bf16.mxu0 %v8340_v14  ;;  %7932 = vmatprep.subr.bf16.mxu1 %v9143_v37  ;;  %v8425_v14 = vld [vmem:[%s9182_s17 + $0x290] ss:$20 sps:$4 sm:$0xff]  }
  0x69   : > { %862 = vmatpush1.bf16.msra.mxu0 %v8338_v15  ;;  %7933 = vmatpush3.bf16.msra.mxu1 %v8341_v16  ;;  %v8428_v15 = vld [vmem:[%s9182_s17 + $0x4e4] ss:$20 sps:$4 sm:$0xff]   ;;  %v8426_v16 = vld [vmem:[%s9182_s17 + $0x4e0] ss:$20 sps:$4 sm:$0xff]  }
  0x6a   : > { %863 = vmatprep.subr.bf16.mxu0 %v8344_v17  ;;  %7934 = vmatprep.subr.bf16.mxu1 %v9143_v37  ;;  %v8429_v17 = vld [vmem:[%s9182_s17 + $0x4e8] ss:$20 sps:$4 sm:$0xff]  }
  0x6d   : > { %864 = vmatpush1.bf16.msra.mxu0 %v8342_v18  ;;  %7935 = vmatpush3.bf16.msra.mxu1 %v8345_v19  ;;  %v8432_v18 = vld [vmem:[%s9182_s17 + $0x4bc] ss:$20 sps:$4 sm:$0xff]   ;;  %v8430_v19 = vld [vmem:[%s9182_s17 + $0x4b8] ss:$20 sps:$4 sm:$0xff]  }
  0x6e   : > { %1192 = vmatprep.subr.bf16.mxu0 %v8348_v20  ;;  %1233 = vmatprep.subr.bf16.mxu1 %v8351_v21  ;;  %v8433_v20 = vld [vmem:[%s9182_s17 + $0x4c0] ss:$20 sps:$4 sm:$0xff]  }
  0x6f   : > { %v8436_v21 = vld [vmem:[%s9182_s17 + $0x494] ss:$20 sps:$4 sm:$0xff]  }
  0x70   : > { %882 = vmatmul.mubr.bf16.vlgmr.msra.gmra.mxu0 %v9220_v34  ;;  %7937 = vmatmul.mubr.bf16.vlgmr.msra.gmra.mxu1 %v9220_v34 }
  0x71   : > { %1193 = vmatpush1.bf16.msra.mxu0 %v8346_v22  ;;  %1234 = vmatpush1.bf16.msra.mxu1 %v8349_v23  ;;  %v8434_v22 = vld [vmem:[%s9182_s17 + $0x490] ss:$20 sps:$4 sm:$0xff]   ;;  %v8440_v23 = vld [vmem:[%s9182_s17 + $0x46c] ss:$20 sps:$4 sm:$0xff]  }
  0x72   : > { %1194 = vmatprep.subr.bf16.mxu0 %v8354_v24  ;;  %1235 = vmatprep.subr.bf16.mxu1 %v8357_v25  ;;  %v8438_v24 = vld [vmem:[%s9182_s17 + $0x468] ss:$20 sps:$4 sm:$0xff]   ;;  %v8441_v25 = vld [vmem:[%s9182_s17 + $0x470] ss:$20 sps:$4 sm:$0xff]  }
  0x73   : > { %1224 = vmatprep.mubr.bf16.mxu0 %v9142_v0  ;;  %1265 = vmatprep.mubr.bf16.mxu1 %v9142_v0 }
  0x75   : > { %1195 = vmatpush1.bf16.msra.mxu0 %v8352_v26  ;;  %1236 = vmatpush1.bf16.msra.mxu1 %v8355_v27  ;;  %v8444_v26 = vld [vmem:[%s9182_s17 + $0x444] ss:$20 sps:$4 sm:$0xff]   ;;  %v8442_v27 = vld [vmem:[%s9182_s17 + $0x440] ss:$20 sps:$4 sm:$0xff]  }
  0x76   : > { %1196 = vmatprep.subr.bf16.mxu0 %v8360_v28  ;;  %1237 = vmatprep.subr.bf16.mxu1 %v8363_v29  ;;  %v8445_v28 = vld [vmem:[%s9182_s17 + $0x448] ss:$20 sps:$4 sm:$0xff]  }
  0x77   : > { %v8448_v29 = vld [vmem:[%s9182_s17 + $0x41c] ss:$20 sps:$4 sm:$0xff]  }
  0x79   : > { %1197 = vmatpush1.bf16.msra.mxu0 %v8358_v30  ;;  %1238 = vmatpush1.bf16.msra.mxu1 %v8361_v31  ;;  %v8446_v30 = vld [vmem:[%s9182_s17 + $0x418] ss:$20 sps:$4 sm:$0xff]   ;;  %v8449_v31 = vld [vmem:[%s9182_s17 + $0x420] ss:$20 sps:$4 sm:$0xff]  }
  0x7a   : > { %1198 = vmatprep.subr.bf16.mxu0 %v8366_v32  ;;  %1239 = vmatprep.subr.bf16.mxu1 %v8369_v33  ;;  %v8452_v32 = vld [vmem:[%s9182_s17 + $0x3f4] ss:$20 sps:$4 sm:$0xff]   ;;  %v8450_v33 = vld [vmem:[%s9182_s17 + $0x3f0] ss:$20 sps:$4 sm:$0xff]  }
  0x7d   : > { %1199 = vmatpush1.bf16.msra.mxu0 %v8364_v35  ;;  %1240 = vmatpush1.bf16.msra.mxu1 %v8367_v36  ;;  %v8453_v35 = vld [vmem:[%s9182_s17 + $0x3f8] ss:$20 sps:$4 sm:$0xff]  }
  0x7e   : > { %1200 = vmatprep.subr.bf16.mxu0 %v8372_v38  ;;  %1241 = vmatprep.subr.bf16.mxu1 %v8375_v39  ;;  %v8456_v36 = vld [vmem:[%s9182_s17 + $0x3cc] ss:$20 sps:$4 sm:$0xff]   ;;  %v8454_v38 = vld [vmem:[%s9182_s17 + $0x3c8] ss:$20 sps:$4 sm:$0xff]   ;;  %v8457_v39 = vld [vmem:[%s9182_s17 + $0x3d0] ss:$20 sps:$4 sm:$0xff]  }
  0x81   : > { %1201 = vmatpush1.bf16.msra.mxu0 %v8370_v40  ;;  %1242 = vmatpush1.bf16.msra.mxu1 %v8373_v41  ;;  %v8460_v40 = vld [vmem:[%s9182_s17 + $0x61c] ss:$20 sps:$4 sm:$0xff]   ;;  %v8463_v41 = vld [vmem:[%s9182_s17 + $0x624] ss:$20 sps:$4 sm:$0xff]  }
  0x82   : > { %1202 = vmatprep.subr.bf16.mxu0 %v8378_v42  ;;  %1243 = vmatprep.subr.bf16.mxu1 %v8381_v43  ;;  %v8458_v42 = vld [vmem:[%s9182_s17 + $0x618] ss:$20 sps:$4 sm:$0xff]   ;;  %v8461_v43 = vld [vmem:[%s9182_s17 + $0x620] ss:$20 sps:$4 sm:$0xff]  }
  0x85   : > { %1203 = vmatpush1.bf16.msra.mxu0 %v8376_v44  ;;  %1244 = vmatpush1.bf16.msra.mxu1 %v8379_v45  ;;  %v8466_v44 = vld [vmem:[%s9182_s17 + $0x5f4] ss:$20 sps:$4 sm:$0xff]   ;;  %v8469_v45 = vld [vmem:[%s9182_s17 + $0x5fc] ss:$20 sps:$4 sm:$0xff]  }
  0x86   : > { %1204 = vmatprep.subr.bf16.mxu0 %v8384_v46  ;;  %1245 = vmatprep.subr.bf16.mxu1 %v8387_v47  ;;  %v9414_v46 = vld [vmem:[%s10357_s1] sm:$0xf]  ;;  %v8464_v47 = vld [vmem:[%s9182_s17 + $0x5f0] ss:$20 sps:$4 sm:$0xff]  }
  0x89   : > { %1205 = vmatpush1.bf16.msra.mxu0 %v8382_v48  ;;  %1246 = vmatpush1.bf16.msra.mxu1 %v8385_v49  ;;  %v8467_v48 = vld [vmem:[%s9182_s17 + $0x5f8] ss:$20 sps:$4 sm:$0xff]  }
  0x8a   : > { %1206 = vmatprep.subr.bf16.mxu0 %v8390_v50  ;;  %1247 = vmatprep.subr.bf16.mxu1 %v8393_v51  ;;  %v8472_v49 = vld [vmem:[%s9182_s17 + $0x5cc] ss:$20 sps:$4 sm:$0xff]   ;;  %v8475_v50 = vld [vmem:[%s9182_s17 + $0x5d4] ss:$20 sps:$4 sm:$0xff]  }
  0x8b   : > { %v8470_v51 = vld [vmem:[%s9182_s17 + $0x5c8] ss:$20 sps:$4 sm:$0xff]  }
  0x8d   : > { %1207 = vmatpush1.bf16.msra.mxu0 %v8388_v52  ;;  %1248 = vmatpush1.bf16.msra.mxu1 %v8391_v53  ;;  %v8473_v52 = vld [vmem:[%s9182_s17 + $0x5d0] ss:$20 sps:$4 sm:$0xff]  }
  0x8e   : > { %7940 = vmatprep.subr.bf16.mxu0 %v9143_v37  ;;  %1576 = vmatprep.subr.bf16.mxu1 %v8396_v54  ;;  %v8478_v53 = vld [vmem:[%s9182_s17 + $0x5a4] ss:$20 sps:$4 sm:$0xff]   ;;  %v8481_v54 = vld [vmem:[%s9182_s17 + $0x5ac] ss:$20 sps:$4 sm:$0xff]  }
  0x90   : > { %1225 = vmatmul.mubr.bf16.vlgmr.msra.gmra.mxu0 %v9220_v34  ;;  %1266 = vmatmul.mubr.bf16.vlgmr.msra.gmra.mxu1 %v9220_v34 }
  0x91   : > { %7941 = vmatpush3.bf16.msra.mxu0 %v8397_v56  ;;  %1577 = vmatpush1.bf16.msra.mxu1 %v8394_v55  ;;  %v8476_v55 = vld [vmem:[%s9182_s17 + $0x5a0] ss:$20 sps:$4 sm:$0xff]   ;;  %v8479_v56 = vld [vmem:[%s9182_s17 + $0x5a8] ss:$20 sps:$4 sm:$0xff]  }
  0x92   : > { %7942 = vmatprep.subr.bf16.mxu0 %v9143_v37  ;;  %1578 = vmatprep.subr.bf16.mxu1 %v8400_v57  ;;  %v8484_v57 = vld [vmem:[%s9182_s17 + $0x57c] ss:$20 sps:$4 sm:$0xff]  }
  0x93   : > { %7956 = vmatprep.mubr.msk.bf16.mxu0 %vm9144_vm0, %v9143_v37  ;;  %1608 = vmatprep.mubr.bf16.mxu1 %v9142_v0 }
  0x95   : > { %7943 = vmatpush3.bf16.msra.mxu0 %v8401_v59  ;;  %1579 = vmatpush1.bf16.msra.mxu1 %v8398_v58  ;;  %v8487_v58 = vld [vmem:[%s9182_s17 + $0x584] ss:$20 sps:$4 sm:$0xff]  }
  0x96   : > { %7944 = vmatprep.subr.bf16.mxu0 %v9143_v37  ;;  %1580 = vmatprep.subr.bf16.mxu1 %v8404_v60  ;;  %v8482_v59 = vld [vmem:[%s9182_s17 + $0x578] ss:$20 sps:$4 sm:$0xff]   ;;  %v8485_v60 = vld [vmem:[%s9182_s17 + $0x580] ss:$20 sps:$4 sm:$0xff]  }
  0x99   : > { %7945 = vmatpush3.bf16.msra.mxu0 %v8405_v62  ;;  %1581 = vmatpush1.bf16.msra.mxu1 %v8402_v61  ;;  %v8490_v61 = vld [vmem:[%s9182_s17 + $0x554] ss:$20 sps:$4 sm:$0xff]   ;;  %v8493_v62 = vld [vmem:[%s9182_s17 + $0x55c] ss:$20 sps:$4 sm:$0xff]  }
  0x9a   : > { %7946 = vmatprep.subr.bf16.mxu0 %v9143_v37  ;;  %1582 = vmatprep.subr.bf16.mxu1 %v8408_v63  ;;  %v8488_v63 = vld [vmem:[%s9182_s17 + $0x550] ss:$20 sps:$4 sm:$0xff]  }
  0x9d   : > { %7947 = vmatpush3.bf16.msra.mxu0 %v8409_v2  ;;  %1583 = vmatpush1.bf16.msra.mxu1 %v8406_v1  ;;  %v8491_v1 = vld [vmem:[%s9182_s17 + $0x558] ss:$20 sps:$4 sm:$0xff]  }
  0x9e   : > { %7948 = vmatprep.subr.bf16.mxu0 %v9143_v37  ;;  %1584 = vmatprep.subr.bf16.mxu1 %v8412_v3  ;;  %v8496_v2 = vld [vmem:[%s9182_s17 + $0x52c] ss:$20 sps:$4 sm:$0xff]   ;;  %v8499_v3 = vld [vmem:[%s9182_s17 + $0x534] ss:$20 sps:$4 sm:$0xff]  }
  0xa1   : > { %7949 = vmatpush3.bf16.msra.mxu0 %v8413_v5  ;;  %1585 = vmatpush1.bf16.msra.mxu1 %v8410_v4  ;;  %v8494_v4 = vld [vmem:[%s9182_s17 + $0x528] ss:$20 sps:$4 sm:$0xff]   ;;  %v8497_v5 = vld [vmem:[%s9182_s17 + $0x530] ss:$20 sps:$4 sm:$0xff]  }
  0xa2   : > { %7950 = vmatprep.subr.bf16.mxu0 %v9143_v37  ;;  %1586 = vmatprep.subr.bf16.mxu1 %v8416_v6  ;;  %v8502_v6 = vld [vmem:[%s9182_s17 + $0x504] ss:$20 sps:$4 sm:$0xff]  }
  0xa5   : > { %7951 = vmatpush3.bf16.msra.mxu0 %v8417_v8  ;;  %1587 = vmatpush1.bf16.msra.mxu1 %v8414_v7  ;;  %v8505_v7 = vld [vmem:[%s9182_s17 + $0x50c] ss:$20 sps:$4 sm:$0xff]  }
  0xa6   : > { %7952 = vmatprep.subr.bf16.mxu0 %v9143_v37  ;;  %1588 = vmatprep.subr.bf16.mxu1 %v8420_v9  ;;  %v8500_v8 = vld [vmem:[%s9182_s17 + $0x500] ss:$20 sps:$4 sm:$0xff]   ;;  %v8503_v9 = vld [vmem:[%s9182_s17 + $0x508] ss:$20 sps:$4 sm:$0xff]  }
  0xa9   : > { %7953 = vmatpush3.bf16.msra.mxu0 %v8421_v11  ;;  %1589 = vmatpush1.bf16.msra.mxu1 %v8418_v10  ;;  %v8508_v10 = vld [vmem:[%s9182_s17 + $0x75c] ss:$20 sps:$4 sm:$0xff]   ;;  %v8506_v11 = vld [vmem:[%s9182_s17 + $0x758] ss:$20 sps:$4 sm:$0xff]  }
  0xaa   : > { %7954 = vmatprep.subr.bf16.mxu0 %v9143_v37  ;;  %1590 = vmatprep.subr.bf16.mxu1 %v8424_v12  ;;  %v8509_v12 = vld [vmem:[%s9182_s17 + $0x628] ss:$20 sps:$4 sm:$0xff]  }
  0xad   : > { %7955 = vmatpush3.bf16.msra.mxu0 %v8425_v14  ;;  %1591 = vmatpush1.bf16.msra.mxu1 %v8422_v13  ;;  %v8512_v13 = vld [vmem:[%s9182_s17 + $0x734] ss:$20 sps:$4 sm:$0xff]   ;;  %v8510_v14 = vld [vmem:[%s9182_s17 + $0x730] ss:$20 sps:$4 sm:$0xff]  }
  0xae   : > { %1617 = vmatprep.subr.bf16.mxu0 %v8428_v15  ;;  %7960 = vmatprep.subr.bf16.mxu1 %v9143_v37  ;;  %v8513_v15 = vld [vmem:[%s9182_s17 + $0x600] ss:$20 sps:$4 sm:$0xff]  }
  0xb0   : > { %7957 = vmatmul.mubr.bf16.vlgmr.msra.gmra.mxu0 %v9220_v34  ;;  %1609 = vmatmul.mubr.bf16.vlgmr.msra.gmra.mxu1 %v9220_v34  ;;  %v8437_v34 = vld [vmem:[%s9182_s17 + $0x498] ss:$20 sps:$4 sm:$0xff]  }
  0xb1   : > { %1618 = vmatpush1.bf16.msra.mxu0 %v8426_v16  ;;  %7961 = vmatpush3.bf16.msra.mxu1 %v8429_v17 }
  0xb2   : > { %1619 = vmatprep.subr.bf16.mxu0 %v8432_v18  ;;  %7962 = vmatprep.subr.bf16.mxu1 %v9143_v37 }
  0xb3   : > { %1649 = vmatprep.mubr.bf16.mxu0 %v9142_v0  ;;  %7976 = vmatprep.mubr.msk.bf16.mxu1 %vm9144_vm0, %v9143_v37 }
  0xb5   : > { %1620 = vmatpush1.bf16.msra.mxu0 %v8430_v19  ;;  %7963 = vmatpush3.bf16.msra.mxu1 %v8433_v20  ;;  %v8516_v20 = vld [vmem:[%s9182_s17 + $0x70c] ss:$20 sps:$4 sm:$0xff]  }
  0xb6   : > { %1621 = vmatprep.subr.bf16.mxu0 %v8436_v21  ;;  %7964 = vmatprep.subr.bf16.mxu1 %v9143_v37  ;;  %v8514_v21 = vld [vmem:[%s9182_s17 + $0x708] ss:$20 sps:$4 sm:$0xff]  }
  0xb9   : > { %1622 = vmatpush1.bf16.msra.mxu0 %v8434_v22  ;;  %7965 = vmatpush3.bf16.msra.mxu1 %v8437_v34  ;;  %v8517_v22 = vld [vmem:[%s9182_s17 + $0x5d8] ss:$20 sps:$4 sm:$0xff]  }
  0xba   : > { %1623 = vmatprep.subr.bf16.mxu0 %v8440_v23  ;;  %7966 = vmatprep.subr.bf16.mxu1 %v9143_v37 }
  0xbd   : > { %1624 = vmatpush1.bf16.msra.mxu0 %v8438_v24  ;;  %7967 = vmatpush3.bf16.msra.mxu1 %v8441_v25 }
  0xbe   : > { %1625 = vmatprep.subr.bf16.mxu0 %v8444_v26  ;;  %7968 = vmatprep.subr.bf16.mxu1 %v9143_v37  ;;  %v8520_v26 = vld [vmem:[%s9182_s17 + $0x6e4] ss:$20 sps:$4 sm:$0xff]  }
  0xc1   : > { %1626 = vmatpush1.bf16.msra.mxu0 %v8442_v27  ;;  %7969 = vmatpush3.bf16.msra.mxu1 %v8445_v28  ;;  %v8518_v27 = vld [vmem:[%s9182_s17 + $0x6e0] ss:$20 sps:$4 sm:$0xff]   ;;  %v8521_v28 = vld [vmem:[%s9182_s17 + $0x5b0] ss:$20 sps:$4 sm:$0xff]  }
  0xc2   : > { %1627 = vmatprep.subr.bf16.mxu0 %v8448_v29  ;;  %7970 = vmatprep.subr.bf16.mxu1 %v9143_v37  ;;  %v8524_v29 = vld [vmem:[%s9182_s17 + $0x6bc] ss:$20 sps:$4 sm:$0xff]  }
  0xc5   : > { %1628 = vmatpush1.bf16.msra.mxu0 %v8446_v30  ;;  %7971 = vmatpush3.bf16.msra.mxu1 %v8449_v31  ;;  %v8522_v30 = vld [vmem:[%s9182_s17 + $0x6b8] ss:$20 sps:$4 sm:$0xff]   ;;  %v8525_v31 = vld [vmem:[%s9182_s17 + $0x588] ss:$20 sps:$4 sm:$0xff]  }
  0xc6   : > { %1629 = vmatprep.subr.bf16.mxu0 %v8452_v32  ;;  %7972 = vmatprep.subr.bf16.mxu1 %v9143_v37  ;;  %v8528_v32 = vld [vmem:[%s9182_s17 + $0x694] ss:$20 sps:$4 sm:$0xff]  }
  0xc9   : > { %1630 = vmatpush1.bf16.msra.mxu0 %v8450_v33  ;;  %7973 = vmatpush3.bf16.msra.mxu1 %v8453_v35  ;;  %v8526_v33 = vld [vmem:[%s9182_s17 + $0x690] ss:$20 sps:$4 sm:$0xff]   ;;  %v8529_v35 = vld [vmem:[%s9182_s17 + $0x560] ss:$20 sps:$4 sm:$0xff]  }
  0xca   : > { %1631 = vmatprep.subr.bf16.mxu0 %v8456_v36  ;;  %7974 = vmatprep.subr.bf16.mxu1 %v9143_v37  ;;  %v8532_v36 = vld [vmem:[%s9182_s17 + $0x66c] ss:$20 sps:$4 sm:$0xff]  }
  0xcd   : > { %1632 = vmatpush1.bf16.msra.mxu0 %v8454_v38  ;;  %7975 = vmatpush3.bf16.msra.mxu1 %v8457_v39  ;;  %v8530_v38 = vld [vmem:[%s9182_s17 + $0x668] ss:$20 sps:$4 sm:$0xff]   ;;  %v8533_v39 = vld [vmem:[%s9182_s17 + $0x538] ss:$20 sps:$4 sm:$0xff]  }
  0xce   : > { %1960 = vmatprep.subr.bf16.mxu0 %v8460_v40  ;;  %2001 = vmatprep.subr.bf16.mxu1 %v8463_v41  ;;  %v8536_v40 = vld [vmem:[%s9182_s17 + $0x644] ss:$20 sps:$4 sm:$0xff]   ;;  %v8534_v41 = vld [vmem:[%s9182_s17 + $0x640] ss:$20 sps:$4 sm:$0xff]  }
  0xd0   : > { %1650 = vmatmul.mubr.bf16.vlgmr.msra.gmra.mxu0 %v9414_v46  ;;  %7977 = vmatmul.mubr.bf16.vlgmr.msra.gmra.mxu1 %v9414_v46 }
  0xd1   : > { %1961 = vmatpush1.bf16.msra.mxu0 %v8458_v42  ;;  %2002 = vmatpush1.bf16.msra.mxu1 %v8461_v43  ;;  %v8537_v42 = vld [vmem:[%s9182_s17 + $0x510] ss:$20 sps:$4 sm:$0xff]  }
  0xd2   : > { %1962 = vmatprep.subr.bf16.mxu0 %v8466_v44  ;;  %2003 = vmatprep.subr.bf16.mxu1 %v8469_v45  ;;  %v8540_v43 = vld [vmem:[%s9182_s17 + $0x764] ss:$20 sps:$4 sm:$0xff]   ;;  %v8538_v44 = vld [vmem:[%s9182_s17 + $0x760] ss:$20 sps:$4 sm:$0xff]   ;;  %v8541_v45 = vld [vmem:[%s9182_s17 + $0x768] ss:$20 sps:$4 sm:$0xff]  }
  0xd3   : > { %1992 = vmatprep.mubr.bf16.mxu0 %v9142_v0  ;;  %2033 = vmatprep.mubr.bf16.mxu1 %v9142_v0 }
  0xd5   : > { %1963 = vmatpush1.bf16.msra.mxu0 %v8464_v47  ;;  %2004 = vmatpush1.bf16.msra.mxu1 %v8467_v48  ;;  %v8544_v47 = vld [vmem:[%s9182_s17 + $0x73c] ss:$20 sps:$4 sm:$0xff]   ;;  %v8542_v48 = vld [vmem:[%s9182_s17 + $0x738] ss:$20 sps:$4 sm:$0xff]  }
  0xd6   : > { %1964 = vmatprep.subr.bf16.mxu0 %v8472_v49  ;;  %2005 = vmatprep.subr.bf16.mxu1 %v8475_v50  ;;  %v8545_v49 = vld [vmem:[%s9182_s17 + $0x740] ss:$20 sps:$4 sm:$0xff]  }
  0xd9   : > { %1965 = vmatpush1.bf16.msra.mxu0 %v8470_v51  ;;  %2006 = vmatpush1.bf16.msra.mxu1 %v8473_v52 }
  0xda   : > { %1966 = vmatprep.subr.bf16.mxu0 %v8478_v53  ;;  %2007 = vmatprep.subr.bf16.mxu1 %v8481_v54 }
  0xdd   : > { %1967 = vmatpush1.bf16.msra.mxu0 %v8476_v55  ;;  %2008 = vmatpush1.bf16.msra.mxu1 %v8479_v56  ;;  %v8548_v55 = vld [vmem:[%s9182_s17 + $0x714] ss:$20 sps:$4 sm:$0xff]  }
  0xde   : > { %1968 = vmatprep.subr.bf16.mxu0 %v8484_v57  ;;  %2009 = vmatprep.subr.bf16.mxu1 %v8487_v58  ;;  %v8546_v57 = vld [vmem:[%s9182_s17 + $0x710] ss:$20 sps:$4 sm:$0xff]   ;;  %v8549_v58 = vld [vmem:[%s9182_s17 + $0x718] ss:$20 sps:$4 sm:$0xff]  }
  0xe1   : > { %1969 = vmatpush1.bf16.msra.mxu0 %v8482_v59  ;;  %2010 = vmatpush1.bf16.msra.mxu1 %v8485_v60 }
  0xe2   : > { %1970 = vmatprep.subr.bf16.mxu0 %v8490_v61  ;;  %2011 = vmatprep.subr.bf16.mxu1 %v8493_v62 }
  0xe5   : > { %1971 = vmatpush1.bf16.msra.mxu0 %v8488_v63  ;;  %2012 = vmatpush1.bf16.msra.mxu1 %v8491_v1  ;;  %v8552_v63 = vld [vmem:[%s9182_s17 + $0x6ec] ss:$20 sps:$4 sm:$0xff]   ;;  %v8550_v1 = vld [vmem:[%s9182_s17 + $0x6e8] ss:$20 sps:$4 sm:$0xff]  }
  0xe6   : > { %1972 = vmatprep.subr.bf16.mxu0 %v8496_v2  ;;  %2013 = vmatprep.subr.bf16.mxu1 %v8499_v3  ;;  %v8553_v2 = vld [vmem:[%s9182_s17 + $0x6f0] ss:$20 sps:$4 sm:$0xff]  }
  0xe7   : > { %v8556_v3 = vld [vmem:[%s9182_s17 + $0x6c4] ss:$20 sps:$4 sm:$0xff]  }
  0xe9   : > { %1973 = vmatpush1.bf16.msra.mxu0 %v8494_v4  ;;  %2014 = vmatpush1.bf16.msra.mxu1 %v8497_v5  ;;  %v8554_v4 = vld [vmem:[%s9182_s17 + $0x6c0] ss:$20 sps:$4 sm:$0xff]   ;;  %v8557_v5 = vld [vmem:[%s9182_s17 + $0x6c8] ss:$20 sps:$4 sm:$0xff]  }
  0xea   : > { %1974 = vmatprep.subr.bf16.mxu0 %v8502_v6  ;;  %2015 = vmatprep.subr.bf16.mxu1 %v8505_v7  ;;  %v8560_v6 = vld [vmem:[%s9182_s17 + $0x69c] ss:$20 sps:$4 sm:$0xff]   ;;  %v8558_v7 = vld [vmem:[%s9182_s17 + $0x698] ss:$20 sps:$4 sm:$0xff]  }
  0xed   : > { %1975 = vmatpush1.bf16.msra.mxu0 %v8500_v8  ;;  %2016 = vmatpush1.bf16.msra.mxu1 %v8503_v9  ;;  %v8561_v8 = vld [vmem:[%s9182_s17 + $0x6a0] ss:$20 sps:$4 sm:$0xff]  }
  0xee   : > { %7980 = vmatprep.subr.bf16.mxu0 %v9143_v37  ;;  %2344 = vmatprep.subr.bf16.mxu1 %v8508_v10  ;;  %v8564_v9 = vld [vmem:[%s9182_s17 + $0x674] ss:$20 sps:$4 sm:$0xff]   ;;  %v8562_v10 = vld [vmem:[%s9182_s17 + $0x670] ss:$20 sps:$4 sm:$0xff]  }
  0xf0   : > { %v9453_v16 = vpop.f32.mrf.mxu0  ;;  %v9455_v17 = vpop.f32.mrf.mxu1  ;;  %1993 = vmatmul.mubr.bf16.vlgmr.msra.gmra.mxu0 %v9414_v46  ;;  %2034 = vmatmul.mubr.bf16.vlgmr.msra.gmra.mxu1 %v9414_v46 }
  0xf1   : > { %7981 = vmatpush3.bf16.msra.mxu0 %v8509_v12  ;;  %2345 = vmatpush1.bf16.msra.mxu1 %v8506_v11  ;;  %v8565_v11 = vld [vmem:[%s9182_s17 + $0x678] ss:$20 sps:$4 sm:$0xff]  }
  0xf2   : > { %v9459_v18 = vpop.f32.mrf.mxu0  ;;  %v9461_v19 = vpop.f32.mrf.mxu1  ;;  %7982 = vmatprep.subr.bf16.mxu0 %v9143_v37  ;;  %2346 = vmatprep.subr.bf16.mxu1 %v8512_v13  ;;  %v8568_v12 = vld [vmem:[%s9182_s17 + $0x64c] ss:$20 sps:$4 sm:$0xff]   ;;  %v8566_v13 = vld [vmem:[%s9182_s17 + $0x648] ss:$20 sps:$4 sm:$0xff]  }
  0xf3   : > { %7996 = vmatprep.mubr.msk.bf16.mxu0 %vm9144_vm0, %v9143_v37  ;;  %2376 = vmatprep.mubr.bf16.mxu1 %v9142_v0 }
  0xf4   : > { %v467_v34 = vpop.f32.mrf.mxu0  ;;  %v508_v23 = vpop.f32.mrf.mxu1 }
  0xf5   : > { %7983 = vmatpush3.bf16.msra.mxu0 %v8513_v15  ;;  %2347 = vmatpush1.bf16.msra.mxu1 %v8510_v14  ;;  %v8569_v14 = vld [vmem:[%s9182_s17 + $0x650] ss:$20 sps:$4 sm:$0xff]   ;;  %v8578_v34 = vld [vmem:[%s9182_s17 + $0x874] ss:$20 sps:$4 sm:$0xff]  }
  0xf6   : > { %v468_v24 = vpop.f32.mrf.mxu0  ;;  %v509_v25 = vpop.f32.mrf.mxu1  ;;  %7984 = vmatprep.subr.bf16.mxu0 %v9143_v37  ;;  %2348 = vmatprep.subr.bf16.mxu1 %v8516_v20  ;;  %v8572_v15 = vld [vmem:[%s9182_s17 + $0x89c] ss:$20 sps:$4 sm:$0xff]   ;;  %v8575_v20 = vld [vmem:[%s9182_s17 + $0x8a4] ss:$20 sps:$4 sm:$0xff]  }
  0xf7   : > { %v8581_v23 = vld [vmem:[%s9182_s17 + $0x87c] ss:$20 sps:$4 sm:$0xff]   ;;  %v8579_v25 = vld [vmem:[%s9182_s17 + $0x878] ss:$20 sps:$4 sm:$0xff]  }
  0xf8   : > { %v8576_v24 = vld [vmem:[%s9182_s17 + $0x870] ss:$20 sps:$4 sm:$0xff]  }
  0xf9   : > { %7985 = vmatpush3.bf16.msra.mxu0 %v8517_v22  ;;  %2349 = vmatpush1.bf16.msra.mxu1 %v8514_v21  ;;  %v8570_v21 = vld [vmem:[%s9182_s17 + $0x898] ss:$20 sps:$4 sm:$0xff]   ;;  %v8573_v22 = vld [vmem:[%s9182_s17 + $0x8a0] ss:$20 sps:$4 sm:$0xff]  }
  0xfa   : > { %7986 = vmatprep.subr.bf16.mxu0 %v9143_v37  ;;  %2350 = vmatprep.subr.bf16.mxu1 %v8520_v26 }
  0xfd   : > { %7987 = vmatpush3.bf16.msra.mxu0 %v8521_v28  ;;  %2351 = vmatpush1.bf16.msra.mxu1 %v8518_v27  ;;  %v8584_v28 = vld [vmem:[%s9182_s17 + $0x84c] ss:$20 sps:$4 sm:$0xff]  }
  0xfe   : > { %7988 = vmatprep.subr.bf16.mxu0 %v9143_v37  ;;  %2352 = vmatprep.subr.bf16.mxu1 %v8524_v29 }
 0x101   : > { %7989 = vmatpush3.bf16.msra.mxu0 %v8525_v31  ;;  %2353 = vmatpush1.bf16.msra.mxu1 %v8522_v30 }
 0x102   : > { %7990 = vmatprep.subr.bf16.mxu0 %v9143_v37  ;;  %2354 = vmatprep.subr.bf16.mxu1 %v8528_v32 }
 0x105   : > { %7991 = vmatpush3.bf16.msra.mxu0 %v8529_v35  ;;  %2355 = vmatpush1.bf16.msra.mxu1 %v8526_v33  ;;  %v8587_v33 = vld [vmem:[%s9182_s17 + $0x854] ss:$20 sps:$4 sm:$0xff]  }
 0x106   : > { %7992 = vmatprep.subr.bf16.mxu0 %v9143_v37  ;;  %2356 = vmatprep.subr.bf16.mxu1 %v8532_v36  ;;  %v8582_v35 = vld [vmem:[%s9182_s17 + $0x848] ss:$20 sps:$4 sm:$0xff]   ;;  %v8585_v36 = vld [vmem:[%s9182_s17 + $0x850] ss:$20 sps:$4 sm:$0xff]  }
 0x109   : > { %7993 = vmatpush3.bf16.msra.mxu0 %v8533_v39  ;;  %2357 = vmatpush1.bf16.msra.mxu1 %v8530_v38 }
 0x10a   : > { %7994 = vmatprep.subr.bf16.mxu0 %v9143_v37  ;;  %2358 = vmatprep.subr.bf16.mxu1 %v8536_v40 }
 0x10d   : > { %7995 = vmatpush3.bf16.msra.mxu0 %v8537_v42  ;;  %2359 = vmatpush1.bf16.msra.mxu1 %v8534_v41  ;;  %v8590_v42 = vld [vmem:[%s9182_s17 + $0x824] ss:$20 sps:$4 sm:$0xff]  }
 0x10e   : > { %2385 = vmatprep.subr.bf16.mxu0 %v8540_v43  ;;  %8000 = vmatprep.subr.bf16.mxu1 %v9143_v37  ;;  %v8593_v43 = vld [vmem:[%s9182_s17 + $0x82c] ss:$20 sps:$4 sm:$0xff]  }
 0x110   : > { %v9498_v50 = vpop.f32.mrf.mxu0  ;;  %v9500_v51 = vpop.f32.mrf.mxu1  ;;  %7997 = vmatmul.mubr.bf16.vlgmr.msra.gmra.mxu0 %v9414_v46  ;;  %2377 = vmatmul.mubr.bf16.vlgmr.msra.gmra.mxu1 %v9414_v46 }
 0x111   : > { %v930_v52 = vmax.f32 %v9453_v16, %v9500_v51  ;;  %2386 = vmatpush1.bf16.msra.mxu0 %v8538_v44  ;;  %8001 = vmatpush3.bf16.msra.mxu1 %v8541_v45  ;;  %v8588_v44 = vld [vmem:[%s9182_s17 + $0x820] ss:$20 sps:$4 sm:$0xff]   ;;  %v8591_v45 = vld [vmem:[%s9182_s17 + $0x828] ss:$20 sps:$4 sm:$0xff]  }
 0x112   : > { %v7918_v53 = vpop.f32.mrf.mxu0  ;;  %v9506_v54 = vpop.f32.mrf.mxu1  ;;  %2387 = vmatprep.subr.bf16.mxu0 %v8544_v47  ;;  %8002 = vmatprep.subr.bf16.mxu1 %v9143_v37  ;;  %v8596_v47 = vld [vmem:[%s9182_s17 + $0x7fc] ss:$20 sps:$4 sm:$0xff]  }
 0x113   : > { %v931_v56 = vmax.f32 %v9459_v18, %v9506_v54  ;;  %2417 = vmatprep.mubr.bf16.mxu0 %v9142_v0  ;;  %8016 = vmatprep.mubr.msk.bf16.mxu1 %vm9144_vm0, %v9143_v37  ;;  %v8597_v53 = vld [vmem:[%s9182_s17 + $0x800] ss:$20 sps:$4 sm:$0xff]   ;;  %v8626_v51 = vld [vmem:[%s9182_s17 + $0x988] ss:$20 sps:$4 sm:$0xff]  }
 0x114   : > { %v548_v59 = vpop.f32.mrf.mxu0  ;;  %v846_v60 = vpop.f32.mrf.mxu1 }
 0x115   : > { %2388 = vmatpush1.bf16.msra.mxu0 %v8542_v48  ;;  %8003 = vmatpush3.bf16.msra.mxu1 %v8545_v49  ;;  %v8599_v48 = vld [vmem:[%s9182_s17 + $0x804] ss:$20 sps:$4 sm:$0xff]   ;;  %v8608_v60 = vld [vmem:[%s9182_s17 + $0x7ac] ss:$20 sps:$4 sm:$0xff]  }
 0x116   : > { %v7919_v61 = vpop.f32.mrf.mxu0  ;;  %v847_v62 = vpop.f32.mrf.mxu1  ;;  %2389 = vmatprep.subr.bf16.mxu0 %v8548_v55  ;;  %8004 = vmatprep.subr.bf16.mxu1 %v9143_v37  ;;  %v8594_v49 = vld [vmem:[%s9182_s17 + $0x7f8] ss:$20 sps:$4 sm:$0xff]   ;;  %v8602_v55 = vld [vmem:[%s9182_s17 + $0x7d4] ss:$20 sps:$4 sm:$0xff]  }
 0x117   : > { %v8603_v59 = vld [vmem:[%s9182_s17 + $0x7d8] ss:$20 sps:$4 sm:$0xff]   ;;  %v8611_v61 = vld [vmem:[%s9182_s17 + $0x7b4] ss:$20 sps:$4 sm:$0xff]  }
 0x118   : > { %v8606_v62 = vld [vmem:[%s9182_s17 + $0x7a8] ss:$20 sps:$4 sm:$0xff]  }
 0x119   : > { %2390 = vmatpush1.bf16.msra.mxu0 %v8546_v57  ;;  %8005 = vmatpush3.bf16.msra.mxu1 %v8549_v58  ;;  %v8605_v57 = vld [vmem:[%s9182_s17 + $0x7dc] ss:$20 sps:$4 sm:$0xff]  }
 0x11a   : > { %2391 = vmatprep.subr.bf16.mxu0 %v8552_v63  ;;  %8006 = vmatprep.subr.bf16.mxu1 %v9143_v37  ;;  %v8600_v58 = vld [vmem:[%s9182_s17 + $0x7d0] ss:$20 sps:$4 sm:$0xff]  }
 0x11b   : > { %v8609_v63 = vld [vmem:[%s9182_s17 + $0x7b0] ss:$20 sps:$4 sm:$0xff]  }
 0x11d   : > { %2392 = vmatpush1.bf16.msra.mxu0 %v8550_v1  ;;  %8007 = vmatpush3.bf16.msra.mxu1 %v8553_v2  ;;  %v8614_v1 = vld [vmem:[%s9182_s17 + $0x784] ss:$20 sps:$4 sm:$0xff]   ;;  %v8617_v2 = vld [vmem:[%s9182_s17 + $0x78c] ss:$20 sps:$4 sm:$0xff]  }
 0x11e   : > { %2393 = vmatprep.subr.bf16.mxu0 %v8556_v3  ;;  %8008 = vmatprep.subr.bf16.mxu1 %v9143_v37  ;;  %v8612_v3 = vld [vmem:[%s9182_s17 + $0x780] ss:$20 sps:$4 sm:$0xff]  }
 0x121   : > { %2394 = vmatpush1.bf16.msra.mxu0 %v8554_v4  ;;  %8009 = vmatpush3.bf16.msra.mxu1 %v8557_v5  ;;  %v8615_v4 = vld [vmem:[%s9182_s17 + $0x788] ss:$20 sps:$4 sm:$0xff]  }
 0x122   : > { %2395 = vmatprep.subr.bf16.mxu0 %v8560_v6  ;;  %8010 = vmatprep.subr.bf16.mxu1 %v9143_v37  ;;  %v8620_v5 = vld [vmem:[%s9182_s17 + $0x9dc] ss:$20 sps:$4 sm:$0xff]   ;;  %v8618_v6 = vld [vmem:[%s9182_s17 + $0x9d8] ss:$20 sps:$4 sm:$0xff]  }
 0x125   : > { %2396 = vmatpush1.bf16.msra.mxu0 %v8558_v7  ;;  %8011 = vmatpush3.bf16.msra.mxu1 %v8561_v8  ;;  %v8621_v7 = vld [vmem:[%s9182_s17 + $0x8a8] ss:$20 sps:$4 sm:$0xff]  }
 0x126   : > { %2397 = vmatprep.subr.bf16.mxu0 %v8564_v9  ;;  %8012 = vmatprep.subr.bf16.mxu1 %v9143_v37  ;;  %v8624_v8 = vld [vmem:[%s9182_s17 + $0x9b4] ss:$20 sps:$4 sm:$0xff]   ;;  %v8622_v9 = vld [vmem:[%s9182_s17 + $0x9b0] ss:$20 sps:$4 sm:$0xff]  }
 0x129   : > { %2398 = vmatpush1.bf16.msra.mxu0 %v8562_v10  ;;  %8013 = vmatpush3.bf16.msra.mxu1 %v8565_v11  ;;  %v8625_v10 = vld [vmem:[%s9182_s17 + $0x880] ss:$20 sps:$4 sm:$0xff]  }
 0x12a   : > { %2399 = vmatprep.subr.bf16.mxu0 %v8568_v12  ;;  %8014 = vmatprep.subr.bf16.mxu1 %v9143_v37 }
 0x12d   : > { %2400 = vmatpush1.bf16.msra.mxu0 %v8566_v13  ;;  %8015 = vmatpush3.bf16.msra.mxu1 %v8569_v14  ;;  %v9596_v13 = vld [vmem:[%s10357_s1] sm:$0xf] }
 0x12e   : > { %2728 = vmatprep.subr.bf16.mxu0 %v8572_v15  ;;  %2769 = vmatprep.subr.bf16.mxu1 %v8575_v20 }
 0x130   : > { %v9546_v26 = vpop.f32.mrf.mxu0  ;;  %v9548_v27 = vpop.f32.mrf.mxu1  ;;  %2418 = vmatmul.mubr.bf16.vlgmr.msra.gmra.mxu0 %v9414_v46  ;;  %8017 = vmatmul.mubr.bf16.vlgmr.msra.gmra.mxu1 %v9414_v46 }
 0x131   : > { %v932_v29 = vmax.f32 %v9455_v17, %v9546_v26  ;;  %v934_v30 = vmax.f32 %v9498_v50, %v9548_v27  ;;  %2729 = vmatpush1.bf16.msra.mxu0 %v8570_v21  ;;  %2770 = vmatpush1.bf16.msra.mxu1 %v8573_v22  ;;  %v8628_v22 = vld [vmem:[%s9182_s17 + $0x98c] ss:$20 sps:$4 sm:$0xff]   ;;  %v8658_v50 = vld [vmem:[%s9182_s17 + $0x990] ss:$20 sps:$4 sm:$0xff]  }
 0x132   : > { %v9557_v31 = vpop.f32.mrf.mxu0  ;;  %v7938_v32 = vpop.f32.mrf.mxu1  ;;  %2730 = vmatprep.subr.bf16.mxu0 %v8578_v34  ;;  %2771 = vmatprep.subr.bf16.mxu1 %v8581_v23  ;;  %v8630_v23 = vld [vmem:[%s9182_s17 + $0x960] ss:$20 sps:$4 sm:$0xff]   ;;  %v8634_v26 = vld [vmem:[%s9182_s17 + $0x938] ss:$20 sps:$4 sm:$0xff]  }
 0x133   : > { %v933_v46 = vmax.f32 %v9461_v19, %v9557_v31  ;;  %2760 = vmatprep.mubr.bf16.mxu0 %v9142_v0  ;;  %2801 = vmatprep.mubr.bf16.mxu1 %v9142_v0  ;;  %v8638_v31 = vld [vmem:[%s9182_s17 + $0x910] ss:$20 sps:$4 sm:$0xff]   ;;  %v8641_v32 = vld [vmem:[%s9182_s17 + $0x7e0] ss:$20 sps:$4 sm:$0xff]   ;;  %v8661_v27 = vld [vmem:[%s9182_s17 + $0x998] ss:$20 sps:$4 sm:$0xff]  }
 0x134   : > { %v887_v38 = vpop.f32.mrf.mxu0  ;;  %v927_v39 = vpop.f32.mrf.mxu1 }
 0x135   : > { %2731 = vmatpush1.bf16.msra.mxu0 %v8576_v24  ;;  %2772 = vmatpush1.bf16.msra.mxu1 %v8579_v25  ;;  %v8633_v24 = vld [vmem:[%s9182_s17 + $0x830] ss:$20 sps:$4 sm:$0xff]   ;;  %v8646_v38 = vld [vmem:[%s9182_s17 + $0x8c0] ss:$20 sps:$4 sm:$0xff]  }
 0x136   : > { %v888_v40 = vpop.f32.mrf.mxu0  ;;  %v7939_v41 = vpop.f32.mrf.mxu1  ;;  %2732 = vmatprep.subr.bf16.mxu0 %v8584_v28  ;;  %2773 = vmatprep.subr.bf16.mxu1 %v8587_v33  ;;  %v8636_v25 = vld [vmem:[%s9182_s17 + $0x93c] ss:$20 sps:$4 sm:$0xff]   ;;  %v8644_v33 = vld [vmem:[%s9182_s17 + $0x8ec] ss:$20 sps:$4 sm:$0xff]  }
 0x137   : > { %v8637_v28 = vld [vmem:[%s9182_s17 + $0x808] ss:$20 sps:$4 sm:$0xff]   ;;  %v8649_v39 = vld [vmem:[%s9182_s17 + $0x790] ss:$20 sps:$4 sm:$0xff]   ;;  %v8650_v41 = vld [vmem:[%s9182_s17 + $0x9e0] ss:$20 sps:$4 sm:$0xff]  }
 0x138   : > { %v8652_v40 = vld [vmem:[%s9182_s17 + $0x9e4] ss:$20 sps:$4 sm:$0xff]  }
 0x139   : > { %2733 = vmatpush1.bf16.msra.mxu0 %v8582_v35  ;;  %2774 = vmatpush1.bf16.msra.mxu1 %v8585_v36  ;;  %v8645_v35 = vld [vmem:[%s9182_s17 + $0x7b8] ss:$20 sps:$4 sm:$0xff]  }
 0x13a   : > { %2734 = vmatprep.subr.bf16.mxu0 %v8590_v42  ;;  %2775 = vmatprep.subr.bf16.mxu1 %v8593_v43  ;;  %v8648_v36 = vld [vmem:[%s9182_s17 + $0x8c4] ss:$20 sps:$4 sm:$0xff]   ;;  %v8653_v42 = vld [vmem:[%s9182_s17 + $0x9e8] ss:$20 sps:$4 sm:$0xff]  }
 0x13b   : > { %v8656_v43 = vld [vmem:[%s9182_s17 + $0x9bc] ss:$20 sps:$4 sm:$0xff]  }
 0x13d   : > { %2735 = vmatpush1.bf16.msra.mxu0 %v8588_v44  ;;  %2776 = vmatpush1.bf16.msra.mxu1 %v8591_v45  ;;  %v8654_v44 = vld [vmem:[%s9182_s17 + $0x9b8] ss:$20 sps:$4 sm:$0xff]   ;;  %v8657_v45 = vld [vmem:[%s9182_s17 + $0x9c0] ss:$20 sps:$4 sm:$0xff]  }
 0x13e   : > { %2736 = vmatprep.subr.bf16.mxu0 %v8596_v47  ;;  %2777 = vmatprep.subr.bf16.mxu1 %v8599_v48 }
 0x141   : > { %2737 = vmatpush1.bf16.msra.mxu0 %v8594_v49  ;;  %2778 = vmatpush1.bf16.msra.mxu1 %v8597_v53 }
 0x142   : > { %2738 = vmatprep.subr.bf16.mxu0 %v8602_v55  ;;  %2779 = vmatprep.subr.bf16.mxu1 %v8605_v57 }
 0x145   : > { %2739 = vmatpush1.bf16.msra.mxu0 %v8600_v58  ;;  %2780 = vmatpush1.bf16.msra.mxu1 %v8603_v59  ;;  %v8660_v58 = vld [vmem:[%s9182_s17 + $0x994] ss:$20 sps:$4 sm:$0xff]  }
 0x146   : > { %2740 = vmatprep.subr.bf16.mxu0 %v8608_v60  ;;  %2781 = vmatprep.subr.bf16.mxu1 %v8611_v61 }
 0x149   : > { %2741 = vmatpush1.bf16.msra.mxu0 %v8606_v62  ;;  %2782 = vmatpush1.bf16.msra.mxu1 %v8609_v63  ;;  %v8664_v63 = vld [vmem:[%s9182_s17 + $0x96c] ss:$20 sps:$4 sm:$0xff]  }
 0x14a   : > { %2742 = vmatprep.subr.bf16.mxu0 %v8614_v1  ;;  %2783 = vmatprep.subr.bf16.mxu1 %v8617_v2  ;;  %v8662_v1 = vld [vmem:[%s9182_s17 + $0x968] ss:$20 sps:$4 sm:$0xff]   ;;  %v8665_v2 = vld [vmem:[%s9182_s17 + $0x970] ss:$20 sps:$4 sm:$0xff]  }
 0x14d   : > { %2743 = vmatpush1.bf16.msra.mxu0 %v8612_v3  ;;  %2784 = vmatpush1.bf16.msra.mxu1 %v8615_v4  ;;  %v8668_v3 = vld [vmem:[%s9182_s17 + $0x944] ss:$20 sps:$4 sm:$0xff]   ;;  %v8666_v4 = vld [vmem:[%s9182_s17 + $0x940] ss:$20 sps:$4 sm:$0xff]  }
 0x14e   : > { %8020 = vmatprep.subr.bf16.mxu0 %v9143_v37  ;;  %3112 = vmatprep.subr.bf16.mxu1 %v8620_v5  ;;  %v8669_v5 = vld [vmem:[%s9182_s17 + $0x948] ss:$20 sps:$4 sm:$0xff]  }
 0x150   : > { %v1226_v11 = vpop.f32.mrf.mxu0  ;;  %v1267_v12 = vpop.f32.mrf.mxu1  ;;  %2761 = vmatmul.mubr.bf16.vlgmr.msra.gmra.mxu0 %v9596_v13  ;;  %2802 = vmatmul.mubr.bf16.vlgmr.msra.gmra.mxu1 %v9596_v13 }
 0x151   : > { %v9603_v14 = vmax.f32 %v930_v52, %v1226_v11  ;;  %v9608_v15 = vmax.f32 %v932_v29, %v1267_v12  ;;  %8021 = vmatpush3.bf16.msra.mxu0 %v8621_v7  ;;  %3113 = vmatpush1.bf16.msra.mxu1 %v8618_v6  ;;  %v8629_v52 = vld [vmem:[%s9182_s17 + $0x858] ss:$20 sps:$4 sm:$0xff]   ;;  %v8640_v29 = vld [vmem:[%s9182_s17 + $0x914] ss:$20 sps:$4 sm:$0xff]   ;;  %v8672_v6 = vld [vmem:[%s9182_s17 + $0x91c] ss:$20 sps:$4 sm:$0xff]  }
 0x152   : > { %v1228_v20 = vpop.f32.mrf.mxu0  ;;  %v1269_v21 = vpop.f32.mrf.mxu1  ;;  %8022 = vmatprep.subr.bf16.mxu0 %v9143_v37  ;;  %3114 = vmatprep.subr.bf16.mxu1 %v8624_v8  ;;  %v8670_v7 = vld [vmem:[%s9182_s17 + $0x918] ss:$20 sps:$4 sm:$0xff]   ;;  %v8673_v8 = vld [vmem:[%s9182_s17 + $0x920] ss:$20 sps:$4 sm:$0xff]  }
 0x153   : > { %v9615_v16 = vmax.f32 %v931_v56, %v1228_v20  ;;  %v9620_v17 = vmax.f32 %v933_v46, %v1269_v21  ;;  %8036 = vmatprep.mubr.msk.bf16.mxu0 %vm9144_vm0, %v9143_v37  ;;  %3144 = vmatprep.mubr.bf16.mxu1 %v9142_v0  ;;  %v8632_v56 = vld [vmem:[%s9182_s17 + $0x964] ss:$20 sps:$4 sm:$0xff]   ;;  %v8642_v46 = vld [vmem:[%s9182_s17 + $0x8e8] ss:$20 sps:$4 sm:$0xff]   ;;  %v8680_v12 = vld [vmem:[%s9182_s17 + $0x8cc] ss:$20 sps:$4 sm:$0xff]  }
 0x154   : > { %v1230_v34 = vpop.f32.mrf.mxu0  ;;  %v1271_v18 = vpop.f32.mrf.mxu1  ;;  %v8677_v11 = vld [vmem:[%s9182_s17 + $0x8f8] ss:$20 sps:$4 sm:$0xff]   ;;  %v8678_v20 = vld [vmem:[%s9182_s17 + $0x8c8] ss:$20 sps:$4 sm:$0xff]   ;;  %v8681_v21 = vld [vmem:[%s9182_s17 + $0x8d0] ss:$20 sps:$4 sm:$0xff]  }
 0x155   : > { %8023 = vmatpush3.bf16.msra.mxu0 %v8625_v10  ;;  %3115 = vmatpush1.bf16.msra.mxu1 %v8622_v9  ;;  %v8676_v9 = vld [vmem:[%s9182_s17 + $0x8f4] ss:$20 sps:$4 sm:$0xff]   ;;  %v8674_v10 = vld [vmem:[%s9182_s17 + $0x8f0] ss:$20 sps:$4 sm:$0xff]  }
 0x156   : > { %v1231_v54 = vpop.f32.mrf.mxu0  ;;  %v1272_v19 = vpop.f32.mrf.mxu1  ;;  %8024 = vmatprep.subr.bf16.mxu0 %v9143_v37  ;;  %3116 = vmatprep.subr.bf16.mxu1 %v8628_v22  ;;  %v8684_v22 = vld [vmem:[%s9182_s17 + $0xb1c] ss:$20 sps:$4 sm:$0xff]   ;;  %v8685_v34 = vld [vmem:[%s9182_s17 + $0xb20] ss:$20 sps:$4 sm:$0xff]  }
 0x157   : > { %v8690_v18 = vld [vmem:[%s9182_s17 + $0xaf4] ss:$20 sps:$4 sm:$0xff]   ;;  %v8693_v54 = vld [vmem:[%s9182_s17 + $0xafc] ss:$20 sps:$4 sm:$0xff]  }
 0x158   : > { %v8688_v19 = vld [vmem:[%s9182_s17 + $0xaf0] ss:$20 sps:$4 sm:$0xff]  }
 0x159   : > { %8025 = vmatpush3.bf16.msra.mxu0 %v8629_v52  ;;  %3117 = vmatpush1.bf16.msra.mxu1 %v8626_v51  ;;  %v8687_v51 = vld [vmem:[%s9182_s17 + $0xb24] ss:$20 sps:$4 sm:$0xff]  }
 0x15a   : > { %8026 = vmatprep.subr.bf16.mxu0 %v9143_v37  ;;  %3118 = vmatprep.subr.bf16.mxu1 %v8632_v56  ;;  %v8682_v52 = vld [vmem:[%s9182_s17 + $0xb18] ss:$20 sps:$4 sm:$0xff]  }
 0x15b   : > { %v8691_v56 = vld [vmem:[%s9182_s17 + $0xaf8] ss:$20 sps:$4 sm:$0xff]  }
 0x15d   : > { %8027 = vmatpush3.bf16.msra.mxu0 %v8633_v24  ;;  %3119 = vmatpush1.bf16.msra.mxu1 %v8630_v23 }
 0x15e   : > { %8028 = vmatprep.subr.bf16.mxu0 %v9143_v37  ;;  %3120 = vmatprep.subr.bf16.mxu1 %v8636_v25  ;;  %v8696_v25 = vld [vmem:[%s9182_s17 + $0xacc] ss:$20 sps:$4 sm:$0xff]  }
 0x161   : > { %8029 = vmatpush3.bf16.msra.mxu0 %v8637_v28  ;;  %3121 = vmatpush1.bf16.msra.mxu1 %v8634_v26 }
 0x162   : > { %8030 = vmatprep.subr.bf16.mxu0 %v9143_v37  ;;  %3122 = vmatprep.subr.bf16.mxu1 %v8640_v29 }
 0x165   : > { %8031 = vmatpush3.bf16.msra.mxu0 %v8641_v32  ;;  %3123 = vmatpush1.bf16.msra.mxu1 %v8638_v31  ;;  %v8699_v32 = vld [vmem:[%s9182_s17 + $0xad4] ss:$20 sps:$4 sm:$0xff]  }
 0x166   : > { %8032 = vmatprep.subr.bf16.mxu0 %v9143_v37  ;;  %3124 = vmatprep.subr.bf16.mxu1 %v8644_v33 }
 0x169   : > { %8033 = vmatpush3.bf16.msra.mxu0 %v8645_v35  ;;  %3125 = vmatpush1.bf16.msra.mxu1 %v8642_v46  ;;  %v8694_v46 = vld [vmem:[%s9182_s17 + $0xac8] ss:$20 sps:$4 sm:$0xff]   ;;  %v8697_v35 = vld [vmem:[%s9182_s17 + $0xad0] ss:$20 sps:$4 sm:$0xff]  }
 0x16a   : > { %8034 = vmatprep.subr.bf16.mxu0 %v9143_v37  ;;  %3126 = vmatprep.subr.bf16.mxu1 %v8648_v36 }
 0x16d   : > { %8035 = vmatpush3.bf16.msra.mxu0 %v8649_v39  ;;  %3127 = vmatpush1.bf16.msra.mxu1 %v8646_v38 }
 0x16e   : > { %3153 = vmatprep.subr.bf16.mxu0 %v8652_v40  ;;  %8040 = vmatprep.subr.bf16.mxu1 %v9143_v37 }
 0x170   : > { %v1308_v47 = vpop.f32.mrf.mxu0  ;;  %v9655_v48 = vpop.f32.mrf.mxu1  ;;  %8037 = vmatmul.mubr.bf16.vlgmr.msra.gmra.mxu0 %v9596_v13  ;;  %3145 = vmatmul.mubr.bf16.vlgmr.msra.gmra.mxu1 %v9596_v13 }
 0x171   : > { %v9662_v49 = vmax.f32 %v934_v30, %v1308_v47  ;;  %v1698_v53 = vmax.f32 %v9603_v14, %v9655_v48  ;;  %3154 = vmatpush1.bf16.msra.mxu0 %v8650_v41  ;;  %8041 = vmatpush3.bf16.msra.mxu1 %v8653_v42  ;;  %v8702_v41 = vld [vmem:[%s9182_s17 + $0xaa4] ss:$20 sps:$4 sm:$0xff]   ;;  %v8705_v42 = vld [vmem:[%s9182_s17 + $0xaac] ss:$20 sps:$4 sm:$0xff]  }
 0x172   : > { %v7958_v55 = vpop.f32.mrf.mxu0  ;;  %v9666_v57 = vpop.f32.mrf.mxu1  ;;  %3155 = vmatprep.subr.bf16.mxu0 %v8656_v43  ;;  %8042 = vmatprep.subr.bf16.mxu1 %v9143_v37  ;;  %v8700_v43 = vld [vmem:[%s9182_s17 + $0xaa0] ss:$20 sps:$4 sm:$0xff]   ;;  %v8711_v47 = vld [vmem:[%s9182_s17 + $0xa84] ss:$20 sps:$4 sm:$0xff]  }
 0x173   : > { %v1699_v59 = vmax.f32 %v9615_v16, %v9666_v57  ;;  %3185 = vmatprep.mubr.bf16.mxu0 %v9142_v0  ;;  %8056 = vmatprep.mubr.msk.bf16.mxu1 %vm9144_vm0, %v9143_v37  ;;  %v8706_v55 = vld [vmem:[%s9182_s17 + $0xa78] ss:$20 sps:$4 sm:$0xff]   ;;  %v8738_v16 = vld [vmem:[%s9182_s17 + $0xc08] ss:$20 sps:$4 sm:$0xff]  }
 0x174   : > { %v1311_v30 = vpop.f32.mrf.mxu0  ;;  %v1614_v60 = vpop.f32.mrf.mxu1  ;;  %v8740_v14 = vld [vmem:[%s9182_s17 + $0xc0c] ss:$20 sps:$4 sm:$0xff]  }
 0x175   : > { %3156 = vmatpush1.bf16.msra.mxu0 %v8654_v44  ;;  %8043 = vmatpush3.bf16.msra.mxu1 %v8657_v45  ;;  %v8703_v44 = vld [vmem:[%s9182_s17 + $0xaa8] ss:$20 sps:$4 sm:$0xff]   ;;  %v8712_v30 = vld [vmem:[%s9182_s17 + $0xa50] ss:$20 sps:$4 sm:$0xff]   ;;  %v8715_v60 = vld [vmem:[%s9182_s17 + $0xa58] ss:$20 sps:$4 sm:$0xff]  }
 0x176   : > { %v7959_v61 = vpop.f32.mrf.mxu0  ;;  %v1615_v62 = vpop.f32.mrf.mxu1  ;;  %3157 = vmatprep.subr.bf16.mxu0 %v8660_v58  ;;  %8044 = vmatprep.subr.bf16.mxu1 %v9143_v37  ;;  %v8708_v45 = vld [vmem:[%s9182_s17 + $0xa7c] ss:$20 sps:$4 sm:$0xff]   ;;  %v8709_v58 = vld [vmem:[%s9182_s17 + $0xa80] ss:$20 sps:$4 sm:$0xff]   ;;  %v8741_v57 = vld [vmem:[%s9182_s17 + $0xad8] ss:$20 sps:$4 sm:$0xff]  }
 0x177   : > { %v8720_v61 = vld [vmem:[%s9182_s17 + $0xa2c] ss:$20 sps:$4 sm:$0xff]   ;;  %v8723_v62 = vld [vmem:[%s9182_s17 + $0xa34] ss:$20 sps:$4 sm:$0xff]  }
 0x179   : > { %3158 = vmatpush1.bf16.msra.mxu0 %v8658_v50  ;;  %8045 = vmatpush3.bf16.msra.mxu1 %v8661_v27  ;;  %v8714_v50 = vld [vmem:[%s9182_s17 + $0xa54] ss:$20 sps:$4 sm:$0xff]   ;;  %v8717_v27 = vld [vmem:[%s9182_s17 + $0xa5c] ss:$20 sps:$4 sm:$0xff]  }
 0x17a   : > { %3159 = vmatprep.subr.bf16.mxu0 %v8664_v63  ;;  %8046 = vmatprep.subr.bf16.mxu1 %v9143_v37  ;;  %v8718_v63 = vld [vmem:[%s9182_s17 + $0xa28] ss:$20 sps:$4 sm:$0xff]  }
 0x17d   : > { %3160 = vmatpush1.bf16.msra.mxu0 %v8662_v1  ;;  %8047 = vmatpush3.bf16.msra.mxu1 %v8665_v2  ;;  %v8721_v1 = vld [vmem:[%s9182_s17 + $0xa30] ss:$20 sps:$4 sm:$0xff]  }
 0x17e   : > { %3161 = vmatprep.subr.bf16.mxu0 %v8668_v3  ;;  %8048 = vmatprep.subr.bf16.mxu1 %v9143_v37  ;;  %v8726_v2 = vld [vmem:[%s9182_s17 + $0xa04] ss:$20 sps:$4 sm:$0xff]   ;;  %v8729_v3 = vld [vmem:[%s9182_s17 + $0xa0c] ss:$20 sps:$4 sm:$0xff]  }
 0x181   : > { %3162 = vmatpush1.bf16.msra.mxu0 %v8666_v4  ;;  %8049 = vmatpush3.bf16.msra.mxu1 %v8669_v5  ;;  %v8724_v4 = vld [vmem:[%s9182_s17 + $0xa00] ss:$20 sps:$4 sm:$0xff]   ;;  %v8727_v5 = vld [vmem:[%s9182_s17 + $0xa08] ss:$20 sps:$4 sm:$0xff]  }
 0x182   : > { %3163 = vmatprep.subr.bf16.mxu0 %v8672_v6  ;;  %8050 = vmatprep.subr.bf16.mxu1 %v9143_v37  ;;  %v8732_v6 = vld [vmem:[%s9182_s17 + $0xc5c] ss:$20 sps:$4 sm:$0xff]  }
 0x185   : > { %3164 = vmatpush1.bf16.msra.mxu0 %v8670_v7  ;;  %8051 = vmatpush3.bf16.msra.mxu1 %v8673_v8  ;;  %v8730_v7 = vld [vmem:[%s9182_s17 + $0xc58] ss:$20 sps:$4 sm:$0xff]   ;;  %v8733_v8 = vld [vmem:[%s9182_s17 + $0xb28] ss:$20 sps:$4 sm:$0xff]  }
 0x186   : > { %3165 = vmatprep.subr.bf16.mxu0 %v8676_v9  ;;  %8052 = vmatprep.subr.bf16.mxu1 %v9143_v37  ;;  %v8736_v9 = vld [vmem:[%s9182_s17 + $0xc34] ss:$20 sps:$4 sm:$0xff]  }
 0x189   : > { %3166 = vmatpush1.bf16.msra.mxu0 %v8674_v10  ;;  %8053 = vmatpush3.bf16.msra.mxu1 %v8677_v11 }
 0x18a   : > { %3167 = vmatprep.subr.bf16.mxu0 %v8680_v12  ;;  %8054 = vmatprep.subr.bf16.mxu1 %v9143_v37 }
 0x18d   : > { %3168 = vmatpush1.bf16.msra.mxu0 %v8678_v20  ;;  %8055 = vmatpush3.bf16.msra.mxu1 %v8681_v21  ;;  %v8734_v21 = vld [vmem:[%s9182_s17 + $0xc30] ss:$20 sps:$4 sm:$0xff]  }
 0x18e   : > { %3496 = vmatprep.subr.bf16.mxu0 %v8684_v22  ;;  %3537 = vmatprep.subr.bf16.mxu1 %v8687_v51  ;;  %v8737_v22 = vld [vmem:[%s9182_s17 + $0xb00] ss:$20 sps:$4 sm:$0xff]  }
 0x190   : > { %v9706_v23 = vpop.f32.mrf.mxu0  ;;  %v9708_v24 = vpop.f32.mrf.mxu1  ;;  %3186 = vmatmul.mubr.bf16.vlgmr.msra.gmra.mxu0 %v9596_v13  ;;  %8057 = vmatmul.mubr.bf16.vlgmr.msra.gmra.mxu1 %v9596_v13 }
 0x191   : > { %v1700_v26 = vmax.f32 %v9608_v15, %v9706_v23  ;;  %v1702_v28 = vmax.f32 %v9662_v49, %v9708_v24  ;;  %3497 = vmatpush1.bf16.msra.mxu0 %v8682_v52  ;;  %3538 = vmatpush1.bf16.msra.mxu1 %v8685_v34  ;;  %v8746_v23 = vld [vmem:[%s9182_s17 + $0xbb8] ss:$20 sps:$4 sm:$0xff]  }
 0x192   : > { %v9717_v29 = vpop.f32.mrf.mxu0  ;;  %v7978_v31 = vpop.f32.mrf.mxu1  ;;  %3498 = vmatprep.subr.bf16.mxu0 %v8690_v18  ;;  %3539 = vmatprep.subr.bf16.mxu1 %v8693_v54  ;;  %v8744_v18 = vld [vmem:[%s9182_s17 + $0xbe4] ss:$20 sps:$4 sm:$0xff]   ;;  %v8742_v54 = vld [vmem:[%s9182_s17 + $0xbe0] ss:$20 sps:$4 sm:$0xff]  }
 0x193   : > { %v1701_v33 = vmax.f32 %v9620_v17, %v9717_v29  ;;  %3528 = vmatprep.mubr.bf16.mxu0 %v9142_v0  ;;  %3569 = vmatprep.mubr.bf16.mxu1 %v9142_v0  ;;  %v8750_v29 = vld [vmem:[%s9182_s17 + $0xb90] ss:$20 sps:$4 sm:$0xff]   ;;  %v8753_v31 = vld [vmem:[%s9182_s17 + $0xa60] ss:$20 sps:$4 sm:$0xff]  }
 0x194   : > { %v1655_v36 = vpop.f32.mrf.mxu0  ;;  %v1695_v38 = vpop.f32.mrf.mxu1 }
 0x195   : > { %3499 = vmatpush1.bf16.msra.mxu0 %v8688_v19  ;;  %3540 = vmatpush1.bf16.msra.mxu1 %v8691_v56  ;;  %v8745_v19 = vld [vmem:[%s9182_s17 + $0xab0] ss:$20 sps:$4 sm:$0xff]   ;;  %v8758_v36 = vld [vmem:[%s9182_s17 + $0xb40] ss:$20 sps:$4 sm:$0xff]  }
 0x196   : > { %v1656_v39 = vpop.f32.mrf.mxu0  ;;  %v7979_v40 = vpop.f32.mrf.mxu1  ;;  %3500 = vmatprep.subr.bf16.mxu0 %v8696_v25  ;;  %3541 = vmatprep.subr.bf16.mxu1 %v8699_v32  ;;  %v8748_v56 = vld [vmem:[%s9182_s17 + $0xbbc] ss:$20 sps:$4 sm:$0xff]   ;;  %v8756_v32 = vld [vmem:[%s9182_s17 + $0xb6c] ss:$20 sps:$4 sm:$0xff]  }
 0x197   : > { %v8749_v25 = vld [vmem:[%s9182_s17 + $0xa88] ss:$20 sps:$4 sm:$0xff]   ;;  %v8761_v38 = vld [vmem:[%s9182_s17 + $0xa10] ss:$20 sps:$4 sm:$0xff]   ;;  %v8762_v40 = vld [vmem:[%s9182_s17 + $0xc60] ss:$20 sps:$4 sm:$0xff]  }
 0x198   : > { %v8764_v39 = vld [vmem:[%s9182_s17 + $0xc64] ss:$20 sps:$4 sm:$0xff]  }
 0x199   : > { %3501 = vmatpush1.bf16.msra.mxu0 %v8694_v46  ;;  %3542 = vmatpush1.bf16.msra.mxu1 %v8697_v35  ;;  %v8757_v46 = vld [vmem:[%s9182_s17 + $0xa38] ss:$20 sps:$4 sm:$0xff]  }
 0x19a   : > { %3502 = vmatprep.subr.bf16.mxu0 %v8702_v41  ;;  %3543 = vmatprep.subr.bf16.mxu1 %v8705_v42  ;;  %v8760_v35 = vld [vmem:[%s9182_s17 + $0xb44] ss:$20 sps:$4 sm:$0xff]   ;;  %v8765_v41 = vld [vmem:[%s9182_s17 + $0xc68] ss:$20 sps:$4 sm:$0xff]  }
 0x19b   : > { %v8768_v42 = vld [vmem:[%s9182_s17 + $0xc3c] ss:$20 sps:$4 sm:$0xff]  }
 0x19d   : > { %3503 = vmatpush1.bf16.msra.mxu0 %v8700_v43  ;;  %3544 = vmatpush1.bf16.msra.mxu1 %v8703_v44 }
 0x19e   : > { %3504 = vmatprep.subr.bf16.mxu0 %v8708_v45  ;;  %3545 = vmatprep.subr.bf16.mxu1 %v8711_v47 }
 0x1a1   : > { %3505 = vmatpush1.bf16.msra.mxu0 %v8706_v55  ;;  %3546 = vmatpush1.bf16.msra.mxu1 %v8709_v58  ;;  %v8766_v55 = vld [vmem:[%s9182_s17 + $0xc38] ss:$20 sps:$4 sm:$0xff]   ;;  %v8769_v58 = vld [vmem:[%s9182_s17 + $0xc40] ss:$20 sps:$4 sm:$0xff]  }
 0x1a2   : > { %3506 = vmatprep.subr.bf16.mxu0 %v8714_v50  ;;  %3547 = vmatprep.subr.bf16.mxu1 %v8717_v27 }
 0x1a5   : > { %3507 = vmatpush1.bf16.msra.mxu0 %v8712_v30  ;;  %3548 = vmatpush1.bf16.msra.mxu1 %v8715_v60  ;;  %v8770_v30 = vld [vmem:[%s9182_s17 + $0xc10] ss:$20 sps:$4 sm:$0xff]   ;;  %v8773_v60 = vld [vmem:[%s9182_s17 + $0xc18] ss:$20 sps:$4 sm:$0xff]  }
 0x1a6   : > { %3508 = vmatprep.subr.bf16.mxu0 %v8720_v61  ;;  %3549 = vmatprep.subr.bf16.mxu1 %v8723_v62 }
 0x1a9   : > { %3509 = vmatpush1.bf16.msra.mxu0 %v8718_v63  ;;  %3550 = vmatpush1.bf16.msra.mxu1 %v8721_v1  ;;  %v8776_v63 = vld [vmem:[%s9182_s17 + $0xbec] ss:$20 sps:$4 sm:$0xff]   ;;  %v8774_v1 = vld [vmem:[%s9182_s17 + $0xbe8] ss:$20 sps:$4 sm:$0xff]  }
 0x1aa   : > { %3510 = vmatprep.subr.bf16.mxu0 %v8726_v2  ;;  %3551 = vmatprep.subr.bf16.mxu1 %v8729_v3  ;;  %v8777_v2 = vld [vmem:[%s9182_s17 + $0xbf0] ss:$20 sps:$4 sm:$0xff]  }
 0x1ab   : > { %v8780_v3 = vld [vmem:[%s9182_s17 + $0xbc4] ss:$20 sps:$4 sm:$0xff]  }
 0x1ad   : > { %3511 = vmatpush1.bf16.msra.mxu0 %v8724_v4  ;;  %3552 = vmatpush1.bf16.msra.mxu1 %v8727_v5  ;;  %v8778_v4 = vld [vmem:[%s9182_s17 + $0xbc0] ss:$20 sps:$4 sm:$0xff]   ;;  %v8781_v5 = vld [vmem:[%s9182_s17 + $0xbc8] ss:$20 sps:$4 sm:$0xff]  }
 0x1ae   : > { %8060 = vmatprep.subr.bf16.mxu0 %v9143_v37  ;;  %3880 = vmatprep.subr.bf16.mxu1 %v8732_v6  ;;  %v8784_v6 = vld [vmem:[%s9182_s17 + $0xb9c] ss:$20 sps:$4 sm:$0xff]  }
 0x1b0   : > { %v1994_v10 = vpop.f32.mrf.mxu0  ;;  %v2035_v11 = vpop.f32.mrf.mxu1  ;;  %3529 = vmatmul.mubr.bf16.vlgmr.msra.gmra.mxu0 %v9596_v13  ;;  %3570 = vmatmul.mubr.bf16.vlgmr.msra.gmra.mxu1 %v9596_v13 }
 0x1b1   : > { %v9756_v12 = vmax.f32 %v1698_v53, %v1994_v10  ;;  %v9761_v20 = vmax.f32 %v1700_v26, %v2035_v11  ;;  %8061 = vmatpush3.bf16.msra.mxu0 %v8733_v8  ;;  %3881 = vmatpush1.bf16.msra.mxu1 %v8730_v7  ;;  %v8752_v26 = vld [vmem:[%s9182_s17 + $0xb94] ss:$20 sps:$4 sm:$0xff]   ;;  %v8782_v7 = vld [vmem:[%s9182_s17 + $0xb98] ss:$20 sps:$4 sm:$0xff]   ;;  %v8786_v10 = vld [vmem:[%s9182_s17 + $0xb70] ss:$20 sps:$4 sm:$0xff]  }
 0x1b2   : > { %v1996_v51 = vpop.f32.mrf.mxu0  ;;  %v2037_v52 = vpop.f32.mrf.mxu1  ;;  %8062 = vmatprep.subr.bf16.mxu0 %v9143_v37  ;;  %3882 = vmatprep.subr.bf16.mxu1 %v8736_v9  ;;  %v8785_v8 = vld [vmem:[%s9182_s17 + $0xba0] ss:$20 sps:$4 sm:$0xff]   ;;  %v8789_v11 = vld [vmem:[%s9182_s17 + $0xb78] ss:$20 sps:$4 sm:$0xff]  }
 0x1b3   : > { %v9770_v48 = vmax.f32 %v1699_v59, %v1996_v51  ;;  %v9775_v15 = vmax.f32 %v1701_v33, %v2037_v52  ;;  %8076 = vmatprep.mubr.msk.bf16.mxu0 %vm9144_vm0, %v9143_v37  ;;  %3912 = vmatprep.mubr.bf16.mxu1 %v9142_v0  ;;  %v8754_v33 = vld [vmem:[%s9182_s17 + $0xb68] ss:$20 sps:$4 sm:$0xff]   ;;  %v8793_v51 = vld [vmem:[%s9182_s17 + $0xb50] ss:$20 sps:$4 sm:$0xff]  }
 0x1b4   : > { %v1998_v53 = vpop.f32.mrf.mxu0  ;;  %v2039_v34 = vpop.f32.mrf.mxu1  ;;  %v8788_v9 = vld [vmem:[%s9182_s17 + $0xb74] ss:$20 sps:$4 sm:$0xff]   ;;  %v8796_v52 = vld [vmem:[%s9182_s17 + $0xd9c] ss:$20 sps:$4 sm:$0xff]  }
 0x1b5   : > { %8063 = vmatpush3.bf16.msra.mxu0 %v8737_v22  ;;  %3883 = vmatpush1.bf16.msra.mxu1 %v8734_v21  ;;  %v8792_v21 = vld [vmem:[%s9182_s17 + $0xb4c] ss:$20 sps:$4 sm:$0xff]   ;;  %v8790_v22 = vld [vmem:[%s9182_s17 + $0xb48] ss:$20 sps:$4 sm:$0xff]  }
 0x1b6   : > { %v1999_v59 = vpop.f32.mrf.mxu0  ;;  %v2040_v17 = vpop.f32.mrf.mxu1  ;;  %8064 = vmatprep.subr.bf16.mxu0 %v9143_v37  ;;  %3884 = vmatprep.subr.bf16.mxu1 %v8740_v14  ;;  %v8799_v14 = vld [vmem:[%s9182_s17 + $0xda4] ss:$20 sps:$4 sm:$0xff]   ;;  %v8797_v34 = vld [vmem:[%s9182_s17 + $0xda0] ss:$20 sps:$4 sm:$0xff]  }
 0x1b7   : > { %v8794_v53 = vld [vmem:[%s9182_s17 + $0xd98] ss:$20 sps:$4 sm:$0xff]  }
 0x1b9   : > { %8065 = vmatpush3.bf16.msra.mxu0 %v8741_v57  ;;  %3885 = vmatpush1.bf16.msra.mxu1 %v8738_v16  ;;  %v8802_v16 = vld [vmem:[%s9182_s17 + $0xd74] ss:$20 sps:$4 sm:$0xff]   ;;  %v8805_v57 = vld [vmem:[%s9182_s17 + $0xd7c] ss:$20 sps:$4 sm:$0xff]  }
 0x1ba   : > { %8066 = vmatprep.subr.bf16.mxu0 %v9143_v37  ;;  %3886 = vmatprep.subr.bf16.mxu1 %v8744_v18  ;;  %v9866_v18 = vld [vmem:[%s10357_s1] sm:$0xf] }
 0x1bd   : > { %8067 = vmatpush3.bf16.msra.mxu0 %v8745_v19  ;;  %3887 = vmatpush1.bf16.msra.mxu1 %v8742_v54 }
 0x1be   : > { %8068 = vmatprep.subr.bf16.mxu0 %v9143_v37  ;;  %3888 = vmatprep.subr.bf16.mxu1 %v8748_v56  ;;  %v8800_v56 = vld [vmem:[%s9182_s17 + $0xd70] ss:$20 sps:$4 sm:$0xff]  }
 0x1c1   : > { %8069 = vmatpush3.bf16.msra.mxu0 %v8749_v25  ;;  %3889 = vmatpush1.bf16.msra.mxu1 %v8746_v23  ;;  %v8803_v23 = vld [vmem:[%s9182_s17 + $0xd78] ss:$20 sps:$4 sm:$0xff]  }
 0x1c2   : > { %8070 = vmatprep.subr.bf16.mxu0 %v9143_v37  ;;  %3890 = vmatprep.subr.bf16.mxu1 %v8752_v26 }
 0x1c5   : > { %8071 = vmatpush3.bf16.msra.mxu0 %v8753_v31  ;;  %3891 = vmatpush1.bf16.msra.mxu1 %v8750_v29  ;;  %v8808_v29 = vld [vmem:[%s9182_s17 + $0xd4c] ss:$20 sps:$4 sm:$0xff]   ;;  %v8811_v31 = vld [vmem:[%s9182_s17 + $0xd54] ss:$20 sps:$4 sm:$0xff]  }
 0x1c6   : > { %8072 = vmatprep.subr.bf16.mxu0 %v9143_v37  ;;  %3892 = vmatprep.subr.bf16.mxu1 %v8756_v32 }
 0x1c9   : > { %8073 = vmatpush3.bf16.msra.mxu0 %v8757_v46  ;;  %3893 = vmatpush1.bf16.msra.mxu1 %v8754_v33 }
 0x1ca   : > { %8074 = vmatprep.subr.bf16.mxu0 %v9143_v37  ;;  %3894 = vmatprep.subr.bf16.mxu1 %v8760_v35  ;;  %v8806_v35 = vld [vmem:[%s9182_s17 + $0xd48] ss:$20 sps:$4 sm:$0xff]  }
 0x1cd   : > { %8075 = vmatpush3.bf16.msra.mxu0 %v8761_v38  ;;  %3895 = vmatpush1.bf16.msra.mxu1 %v8758_v36  ;;  %v8809_v36 = vld [vmem:[%s9182_s17 + $0xd50] ss:$20 sps:$4 sm:$0xff]  }
 0x1ce   : > { %3921 = vmatprep.subr.bf16.mxu0 %v8764_v39  ;;  %8080 = vmatprep.subr.bf16.mxu1 %v9143_v37 }
 0x1d0   : > { %v2076_v43 = vpop.f32.mrf.mxu0  ;;  %v9808_v44 = vpop.f32.mrf.mxu1  ;;  %8077 = vmatmul.mubr.bf16.vlgmr.msra.gmra.mxu0 %v9596_v13  ;;  %3913 = vmatmul.mubr.bf16.vlgmr.msra.gmra.mxu1 %v9596_v13  ;;  %v8772_v13 = vld [vmem:[%s9182_s17 + $0xc14] ss:$20 sps:$4 sm:$0xff]  }
 0x1d1   : > { %v9815_v45 = vmax.f32 %v1702_v28, %v2076_v43  ;;  %v2466_v47 = vmax.f32 %v9756_v12, %v9808_v44  ;;  %3922 = vmatpush1.bf16.msra.mxu0 %v8762_v40  ;;  %8081 = vmatpush3.bf16.msra.mxu1 %v8765_v41  ;;  %v8814_v40 = vld [vmem:[%s9182_s17 + $0xd24] ss:$20 sps:$4 sm:$0xff]   ;;  %v8817_v41 = vld [vmem:[%s9182_s17 + $0xd2c] ss:$20 sps:$4 sm:$0xff]   ;;  %v8815_v43 = vld [vmem:[%s9182_s17 + $0xd28] ss:$20 sps:$4 sm:$0xff]  }
 0x1d2   : > { %v7998_v50 = vpop.f32.mrf.mxu0  ;;  %v9821_v27 = vpop.f32.mrf.mxu1  ;;  %3923 = vmatprep.subr.bf16.mxu0 %v8768_v42  ;;  %8082 = vmatprep.subr.bf16.mxu1 %v9143_v37  ;;  %v8812_v42 = vld [vmem:[%s9182_s17 + $0xd20] ss:$20 sps:$4 sm:$0xff]  }
 0x1d3   : > { %v2467_v49 = vmax.f32 %v9770_v48, %v9821_v27  ;;  %3953 = vmatprep.mubr.bf16.mxu0 %v9142_v0  ;;  %8096 = vmatprep.mubr.msk.bf16.mxu1 %vm9144_vm0, %v9143_v37  ;;  %v8818_v50 = vld [vmem:[%s9182_s17 + $0xcf8] ss:$20 sps:$4 sm:$0xff]   ;;  %v8850_v48 = vld [vmem:[%s9182_s17 + $0xe88] ss:$20 sps:$4 sm:$0xff]  }
 0x1d4   : > { %v2079_v24 = vpop.f32.mrf.mxu0  ;;  %v2382_v28 = vpop.f32.mrf.mxu1  ;;  %v8852_v12 = vld [vmem:[%s9182_s17 + $0xe8c] ss:$20 sps:$4 sm:$0xff]  }
 0x1d5   : > { %3924 = vmatpush1.bf16.msra.mxu0 %v8766_v55  ;;  %8083 = vmatpush3.bf16.msra.mxu1 %v8769_v58  ;;  %v8820_v55 = vld [vmem:[%s9182_s17 + $0xcfc] ss:$20 sps:$4 sm:$0xff]   ;;  %v8823_v58 = vld [vmem:[%s9182_s17 + $0xd04] ss:$20 sps:$4 sm:$0xff]   ;;  %v8826_v24 = vld [vmem:[%s9182_s17 + $0xcd4] ss:$20 sps:$4 sm:$0xff]  }
 0x1d6   : > { %v7999_v61 = vpop.f32.mrf.mxu0  ;;  %v2383_v62 = vpop.f32.mrf.mxu1  ;;  %3925 = vmatprep.subr.bf16.mxu0 %v8772_v13  ;;  %8084 = vmatprep.subr.bf16.mxu1 %v9143_v37  ;;  %v8821_v13 = vld [vmem:[%s9182_s17 + $0xd00] ss:$20 sps:$4 sm:$0xff]   ;;  %v8829_v28 = vld [vmem:[%s9182_s17 + $0xcdc] ss:$20 sps:$4 sm:$0xff]   ;;  %v8853_v27 = vld [vmem:[%s9182_s17 + $0xd58] ss:$20 sps:$4 sm:$0xff]  }
 0x1d7   : > { %v8832_v61 = vld [vmem:[%s9182_s17 + $0xcac] ss:$20 sps:$4 sm:$0xff]   ;;  %v8835_v62 = vld [vmem:[%s9182_s17 + $0xcb4] ss:$20 sps:$4 sm:$0xff]  }
 0x1d9   : > { %3926 = vmatpush1.bf16.msra.mxu0 %v8770_v30  ;;  %8085 = vmatpush3.bf16.msra.mxu1 %v8773_v60  ;;  %v8824_v30 = vld [vmem:[%s9182_s17 + $0xcd0] ss:$20 sps:$4 sm:$0xff]   ;;  %v8827_v60 = vld [vmem:[%s9182_s17 + $0xcd8] ss:$20 sps:$4 sm:$0xff]  }
 0x1da   : > { %3927 = vmatprep.subr.bf16.mxu0 %v8776_v63  ;;  %8086 = vmatprep.subr.bf16.mxu1 %v9143_v37  ;;  %v8830_v63 = vld [vmem:[%s9182_s17 + $0xca8] ss:$20 sps:$4 sm:$0xff]  }
 0x1dd   : > { %3928 = vmatpush1.bf16.msra.mxu0 %v8774_v1  ;;  %8087 = vmatpush3.bf16.msra.mxu1 %v8777_v2  ;;  %v8833_v1 = vld [vmem:[%s9182_s17 + $0xcb0] ss:$20 sps:$4 sm:$0xff]  }
 0x1de   : > { %3929 = vmatprep.subr.bf16.mxu0 %v8780_v3  ;;  %8088 = vmatprep.subr.bf16.mxu1 %v9143_v37  ;;  %v8838_v2 = vld [vmem:[%s9182_s17 + $0xc84] ss:$20 sps:$4 sm:$0xff]   ;;  %v8841_v3 = vld [vmem:[%s9182_s17 + $0xc8c] ss:$20 sps:$4 sm:$0xff]  }
 0x1e1   : > { %3930 = vmatpush1.bf16.msra.mxu0 %v8778_v4  ;;  %8089 = vmatpush3.bf16.msra.mxu1 %v8781_v5  ;;  %v8836_v4 = vld [vmem:[%s9182_s17 + $0xc80] ss:$20 sps:$4 sm:$0xff]   ;;  %v8839_v5 = vld [vmem:[%s9182_s17 + $0xc88] ss:$20 sps:$4 sm:$0xff]  }
 0x1e2   : > { %3931 = vmatprep.subr.bf16.mxu0 %v8784_v6  ;;  %8090 = vmatprep.subr.bf16.mxu1 %v9143_v37  ;;  %v8844_v6 = vld [vmem:[%s9182_s17 + $0xedc] ss:$20 sps:$4 sm:$0xff]  }
 0x1e5   : > { %3932 = vmatpush1.bf16.msra.mxu0 %v8782_v7  ;;  %8091 = vmatpush3.bf16.msra.mxu1 %v8785_v8  ;;  %v8842_v7 = vld [vmem:[%s9182_s17 + $0xed8] ss:$20 sps:$4 sm:$0xff]   ;;  %v8845_v8 = vld [vmem:[%s9182_s17 + $0xda8] ss:$20 sps:$4 sm:$0xff]  }
 0x1e6   : > { %3933 = vmatprep.subr.bf16.mxu0 %v8788_v9  ;;  %8092 = vmatprep.subr.bf16.mxu1 %v9143_v37  ;;  %v8848_v9 = vld [vmem:[%s9182_s17 + $0xeb4] ss:$20 sps:$4 sm:$0xff]  }
 0x1e9   : > { %3934 = vmatpush1.bf16.msra.mxu0 %v8786_v10  ;;  %8093 = vmatpush3.bf16.msra.mxu1 %v8789_v11 }
 0x1ea   : > { %3935 = vmatprep.subr.bf16.mxu0 %v8792_v21  ;;  %8094 = vmatprep.subr.bf16.mxu1 %v9143_v37 }
 0x1ed   : > { %3936 = vmatpush1.bf16.msra.mxu0 %v8790_v22  ;;  %8095 = vmatpush3.bf16.msra.mxu1 %v8793_v51  ;;  %v8846_v51 = vld [vmem:[%s9182_s17 + $0xeb0] ss:$20 sps:$4 sm:$0xff]  }
 0x1ee   : > { %4264 = vmatprep.subr.bf16.mxu0 %v8796_v52  ;;  %4305 = vmatprep.subr.bf16.mxu1 %v8799_v14  ;;  %v8849_v52 = vld [vmem:[%s9182_s17 + $0xd80] ss:$20 sps:$4 sm:$0xff]  }
 0x1f0   : > { %v9859_v59 = vpop.f32.mrf.mxu0  ;;  %v9861_v17 = vpop.f32.mrf.mxu1  ;;  %3954 = vmatmul.mubr.bf16.vlgmr.msra.gmra.mxu0 %v9866_v18  ;;  %8097 = vmatmul.mubr.bf16.vlgmr.msra.gmra.mxu1 %v9866_v18 }
 0x1f1   : > { %v2468_v54 = vmax.f32 %v9761_v20, %v9859_v59  ;;  %v2470_v19 = vmax.f32 %v9815_v45, %v9861_v17  ;;  %4265 = vmatpush1.bf16.msra.mxu0 %v8794_v53  ;;  %4306 = vmatpush1.bf16.msra.mxu1 %v8797_v34  ;;  %v8857_v59 = vld [vmem:[%s9182_s17 + $0xd30] ss:$20 sps:$4 sm:$0xff]  }
 0x1f2   : > { %v9876_v25 = vpop.f32.mrf.mxu0  ;;  %v8018_v26 = vpop.f32.mrf.mxu1  ;;  %4266 = vmatprep.subr.bf16.mxu0 %v8802_v16  ;;  %4307 = vmatprep.subr.bf16.mxu1 %v8805_v57  ;;  %v8856_v16 = vld [vmem:[%s9182_s17 + $0xe64] ss:$20 sps:$4 sm:$0xff]   ;;  %v8854_v57 = vld [vmem:[%s9182_s17 + $0xe60] ss:$20 sps:$4 sm:$0xff]  }
 0x1f3   : > { %v2469_v32 = vmax.f32 %v9775_v15, %v9876_v25  ;;  %4296 = vmatprep.mubr.bf16.mxu0 %v9142_v0  ;;  %4337 = vmatprep.mubr.bf16.mxu1 %v9142_v0  ;;  %v8864_v25 = vld [vmem:[%s9182_s17 + $0xe14] ss:$20 sps:$4 sm:$0xff]   ;;  %v8862_v26 = vld [vmem:[%s9182_s17 + $0xe10] ss:$20 sps:$4 sm:$0xff]  }
 0x1f4   : > { %v2423_v33 = vpop.f32.mrf.mxu0  ;;  %v2463_v46 = vpop.f32.mrf.mxu1 }
 0x1f5   : > { %4267 = vmatpush1.bf16.msra.mxu0 %v8800_v56  ;;  %4308 = vmatpush1.bf16.msra.mxu1 %v8803_v23  ;;  %v8858_v56 = vld [vmem:[%s9182_s17 + $0xe38] ss:$20 sps:$4 sm:$0xff]   ;;  %v8861_v23 = vld [vmem:[%s9182_s17 + $0xd08] ss:$20 sps:$4 sm:$0xff]  }
 0x1f6   : > { %v2424_v38 = vpop.f32.mrf.mxu0  ;;  %v8019_v39 = vpop.f32.mrf.mxu1  ;;  %4268 = vmatprep.subr.bf16.mxu0 %v8808_v29  ;;  %4309 = vmatprep.subr.bf16.mxu1 %v8811_v31  ;;  %v8865_v29 = vld [vmem:[%s9182_s17 + $0xce0] ss:$20 sps:$4 sm:$0xff]   ;;  %v8869_v33 = vld [vmem:[%s9182_s17 + $0xcb8] ss:$20 sps:$4 sm:$0xff]  }
 0x1f7   : > { %v8868_v31 = vld [vmem:[%s9182_s17 + $0xdec] ss:$20 sps:$4 sm:$0xff]   ;;  %v8872_v46 = vld [vmem:[%s9182_s17 + $0xdc4] ss:$20 sps:$4 sm:$0xff]  }
 0x1f8   : > { %v8876_v38 = vld [vmem:[%s9182_s17 + $0xee4] ss:$20 sps:$4 sm:$0xff]   ;;  %v8874_v39 = vld [vmem:[%s9182_s17 + $0xee0] ss:$20 sps:$4 sm:$0xff]  }
 0x1f9   : > { %4269 = vmatpush1.bf16.msra.mxu0 %v8806_v35  ;;  %4310 = vmatpush1.bf16.msra.mxu1 %v8809_v36  ;;  %v8870_v35 = vld [vmem:[%s9182_s17 + $0xdc0] ss:$20 sps:$4 sm:$0xff]   ;;  %v8873_v36 = vld [vmem:[%s9182_s17 + $0xc90] ss:$20 sps:$4 sm:$0xff]  }
 0x1fa   : > { %4270 = vmatprep.subr.bf16.mxu0 %v8814_v40  ;;  %4311 = vmatprep.subr.bf16.mxu1 %v8817_v41  ;;  %v8877_v40 = vld [vmem:[%s9182_s17 + $0xee8] ss:$20 sps:$4 sm:$0xff]  }
 0x1fb   : > { %v8880_v41 = vld [vmem:[%s9182_s17 + $0xebc] ss:$20 sps:$4 sm:$0xff]  }
 0x1fd   : > { %4271 = vmatpush1.bf16.msra.mxu0 %v8812_v42  ;;  %4312 = vmatpush1.bf16.msra.mxu1 %v8815_v43 }
 0x1fe   : > { %4272 = vmatprep.subr.bf16.mxu0 %v8820_v55  ;;  %4313 = vmatprep.subr.bf16.mxu1 %v8823_v58 }
 0x201   : > { %4273 = vmatpush1.bf16.msra.mxu0 %v8818_v50  ;;  %4314 = vmatpush1.bf16.msra.mxu1 %v8821_v13  ;;  %v8878_v50 = vld [vmem:[%s9182_s17 + $0xeb8] ss:$20 sps:$4 sm:$0xff]   ;;  %v8881_v13 = vld [vmem:[%s9182_s17 + $0xec0] ss:$20 sps:$4 sm:$0xff]  }
 0x202   : > { %4274 = vmatprep.subr.bf16.mxu0 %v8826_v24  ;;  %4315 = vmatprep.subr.bf16.mxu1 %v8829_v28 }
 0x205   : > { %4275 = vmatpush1.bf16.msra.mxu0 %v8824_v30  ;;  %4316 = vmatpush1.bf16.msra.mxu1 %v8827_v60  ;;  %v8884_v30 = vld [vmem:[%s9182_s17 + $0xe94] ss:$20 sps:$4 sm:$0xff]   ;;  %v8882_v60 = vld [vmem:[%s9182_s17 + $0xe90] ss:$20 sps:$4 sm:$0xff]  }
 0x206   : > { %4276 = vmatprep.subr.bf16.mxu0 %v8832_v61  ;;  %4317 = vmatprep.subr.bf16.mxu1 %v8835_v62  ;;  %v8885_v61 = vld [vmem:[%s9182_s17 + $0xe98] ss:$20 sps:$4 sm:$0xff]  }
 0x209   : > { %4277 = vmatpush1.bf16.msra.mxu0 %v8830_v63  ;;  %4318 = vmatpush1.bf16.msra.mxu1 %v8833_v1  ;;  %v8888_v1 = vld [vmem:[%s9182_s17 + $0xe6c] ss:$20 sps:$4 sm:$0xff]  }
 0x20a   : > { %4278 = vmatprep.subr.bf16.mxu0 %v8838_v2  ;;  %4319 = vmatprep.subr.bf16.mxu1 %v8841_v3  ;;  %v8886_v2 = vld [vmem:[%s9182_s17 + $0xe68] ss:$20 sps:$4 sm:$0xff]   ;;  %v8889_v3 = vld [vmem:[%s9182_s17 + $0xe70] ss:$20 sps:$4 sm:$0xff]  }
 0x20d   : > { %4279 = vmatpush1.bf16.msra.mxu0 %v8836_v4  ;;  %4320 = vmatpush1.bf16.msra.mxu1 %v8839_v5  ;;  %v8892_v4 = vld [vmem:[%s9182_s17 + $0xe44] ss:$20 sps:$4 sm:$0xff]   ;;  %v8890_v5 = vld [vmem:[%s9182_s17 + $0xe40] ss:$20 sps:$4 sm:$0xff]  }
 0x20e   : > { %8100 = vmatprep.subr.bf16.mxu0 %v9143_v37  ;;  %4648 = vmatprep.subr.bf16.mxu1 %v8844_v6  ;;  %v8893_v6 = vld [vmem:[%s9182_s17 + $0xe48] ss:$20 sps:$4 sm:$0xff]  }
 0x210   : > { %v2762_v10 = vpop.f32.mrf.mxu0  ;;  %v2803_v11 = vpop.f32.mrf.mxu1  ;;  %4297 = vmatmul.mubr.bf16.vlgmr.msra.gmra.mxu0 %v9866_v18  ;;  %4338 = vmatmul.mubr.bf16.vlgmr.msra.gmra.mxu1 %v9866_v18 }
 0x211   : > { %v9916_v21 = vmax.f32 %v2466_v47, %v2762_v10  ;;  %v9921_v22 = vmax.f32 %v2468_v54, %v2803_v11  ;;  %8101 = vmatpush3.bf16.msra.mxu0 %v8845_v8  ;;  %4649 = vmatpush1.bf16.msra.mxu1 %v8842_v7  ;;  %v8860_v54 = vld [vmem:[%s9182_s17 + $0xe3c] ss:$20 sps:$4 sm:$0xff]   ;;  %v8894_v8 = vld [vmem:[%s9182_s17 + $0xe18] ss:$20 sps:$4 sm:$0xff]   ;;  %v8900_v10 = vld [vmem:[%s9182_s17 + $0xdf4] ss:$20 sps:$4 sm:$0xff]  }
 0x212   : > { %v2764_v14 = vpop.f32.mrf.mxu0  ;;  %v2805_v53 = vpop.f32.mrf.mxu1  ;;  %8102 = vmatprep.subr.bf16.mxu0 %v9143_v37  ;;  %4650 = vmatprep.subr.bf16.mxu1 %v8848_v9  ;;  %v8896_v7 = vld [vmem:[%s9182_s17 + $0xe1c] ss:$20 sps:$4 sm:$0xff]   ;;  %v8897_v9 = vld [vmem:[%s9182_s17 + $0xe20] ss:$20 sps:$4 sm:$0xff]  }
 0x213   : > { %v9930_v44 = vmax.f32 %v2467_v49, %v2764_v14  ;;  %v9935_v20 = vmax.f32 %v2469_v32, %v2805_v53  ;;  %8116 = vmatprep.mubr.msk.bf16.mxu0 %vm9144_vm0, %v9143_v37  ;;  %4680 = vmatprep.mubr.bf16.mxu1 %v9142_v0  ;;  %v8866_v32 = vld [vmem:[%s9182_s17 + $0xde8] ss:$20 sps:$4 sm:$0xff]   ;;  %v8898_v11 = vld [vmem:[%s9182_s17 + $0xdf0] ss:$20 sps:$4 sm:$0xff]  }
 0x214   : > { %v2766_v47 = vpop.f32.mrf.mxu0  ;;  %v2807_v34 = vpop.f32.mrf.mxu1  ;;  %v8902_v14 = vld [vmem:[%s9182_s17 + $0xdc8] ss:$20 sps:$4 sm:$0xff]   ;;  %v8905_v53 = vld [vmem:[%s9182_s17 + $0xdd0] ss:$20 sps:$4 sm:$0xff]  }
 0x215   : > { %8103 = vmatpush3.bf16.msra.mxu0 %v8849_v52  ;;  %4651 = vmatpush1.bf16.msra.mxu1 %v8846_v51  ;;  %v8901_v51 = vld [vmem:[%s9182_s17 + $0xdf8] ss:$20 sps:$4 sm:$0xff]  }
 0x216   : > { %v2767_v49 = vpop.f32.mrf.mxu0  ;;  %v2808_v15 = vpop.f32.mrf.mxu1  ;;  %8104 = vmatprep.subr.bf16.mxu0 %v9143_v37  ;;  %4652 = vmatprep.subr.bf16.mxu1 %v8852_v12  ;;  %v8904_v52 = vld [vmem:[%s9182_s17 + $0xdcc] ss:$20 sps:$4 sm:$0xff]   ;;  %v8908_v12 = vld [vmem:[%s9182_s17 + $0x101c] ss:$20 sps:$4 sm:$0xff]   ;;  %v8911_v47 = vld [vmem:[%s9182_s17 + $0x1024] ss:$20 sps:$4 sm:$0xff]  }
 0x217   : > { %v8906_v34 = vld [vmem:[%s9182_s17 + $0x1018] ss:$20 sps:$4 sm:$0xff]   ;;  %v8917_v49 = vld [vmem:[%s9182_s17 + $0xffc] ss:$20 sps:$4 sm:$0xff]  }
 0x219   : > { %8105 = vmatpush3.bf16.msra.mxu0 %v8853_v27  ;;  %4653 = vmatpush1.bf16.msra.mxu1 %v8850_v48  ;;  %v8909_v48 = vld [vmem:[%s9182_s17 + $0x1020] ss:$20 sps:$4 sm:$0xff]  }
 0x21a   : > { %8106 = vmatprep.subr.bf16.mxu0 %v9143_v37  ;;  %4654 = vmatprep.subr.bf16.mxu1 %v8856_v16  ;;  %v8914_v27 = vld [vmem:[%s9182_s17 + $0xff4] ss:$20 sps:$4 sm:$0xff]  }
 0x21d   : > { %8107 = vmatpush3.bf16.msra.mxu0 %v8857_v59  ;;  %4655 = vmatpush1.bf16.msra.mxu1 %v8854_v57 }
 0x21e   : > { %8108 = vmatprep.subr.bf16.mxu0 %v9143_v37  ;;  %4656 = vmatprep.subr.bf16.mxu1 %v8860_v54  ;;  %v8912_v54 = vld [vmem:[%s9182_s17 + $0xff0] ss:$20 sps:$4 sm:$0xff]  }
 0x221   : > { %8109 = vmatpush3.bf16.msra.mxu0 %v8861_v23  ;;  %4657 = vmatpush1.bf16.msra.mxu1 %v8858_v56  ;;  %v8915_v56 = vld [vmem:[%s9182_s17 + $0xff8] ss:$20 sps:$4 sm:$0xff]  }
 0x222   : > { %8110 = vmatprep.subr.bf16.mxu0 %v9143_v37  ;;  %4658 = vmatprep.subr.bf16.mxu1 %v8864_v25 }
 0x225   : > { %8111 = vmatpush3.bf16.msra.mxu0 %v8865_v29  ;;  %4659 = vmatpush1.bf16.msra.mxu1 %v8862_v26  ;;  %v8920_v26 = vld [vmem:[%s9182_s17 + $0xfcc] ss:$20 sps:$4 sm:$0xff]   ;;  %v8923_v29 = vld [vmem:[%s9182_s17 + $0xfd4] ss:$20 sps:$4 sm:$0xff]  }
 0x226   : > { %8112 = vmatprep.subr.bf16.mxu0 %v9143_v37  ;;  %4660 = vmatprep.subr.bf16.mxu1 %v8868_v31 }
 0x229   : > { %8113 = vmatpush3.bf16.msra.mxu0 %v8869_v33  ;;  %4661 = vmatpush1.bf16.msra.mxu1 %v8866_v32 }
 0x22a   : > { %8114 = vmatprep.subr.bf16.mxu0 %v9143_v37  ;;  %4662 = vmatprep.subr.bf16.mxu1 %v8872_v46  ;;  %v8918_v46 = vld [vmem:[%s9182_s17 + $0xfc8] ss:$20 sps:$4 sm:$0xff]  }
 0x22d   : > { %8115 = vmatpush3.bf16.msra.mxu0 %v8873_v36  ;;  %4663 = vmatpush1.bf16.msra.mxu1 %v8870_v35  ;;  %v8921_v35 = vld [vmem:[%s9182_s17 + $0xfd0] ss:$20 sps:$4 sm:$0xff]  }
 0x22e   : > { %4689 = vmatprep.subr.bf16.mxu0 %v8876_v38  ;;  %8120 = vmatprep.subr.bf16.mxu1 %v9143_v37 }
 0x230   : > { %v2844_v42 = vpop.f32.mrf.mxu0  ;;  %v9968_v43 = vpop.f32.mrf.mxu1  ;;  %8117 = vmatmul.mubr.bf16.vlgmr.msra.gmra.mxu0 %v9866_v18  ;;  %4681 = vmatmul.mubr.bf16.vlgmr.msra.gmra.mxu1 %v9866_v18 }
 0x231   : > { %v9975_v55 = vmax.f32 %v2470_v19, %v2844_v42  ;;  %v3234_v58 = vmax.f32 %v9916_v21, %v9968_v43  ;;  %4690 = vmatpush1.bf16.msra.mxu0 %v8874_v39  ;;  %8121 = vmatpush3.bf16.msra.mxu1 %v8877_v40  ;;  %v8926_v39 = vld [vmem:[%s9182_s17 + $0xfa4] ss:$20 sps:$4 sm:$0xff]   ;;  %v8929_v40 = vld [vmem:[%s9182_s17 + $0xfac] ss:$20 sps:$4 sm:$0xff]   ;;  %v8927_v42 = vld [vmem:[%s9182_s17 + $0xfa8] ss:$20 sps:$4 sm:$0xff]  }
 0x232   : > { %v8038_v24 = vpop.f32.mrf.mxu0  ;;  %v9981_v28 = vpop.f32.mrf.mxu1  ;;  %4691 = vmatprep.subr.bf16.mxu0 %v8880_v41  ;;  %8122 = vmatprep.subr.bf16.mxu1 %v9143_v37  ;;  %v8924_v41 = vld [vmem:[%s9182_s17 + $0xfa0] ss:$20 sps:$4 sm:$0xff]  }
 0x233   : > { %v3235_v45 = vmax.f32 %v9930_v44, %v9981_v28  ;;  %4721 = vmatprep.mubr.bf16.mxu0 %v9142_v0  ;;  %8136 = vmatprep.mubr.msk.bf16.mxu1 %vm9144_vm0, %v9143_v37  ;;  %v8930_v24 = vld [vmem:[%s9182_s17 + $0xf78] ss:$20 sps:$4 sm:$0xff]   ;;  %v8962_v44 = vld [vmem:[%s9182_s17 + $0x1108] ss:$20 sps:$4 sm:$0xff]  }
 0x234   : > { %v2847_v17 = vpop.f32.mrf.mxu0  ;;  %v3150_v19 = vpop.f32.mrf.mxu1  ;;  %v8964_v21 = vld [vmem:[%s9182_s17 + $0x110c] ss:$20 sps:$4 sm:$0xff]  }
 0x235   : > { %4692 = vmatpush1.bf16.msra.mxu0 %v8878_v50  ;;  %8123 = vmatpush3.bf16.msra.mxu1 %v8881_v13  ;;  %v8932_v50 = vld [vmem:[%s9182_s17 + $0xf7c] ss:$20 sps:$4 sm:$0xff]   ;;  %v8935_v13 = vld [vmem:[%s9182_s17 + $0xf84] ss:$20 sps:$4 sm:$0xff]   ;;  %v8938_v17 = vld [vmem:[%s9182_s17 + $0xf54] ss:$20 sps:$4 sm:$0xff]  }
 0x236   : > { %v8039_v62 = vpop.f32.mrf.mxu0  ;;  %v3151_v63 = vpop.f32.mrf.mxu1  ;;  %4693 = vmatprep.subr.bf16.mxu0 %v8884_v30  ;;  %8124 = vmatprep.subr.bf16.mxu1 %v9143_v37  ;;  %v8933_v30 = vld [vmem:[%s9182_s17 + $0xf80] ss:$20 sps:$4 sm:$0xff]   ;;  %v8941_v19 = vld [vmem:[%s9182_s17 + $0xf5c] ss:$20 sps:$4 sm:$0xff]   ;;  %v8965_v28 = vld [vmem:[%s9182_s17 + $0xfd8] ss:$20 sps:$4 sm:$0xff]  }
 0x237   : > { %v8944_v62 = vld [vmem:[%s9182_s17 + $0xf2c] ss:$20 sps:$4 sm:$0xff]   ;;  %v8947_v63 = vld [vmem:[%s9182_s17 + $0xf34] ss:$20 sps:$4 sm:$0xff]  }
 0x239   : > { %4694 = vmatpush1.bf16.msra.mxu0 %v8882_v60  ;;  %8125 = vmatpush3.bf16.msra.mxu1 %v8885_v61  ;;  %v8936_v60 = vld [vmem:[%s9182_s17 + $0xf50] ss:$20 sps:$4 sm:$0xff]   ;;  %v8939_v61 = vld [vmem:[%s9182_s17 + $0xf58] ss:$20 sps:$4 sm:$0xff]  }
 0x23a   : > { %4695 = vmatprep.subr.bf16.mxu0 %v8888_v1  ;;  %8126 = vmatprep.subr.bf16.mxu1 %v9143_v37  ;;  %v8942_v1 = vld [vmem:[%s9182_s17 + $0xf28] ss:$20 sps:$4 sm:$0xff]  }
 0x23d   : > { %4696 = vmatpush1.bf16.msra.mxu0 %v8886_v2  ;;  %8127 = vmatpush3.bf16.msra.mxu1 %v8889_v3  ;;  %v8945_v2 = vld [vmem:[%s9182_s17 + $0xf30] ss:$20 sps:$4 sm:$0xff]  }
 0x23e   : > { %4697 = vmatprep.subr.bf16.mxu0 %v8892_v4  ;;  %8128 = vmatprep.subr.bf16.mxu1 %v9143_v37  ;;  %v8950_v3 = vld [vmem:[%s9182_s17 + $0xf04] ss:$20 sps:$4 sm:$0xff]   ;;  %v8953_v4 = vld [vmem:[%s9182_s17 + $0xf0c] ss:$20 sps:$4 sm:$0xff]  }
 0x241   : > { %4698 = vmatpush1.bf16.msra.mxu0 %v8890_v5  ;;  %8129 = vmatpush3.bf16.msra.mxu1 %v8893_v6  ;;  %v8948_v5 = vld [vmem:[%s9182_s17 + $0xf00] ss:$20 sps:$4 sm:$0xff]   ;;  %v8951_v6 = vld [vmem:[%s9182_s17 + $0xf08] ss:$20 sps:$4 sm:$0xff]  }
 0x242   : > { %4699 = vmatprep.subr.bf16.mxu0 %v8896_v7  ;;  %8130 = vmatprep.subr.bf16.mxu1 %v9143_v37  ;;  %v8956_v7 = vld [vmem:[%s9182_s17 + $0x115c] ss:$20 sps:$4 sm:$0xff]  }
 0x245   : > { %4700 = vmatpush1.bf16.msra.mxu0 %v8894_v8  ;;  %8131 = vmatpush3.bf16.msra.mxu1 %v8897_v9  ;;  %v8954_v8 = vld [vmem:[%s9182_s17 + $0x1158] ss:$20 sps:$4 sm:$0xff]   ;;  %v8957_v9 = vld [vmem:[%s9182_s17 + $0x1028] ss:$20 sps:$4 sm:$0xff]  }
 0x246   : > { %4701 = vmatprep.subr.bf16.mxu0 %v8900_v10  ;;  %8132 = vmatprep.subr.bf16.mxu1 %v9143_v37  ;;  %v8960_v10 = vld [vmem:[%s9182_s17 + $0x1134] ss:$20 sps:$4 sm:$0xff]  }
 0x249   : > { %4702 = vmatpush1.bf16.msra.mxu0 %v8898_v11  ;;  %8133 = vmatpush3.bf16.msra.mxu1 %v8901_v51 }
 0x24a   : > { %4703 = vmatprep.subr.bf16.mxu0 %v8904_v52  ;;  %8134 = vmatprep.subr.bf16.mxu1 %v9143_v37 }
 0x24d   : > { %4704 = vmatpush1.bf16.msra.mxu0 %v8902_v14  ;;  %8135 = vmatpush3.bf16.msra.mxu1 %v8905_v53  ;;  %v8958_v53 = vld [vmem:[%s9182_s17 + $0x1130] ss:$20 sps:$4 sm:$0xff]  }
 0x24e   : > { %5032 = vmatprep.subr.bf16.mxu0 %v8908_v12  ;;  %5073 = vmatprep.subr.bf16.mxu1 %v8911_v47  ;;  %v8961_v12 = vld [vmem:[%s9182_s17 + $0x1000] ss:$20 sps:$4 sm:$0xff]  }
 0x250   : > { %v10019_v15 = vpop.f32.mrf.mxu0  ;;  %v10021_v16 = vpop.f32.mrf.mxu1  ;;  %4722 = vmatmul.mubr.bf16.vlgmr.msra.gmra.mxu0 %v9866_v18  ;;  %8137 = vmatmul.mubr.bf16.vlgmr.msra.gmra.mxu1 %v9866_v18 }
 0x251   : > { %v3236_v57 = vmax.f32 %v9921_v22, %v10019_v15  ;;  %v3238_v59 = vmax.f32 %v9975_v55, %v10021_v16  ;;  %5033 = vmatpush1.bf16.msra.mxu0 %v8906_v34  ;;  %5074 = vmatpush1.bf16.msra.mxu1 %v8909_v48  ;;  %v8969_v15 = vld [vmem:[%s9182_s17 + $0xfb0] ss:$20 sps:$4 sm:$0xff]  }
 0x252   : > { %v10031_v23 = vpop.f32.mrf.mxu0  ;;  %v8058_v25 = vpop.f32.mrf.mxu1  ;;  %5034 = vmatprep.subr.bf16.mxu0 %v8914_v27  ;;  %5075 = vmatprep.subr.bf16.mxu1 %v8917_v49  ;;  %v8968_v27 = vld [vmem:[%s9182_s17 + $0x10e4] ss:$20 sps:$4 sm:$0xff]   ;;  %v8966_v49 = vld [vmem:[%s9182_s17 + $0x10e0] ss:$20 sps:$4 sm:$0xff]  }
 0x253   : > { %v3237_v31 = vmax.f32 %v9935_v20, %v10031_v23  ;;  %5064 = vmatprep.mubr.bf16.mxu0 %v9142_v0  ;;  %5105 = vmatprep.mubr.bf16.mxu1 %v9142_v0  ;;  %v8976_v23 = vld [vmem:[%s9182_s17 + $0x1094] ss:$20 sps:$4 sm:$0xff]   ;;  %v8974_v25 = vld [vmem:[%s9182_s17 + $0x1090] ss:$20 sps:$4 sm:$0xff]  }
 0x254   : > { %v3191_v32 = vpop.f32.mrf.mxu0  ;;  %v3231_v33 = vpop.f32.mrf.mxu1 }
 0x255   : > { %5035 = vmatpush1.bf16.msra.mxu0 %v8912_v54  ;;  %5076 = vmatpush1.bf16.msra.mxu1 %v8915_v56  ;;  %v8970_v54 = vld [vmem:[%s9182_s17 + $0x10b8] ss:$20 sps:$4 sm:$0xff]   ;;  %v8973_v56 = vld [vmem:[%s9182_s17 + $0xf88] ss:$20 sps:$4 sm:$0xff]  }
 0x256   : > { %v3192_v36 = vpop.f32.mrf.mxu0  ;;  %v8059_v38 = vpop.f32.mrf.mxu1  ;;  %5036 = vmatprep.subr.bf16.mxu0 %v8920_v26  ;;  %5077 = vmatprep.subr.bf16.mxu1 %v8923_v29  ;;  %v8977_v26 = vld [vmem:[%s9182_s17 + $0xf60] ss:$20 sps:$4 sm:$0xff]   ;;  %v8981_v32 = vld [vmem:[%s9182_s17 + $0xf38] ss:$20 sps:$4 sm:$0xff]  }
 0x257   : > { %v8980_v29 = vld [vmem:[%s9182_s17 + $0x106c] ss:$20 sps:$4 sm:$0xff]   ;;  %v8984_v33 = vld [vmem:[%s9182_s17 + $0x1044] ss:$20 sps:$4 sm:$0xff]  }
 0x258   : > { %v8988_v36 = vld [vmem:[%s9182_s17 + $0x1164] ss:$20 sps:$4 sm:$0xff]   ;;  %v8986_v38 = vld [vmem:[%s9182_s17 + $0x1160] ss:$20 sps:$4 sm:$0xff]  }
 0x259   : > { %5037 = vmatpush1.bf16.msra.mxu0 %v8918_v46  ;;  %5078 = vmatpush1.bf16.msra.mxu1 %v8921_v35  ;;  %v8982_v46 = vld [vmem:[%s9182_s17 + $0x1040] ss:$20 sps:$4 sm:$0xff]   ;;  %v8985_v35 = vld [vmem:[%s9182_s17 + $0xf10] ss:$20 sps:$4 sm:$0xff]  }
 0x25a   : > { %5038 = vmatprep.subr.bf16.mxu0 %v8926_v39  ;;  %5079 = vmatprep.subr.bf16.mxu1 %v8929_v40  ;;  %v8989_v39 = vld [vmem:[%s9182_s17 + $0x1168] ss:$20 sps:$4 sm:$0xff]  }
 0x25b   : > { %v8992_v40 = vld [vmem:[%s9182_s17 + $0x113c] ss:$20 sps:$4 sm:$0xff]  }
 0x25d   : > { %5039 = vmatpush1.bf16.msra.mxu0 %v8924_v41  ;;  %5080 = vmatpush1.bf16.msra.mxu1 %v8927_v42 }
 0x25e   : > { %5040 = vmatprep.subr.bf16.mxu0 %v8932_v50  ;;  %5081 = vmatprep.subr.bf16.mxu1 %v8935_v13 }
 0x261   : > { %5041 = vmatpush1.bf16.msra.mxu0 %v8930_v24  ;;  %5082 = vmatpush1.bf16.msra.mxu1 %v8933_v30  ;;  %v8990_v24 = vld [vmem:[%s9182_s17 + $0x1138] ss:$20 sps:$4 sm:$0xff]   ;;  %v8993_v30 = vld [vmem:[%s9182_s17 + $0x1140] ss:$20 sps:$4 sm:$0xff]  }
 0x262   : > { %5042 = vmatprep.subr.bf16.mxu0 %v8938_v17  ;;  %5083 = vmatprep.subr.bf16.mxu1 %v8941_v19 }
 0x265   : > { %5043 = vmatpush1.bf16.msra.mxu0 %v8936_v60  ;;  %5084 = vmatpush1.bf16.msra.mxu1 %v8939_v61  ;;  %v8996_v60 = vld [vmem:[%s9182_s17 + $0x1114] ss:$20 sps:$4 sm:$0xff]   ;;  %v8994_v61 = vld [vmem:[%s9182_s17 + $0x1110] ss:$20 sps:$4 sm:$0xff]  }
 0x266   : > { %5044 = vmatprep.subr.bf16.mxu0 %v8944_v62  ;;  %5085 = vmatprep.subr.bf16.mxu1 %v8947_v63  ;;  %v8997_v62 = vld [vmem:[%s9182_s17 + $0x1118] ss:$20 sps:$4 sm:$0xff]  }
 0x269   : > { %5045 = vmatpush1.bf16.msra.mxu0 %v8942_v1  ;;  %5086 = vmatpush1.bf16.msra.mxu1 %v8945_v2  ;;  %v9000_v2 = vld [vmem:[%s9182_s17 + $0x10ec] ss:$20 sps:$4 sm:$0xff]  }
 0x26a   : > { %5046 = vmatprep.subr.bf16.mxu0 %v8950_v3  ;;  %5087 = vmatprep.subr.bf16.mxu1 %v8953_v4  ;;  %v8998_v3 = vld [vmem:[%s9182_s17 + $0x10e8] ss:$20 sps:$4 sm:$0xff]   ;;  %v9001_v4 = vld [vmem:[%s9182_s17 + $0x10f0] ss:$20 sps:$4 sm:$0xff]  }
 0x26d   : > { %5047 = vmatpush1.bf16.msra.mxu0 %v8948_v5  ;;  %5088 = vmatpush1.bf16.msra.mxu1 %v8951_v6  ;;  %v9004_v5 = vld [vmem:[%s9182_s17 + $0x10c4] ss:$20 sps:$4 sm:$0xff]   ;;  %v9002_v6 = vld [vmem:[%s9182_s17 + $0x10c0] ss:$20 sps:$4 sm:$0xff]  }
 0x26e   : > { %8140 = vmatprep.subr.bf16.mxu0 %v9143_v37  ;;  %5416 = vmatprep.subr.bf16.mxu1 %v8956_v7  ;;  %v9005_v7 = vld [vmem:[%s9182_s17 + $0x10c8] ss:$20 sps:$4 sm:$0xff]  }
 0x270   : > { %v3530_v11 = vpop.f32.mrf.mxu0  ;;  %v3571_v51 = vpop.f32.mrf.mxu1  ;;  %5065 = vmatmul.mubr.bf16.vlgmr.msra.gmra.mxu0 %v9866_v18  ;;  %5106 = vmatmul.mubr.bf16.vlgmr.msra.gmra.mxu1 %v9866_v18 }
 0x271   : > { %v10071_v52 = vmax.f32 %v3234_v58, %v3530_v11  ;;  %v10076_v14 = vmax.f32 %v3236_v57, %v3571_v51  ;;  %8141 = vmatpush3.bf16.msra.mxu0 %v8957_v9  ;;  %5417 = vmatpush1.bf16.msra.mxu1 %v8954_v8  ;;  %v8972_v57 = vld [vmem:[%s9182_s17 + $0x10bc] ss:$20 sps:$4 sm:$0xff]   ;;  %v9006_v9 = vld [vmem:[%s9182_s17 + $0x1098] ss:$20 sps:$4 sm:$0xff]   ;;  %v9012_v11 = vld [vmem:[%s9182_s17 + $0x1074] ss:$20 sps:$4 sm:$0xff]  }
 0x272   : > { %v3532_v47 = vpop.f32.mrf.mxu0  ;;  %v3573_v34 = vpop.f32.mrf.mxu1  ;;  %8142 = vmatprep.subr.bf16.mxu0 %v9143_v37  ;;  %5418 = vmatprep.subr.bf16.mxu1 %v8960_v10  ;;  %v9008_v8 = vld [vmem:[%s9182_s17 + $0x109c] ss:$20 sps:$4 sm:$0xff]   ;;  %v9009_v10 = vld [vmem:[%s9182_s17 + $0x10a0] ss:$20 sps:$4 sm:$0xff]  }
 0x273   : > { %v10085_v43 = vmax.f32 %v3235_v45, %v3532_v47  ;;  %v10090_v22 = vmax.f32 %v3237_v31, %v3573_v34  ;;  %8156 = vmatprep.mubr.msk.bf16.mxu0 %vm9144_vm0, %v9143_v37  ;;  %5448 = vmatprep.mubr.bf16.mxu1 %v9142_v0  ;;  %v8978_v31 = vld [vmem:[%s9182_s17 + $0x1068] ss:$20 sps:$4 sm:$0xff]   ;;  %v9010_v51 = vld [vmem:[%s9182_s17 + $0x1070] ss:$20 sps:$4 sm:$0xff]  }
 0x274   : > { %v3534_v58 = vpop.f32.mrf.mxu0  ;;  %v3575_v48 = vpop.f32.mrf.mxu1  ;;  %v9014_v47 = vld [vmem:[%s9182_s17 + $0x1048] ss:$20 sps:$4 sm:$0xff]   ;;  %v9017_v34 = vld [vmem:[%s9182_s17 + $0x1050] ss:$20 sps:$4 sm:$0xff]  }
 0x275   : > { %8143 = vmatpush3.bf16.msra.mxu0 %v8961_v12  ;;  %5419 = vmatpush1.bf16.msra.mxu1 %v8958_v53  ;;  %v9013_v53 = vld [vmem:[%s9182_s17 + $0x1078] ss:$20 sps:$4 sm:$0xff]  }
 0x276   : > { %v3535_v45 = vpop.f32.mrf.mxu0  ;;  %v3576_v20 = vpop.f32.mrf.mxu1  ;;  %8144 = vmatprep.subr.bf16.mxu0 %v9143_v37  ;;  %5420 = vmatprep.subr.bf16.mxu1 %v8964_v21  ;;  %v9016_v12 = vld [vmem:[%s9182_s17 + $0x104c] ss:$20 sps:$4 sm:$0xff]   ;;  %v9020_v21 = vld [vmem:[%s9182_s17 + $0x129c] ss:$20 sps:$4 sm:$0xff]   ;;  %v9023_v58 = vld [vmem:[%s9182_s17 + $0x12a4] ss:$20 sps:$4 sm:$0xff]  }
 0x277   : > { %v9018_v48 = vld [vmem:[%s9182_s17 + $0x1298] ss:$20 sps:$4 sm:$0xff]   ;;  %v9029_v45 = vld [vmem:[%s9182_s17 + $0x127c] ss:$20 sps:$4 sm:$0xff]  }
 0x279   : > { %8145 = vmatpush3.bf16.msra.mxu0 %v8965_v28  ;;  %5421 = vmatpush1.bf16.msra.mxu1 %v8962_v44  ;;  %v9021_v44 = vld [vmem:[%s9182_s17 + $0x12a0] ss:$20 sps:$4 sm:$0xff]  }
 0x27a   : > { %8146 = vmatprep.subr.bf16.mxu0 %v9143_v37  ;;  %5422 = vmatprep.subr.bf16.mxu1 %v8968_v27  ;;  %v9026_v28 = vld [vmem:[%s9182_s17 + $0x1274] ss:$20 sps:$4 sm:$0xff]  }
 0x27d   : > { %8147 = vmatpush3.bf16.msra.mxu0 %v8969_v15  ;;  %5423 = vmatpush1.bf16.msra.mxu1 %v8966_v49 }
 0x27e   : > { %8148 = vmatprep.subr.bf16.mxu0 %v9143_v37  ;;  %5424 = vmatprep.subr.bf16.mxu1 %v8972_v57  ;;  %v9024_v57 = vld [vmem:[%s9182_s17 + $0x1270] ss:$20 sps:$4 sm:$0xff]  }
 0x281   : > { %8149 = vmatpush3.bf16.msra.mxu0 %v8973_v56  ;;  %5425 = vmatpush1.bf16.msra.mxu1 %v8970_v54  ;;  %v9027_v54 = vld [vmem:[%s9182_s17 + $0x1278] ss:$20 sps:$4 sm:$0xff]  }
 0x282   : > { %8150 = vmatprep.subr.bf16.mxu0 %v9143_v37  ;;  %5426 = vmatprep.subr.bf16.mxu1 %v8976_v23 }
 0x285   : > { %8151 = vmatpush3.bf16.msra.mxu0 %v8977_v26  ;;  %5427 = vmatpush1.bf16.msra.mxu1 %v8974_v25  ;;  %v9032_v25 = vld [vmem:[%s9182_s17 + $0x124c] ss:$20 sps:$4 sm:$0xff]  }
 0x286   : > { %8152 = vmatprep.subr.bf16.mxu0 %v9143_v37  ;;  %5428 = vmatprep.subr.bf16.mxu1 %v8980_v29 }
 0x289   : > { %8153 = vmatpush3.bf16.msra.mxu0 %v8981_v32  ;;  %5429 = vmatpush1.bf16.msra.mxu1 %v8978_v31  ;;  %v9030_v32 = vld [vmem:[%s9182_s17 + $0x1248] ss:$20 sps:$4 sm:$0xff]  }
 0x28a   : > { %8154 = vmatprep.subr.bf16.mxu0 %v9143_v37  ;;  %5430 = vmatprep.subr.bf16.mxu1 %v8984_v33  ;;  %v9033_v33 = vld [vmem:[%s9182_s17 + $0x1250] ss:$20 sps:$4 sm:$0xff]  }
 0x28d   : > { %8155 = vmatpush3.bf16.msra.mxu0 %v8985_v35  ;;  %5431 = vmatpush1.bf16.msra.mxu1 %v8982_v46 }
 0x28e   : > { %5457 = vmatprep.subr.bf16.mxu0 %v8988_v36  ;;  %8160 = vmatprep.subr.bf16.mxu1 %v9143_v37  ;;  %v9038_v36 = vld [vmem:[%s9182_s17 + $0x1224] ss:$20 sps:$4 sm:$0xff]  }
 0x290   : > { %v3612_v41 = vpop.f32.mrf.mxu0  ;;  %v10123_v42 = vpop.f32.mrf.mxu1  ;;  %8157 = vmatmul.mubr.bf16.vlgmr.msra.gmra.mxu0 %v9866_v18  ;;  %5449 = vmatmul.mubr.bf16.vlgmr.msra.gmra.mxu1 %v9866_v18 }
 0x291   : > { %v10130_v50 = vmax.f32 %v3238_v59, %v3612_v41  ;;  %v4002_v13 = vmax.f32 %v10071_v52, %v10123_v42  ;;  %5458 = vmatpush1.bf16.msra.mxu0 %v8986_v38  ;;  %8161 = vmatpush3.bf16.msra.mxu1 %v8989_v39  ;;  %v9041_v38 = vld [vmem:[%s9182_s17 + $0x122c] ss:$20 sps:$4 sm:$0xff]   ;;  %v9039_v41 = vld [vmem:[%s9182_s17 + $0x1228] ss:$20 sps:$4 sm:$0xff]  }
 0x292   : > { %v8078_v17 = vpop.f32.mrf.mxu0  ;;  %v10136_v19 = vpop.f32.mrf.mxu1  ;;  %5459 = vmatprep.subr.bf16.mxu0 %v8992_v40  ;;  %8162 = vmatprep.subr.bf16.mxu1 %v9143_v37  ;;  %v6311_v39 = vld [vmem:[%s10358_s2] sm:$0xff] }
 0x293   : > { %v4003_v55 = vmax.f32 %v10085_v43, %v10136_v19  ;;  %5489 = vmatprep.mubr.bf16.mxu0 %v9142_v0  ;;  %8176 = vmatprep.mubr.msk.bf16.mxu1 %vm9144_vm0, %v9143_v37  ;;  %v9036_v40 = vld [vmem:[%s9182_s17 + $0x1220] ss:$20 sps:$4 sm:$0xff]   ;;  %v9042_v17 = vld [vmem:[%s9182_s17 + $0x11f8] ss:$20 sps:$4 sm:$0xff]   ;;  %v9074_v43 = vld [vmem:[%s9182_s17 + $0x1388] ss:$20 sps:$4 sm:$0xff]  }
 0x294   : > { %v3615_v16 = vpop.f32.mrf.mxu0  ;;  %v3918_v59 = vpop.f32.mrf.mxu1  ;;  %6314 = vperm.xlu0 %8233, %v6311_v39   ;;  %v9076_v52 = vld [vmem:[%s9182_s17 + $0x138c] ss:$20 sps:$4 sm:$0xff]   ;;  %v9104_v39 = vld [vmem:[%s9182_s17 + $0x13bc] ss:$20 sps:$4 sm:$0xff]  }
 0x295   : > { %5460 = vmatpush1.bf16.msra.mxu0 %v8990_v24  ;;  %8163 = vmatpush3.bf16.msra.mxu1 %v8993_v30  ;;  %v9044_v24 = vld [vmem:[%s9182_s17 + $0x11fc] ss:$20 sps:$4 sm:$0xff]   ;;  %v9047_v30 = vld [vmem:[%s9182_s17 + $0x1204] ss:$20 sps:$4 sm:$0xff]   ;;  %v9050_v16 = vld [vmem:[%s9182_s17 + $0x11d4] ss:$20 sps:$4 sm:$0xff]  }
 0x296   : > { %v8079_v63 = vpop.f32.mrf.mxu0  ;;  %v3919_v1 = vpop.f32.mrf.mxu1  ;;  %5461 = vmatprep.subr.bf16.mxu0 %v8996_v60  ;;  %8164 = vmatprep.subr.bf16.mxu1 %v9143_v37  ;;  %v9045_v60 = vld [vmem:[%s9182_s17 + $0x1200] ss:$20 sps:$4 sm:$0xff]   ;;  %v9053_v59 = vld [vmem:[%s9182_s17 + $0x11dc] ss:$20 sps:$4 sm:$0xff]   ;;  %v9077_v19 = vld [vmem:[%s9182_s17 + $0x1258] ss:$20 sps:$4 sm:$0xff]  }
 0x297   : > { %v9056_v63 = vld [vmem:[%s9182_s17 + $0x11ac] ss:$20 sps:$4 sm:$0xff]   ;;  %v9059_v1 = vld [vmem:[%s9182_s17 + $0x11b4] ss:$20 sps:$4 sm:$0xff]  }
 0x299   : > { %5462 = vmatpush1.bf16.msra.mxu0 %v8994_v61  ;;  %8165 = vmatpush3.bf16.msra.mxu1 %v8997_v62  ;;  %v9048_v61 = vld [vmem:[%s9182_s17 + $0x11d0] ss:$20 sps:$4 sm:$0xff]   ;;  %v9051_v62 = vld [vmem:[%s9182_s17 + $0x11d8] ss:$20 sps:$4 sm:$0xff]  }
 0x29a   : > { %5463 = vmatprep.subr.bf16.mxu0 %v9000_v2  ;;  %8166 = vmatprep.subr.bf16.mxu1 %v9143_v37  ;;  %v9054_v2 = vld [vmem:[%s9182_s17 + $0x11a8] ss:$20 sps:$4 sm:$0xff]  }
 0x29d   : > { %5464 = vmatpush1.bf16.msra.mxu0 %v8998_v3  ;;  %8167 = vmatpush3.bf16.msra.mxu1 %v9001_v4  ;;  %v9057_v3 = vld [vmem:[%s9182_s17 + $0x11b0] ss:$20 sps:$4 sm:$0xff]  }
 0x29e   : > { %5465 = vmatprep.subr.bf16.mxu0 %v9004_v5  ;;  %8168 = vmatprep.subr.bf16.mxu1 %v9143_v37  ;;  %v9062_v4 = vld [vmem:[%s9182_s17 + $0x1184] ss:$20 sps:$4 sm:$0xff]   ;;  %v9065_v5 = vld [vmem:[%s9182_s17 + $0x118c] ss:$20 sps:$4 sm:$0xff]  }
 0x2a1   : > { %5466 = vmatpush1.bf16.msra.mxu0 %v9002_v6  ;;  %8169 = vmatpush3.bf16.msra.mxu1 %v9005_v7  ;;  %v9060_v6 = vld [vmem:[%s9182_s17 + $0x1180] ss:$20 sps:$4 sm:$0xff]   ;;  %v9063_v7 = vld [vmem:[%s9182_s17 + $0x1188] ss:$20 sps:$4 sm:$0xff]  }
 0x2a2   : > { %5467 = vmatprep.subr.bf16.mxu0 %v9008_v8  ;;  %8170 = vmatprep.subr.bf16.mxu1 %v9143_v37  ;;  %v9068_v8 = vld [vmem:[%s9182_s17 + $0x13dc] ss:$20 sps:$4 sm:$0xff]  }
 0x2a5   : > { %5468 = vmatpush1.bf16.msra.mxu0 %v9006_v9  ;;  %8171 = vmatpush3.bf16.msra.mxu1 %v9009_v10  ;;  %v9066_v9 = vld [vmem:[%s9182_s17 + $0x13d8] ss:$20 sps:$4 sm:$0xff]   ;;  %v9069_v10 = vld [vmem:[%s9182_s17 + $0x12a8] ss:$20 sps:$4 sm:$0xff]  }
 0x2a6   : > { %5469 = vmatprep.subr.bf16.mxu0 %v9012_v11  ;;  %8172 = vmatprep.subr.bf16.mxu1 %v9143_v37  ;;  %v9072_v11 = vld [vmem:[%s9182_s17 + $0x13b4] ss:$20 sps:$4 sm:$0xff]  }
 0x2a9   : > { %5470 = vmatpush1.bf16.msra.mxu0 %v9010_v51  ;;  %8173 = vmatpush3.bf16.msra.mxu1 %v9013_v53 }
 0x2aa   : > { %5471 = vmatprep.subr.bf16.mxu0 %v9016_v12  ;;  %8174 = vmatprep.subr.bf16.mxu1 %v9143_v37  ;;  %v10227_v12 = vld [vmem:[%s10357_s1] sm:$0xf] }
 0x2ad   : > { %5472 = vmatpush1.bf16.msra.mxu0 %v9014_v47  ;;  %8175 = vmatpush3.bf16.msra.mxu1 %v9017_v34 }
 0x2ae   : > { %5800 = vmatprep.subr.bf16.mxu0 %v9020_v21  ;;  %5841 = vmatprep.subr.bf16.mxu1 %v9023_v58  ;;  %v9070_v21 = vld [vmem:[%s9182_s17 + $0x13b0] ss:$20 sps:$4 sm:$0xff]   ;;  %v9073_v58 = vld [vmem:[%s9182_s17 + $0x1280] ss:$20 sps:$4 sm:$0xff]  }
 0x2b0   : > { %v10174_v20 = vpop.f32.mrf.mxu0  ;;  %v10176_v27 = vpop.f32.mrf.mxu1  ;;  %5490 = vmatmul.mubr.bf16.vlgmr.msra.gmra.mxu0 %v9866_v18  ;;  %8177 = vmatmul.mubr.bf16.vlgmr.msra.gmra.mxu1 %v9866_v18  ;;  %v9035_v18 = vld [vmem:[%s9182_s17 + $0x1254] ss:$20 sps:$4 sm:$0xff]  }
 0x2b1   : > { %v4004_v49 = vmax.f32 %v10076_v14, %v10174_v20  ;;  %v4006_v15 = vmax.f32 %v10130_v50, %v10176_v27  ;;  %5801 = vmatpush1.bf16.msra.mxu0 %v9018_v48  ;;  %5842 = vmatpush1.bf16.msra.mxu1 %v9021_v44  ;;  %v9078_v20 = vld [vmem:[%s9182_s17 + $0x1360] ss:$20 sps:$4 sm:$0xff]  }
 0x2b2   : > { %v10186_v56 = vpop.f32.mrf.mxu0  ;;  %v8098_v23 = vpop.f32.mrf.mxu1  ;;  %5802 = vmatprep.subr.bf16.mxu0 %v9026_v28  ;;  %5843 = vmatprep.subr.bf16.mxu1 %v9029_v45  ;;  %v9080_v45 = vld [vmem:[%s9182_s17 + $0x1364] ss:$20 sps:$4 sm:$0xff]  }
 0x2b3   : > { %v4005_v26 = vmax.f32 %v10090_v22, %v10186_v56  ;;  %5832 = vmatprep.mubr.bf16.mxu0 %v9142_v0  ;;  %5873 = vmatprep.mubr.bf16.mxu1 %v9142_v0  ;;  %v9085_v56 = vld [vmem:[%s9182_s17 + $0x1208] ss:$20 sps:$4 sm:$0xff]  }
 0x2b4   : > { %v3959_v29 = vpop.f32.mrf.mxu0  ;;  %v3999_v31 = vpop.f32.mrf.mxu1  ;;  %v9088_v23 = vld [vmem:[%s9182_s17 + $0x1314] ss:$20 sps:$4 sm:$0xff]  }
 0x2b5   : > { %5803 = vmatpush1.bf16.msra.mxu0 %v9024_v57  ;;  %5844 = vmatpush1.bf16.msra.mxu1 %v9027_v54  ;;  %v9084_v57 = vld [vmem:[%s9182_s17 + $0x133c] ss:$20 sps:$4 sm:$0xff]   ;;  %v9082_v54 = vld [vmem:[%s9182_s17 + $0x1338] ss:$20 sps:$4 sm:$0xff]  }
 0x2b6   : > { %v3960_v46 = vpop.f32.mrf.mxu0  ;;  %v8099_v35 = vpop.f32.mrf.mxu1  ;;  %5804 = vmatprep.subr.bf16.mxu0 %v9032_v25  ;;  %5845 = vmatprep.subr.bf16.mxu1 %v9035_v18  ;;  %v9086_v25 = vld [vmem:[%s9182_s17 + $0x1310] ss:$20 sps:$4 sm:$0xff]   ;;  %v9089_v18 = vld [vmem:[%s9182_s17 + $0x11e0] ss:$20 sps:$4 sm:$0xff]   ;;  %v9090_v29 = vld [vmem:[%s9182_s17 + $0x12e8] ss:$20 sps:$4 sm:$0xff]  }
 0x2b7   : > { %v9093_v31 = vld [vmem:[%s9182_s17 + $0x11b8] ss:$20 sps:$4 sm:$0xff]   ;;  %v9097_v46 = vld [vmem:[%s9182_s17 + $0x1190] ss:$20 sps:$4 sm:$0xff]  }
 0x2b8   : > { %v9100_v35 = vld [vmem:[%s9182_s17 + $0x13e4] ss:$20 sps:$4 sm:$0xff]  }
 0x2b9   : > { %5805 = vmatpush1.bf16.msra.mxu0 %v9030_v32  ;;  %5846 = vmatpush1.bf16.msra.mxu1 %v9033_v33  ;;  %v9096_v32 = vld [vmem:[%s9182_s17 + $0x12c4] ss:$20 sps:$4 sm:$0xff]   ;;  %v9094_v33 = vld [vmem:[%s9182_s17 + $0x12c0] ss:$20 sps:$4 sm:$0xff]  }
 0x2ba   : > { %5806 = vmatprep.subr.bf16.mxu0 %v9038_v36  ;;  %5847 = vmatprep.subr.bf16.mxu1 %v9041_v38  ;;  %v9098_v36 = vld [vmem:[%s9182_s17 + $0x13e0] ss:$20 sps:$4 sm:$0xff]   ;;  %v9101_v38 = vld [vmem:[%s9182_s17 + $0x13e8] ss:$20 sps:$4 sm:$0xff]  }
 0x2bd   : > { %5807 = vmatpush1.bf16.msra.mxu0 %v9036_v40  ;;  %5848 = vmatpush1.bf16.msra.mxu1 %v9039_v41 }
 0x2be   : > { %5808 = vmatprep.subr.bf16.mxu0 %v9044_v24  ;;  %5849 = vmatprep.subr.bf16.mxu1 %v9047_v30 }
 0x2c1   : > { %5809 = vmatpush1.bf16.msra.mxu0 %v9042_v17  ;;  %5850 = vmatpush1.bf16.msra.mxu1 %v9045_v60  ;;  %v9102_v17 = vld [vmem:[%s9182_s17 + $0x13b8] ss:$20 sps:$4 sm:$0xff]   ;;  %v9105_v60 = vld [vmem:[%s9182_s17 + $0x13c0] ss:$20 sps:$4 sm:$0xff]  }
 0x2c2   : > { %5810 = vmatprep.subr.bf16.mxu0 %v9050_v16  ;;  %5851 = vmatprep.subr.bf16.mxu1 %v9053_v59 }
 0x2c5   : > { %5811 = vmatpush1.bf16.msra.mxu0 %v9048_v61  ;;  %5852 = vmatpush1.bf16.msra.mxu1 %v9051_v62  ;;  %v9108_v61 = vld [vmem:[%s9182_s17 + $0x1394] ss:$20 sps:$4 sm:$0xff]   ;;  %v9106_v62 = vld [vmem:[%s9182_s17 + $0x1390] ss:$20 sps:$4 sm:$0xff]  }
 0x2c6   : > { %5812 = vmatprep.subr.bf16.mxu0 %v9056_v63  ;;  %5853 = vmatprep.subr.bf16.mxu1 %v9059_v1  ;;  %v9109_v63 = vld [vmem:[%s9182_s17 + $0x1398] ss:$20 sps:$4 sm:$0xff]  }
 0x2c9   : > { %5813 = vmatpush1.bf16.msra.mxu0 %v9054_v2  ;;  %5854 = vmatpush1.bf16.msra.mxu1 %v9057_v3  ;;  %v9110_v3 = vld [vmem:[%s9182_s17 + $0x1368] ss:$20 sps:$4 sm:$0xff]  }
 0x2ca   : > { %5814 = vmatprep.subr.bf16.mxu0 %v9062_v4  ;;  %5855 = vmatprep.subr.bf16.mxu1 %v9065_v5  ;;  %v9113_v4 = vld [vmem:[%s9182_s17 + $0x1370] ss:$20 sps:$4 sm:$0xff]  }
 0x2cb   : > { %v9116_v5 = vld [vmem:[%s9182_s17 + $0x1344] ss:$20 sps:$4 sm:$0xff]  }
 0x2cd   : > { %5815 = vmatpush1.bf16.msra.mxu0 %v9060_v6  ;;  %5856 = vmatpush1.bf16.msra.mxu1 %v9063_v7  ;;  %v9114_v6 = vld [vmem:[%s9182_s17 + $0x1340] ss:$20 sps:$4 sm:$0xff]   ;;  %v9117_v7 = vld [vmem:[%s9182_s17 + $0x1348] ss:$20 sps:$4 sm:$0xff]  }
 0x2ce   : > { %8180 = vmatprep.subr.bf16.mxu0 %v9143_v37  ;;  %6184 = vmatprep.subr.bf16.mxu1 %v9068_v8  ;;  %v9120_v8 = vld [vmem:[%s9182_s17 + $0x131c] ss:$20 sps:$4 sm:$0xff]  }
 0x2d0   : > { %v4298_v51 = vpop.f32.mrf.mxu0  ;;  %v4339_v53 = vpop.f32.mrf.mxu1  ;;  %5833 = vmatmul.mubr.bf16.vlgmr.msra.gmra.mxu0 %v10227_v12  ;;  %5874 = vmatmul.mubr.bf16.vlgmr.msra.gmra.mxu1 %v10227_v12 }
 0x2d1   : > { %v10234_v47 = vmax.f32 %v4002_v13, %v4298_v51  ;;  %v10239_v34 = vmax.f32 %v4004_v49, %v4339_v53  ;;  %8181 = vmatpush3.bf16.msra.mxu0 %v9069_v10  ;;  %6185 = vmatpush1.bf16.msra.mxu1 %v9066_v9  ;;  %v9081_v49 = vld [vmem:[%s9182_s17 + $0x1230] ss:$20 sps:$4 sm:$0xff]   ;;  %v9118_v9 = vld [vmem:[%s9182_s17 + $0x1318] ss:$20 sps:$4 sm:$0xff]   ;;  %v9121_v10 = vld [vmem:[%s9182_s17 + $0x1320] ss:$20 sps:$4 sm:$0xff]  }
 0x2d2   : > { %v4300_v48 = vpop.f32.mrf.mxu0  ;;  %v4341_v44 = vpop.f32.mrf.mxu1  ;;  %8182 = vmatprep.subr.bf16.mxu0 %v9143_v37  ;;  %6186 = vmatprep.subr.bf16.mxu1 %v9072_v11  ;;  %v9124_v11 = vld [vmem:[%s9182_s17 + $0x12f4] ss:$20 sps:$4 sm:$0xff]   ;;  %v9122_v51 = vld [vmem:[%s9182_s17 + $0x12f0] ss:$20 sps:$4 sm:$0xff]   ;;  %v9125_v53 = vld [vmem:[%s9182_s17 + $0x12f8] ss:$20 sps:$4 sm:$0xff]  }
 0x2d3   : > { %v10248_v42 = vmax.f32 %v4003_v55, %v4300_v48  ;;  %v10253_v14 = vmax.f32 %v4005_v26, %v4341_v44  ;;  %8196 = vmatprep.mubr.msk.bf16.mxu0 %vm9144_vm0, %v9143_v37  ;;  %6216 = vmatprep.mubr.bf16.mxu1 %v9142_v0  ;;  %v9092_v26 = vld [vmem:[%s9182_s17 + $0x12ec] ss:$20 sps:$4 sm:$0xff]   ;;  %v9129_v48 = vld [vmem:[%s9182_s17 + $0x12d0] ss:$20 sps:$4 sm:$0xff]  }
 0x2d4   : > { %v4302_v13 = vpop.f32.mrf.mxu0  ;;  %v4343_v28 = vpop.f32.mrf.mxu1 }
 0x2d5   : > { %8183 = vmatpush3.bf16.msra.mxu0 %v9073_v58  ;;  %6187 = vmatpush1.bf16.msra.mxu1 %v9070_v21  ;;  %v9128_v21 = vld [vmem:[%s9182_s17 + $0x12cc] ss:$20 sps:$4 sm:$0xff]   ;;  %v9126_v58 = vld [vmem:[%s9182_s17 + $0x12c8] ss:$20 sps:$4 sm:$0xff]  }
 0x2d6   : > { %v4303_v55 = vpop.f32.mrf.mxu0  ;;  %v4344_v22 = vpop.f32.mrf.mxu1  ;;  %8184 = vmatprep.subr.bf16.mxu0 %v9143_v37  ;;  %6188 = vmatprep.subr.bf16.mxu1 %v9076_v52 }
 0x2d9   : > { %8185 = vmatpush3.bf16.msra.mxu0 %v9077_v19  ;;  %6189 = vmatpush1.bf16.msra.mxu1 %v9074_v43 }
 0x2da   : > { %8186 = vmatprep.subr.bf16.mxu0 %v9143_v37  ;;  %6190 = vmatprep.subr.bf16.mxu1 %v9080_v45 }
 0x2dd   : > { %8187 = vmatpush3.bf16.msra.mxu0 %v9081_v49  ;;  %6191 = vmatpush1.bf16.msra.mxu1 %v9078_v20 }
 0x2de   : > { %8188 = vmatprep.subr.bf16.mxu0 %v9143_v37  ;;  %6192 = vmatprep.subr.bf16.mxu1 %v9084_v57 }
 0x2e1   : > { %8189 = vmatpush3.bf16.msra.mxu0 %v9085_v56  ;;  %6193 = vmatpush1.bf16.msra.mxu1 %v9082_v54 }
 0x2e2   : > { %8190 = vmatprep.subr.bf16.mxu0 %v9143_v37  ;;  %6194 = vmatprep.subr.bf16.mxu1 %v9088_v23 }
 0x2e5   : > { %8191 = vmatpush3.bf16.msra.mxu0 %v9089_v18  ;;  %6195 = vmatpush1.bf16.msra.mxu1 %v9086_v25 }
 0x2e6   : > { %8192 = vmatprep.subr.bf16.mxu0 %v9143_v37  ;;  %6196 = vmatprep.subr.bf16.mxu1 %v9092_v26 }
 0x2e9   : > { %8193 = vmatpush3.bf16.msra.mxu0 %v9093_v31  ;;  %6197 = vmatpush1.bf16.msra.mxu1 %v9090_v29 }
 0x2ea   : > { %8194 = vmatprep.subr.bf16.mxu0 %v9143_v37  ;;  %6198 = vmatprep.subr.bf16.mxu1 %v9096_v32 }
 0x2ed   : > { %8195 = vmatpush3.bf16.msra.mxu0 %v9097_v46  ;;  %6199 = vmatpush1.bf16.msra.mxu1 %v9094_v33 }
 0x2ee   : > { %6225 = vmatprep.subr.bf16.mxu0 %v9100_v35  ;;  %8200 = vmatprep.subr.bf16.mxu1 %v9143_v37 }
 0x2f0   : > { %v4380_v40 = vpop.f32.mrf.mxu0  ;;  %v10286_v41 = vpop.f32.mrf.mxu1  ;;  %8197 = vmatmul.mubr.bf16.vlgmr.msra.gmra.mxu0 %v10227_v12  ;;  %6217 = vmatmul.mubr.bf16.vlgmr.msra.gmra.mxu1 %v10227_v12 }
 0x2f1   : > { %v10293_v24 = vmax.f32 %v4006_v15, %v4380_v40  ;;  %v4770_v30 = vmax.f32 %v10234_v47, %v10286_v41  ;;  %6226 = vmatpush1.bf16.msra.mxu0 %v9098_v36  ;;  %8201 = vmatpush3.bf16.msra.mxu1 %v9101_v38 }
 0x2f2   : > { %v8118_v16 = vpop.f32.mrf.mxu0  ;;  %v10299_v59 = vpop.f32.mrf.mxu1  ;;  %6227 = vmatprep.subr.bf16.mxu0 %v9104_v39  ;;  %8202 = vmatprep.subr.bf16.mxu1 %v9143_v37 }
 0x2f3   : > { %v4771_v50 = vmax.f32 %v10248_v42, %v10299_v59  ;;  %6257 = vmatprep.mubr.bf16.mxu0 %v9142_v0  ;;  %8216 = vmatprep.mubr.msk.bf16.mxu1 %vm9144_vm0, %v9143_v37  ;;  %v9112_v0 = vld [vmem:[%s9182_s17 + $0x136c] ss:$20 sps:$4 sm:$0xff]  }
 0x2f4   : > { %v4383_v27 = vpop.f32.mrf.mxu0  ;;  %v4686_v15 = vpop.f32.mrf.mxu1 }
 0x2f5   : > { %6228 = vmatpush1.bf16.msra.mxu0 %v9102_v17  ;;  %8203 = vmatpush3.bf16.msra.mxu1 %v9105_v60 }
 0x2f6   : > { %v8119_v1 = vpop.f32.mrf.mxu0  ;;  %v4687_v2 = vpop.f32.mrf.mxu1  ;;  %6229 = vmatprep.subr.bf16.mxu0 %v9108_v61  ;;  %8204 = vmatprep.subr.bf16.mxu1 %v9143_v37 }
 0x2f9   : > { %6230 = vmatpush1.bf16.msra.mxu0 %v9106_v62  ;;  %8205 = vmatpush3.bf16.msra.mxu1 %v9109_v63 }
 0x2fa   : > { %6231 = vmatprep.subr.bf16.mxu0 %v9112_v0  ;;  %8206 = vmatprep.subr.bf16.mxu1 %v9143_v37 }
 0x2fd   : > { %6232 = vmatpush1.bf16.msra.mxu0 %v9110_v3  ;;  %8207 = vmatpush3.bf16.msra.mxu1 %v9113_v4 }
 0x2fe   : > { %6233 = vmatprep.subr.bf16.mxu0 %v9116_v5  ;;  %8208 = vmatprep.subr.bf16.mxu1 %v9143_v37 }
 0x301   : > { %6234 = vmatpush1.bf16.msra.mxu0 %v9114_v6  ;;  %8209 = vmatpush3.bf16.msra.mxu1 %v9117_v7 }
 0x302   : > { %6235 = vmatprep.subr.bf16.mxu0 %v9120_v8  ;;  %8210 = vmatprep.subr.bf16.mxu1 %v9143_v37 }
 0x305   : > { %6236 = vmatpush1.bf16.msra.mxu0 %v9118_v9  ;;  %8211 = vmatpush3.bf16.msra.mxu1 %v9121_v10 }
 0x306   : > { %6237 = vmatprep.subr.bf16.mxu0 %v9124_v11  ;;  %8212 = vmatprep.subr.bf16.mxu1 %v9143_v37 }
 0x309   : > { %6238 = vmatpush1.bf16.msra.mxu0 %v9122_v51  ;;  %8213 = vmatpush3.bf16.msra.mxu1 %v9125_v53 }
 0x30a   : > { %6239 = vmatprep.subr.bf16.mxu0 %v9128_v21  ;;  %8214 = vmatprep.subr.bf16.mxu1 %v9143_v37 }
 0x30d   : > { %6240 = vmatpush1.bf16.msra.mxu0 %v9126_v58  ;;  %8215 = vmatpush3.bf16.msra.mxu1 %v9129_v48 }
 0x30f   : > { %v6315_v7 = vpop.permute.xlu0 %6314 }
 0x310   : > { %v4723_v44 = vpop.f32.mrf.mxu0  ;;  %v4764_v52 = vpop.f32.mrf.mxu1  ;;  %6258 = vmatmul.mubr.bf16.vlgmr.msra.gmra.mxu0 %v10227_v12  ;;  %8217 = vmatmul.mubr.bf16.vlgmr.msra.gmra.mxu1 %v10227_v12 }
 0x311   : > { %v4772_v13 = vmax.f32 %v10239_v34, %v4723_v44  ;;  %v4774_v28 = vmax.f32 %v10293_v24, %v4764_v52 }
 0x312   : > { %v4725_v43 = vpop.f32.mrf.mxu0  ;;  %v8138_v19 = vpop.f32.mrf.mxu1 }
 0x313   : > { %v4773_v55 = vmax.f32 %v10253_v14, %v4725_v43 }
 0x314   : > { %v4727_v22 = vpop.f32.mrf.mxu0  ;;  %v4767_v45 = vpop.f32.mrf.mxu1 }
 0x316   : > { %v4728_v20 = vpop.f32.mrf.mxu0  ;;  %v8139_v37 = vpop.f32.mrf.mxu1 }
 0x330   : > { %v5066_v49 = vpop.f32.mrf.mxu0  ;;  %v5107_v57 = vpop.f32.mrf.mxu1 }
 0x331   : > { %v5154_v54 = vmax.f32 %v4770_v30, %v5066_v49  ;;  %v5156_v56 = vmax.f32 %v4772_v13, %v5107_v57 }
 0x332   : > { %v5068_v12 = vpop.f32.mrf.mxu0  ;;  %v5109_v23 = vpop.f32.mrf.mxu1 }
 0x333   : > { %v5155_v34 = vmax.f32 %v4771_v50, %v5068_v12  ;;  %v5157_v25 = vmax.f32 %v4773_v55, %v5109_v23 }
 0x334   : > { %v5070_v18 = vpop.f32.mrf.mxu0  ;;  %v5111_v14 = vpop.f32.mrf.mxu1 }
 0x336   : > { %v5071_v26 = vpop.f32.mrf.mxu0  ;;  %v5112_v29 = vpop.f32.mrf.mxu1 }
 0x350   : > { %v5148_v31 = vpop.f32.mrf.mxu0  ;;  %v5450_v32 = vpop.f32.mrf.mxu1 }
 0x351   : > { %v5158_v33 = vmax.f32 %v4774_v28, %v5148_v31  ;;  %v5538_v46 = vmax.f32 %v5154_v54, %v5450_v32 }
 0x352   : > { %v8158_v35 = vpop.f32.mrf.mxu0  ;;  %v5452_v36 = vpop.f32.mrf.mxu1 }
 0x353   : > { %v5539_v47 = vmax.f32 %v5155_v34, %v5452_v36 }
 0x354   : > { %v5151_v38 = vpop.f32.mrf.mxu0  ;;  %v5454_v39 = vpop.f32.mrf.mxu1 }
 0x356   : > { %v8159_v40 = vpop.f32.mrf.mxu0  ;;  %v5455_v41 = vpop.f32.mrf.mxu1 }
 0x370   : > { %v5491_v24 = vpop.f32.mrf.mxu0  ;;  %v5532_v30 = vpop.f32.mrf.mxu1 }
 0x371   : > { %v5540_v42 = vmax.f32 %v5156_v56, %v5491_v24  ;;  %v5542_v17 = vmax.f32 %v5158_v33, %v5532_v30 }
 0x372   : > { %v5493_v60 = vpop.f32.mrf.mxu0  ;;  %v8178_v16 = vpop.f32.mrf.mxu1 }
 0x373   : > { %v5541_v59 = vmax.f32 %v5157_v25, %v5493_v60 }
 0x374   : > { %v5495_v61 = vpop.f32.mrf.mxu0  ;;  %v5535_v50 = vpop.f32.mrf.mxu1 }
 0x376   : > { %v5496_v27 = vpop.f32.mrf.mxu0  ;;  %v8179_v15 = vpop.f32.mrf.mxu1 }
 0x390   : > { %v5834_v62 = vpop.f32.mrf.mxu0  ;;  %v5875_v63 = vpop.f32.mrf.mxu1 }
 0x391   : > { %v5922_v6 = vmax.f32 %v5538_v46, %v5834_v62  ;;  %v5924_v55 = vmax.f32 %v5540_v42, %v5875_v63 }
 0x392   : > { %v5836_v1 = vpop.f32.mrf.mxu0  ;;  %v5877_v2 = vpop.f32.mrf.mxu1 }
 0x393   : > { %v5923_v10 = vmax.f32 %v5539_v47, %v5836_v1  ;;  %v5925_v37 = vmax.f32 %v5541_v59, %v5877_v2 }
 0x394   : > { %v5838_v0 = vpop.f32.mrf.mxu0  ;;  %v5879_v3 = vpop.f32.mrf.mxu1 }
 0x396   : > { %v5839_v4 = vpop.f32.mrf.mxu0  ;;  %v5880_v5 = vpop.f32.mrf.mxu1 }
 0x3b0   : > { %v5916_v8 = vpop.f32.mrf.mxu0  ;;  %v6218_v9 = vpop.f32.mrf.mxu1 }
 0x3b1   : > { %v6306_v11 = vmax.f32 %v5922_v6, %v6218_v9  ;;  %v5926_v22 = vmax.f32 %v5542_v17, %v5916_v8 }
 0x3b2   : > { %v8198_v51 = vpop.f32.mrf.mxu0  ;;  %v6220_v53 = vpop.f32.mrf.mxu1 }
 0x3b3   : > { %v6317_v21 = vadd.f32 %v6315_v7, %v6306_v11  ;;  %v6307_v58 = vmax.f32 %v5923_v10, %v6220_v53 }
 0x3b4   : > { %v5919_v48 = vpop.f32.mrf.mxu0  ;;  %v6222_v44 = vpop.f32.mrf.mxu1 }
 0x3b5   : > { %v6322_v52 = vmax.f32 %v6317_v21, 0.0  ;;  %v6318_v13 = vadd.f32 %v6315_v7, %v6307_v58 }
 0x3b6   : > { %v8199_v28 = vpop.f32.mrf.mxu0  ;;  %v6223_v43 = vpop.f32.mrf.mxu1 }
 0x3b7   : > { %6327 = vst [vmem:[%s10346_s6] sm:$0xff] %v6322_v52  ;;  %v6323_v19 = vmax.f32 %v6318_v13, 0.0 }
 0x3b9   : > { %6328 = vst [vmem:[%s10346_s6 + $0x8] sm:$0xff] %v6323_v19 }
 0x3d0   : > { %v6259_v45 = vpop.f32.mrf.mxu0  ;;  %v6300_v20 = vpop.f32.mrf.mxu1 }
 0x3d1   : > { %v6308_v49 = vmax.f32 %v5924_v55, %v6259_v45  ;;  %v6310_v57 = vmax.f32 %v5926_v22, %v6300_v20 }
 0x3d2   : > { %v6261_v54 = vpop.f32.mrf.mxu0  ;;  %v8218_v56 = vpop.f32.mrf.mxu1 }
 0x3d3   : > { %v6319_v12 = vadd.f32 %v6315_v7, %v6308_v49  ;;  %v6321_v23 = vadd.f32 %v6315_v7, %v6310_v57  ;;  %v6309_v34 = vmax.f32 %v5925_v37, %v6261_v54 }
 0x3d4   : > { %v6263_v25 = vpop.f32.mrf.mxu0  ;;  %v6303_v18 = vpop.f32.mrf.mxu1 }
 0x3d5   : > { %v6324_v14 = vmax.f32 %v6319_v12, 0.0  ;;  %v6326_v26 = vmax.f32 %v6321_v23, 0.0  ;;  %v6320_v29 = vadd.f32 %v6315_v7, %v6309_v34 }
 0x3d6   : > { %v6264_v31 = vpop.f32.mrf.mxu0  ;;  %v8219_v32 = vpop.f32.mrf.mxu1 }
 0x3d7   : > { %6329 = vst [vmem:[%s10346_s6 + $0x10] sm:$0xff] %v6324_v14  ;;  %6331 = vst [vmem:[%s10346_s6 + $0x20] sm:$0xff] %v6326_v26  ;;  %v6325_v33 = vmax.f32 %v6320_v29, 0.0 }
 0x3d9   : > { %6330 = vst [vmem:[%s10346_s6 + $0x18] sm:$0xff] %v6325_v33 }
 0x3da PF: > { %s13_s12 = sadd.s32 1, %s9140_s12  }
 0x3db   : > { %p10_p4 = scmp.ge.s32.totalorder %s13_s12, 4  }
 0x3dd   :  { %12 = sbr.rel (!%p10_p4) target bundleno = 1 (0x1), region = 77 }

// kernel: net_fighter_sq_forward.3
= control target key start
LH: loop header
LB: loop body
LE: loop exit
PB: predicated region body
PF: predicated region fallthrough
CT: control target
= control target key end

     0   :  { %vm1471_vm0 = vcmask 1042432   ;;  %vm1467_vm1 = vcmask 23552   ;;  %v8541_v0 = vmov 0.0   ;;  %vm8542_vm2 = vmmov 0   ;;  %s11500_s5 = inlined_call_operand.vmem [shape: f32[3,64], index: 5, kind: input, shape index: {}]   ;;  %s11501_s1 = inlined_call_operand.vmem [shape: f32[2,3], index: 1, kind: input, shape index: {}]   ;;  %s11502_s0 = inlined_call_operand.vmem [shape: f32[2,5000], index: 0, kind: input, shape index: {}]   ;;  %s11503_s9 = inlined_call_operand.vmem [shape: f32[8,128], index: 9, kind: input, shape index: {}]   ;;  %s11504_s2 = inlined_call_operand.vmem [shape: f32[2,8], index: 2, kind: input, shape index: {}]   ;;  %s11505_s6 = inlined_call_operand.vmem [shape: f32[1,64], index: 6, kind: input, shape index: {}]   ;;  %s11506_s13 = inlined_call_operand.vmem [shape: bf16[5000,256], index: 13, kind: input, shape index: {}]   ;;  %s11507_s10 = inlined_call_operand.vmem [shape: f32[1,128], index: 10, kind: input, shape index: {}]   ;;  %s11508_s3 = inlined_call_operand.vmem [shape: f32[1,5000], index: 3, kind: input, shape index: {}]   ;;  %s11509_s14 = inlined_call_operand.vmem [shape: bf16[64,256], index: 14, kind: input, shape index: {}]   ;;  %s11510_s4 = inlined_call_operand.vmem [shape: f32[1,5000], index: 4, kind: input, shape index: {}]   ;;  %s11511_s7 = inlined_call_operand.vmem [shape: f32[1,64], index: 7, kind: input, shape index: {}]   ;;  %s11512_s8 = inlined_call_operand.vmem [shape: f32[1,64], index: 8, kind: input, shape index: {}]   ;;  %s11513_s15 = inlined_call_operand.vmem [shape: bf16[128,256], index: 15, kind: input, shape index: {}]   ;;  %s11514_s11 = inlined_call_operand.vmem [shape: f32[1,128], index: 11, kind: input, shape index: {}]   ;;  %s11515_s12 = inlined_call_operand.vmem [shape: f32[1,128], index: 12, kind: input, shape index: {}]   ;;  %s11516_s16 = inlined_call_operand.vmem [shape: f32[1,256], index: 16, kind: input, shape index: {}]   ;;  %s11517_s20 = inlined_call_operand.<no memory space> [shape: f32[1,1], index: 20, kind: input, shape index: {}]   ;;  %s11518_s17 = inlined_call_operand.vmem [shape: f32[1,256], index: 17, kind: input, shape index: {}]   ;;  %s11519_s18 = inlined_call_operand.vmem [shape: f32[1,256], index: 18, kind: input, shape index: {}]   ;;  %s11520_s19 = inlined_call_operand.vmem [shape: f32[1,256], index: 19, kind: input, shape index: {}]   ;;  %s11521_s21 = inlined_call_operand.vmem [shape: f32[2,1], index: 21, kind: output, shape index: {}]  }
   0x1   :  { %11524 = sst [smem:[#allocation3_spill]] %s11500_s5  ;;  %7530 = vmatprep.subr.mxu0 %v8541_v0  ;;  %7532 = vmatprep.mubr.msk.f32.mxu0 %vm8542_vm2, %v8541_v0  ;;  %v105_v3 = vlaneseq  ;;  %v8543_v4 = vmov 1983009808   ;;  %vm311_vm3 = vcmask 1041408   ;;  %vm1586_vm4 = vcmask 64512  }
   0x2   :  { %11525 = sst [smem:[#allocation4_spill]] %s11501_s1  ;;  %v103_v5 = vunpack.c.l.s4 %v8543_v4  ;;  %vm389_vm5 = vcmask 58368   ;;  %vm1547_vm6 = vcmask 517120   ;;  %vm2625_vm7 = vcmask 523264  }
   0x3   :  { %11526 = sst [smem:[#allocation5_spill]] %s11502_s0  ;;  %v8662_v6 = vshrl.u32 %v105_v3, 7  ;;  %vm5798_vm8 = vcmask 1043456   ;;  %vm6857_vm9 = vcmask 1024  }
   0x4   :  { %11527 = sst [smem:[#allocation6_spill]] %s11503_s9  ;;  %v104_v7 = vunpack.c.0.s8 %v103_v5 }
   0x5   :  { %11528 = sst [smem:[#allocation7_spill]] %s11504_s2 }
   0x6   :  { %11529 = sst [smem:[#allocation8_spill]] %s11505_s6  ;;  %v8670_v9 = vsub.s32 %v104_v7, %v8662_v6 }
   0x7   :  { %s11530_s26 = sld [smem:[#allocation3_spill]] }
   0x8   :  { %s11531_s28 = sld [smem:[#allocation4_spill]] }
   0x9   :  { %s11532_s5 = sld [smem:[#allocation5_spill]] }
   0xa   :  { %s11533_s1 = sld [smem:[#allocation6_spill]] }
   0xb   :  { %s11534_s25 = sld [smem:[#allocation7_spill]] }
   0xd   :  { %v1459_v1 = vld [vmem:[%s11530_s26] sm:$0x7] }
   0xe   :  { %v1458_v2 = vld [vmem:[%s11531_s28] sm:$0x3]  ;;  %7531 = vmatpush3.msk.msra.mxu0 %vm1471_vm0, %v1459_v1  ;;  %s11535_s28 = sld [smem:[#allocation8_spill]] }
   0xf   :  { %7533 = vmatmul.mubr.msk.f32.vlgmr.msra.gmra.mxu0 %vm1467_vm1, %v1458_v2  ;;  %7535 = vmatprep.subr.mxu0 %v8541_v0  ;;  %v8667_v8 = vld [vmem:[%s11532_s5] sm:$0xff]  ;;  %v8680_v13 = vld [vmem:[%s11532_s5 + $0x8] sm:$0xff]  ;;  %v8694_v25 = vld [vmem:[%s11532_s5 + $0x10] sm:$0xff] }
  0x10   :  { %7537 = vmatprep.mubr.msk.f32.mxu0 %vm8542_vm2, %v8541_v0  ;;  %v101_v10 = vcombine.high %v8667_v8, %v8667_v8  ;;  %v108_v11 = vrot.slane %v8667_v8, %v8670_v9  ;;  %v118_v16 = vcombine.high %v8680_v13, %v8680_v13  ;;  %v125_v17 = vrot.slane %v8680_v13, %v8670_v9  ;;  %v8708_v39 = vld [vmem:[%s11532_s5 + $0x18] sm:$0xff]  ;;  %v8722_v53 = vld [vmem:[%s11532_s5 + $0x20] sm:$0xff]  ;;  %v8736_v3 = vld [vmem:[%s11532_s5 + $0x28] sm:$0xff] }
  0x11   :  { %v135_v30 = vcombine.high %v8694_v25, %v8694_v25  ;;  %v142_v31 = vrot.slane %v8694_v25, %v8670_v9  ;;  %v152_v44 = vcombine.high %v8708_v39, %v8708_v39  ;;  %v159_v45 = vrot.slane %v8708_v39, %v8670_v9 }
  0x12   :  { %v115_v12 = vrot.slane %v101_v10, %v8670_v9  ;;  %v116_v14 = vcombine.high %v108_v11, %v108_v11  ;;  %v312_v18 = vsel %vm311_vm3, %v108_v11, 0.0  ;;  %v132_v22 = vrot.slane %v118_v16, %v8670_v9 }
  0x13   :  { %v133_v23 = vcombine.high %v125_v17, %v125_v17  ;;  %v319_v27 = vsel %vm311_vm3, %v125_v17, 0.0  ;;  %v149_v36 = vrot.slane %v135_v30, %v8670_v9  ;;  %v150_v37 = vcombine.high %v142_v31, %v142_v31 }
  0x14   :  { %v117_v15 = vcombine.high %v115_v12, %v115_v12  ;;  %v313_v19 = vsel %vm311_vm3, %v116_v14, 0.0  ;;  %v315_v20 = vsel %vm311_vm3, %v115_v12, 0.0  ;;  %v134_v29 = vcombine.high %v132_v22, %v132_v22 }
  0x15   :  { %v314_v21 = vadd.f32 %v313_v19, %v312_v18  ;;  %v321_v32 = vsel %vm311_vm3, %v133_v23, 0.0  ;;  %v323_v34 = vsel %vm311_vm3, %v132_v22, 0.0  ;;  %v327_v41 = vsel %vm311_vm3, %v142_v31, 0.0 }
  0x16   :  { %v317_v24 = vsel %vm311_vm3, %v117_v15, 0.0  ;;  %v325_v38 = vsel %vm311_vm3, %v134_v29, 0.0  ;;  %v151_v43 = vcombine.high %v149_v36, %v149_v36  ;;  %v329_v46 = vsel %vm311_vm3, %v150_v37, 0.0 }
  0x17   :  { %v316_v26 = vadd.f32 %v315_v20, %v314_v21  ;;  %v331_v48 = vsel %vm311_vm3, %v149_v36, 0.0  ;;  %v166_v50 = vrot.slane %v152_v44, %v8670_v9  ;;  %v167_v51 = vcombine.high %v159_v45, %v159_v45  ;;  %v8750_v21 = vld [vmem:[%s11532_s5 + $0x30] sm:$0xff]  ;;  %v8764_v36 = vld [vmem:[%s11532_s5 + $0x38] sm:$0xff] }
  0x18   :  { %v333_v52 = vsel %vm311_vm3, %v151_v43, 0.0  ;;  %v335_v55 = vsel %vm311_vm3, %v159_v45, 0.0  ;;  %v169_v58 = vcombine.high %v8722_v53, %v8722_v53  ;;  %v176_v59 = vrot.slane %v8722_v53, %v8670_v9 }
  0x19   :  { %v318_v28 = vadd.f32 %v317_v24, %v316_v26  ;;  %v168_v57 = vcombine.high %v166_v50, %v166_v50  ;;  %v337_v60 = vsel %vm311_vm3, %v167_v51, 0.0  ;;  %v339_v62 = vsel %vm311_vm3, %v166_v50, 0.0  ;;  %v8778_v51 = vld [vmem:[%s11532_s5 + $0x40] sm:$0xff] }
  0x1a   :  { %v183_v0 = vrot.slane %v169_v58, %v8670_v9  ;;  %v184_v1 = vcombine.high %v176_v59, %v176_v59  ;;  %v343_v5 = vsel %vm311_vm3, %v176_v59, 0.0  ;;  %v186_v11 = vcombine.high %v8736_v3, %v8736_v3 }
  0x1b   :  { %v320_v33 = vadd.f32 %v319_v27, %v318_v28  ;;  %v341_v2 = vsel %vm311_vm3, %v168_v57, 0.0  ;;  %v193_v12 = vrot.slane %v8736_v3, %v8670_v9  ;;  %v203_v27 = vcombine.high %v8750_v21, %v8750_v21  ;;  %v1577_v57 = vld [vmem:[%s11534_s25] sm:$0x3] }
  0x1c   :  { %v185_v10 = vcombine.high %v183_v0, %v183_v0  ;;  %v345_v14 = vsel %vm311_vm3, %v184_v1, 0.0  ;;  %v347_v16 = vsel %vm311_vm3, %v183_v0, 0.0  ;;  %v200_v18 = vrot.slane %v186_v11, %v8670_v9 }
  0x1d   :  { %v322_v35 = vadd.f32 %v321_v32, %v320_v33  ;;  %v201_v19 = vcombine.high %v193_v12, %v193_v12  ;;  %v351_v23 = vsel %vm311_vm3, %v193_v12, 0.0  ;;  %v210_v28 = vrot.slane %v8750_v21, %v8670_v9 }
  0x1e   :  { %v349_v20 = vsel %vm311_vm3, %v185_v10, 0.0  ;;  %v202_v26 = vcombine.high %v200_v18, %v200_v18  ;;  %v355_v31 = vsel %vm311_vm3, %v200_v18, 0.0  ;;  %v217_v33 = vrot.slane %v203_v27, %v8670_v9 }
  0x1f   :  { %v324_v40 = vadd.f32 %v323_v34, %v322_v35  ;;  %v353_v29 = vsel %vm311_vm3, %v201_v19, 0.0  ;;  %v218_v34 = vcombine.high %v210_v28, %v210_v28  ;;  %v227_v43 = vrot.slane %v8764_v36, %v8670_v9 }
  0x20   :  { %v357_v35 = vsel %vm311_vm3, %v202_v26, 0.0  ;;  %v237_v59 = vcombine.high %v8778_v51, %v8778_v51 }
  0x21   :  { %v326_v42 = vadd.f32 %v325_v38, %v324_v40  ;;  %v359_v38 = vsel %vm311_vm3, %v210_v28, 0.0  ;;  %v361_v44 = vsel %vm311_vm3, %v218_v34, 0.0 }
  0x22   :  { %v251_v1 = vrot.slane %v237_v59, %v8670_v9  ;;  %v7567_v59 = vld [vmem:[%s11506_s13 + $0x130] ss:$8 sps:$4 sm:$0xff]  }
  0x23   :  { %v328_v47 = vadd.f32 %v327_v41, %v326_v42  ;;  %v219_v41 = vcombine.high %v217_v33, %v217_v33  ;;  %v220_v42 = vcombine.high %v8764_v36, %v8764_v36 }
  0x24   :  { %v253_v12 = vcombine.high %v251_v1, %v251_v1  ;;  %v379_v18 = vsel %vm311_vm3, %v251_v1, 0.0 }
  0x25   :  { %v330_v49 = vadd.f32 %v329_v46, %v328_v47  ;;  %v363_v46 = vsel %vm311_vm3, %v217_v33, 0.0  ;;  %v365_v50 = vsel %vm311_vm3, %v219_v41, 0.0 }
  0x27   :  { %v332_v54 = vadd.f32 %v331_v48, %v330_v49  ;;  %v234_v48 = vrot.slane %v220_v42, %v8670_v9  ;;  %v235_v49 = vcombine.high %v227_v43, %v227_v43 }
  0x29   :  { %v334_v56 = vadd.f32 %v333_v52, %v332_v54  ;;  %v367_v54 = vsel %vm311_vm3, %v227_v43, 0.0  ;;  %v236_v58 = vcombine.high %v234_v48, %v234_v48  ;;  %v7555_v43 = vld [vmem:[%s11506_s13 + $0x170] ss:$8 sps:$4 sm:$0xff]  }
  0x2b   :  { %v336_v61 = vadd.f32 %v335_v55, %v334_v56  ;;  %v1578_v56 = vld [vmem:[%s11533_s1] sm:$0xff] }
  0x2c   :  { %7536 = vmatpush3.msra.mxu0 %v1578_v56  ;;  %v7569_v56 = vld [vmem:[%s11506_s13 + $0x134] ss:$8 sps:$4 sm:$0xff]  }
  0x2d   :  { %v338_v63 = vadd.f32 %v337_v60, %v336_v61  ;;  %v244_v60 = vrot.slane %v8778_v51, %v8670_v9  ;;  %v369_v61 = vsel %vm311_vm3, %v235_v49, 0.0  ;;  %7538 = vmatmul.mubr.msk.f32.vlgmr.msra.gmra.mxu0 %vm1586_vm4, %v1577_v57  ;;  %v7563_v49 = vld [vmem:[%s11506_s13 + $0x154] ss:$8 sps:$4 sm:$0xff]  }
  0x2f   :  { %v340_v4 = vadd.f32 %v339_v62, %v338_v63  ;;  %v371_v63 = vsel %vm311_vm3, %v234_v48, 0.0  ;;  %v375_v10 = vsel %vm311_vm3, %v244_v60, 0.0 }
  0x31   :  { %v342_v7 = vadd.f32 %v341_v2, %v340_v4  ;;  %v252_v2 = vcombine.high %v244_v60, %v244_v60  ;;  %v373_v4 = vsel %vm311_vm3, %v236_v58, 0.0 }
  0x33   :  { %v344_v15 = vadd.f32 %v343_v5, %v342_v7  ;;  %v8799_v5 = vld [vmem:[%s11532_s5 + $0x48] sm:$0xff] }
  0x35   :  { %v346_v17 = vadd.f32 %v345_v14, %v344_v15  ;;  %v254_v14 = vcombine.high %v8799_v5, %v8799_v5  ;;  %v261_v15 = vrot.slane %v8799_v5, %v8670_v9 }
  0x37   :  { %v348_v22 = vadd.f32 %v347_v16, %v346_v17  ;;  %v377_v16 = vsel %vm311_vm3, %v252_v2, 0.0  ;;  %v383_v26 = vsel %vm311_vm3, %v261_v15, 0.0  ;;  %v7575_v2 = vld [vmem:[%s11506_s13 + $0x114] ss:$8 sps:$4 sm:$0xff]  }
  0x39   :  { %v350_v24 = vadd.f32 %v349_v20, %v348_v22  ;;  %v268_v20 = vrot.slane %v254_v14, %v8670_v9  ;;  %v269_v22 = vcombine.high %v261_v15, %v261_v15 }
  0x3b   :  { %v352_v30 = vadd.f32 %v351_v23, %v350_v24  ;;  %v381_v23 = vsel %vm311_vm3, %v253_v12, 0.0  ;;  %v270_v28 = vcombine.high %v268_v20, %v268_v20 }
  0x3d   :  { %v354_v32 = vadd.f32 %v353_v29, %v352_v30  ;;  %v385_v29 = vsel %vm311_vm3, %v269_v22, 0.0  ;;  %v390_v33 = vsel %vm389_vm5, %v270_v28, 0.0 }
  0x3f   :  { %v356_v37 = vadd.f32 %v355_v31, %v354_v32  ;;  %v387_v31 = vsel %vm311_vm3, %v268_v20, 0.0 }
  0x41   :  { %v358_v40 = vadd.f32 %v357_v35, %v356_v37  ;;  %v6863_v37 = vld [vmem:[%s11535_s28] ss:$0 sm:$0xff] }
  0x43   :  { %v360_v45 = vadd.f32 %v359_v38, %v358_v40 }
  0x45   :  { %v362_v47 = vadd.f32 %v361_v44, %v360_v45  ;;  %v7557_v44 = vld [vmem:[%s11506_s13 + $0x174] ss:$8 sps:$4 sm:$0xff]   ;;  %v7560_v45 = vld [vmem:[%s11506_s13 + $0x164] ss:$8 sps:$4 sm:$0xff]  }
  0x46   :  { %5846 = vmatprep.subr.bf16.mxu0 %v7557_v44 }
  0x47   :  { %v364_v52 = vadd.f32 %v363_v46, %v362_v47  ;;  %5847 = vmatpush1.bf16.msra.mxu0 %v7555_v43  ;;  %v7558_v46 = vld [vmem:[%s11506_s13 + $0x160] ss:$8 sps:$4 sm:$0xff]   ;;  %v8544_v47 = vmov 269488144  }
  0x48   :  { %v398_v48 = vunpack.c.l.s4 %v8544_v47  ;;  %5848 = vmatprep.subr.bf16.mxu0 %v7560_v45 }
  0x49   :  { %v366_v55 = vadd.f32 %v365_v50, %v364_v52  ;;  %v7561_v50 = vld [vmem:[%s11506_s13 + $0x150] ss:$8 sps:$4 sm:$0xff]  }
  0x4a   :  { %v399_v52 = vunpack.c.0.s8 %v398_v48 }
  0x4b   :  { %v368_v62 = vadd.f32 %v367_v54, %v366_v55  ;;  %5849 = vmatpush1.bf16.msra.mxu0 %v7558_v46  ;;  %v7566_v54 = vld [vmem:[%s11506_s13 + $0x144] ss:$8 sps:$4 sm:$0xff]   ;;  %v7564_v55 = vld [vmem:[%s11506_s13 + $0x140] ss:$8 sps:$4 sm:$0xff]  }
  0x4c   :  { %5850 = vmatprep.subr.bf16.mxu0 %v7563_v49  ;;  %v8849_v57 = vsub.s32 %v399_v52, %v8662_v6 }
  0x4d   :  { %v370_v0 = vadd.f32 %v369_v61, %v368_v62  ;;  %v7572_v61 = vld [vmem:[%s11506_s13 + $0x124] ss:$8 sps:$4 sm:$0xff]  }
  0x4f   :  { %v372_v7 = vadd.f32 %v371_v63, %v370_v0  ;;  %5851 = vmatpush1.bf16.msra.mxu0 %v7561_v50  ;;  %v7570_v63 = vld [vmem:[%s11506_s13 + $0x120] ss:$8 sps:$4 sm:$0xff]  }
  0x50   :  { %5852 = vmatprep.subr.bf16.mxu0 %v7566_v54 }
  0x51   :  { %v374_v11 = vadd.f32 %v373_v4, %v372_v7 }
  0x53   :  { %v376_v17 = vadd.f32 %v375_v10, %v374_v11  ;;  %5853 = vmatpush1.bf16.msra.mxu0 %v7564_v55 }
  0x54   :  { %5854 = vmatprep.subr.bf16.mxu0 %v7569_v56 }
  0x55   :  { %v378_v19 = vadd.f32 %v377_v16, %v376_v17 }
  0x57   :  { %v380_v24 = vadd.f32 %v379_v18, %v378_v19  ;;  %5855 = vmatpush1.bf16.msra.mxu0 %v7567_v59 }
  0x58   :  { %5856 = vmatprep.subr.bf16.mxu0 %v7572_v61 }
  0x59   :  { %v382_v27 = vadd.f32 %v381_v23, %v380_v24 }
  0x5b   :  { %v384_v30 = vadd.f32 %v383_v26, %v382_v27  ;;  %5857 = vmatpush1.bf16.msra.mxu0 %v7570_v63 }
  0x5c   :  { %5858 = vmatprep.subr.bf16.mxu0 %v7575_v2 }
  0x5d   :  { %v386_v32 = vadd.f32 %v385_v29, %v384_v30 }
  0x5f   :  { %v388_v34 = vadd.f32 %v387_v31, %v386_v32 }
  0x61   :  { %v391_v35 = vadd.f32 %v390_v33, %v388_v34 }
  0x63   :  { %392 = vadd.xlane.f32.xlu0 %v391_v35 }
  0xcf   :  { %v1541_v38 = vpop.f32.mrf.mxu0 }
  0xd0   :  { %v8817_v40 = vadd.f32 %v6863_v37, %v1541_v38 }
  0xd1   :  { %v7534_v41 = vpop.f32.mrf.mxu0 }
  0xd2   :  { %v1548_v42 = vsel %vm1547_vm6, %v8817_v40, 0.0 }
  0xd3   :  { %1549 = vadd.xlane.f32.xlu0 %v1548_v42 }
  0xec   :  { %v393_v58 = vpop.xlane.xlu0 %392 }
  0xed   :  { %v395_v60 = vmul.f32 0.0002, %v393_v58  ;;  %v1656_v63 = vpop.f32.mrf.mxu0 }
  0xef   :  { %v8858_v62 = vrot.slane %v395_v60, %v8849_v57 }
  0xf1   :  { %v8865_v0 = vsub.f32 %v8667_v8, %v8858_v62  ;;  %v8869_v1 = vsub.f32 %v8680_v13, %v8858_v62  ;;  %v7573_v8 = vld [vmem:[%s11506_s13 + $0x110] ss:$8 sps:$4 sm:$0xff]   ;;  %v8884_v11 = vsub.f32 %v8694_v25, %v8858_v62  ;;  %v8898_v29 = vsub.f32 %v8708_v39, %v8858_v62 }
  0xf2   :  { %5859 = vmatpush1.bf16.msra.mxu0 %v7573_v8  ;;  %v8910_v47 = vsub.f32 %v8722_v53, %v8858_v62  ;;  %v6868_v53 = vld [vmem:[%s11507_s10] ss:$0 sm:$0xff]  ;;  %v8925_v8 = vsub.f32 %v8736_v3, %v8858_v62 }
  0xf3   :  { %v415_v4 = vmul.f32 %v8865_v0, %v8865_v0  ;;  %v416_v7 = vmul.f32 %v8869_v1, %v8869_v1  ;;  %v417_v25 = vmul.f32 %v8884_v11, %v8884_v11  ;;  %v418_v41 = vmul.f32 %v8898_v29, %v8898_v29 }
  0xf4   :  { %v419_v58 = vmul.f32 %v8910_v47, %v8910_v47  ;;  %v420_v3 = vmul.f32 %v8925_v8, %v8925_v8 }
  0xf5   :  { %v435_v10 = vcombine.high %v415_v4, %v415_v4  ;;  %v442_v13 = vrot.slane %v415_v4, %v8670_v9  ;;  %v452_v15 = vcombine.high %v416_v7, %v416_v7  ;;  %v459_v16 = vrot.slane %v416_v7, %v8670_v9  ;;  %v7539_v7 = vpop.f32.mrf.mxu0 }
  0xf6   :  { %v469_v32 = vcombine.high %v417_v25, %v417_v25  ;;  %v476_v33 = vrot.slane %v417_v25, %v8670_v9  ;;  %v493_v48 = vrot.slane %v418_v41, %v8670_v9  ;;  %v486_v52 = vcombine.high %v418_v41, %v418_v41 }
  0xf7   :  { %v449_v12 = vrot.slane %v435_v10, %v8670_v9  ;;  %v450_v14 = vcombine.high %v442_v13, %v442_v13  ;;  %v645_v17 = vsel %vm311_vm3, %v442_v13, 0.0  ;;  %v466_v23 = vrot.slane %v452_v15, %v8670_v9 }
  0xf8   :  { %v467_v24 = vcombine.high %v459_v16, %v459_v16  ;;  %v652_v28 = vsel %vm311_vm3, %v459_v16, 0.0  ;;  %v483_v42 = vrot.slane %v469_v32, %v8670_v9  ;;  %v484_v43 = vcombine.high %v476_v33, %v476_v33 }
  0xf9   :  { %v451_v18 = vcombine.high %v449_v12, %v449_v12  ;;  %v646_v19 = vsel %vm311_vm3, %v450_v14, 0.0  ;;  %v648_v20 = vsel %vm311_vm3, %v449_v12, 0.0  ;;  %v468_v31 = vcombine.high %v466_v23, %v466_v23 }
  0xfa   :  { %v647_v22 = vadd.f32 %v646_v19, %v645_v17  ;;  %v654_v34 = vsel %vm311_vm3, %v467_v24, 0.0  ;;  %v656_v37 = vsel %vm311_vm3, %v466_v23, 0.0  ;;  %v660_v45 = vsel %vm311_vm3, %v476_v33, 0.0 }
  0xfb   :  { %v650_v26 = vsel %vm311_vm3, %v451_v18, 0.0  ;;  %v658_v39 = vsel %vm311_vm3, %v468_v31, 0.0  ;;  %v662_v49 = vsel %vm311_vm3, %v484_v43, 0.0  ;;  %v485_v50 = vcombine.high %v483_v42, %v483_v42 }
  0xfc   :  { %v649_v27 = vadd.f32 %v648_v20, %v647_v22  ;;  %v664_v55 = vsel %vm311_vm3, %v483_v42, 0.0  ;;  %v500_v59 = vrot.slane %v486_v52, %v8670_v9  ;;  %v501_v60 = vcombine.high %v493_v48, %v493_v48 }
  0xfd   :  { %v666_v61 = vsel %vm311_vm3, %v485_v50, 0.0  ;;  %v668_v4 = vsel %vm311_vm3, %v493_v48, 0.0  ;;  %v503_v10 = vcombine.high %v419_v58, %v419_v58  ;;  %v510_v14 = vrot.slane %v419_v58, %v8670_v9 }
  0xfe   :  { %v651_v30 = vadd.f32 %v650_v26, %v649_v27  ;;  %v502_v12 = vcombine.high %v500_v59, %v500_v59  ;;  %v670_v15 = vsel %vm311_vm3, %v501_v60, 0.0  ;;  %v8929_v16 = vadd.f32 %v6868_v53, %v1656_v63 }
  0xff   :  { %v672_v18 = vsel %vm311_vm3, %v500_v59, 0.0  ;;  %v517_v22 = vrot.slane %v503_v10, %v8670_v9  ;;  %v518_v25 = vcombine.high %v510_v14, %v510_v14  ;;  %v676_v26 = vsel %vm311_vm3, %v510_v14, 0.0 }
 0x100   :  { %v653_v35 = vadd.f32 %v652_v28, %v651_v30  ;;  %v1662_v19 = vsel %vm311_vm3, %v8929_v16, 0.0  ;;  %v674_v23 = vsel %vm311_vm3, %v502_v12, 0.0  ;;  %v8941_v27 = vsub.f32 %v8750_v21, %v8858_v62 }
 0x101   :  { %1663 = vadd.xlane.f32.xlu0 %v1662_v19  ;;  %v519_v30 = vcombine.high %v517_v22, %v517_v22  ;;  %v520_v31 = vcombine.high %v420_v3, %v420_v3  ;;  %v527_v32 = vrot.slane %v420_v3, %v8670_v9  ;;  %v678_v33 = vsel %vm311_vm3, %v518_v25, 0.0 }
 0x102   :  { %v655_v38 = vadd.f32 %v654_v34, %v653_v35  ;;  %v680_v35 = vsel %vm311_vm3, %v517_v22, 0.0  ;;  %v8955_v50 = vsub.f32 %v8764_v36, %v8858_v62 }
 0x103   :  { %v534_v41 = vrot.slane %v520_v31, %v8670_v9  ;;  %v535_v42 = vcombine.high %v527_v32, %v527_v32  ;;  %v682_v21 = vsel %vm311_vm3, %v519_v30, 0.0 }
 0x104   :  { %v657_v44 = vadd.f32 %v656_v37, %v655_v38  ;;  %v421_v38 = vmul.f32 %v8941_v27, %v8941_v27  ;;  %v422_v60 = vmul.f32 %v8955_v50, %v8955_v50 }
 0x106   :  { %v659_v46 = vadd.f32 %v658_v39, %v657_v44  ;;  %v684_v39 = vsel %vm311_vm3, %v527_v32, 0.0  ;;  %v544_v48 = vrot.slane %v421_v38, %v8670_v9  ;;  %v554_v14 = vcombine.high %v422_v60, %v422_v60 }
 0x108   :  { %v661_v54 = vadd.f32 %v660_v45, %v659_v46  ;;  %v536_v45 = vcombine.high %v534_v41, %v534_v41  ;;  %v537_v46 = vcombine.high %v421_v38, %v421_v38  ;;  %v552_v58 = vcombine.high %v544_v48, %v544_v48 }
 0x109   :  { %v692_v53 = vsel %vm311_vm3, %v544_v48, 0.0  ;;  %v568_v3 = vrot.slane %v554_v14, %v8670_v9  ;;  %v8982_v38 = vsub.f32 %v8799_v5, %v8858_v62  ;;  %v7579_v14 = vld [vmem:[%s11506_s13 + $0x1f0] ss:$8 sps:$4 sm:$0xff]  }
 0x10a   :  { %v663_v56 = vadd.f32 %v662_v49, %v661_v54  ;;  %v686_v49 = vsel %vm311_vm3, %v535_v42, 0.0  ;;  %v688_v54 = vsel %vm311_vm3, %v534_v41, 0.0  ;;  %v690_v59 = vsel %vm311_vm3, %v536_v45, 0.0 }
 0x10b   :  { %v694_v36 = vsel %vm311_vm3, %v552_v58, 0.0 }
 0x10c   :  { %v665_v2 = vadd.f32 %v664_v55, %v663_v56  ;;  %v551_v56 = vrot.slane %v537_v46, %v8670_v9 }
 0x10e   :  { %v667_v13 = vadd.f32 %v666_v61, %v665_v2  ;;  %v553_v2 = vcombine.high %v551_v56, %v551_v56  ;;  %v696_v10 = vsel %vm311_vm3, %v551_v56, 0.0 }
 0x110   :  { %v669_v17 = vadd.f32 %v668_v4, %v667_v13  ;;  %v561_v4 = vrot.slane %v422_v60, %v8670_v9  ;;  %v698_v12 = vsel %vm311_vm3, %v553_v2, 0.0 }
 0x112   :  { %v671_v20 = vadd.f32 %v670_v15, %v669_v17  ;;  %v569_v15 = vcombine.high %v561_v4, %v561_v4 }
 0x114   :  { %v673_v24 = vadd.f32 %v672_v18, %v671_v20  ;;  %v700_v18 = vsel %vm311_vm3, %v561_v4, 0.0  ;;  %v8970_v20 = vsub.f32 %v8778_v51, %v8858_v62  ;;  %v702_v25 = vsel %vm311_vm3, %v569_v15, 0.0  ;;  %v7584_v15 = vld [vmem:[%s11506_s13 + $0x1e4] ss:$8 sps:$4 sm:$0xff]  }
 0x116   :  { %v675_v28 = vadd.f32 %v674_v23, %v673_v24  ;;  %v423_v24 = vmul.f32 %v8970_v20, %v8970_v20 }
 0x118   :  { %v677_v34 = vadd.f32 %v676_v26, %v675_v28  ;;  %v570_v26 = vcombine.high %v568_v3, %v568_v3  ;;  %v704_v28 = vsel %vm311_vm3, %v568_v3, 0.0  ;;  %v578_v31 = vrot.slane %v423_v24, %v8670_v9  ;;  %v7590_v3 = vld [vmem:[%s11506_s13 + $0x1c4] ss:$8 sps:$4 sm:$0xff]  }
 0x119   :  { %v571_v51 = vcombine.high %v423_v24, %v423_v24  ;;  %v7591_v24 = vld [vmem:[%s11506_s13 + $0x1b0] ss:$8 sps:$4 sm:$0xff]  }
 0x11a   :  { %v679_v37 = vadd.f32 %v678_v33, %v677_v34  ;;  %v706_v32 = vsel %vm311_vm3, %v570_v26, 0.0  ;;  %v586_v34 = vcombine.high %v578_v31, %v578_v31  ;;  %v9042_v26 = vsub.s32 1, %v8662_v6 }
 0x11b   :  { %v585_v41 = vrot.slane %v571_v51, %v8670_v9  ;;  %v7599_v51 = vld [vmem:[%s11506_s13 + $0x1a4] ss:$8 sps:$4 sm:$0xff]  }
 0x11c   :  { %v681_v43 = vadd.f32 %v680_v35, %v679_v37  ;;  %v708_v35 = vsel %vm311_vm3, %v578_v31, 0.0  ;;  %v710_v42 = vsel %vm311_vm3, %v586_v34, 0.0  ;;  %v7594_v31 = vld [vmem:[%s11509_s14 + $0x34] ss:$8 sps:$4 sm:$0xff]   ;;  %v9063_v34 = vsub.s32 3, %v8662_v6 }
 0x11d   :  { %2637 = vmatprep.subr.bf16.mxu1 %v7594_v31 }
 0x11e   :  { %v683_v44 = vadd.f32 %v682_v21, %v681_v43  ;;  %v424_v43 = vmul.f32 %v8982_v38, %v8982_v38 }
 0x120   :  { %v685_v52 = vadd.f32 %v684_v39, %v683_v44  ;;  %v587_v39 = vcombine.high %v585_v41, %v585_v41  ;;  %v712_v44 = vsel %vm311_vm3, %v585_v41, 0.0  ;;  %v595_v46 = vrot.slane %v424_v43, %v8670_v9  ;;  %v9074_v41 = vld [vmem:[%s11510_s4 + $0x8] sm:$0xff] }
 0x122   :  { %v687_v55 = vadd.f32 %v686_v49, %v685_v52  ;;  %v714_v48 = vsel %vm311_vm3, %v587_v39, 0.0  ;;  %v588_v52 = vcombine.high %v424_v43, %v424_v43  ;;  %v603_v5 = vcombine.high %v595_v46, %v595_v46  ;;  %v7606_v43 = vld [vmem:[%s11509_s14 + $0x14] ss:$8 sps:$4 sm:$0xff]  }
 0x123   :  { %v716_v62 = vsel %vm311_vm3, %v595_v46, 0.0  ;;  %v9086_v39 = vsub.s32 5, %v8662_v6 }
 0x124   :  { %v689_v61 = vadd.f32 %v688_v54, %v687_v55  ;;  %v602_v55 = vrot.slane %v588_v52, %v8670_v9  ;;  %v718_v56 = vsel %vm311_vm3, %v603_v5, 0.0  ;;  %v9098_v52 = vsub.s32 7, %v8662_v6 }
 0x126   :  { %v691_v63 = vadd.f32 %v690_v59, %v689_v61 }
 0x128   :  { %v693_v7 = vadd.f32 %v692_v53, %v691_v63  ;;  %v604_v53 = vcombine.high %v602_v55, %v602_v55  ;;  %v720_v63 = vsel %vm311_vm3, %v602_v55, 0.0 }
 0x12a   :  { %v695_v13 = vadd.f32 %v694_v36, %v693_v7  ;;  %v722_v7 = vsel %vm389_vm5, %v604_v53, 0.0 }
 0x12c   :  { %v697_v17 = vadd.f32 %v696_v10, %v695_v13  ;;  %v7578_v13 = vld [vmem:[%s11506_s13 + $0x104] ss:$8 sps:$4 sm:$0xff]  }
 0x12d   :  { %5860 = vmatprep.subr.bf16.mxu0 %v7578_v13  ;;  %v7614_v13 = vld [vmem:[%s11509_s14] ss:$8 sps:$4 sm:$0xff]  }
 0x12e   :  { %v699_v19 = vadd.f32 %v698_v12, %v697_v17  ;;  %v7581_v12 = vld [vmem:[%s11506_s13 + $0x1f4] ss:$8 sps:$4 sm:$0xff]   ;;  %v7582_v17 = vld [vmem:[%s11506_s13 + $0x1e0] ss:$8 sps:$4 sm:$0xff]  }
 0x130   :  { %v701_v22 = vadd.f32 %v700_v18, %v699_v19  ;;  %v7587_v18 = vld [vmem:[%s11506_s13 + $0x1d4] ss:$8 sps:$4 sm:$0xff]   ;;  %v7585_v19 = vld [vmem:[%s11506_s13 + $0x1d0] ss:$8 sps:$4 sm:$0xff]  }
 0x132   :  { %v703_v23 = vadd.f32 %v702_v25, %v701_v22  ;;  %v7588_v22 = vld [vmem:[%s11506_s13 + $0x1c0] ss:$8 sps:$4 sm:$0xff]   ;;  %v7593_v25 = vld [vmem:[%s11506_s13 + $0x1b4] ss:$8 sps:$4 sm:$0xff]  }
 0x134   :  { %v705_v30 = vadd.f32 %v704_v28, %v703_v23  ;;  %v9036_v23 = vsub.s32 0, %v8662_v6  ;;  %v9045_v28 = vsub.s32 2, %v8662_v6 }
 0x136   :  { %v707_v33 = vadd.f32 %v706_v32, %v705_v30  ;;  %v82_v30 = vld [vmem:[%s11508_s3 + $0x8] sm:$0xff]  ;;  %v7596_v32 = vld [vmem:[%s11509_s14 + $0x30] ss:$8 sps:$4 sm:$0xff]   ;;  %v1143_v55 = vrot.slane %v9074_v41, %v9036_v23  ;;  %v1151_v53 = vrot.slane %v9074_v41, %v9045_v28 }
 0x137   :  { %2638 = vmatpush1.bf16.msra.mxu1 %v7596_v32  ;;  %v796_v46 = vrot.slane %v82_v30, %v9045_v28  ;;  %v800_v5 = vrot.slane %v82_v30, %v9063_v34 }
 0x138   :  { %v709_v37 = vadd.f32 %v708_v35, %v707_v33  ;;  %v7597_v33 = vld [vmem:[%s11506_s13 + $0x1a0] ss:$8 sps:$4 sm:$0xff]   ;;  %v7600_v35 = vld [vmem:[%s11509_s14 + $0x24] ss:$8 sps:$4 sm:$0xff]  }
 0x139   :  { %2639 = vmatprep.subr.bf16.mxu1 %v7600_v35 }
 0x13a   :  { %v711_v21 = vadd.f32 %v710_v42, %v709_v37  ;;  %v7602_v37 = vld [vmem:[%s11509_s14 + $0x20] ss:$8 sps:$4 sm:$0xff]   ;;  %v7605_v42 = vld [vmem:[%s11506_s13 + $0x194] ss:$8 sps:$4 sm:$0xff]  }
 0x13b   :  { %2640 = vmatpush1.bf16.msra.mxu1 %v7602_v37 }
 0x13c   :  { %v713_v45 = vadd.f32 %v712_v44, %v711_v21  ;;  %v9080_v21 = vsub.s32 4, %v8662_v6  ;;  %v788_v44 = vrot.slane %v82_v30, %v9036_v23  ;;  %2641 = vmatprep.subr.bf16.mxu1 %v7606_v43 }
 0x13e   :  { %v715_v49 = vadd.f32 %v714_v48, %v713_v45  ;;  %v792_v45 = vrot.slane %v82_v30, %v9042_v26  ;;  %v7603_v48 = vld [vmem:[%s11506_s13 + $0x190] ss:$8 sps:$4 sm:$0xff]  }
 0x140   :  { %v717_v54 = vadd.f32 %v716_v62, %v715_v49  ;;  %v9095_v49 = vsub.s32 6, %v8662_v6  ;;  %v7611_v62 = vld [vmem:[%s11506_s13 + $0x184] ss:$8 sps:$4 sm:$0xff]   ;;  %v7608_v6 = vld [vmem:[%s11509_s14 + $0x10] ss:$8 sps:$4 sm:$0xff]  }
 0x141   :  { %2642 = vmatpush1.bf16.msra.mxu1 %v7608_v6 }
 0x142   :  { %v719_v60 = vadd.f32 %v718_v56, %v717_v54  ;;  %v947_v54 = vcombine.low %v788_v44, %v792_v45  ;;  %v1147_v56 = vrot.slane %v9074_v41, %v9042_v26  ;;  %v1167_v31 = vrot.slane %v9074_v41, %v9095_v49  ;;  %v7617_v45 = vld [vmem:[%s11506_s13 + $0x374] ss:$8 sps:$4 sm:$0xff]  }
 0x144   :  { %v721_v36 = vadd.f32 %v720_v63, %v719_v60  ;;  %v948_v60 = vcombine.low %v796_v46, %v800_v5  ;;  %v1155_v63 = vrot.slane %v9074_v41, %v9063_v34 }
 0x146   :  { %v723_v10 = vadd.f32 %v722_v7, %v721_v36  ;;  %v955_v36 = vrot.slane %v947_v54, %v8670_v9  ;;  %v808_v7 = vrot.slane %v82_v30, %v9086_v39 }
 0x15c   :  { %v1550_v58 = vpop.xlane.xlu0 %1549 }
 0x15d   :  { %v1552_v59 = vmul.f32 0.015625, %v1550_v58  ;;  %v7609_v58 = vld [vmem:[%s11506_s13 + $0x180] ss:$8 sps:$4 sm:$0xff]  }
 0x15f   :  { %v8995_v61 = vsub.f32 %v8817_v40, %v1552_v59  ;;  %v7576_v40 = vld [vmem:[%s11506_s13 + $0x100] ss:$8 sps:$4 sm:$0xff]   ;;  %v7612_v59 = vld [vmem:[%s11509_s14 + $0x4] ss:$8 sps:$4 sm:$0xff]  }
 0x160   :  { %5861 = vmatpush1.bf16.msra.mxu0 %v7576_v40  ;;  %v962_v40 = vrot.slane %v948_v60, %v8670_v9  ;;  %2643 = vmatprep.subr.bf16.mxu1 %v7612_v59 }
 0x161   :  { %v1554_v2 = vmul.f32 %v8995_v61, %v8995_v61  ;;  %5862 = vmatprep.subr.bf16.mxu0 %v7581_v12  ;;  %v1303_v12 = vcombine.low %v1151_v53, %v1155_v63  ;;  %2644 = vmatpush1.bf16.msra.mxu1 %v7614_v13  ;;  %v11523_v53 = vmov 0  }
 0x162   :  { %2661 = vmatprep.mubr.bf16.mxu1 %v11523_v53 }
 0x163   :  { %v1555_v4 = vsel %vm1547_vm6, %v1554_v2, 0.0  ;;  %v804_v2 = vrot.slane %v82_v30, %v9080_v21 }
 0x164   :  { %1556 = vadd.xlane.f32.xlu1 %v1555_v4  ;;  %5863 = vmatpush2.bf16.msra.mxu0 %v7579_v14  ;;  %v1302_v4 = vcombine.low %v1143_v55, %v1147_v56  ;;  %v812_v14 = vrot.slane %v82_v30, %v9095_v49 }
 0x165   :  { %5864 = vmatprep.subr.bf16.mxu0 %v7584_v15  ;;  %v816_v15 = vrot.slane %v82_v30, %v9098_v52 }
 0x167   :  { %v965_v30 = vcombine.low %v812_v14, %v816_v15 }
 0x168   :  { %724 = vadd.xlane.f32.xlu1 %v723_v10  ;;  %5865 = vmatpush2.bf16.msra.mxu0 %v7582_v17  ;;  %v9127_v10 = vld [vmem:[%s11508_s3 + $0x10] sm:$0xff] }
 0x169   :  { %5866 = vmatprep.subr.bf16.mxu0 %v7587_v18  ;;  %v9138_v17 = vld [vmem:[%s11510_s4 + $0x10] sm:$0xff]  ;;  %v1310_v18 = vrot.slane %v1302_v4, %v8670_v9  ;;  %v820_v35 = vrot.slane %v9127_v10, %v9036_v23  ;;  %v824_v43 = vrot.slane %v9127_v10, %v9042_v26  ;;  %v828_v44 = vrot.slane %v9127_v10, %v9045_v28 }
 0x16a   :  { %v1175_v5 = vrot.slane %v9138_v17, %v9036_v23  ;;  %v1179_v56 = vrot.slane %v9138_v17, %v9042_v26  ;;  %v1183_v6 = vrot.slane %v9138_v17, %v9045_v28  ;;  %v1187_v60 = vrot.slane %v9138_v17, %v9063_v34 }
 0x16b   :  { %v981_v55 = vcombine.low %v820_v35, %v824_v43  ;;  %v844_v14 = vrot.slane %v9127_v10, %v9095_v49  ;;  %v848_v15 = vrot.slane %v9127_v10, %v9098_v52 }
 0x16c   :  { %5867 = vmatpush2.bf16.msra.mxu0 %v7585_v19  ;;  %v964_v19 = vcombine.low %v804_v2, %v808_v7  ;;  %v1336_v2 = vcombine.low %v1175_v5, %v1179_v56  ;;  %v1337_v13 = vcombine.low %v1183_v6, %v1187_v60 }
 0x16d   :  { %5868 = vmatprep.subr.bf16.mxu0 %v7590_v3  ;;  %v1159_v3 = vrot.slane %v9074_v41, %v9080_v21  ;;  %v989_v63 = vrot.slane %v981_v55, %v8670_v9 }
 0x16e   :  { %v972_v32 = vrot.slane %v964_v19, %v8670_v9 }
 0x170   :  { %5869 = vmatpush2.bf16.msra.mxu0 %v7588_v22  ;;  %v1163_v22 = vrot.slane %v9074_v41, %v9086_v39 }
 0x171   :  { %5870 = vmatprep.subr.bf16.mxu0 %v7593_v25  ;;  %v9145_v25 = vcombine.low %v955_v36, %v962_v40  ;;  %v836_v36 = vrot.slane %v9127_v10, %v9080_v21  ;;  %v1344_v40 = vrot.slane %v1336_v2, %v8670_v9 }
 0x174   :  { %5871 = vmatpush2.bf16.msra.mxu0 %v7591_v24  ;;  %v1317_v24 = vrot.slane %v1303_v12, %v8670_v9  ;;  %v840_v12 = vrot.slane %v9127_v10, %v9086_v39 }
 0x175   :  { %5872 = vmatprep.subr.bf16.mxu0 %v7599_v51  ;;  %v1319_v51 = vcombine.low %v1159_v3, %v1163_v22  ;;  %v1351_v3 = vrot.slane %v1337_v13, %v8670_v9  ;;  %v1191_v22 = vrot.slane %v9138_v17, %v9080_v21 }
 0x176   :  { %v9155_v37 = vcombine.low %v1310_v18, %v1317_v24  ;;  %v84_v18 = vld [vmem:[%s11508_s3 + $0x18] sm:$0xff]  ;;  %v1195_v24 = vrot.slane %v9138_v17, %v9086_v39 }
 0x177   :  { %v1327_v46 = vrot.slane %v1319_v51, %v8670_v9  ;;  %v9213_v51 = vcombine.low %v1344_v40, %v1351_v3  ;;  %v856_v43 = vrot.slane %v84_v18, %v9042_v26  ;;  %v864_v5 = vrot.slane %v84_v18, %v9063_v34 }
 0x178   :  { %5873 = vmatpush2.bf16.msra.mxu0 %v7597_v33  ;;  %v1171_v33 = vrot.slane %v9074_v41, %v9098_v52  ;;  %v1353_v35 = vcombine.low %v1191_v22, %v1195_v24  ;;  %v868_v2 = vrot.slane %v84_v18, %v9080_v21  ;;  %v872_v13 = vrot.slane %v84_v18, %v9086_v39 }
 0x179   :  { %5874 = vmatprep.subr.bf16.mxu0 %v7605_v42  ;;  %v979_v42 = vrot.slane %v965_v30, %v8670_v9  ;;  %v89_v30 = vld [vmem:[%s11510_s4 + $0x18] sm:$0xff]  ;;  %v876_v40 = vrot.slane %v84_v18, %v9095_v49 }
 0x17a   :  { %v1320_v41 = vcombine.low %v1167_v31, %v1171_v33  ;;  %v998_v31 = vcombine.low %v836_v36, %v840_v12  ;;  %v1203_v33 = vrot.slane %v9138_v17, %v9098_v52  ;;  %v1211_v6 = vrot.slane %v89_v30, %v9042_v26 }
 0x17b   :  { %v9173_v54 = vcombine.low %v972_v32, %v979_v42  ;;  %v1199_v32 = vrot.slane %v9138_v17, %v9095_v49  ;;  %v852_v42 = vrot.slane %v84_v18, %v9036_v23  ;;  %v1207_v17 = vrot.slane %v89_v30, %v9036_v23 }
 0x17c   :  { %5875 = vmatpush2.bf16.msra.mxu0 %v7603_v48  ;;  %v832_v48 = vrot.slane %v9127_v10, %v9063_v34  ;;  %v999_v10 = vcombine.low %v844_v14, %v848_v15  ;;  %v880_v15 = vrot.slane %v84_v18, %v9098_v52  ;;  %v1223_v3 = vrot.slane %v89_v30, %v9080_v21 }
 0x17d   :  { %5876 = vmatprep.subr.bf16.mxu0 %v7611_v62  ;;  %v7620_v62 = vld [vmem:[%s11506_s13 + $0x74] ss:$8 sps:$4 sm:$0xff]   ;;  %v1032_v24 = vcombine.low %v868_v2, %v872_v13 }
 0x17e   :  { %v982_v59 = vcombine.low %v828_v44, %v832_v48  ;;  %5805 = vmatprep.subr.bf16.mxu1 %v7620_v62  ;;  %v1006_v44 = vrot.slane %v998_v31, %v8670_v9  ;;  %v1361_v48 = vrot.slane %v1353_v35, %v8670_v9  ;;  %v1015_v62 = vcombine.low %v852_v42, %v856_v43 }
 0x17f   :  { %v1227_v31 = vrot.slane %v89_v30, %v9086_v39  ;;  %v1033_v35 = vcombine.low %v876_v40, %v880_v15  ;;  %v1235_v42 = vrot.slane %v89_v30, %v9098_v52  ;;  %v1040_v43 = vrot.slane %v1032_v24, %v8670_v9 }
 0x180   :  { %5877 = vmatpush2.bf16.msra.mxu0 %v7609_v58  ;;  %v1334_v58 = vrot.slane %v1320_v41, %v8670_v9  ;;  %v996_v7 = vrot.slane %v982_v59, %v8670_v9  ;;  %v1354_v41 = vcombine.low %v1199_v32, %v1203_v33  ;;  %v1023_v60 = vrot.slane %v1015_v62, %v8670_v9  ;;  %v85_v62 = vld [vmem:[%s11508_s3 + $0x20] sm:$0xff] }
 0x181   :  { %5928 = vmatprep.subr.bf16.mxu0 %v7617_v45  ;;  %v1013_v45 = vrot.slane %v999_v10, %v8670_v9  ;;  %v1231_v10 = vrot.slane %v89_v30, %v9095_v49  ;;  %v908_v2 = vrot.slane %v85_v62, %v9095_v49 }
 0x182   :  { %v9186_v4 = vcombine.low %v1327_v46, %v1334_v58  ;;  %v9199_v19 = vcombine.low %v989_v63, %v996_v7  ;;  %v860_v46 = vrot.slane %v84_v18, %v9045_v28  ;;  %v1368_v56 = vrot.slane %v1354_v41, %v8670_v9 }
 0x183   :  { %v9223_v55 = vcombine.low %v1006_v44, %v1013_v45  ;;  %v1215_v58 = vrot.slane %v89_v30, %v9045_v28  ;;  %v1219_v63 = vrot.slane %v89_v30, %v9063_v34  ;;  %v1370_v7 = vcombine.low %v1207_v17, %v1211_v6 }
 0x184   :  { %v1016_v59 = vcombine.low %v860_v46, %v864_v5  ;;  %v9231_v36 = vcombine.low %v1361_v48, %v1368_v56  ;;  %v1387_v44 = vcombine.low %v1223_v3, %v1227_v31  ;;  %v1047_v45 = vrot.slane %v1033_v35, %v8670_v9 }
 0x185   :  { %v1371_v14 = vcombine.low %v1215_v58, %v1219_v63  ;;  %v1378_v22 = vrot.slane %v1370_v7, %v8670_v9  ;;  %v1388_v41 = vcombine.low %v1231_v10, %v1235_v42  ;;  %v884_v30 = vrot.slane %v85_v62, %v9036_v23 }
 0x186   :  { %v1030_v12 = vrot.slane %v1016_v59, %v8670_v9  ;;  %v1395_v46 = vrot.slane %v1387_v44, %v8670_v9  ;;  %v9250_v48 = vcombine.low %v1040_v43, %v1047_v45  ;;  %v888_v17 = vrot.slane %v85_v62, %v9042_v26  ;;  %v90_v59 = vld [vmem:[%s11510_s4 + $0x20] sm:$0xff] }
 0x187   :  { %v1385_v33 = vrot.slane %v1371_v14, %v8670_v9  ;;  %v1402_v5 = vrot.slane %v1388_v41, %v8670_v9  ;;  %v892_v56 = vrot.slane %v85_v62, %v9045_v28  ;;  %v896_v6 = vrot.slane %v85_v62, %v9063_v34 }
 0x188   :  { %v9241_v32 = vcombine.low %v1023_v60, %v1030_v12  ;;  %v900_v60 = vrot.slane %v85_v62, %v9080_v21  ;;  %v904_v63 = vrot.slane %v85_v62, %v9086_v39  ;;  %v1049_v7 = vcombine.low %v884_v30, %v888_v17 }
 0x189   :  { %v9246_v18 = vcombine.low %v1378_v22, %v1385_v33  ;;  %v9260_v58 = vcombine.low %v1395_v46, %v1402_v5  ;;  %v1050_v13 = vcombine.low %v892_v56, %v896_v6  ;;  %v1239_v40 = vrot.slane %v90_v59, %v9036_v23 }
 0x18a   :  { %v1243_v12 = vrot.slane %v90_v59, %v9042_v26  ;;  %v1247_v14 = vrot.slane %v90_v59, %v9045_v28  ;;  %v1251_v15 = vrot.slane %v90_v59, %v9063_v34  ;;  %v912_v3 = vrot.slane %v85_v62, %v9098_v52 }
 0x18b   :  { %v1066_v22 = vcombine.low %v900_v60, %v904_v63  ;;  %v1057_v24 = vrot.slane %v1049_v7, %v8670_v9  ;;  %v1064_v31 = vrot.slane %v1050_v13, %v8670_v9  ;;  %v1255_v33 = vrot.slane %v90_v59, %v9080_v21  ;;  %v1664_v13 = vpop.xlane.xlu0 %1663 }
 0x18c   :  { %v1404_v10 = vcombine.low %v1239_v40, %v1243_v12  ;;  %v1405_v35 = vcombine.low %v1247_v14, %v1251_v15  ;;  %v1067_v42 = vcombine.low %v908_v2, %v912_v3  ;;  %v1259_v44 = vrot.slane %v90_v59, %v9086_v39 }
 0x18d   :  { %v1074_v43 = vrot.slane %v1066_v22, %v8670_v9  ;;  %v9278_v45 = vcombine.low %v1057_v24, %v1064_v31  ;;  %v1263_v46 = vrot.slane %v90_v59, %v9095_v49  ;;  %v1267_v5 = vrot.slane %v90_v59, %v9098_v52 }
 0x18e   :  { %v1412_v41 = vrot.slane %v1404_v10, %v8670_v9  ;;  %v1419_v62 = vrot.slane %v1405_v35, %v8670_v9  ;;  %v1081_v30 = vrot.slane %v1067_v42, %v8670_v9  ;;  %v1421_v17 = vcombine.low %v1255_v33, %v1259_v44  ;;  %v81_v10 = vld [vmem:[%s11508_s3] sm:$0xff] }
 0x18f   :  { %v1422_v56 = vcombine.low %v1263_v46, %v1267_v5  ;;  %v1666_v40 = vmul.f32 0.0078125, %v1664_v13  ;;  %v756_v35 = vrot.slane %v81_v10, %v9036_v23  ;;  %v760_v42 = vrot.slane %v81_v10, %v9042_v26 }
 0x190   :  { %v9285_v6 = vcombine.low %v1412_v41, %v1419_v62  ;;  %v9287_v60 = vcombine.low %v1074_v43, %v1081_v30  ;;  %v1429_v63 = vrot.slane %v1421_v17, %v8670_v9  ;;  %v764_v43 = vrot.slane %v81_v10, %v9045_v28 }
 0x191   :  { %v1436_v2 = vrot.slane %v1422_v56, %v8670_v9  ;;  %v9294_v59 = vsub.f32 %v8929_v16, %v1666_v40  ;;  %v86_v16 = vld [vmem:[%s11510_s4] sm:$0xff]  ;;  %v768_v44 = vrot.slane %v81_v10, %v9063_v34  ;;  %v772_v46 = vrot.slane %v81_v10, %v9080_v21 }
 0x192   :  { %v1111_v41 = vrot.slane %v86_v16, %v9036_v23  ;;  %v776_v5 = vrot.slane %v81_v10, %v9086_v39  ;;  %v780_v62 = vrot.slane %v81_v10, %v9095_v49  ;;  %v1115_v30 = vrot.slane %v86_v16, %v9042_v26 }
 0x193   :  { %v9291_v7 = vcombine.low %v1429_v63, %v1436_v2  ;;  %v1668_v12 = vmul.f32 %v9294_v59, %v9294_v59  ;;  %v1119_v17 = vrot.slane %v86_v16, %v9045_v28  ;;  %v1123_v56 = vrot.slane %v86_v16, %v9063_v34 }
 0x194   :  { %v784_v63 = vrot.slane %v81_v10, %v9098_v52  ;;  %v1127_v2 = vrot.slane %v86_v16, %v9080_v21  ;;  %v1131_v13 = vrot.slane %v86_v16, %v9086_v39  ;;  %v1135_v40 = vrot.slane %v86_v16, %v9095_v49  ;;  %v6866_v21 = vld [vmem:[%s11511_s7] ss:$0 sm:$0xff] }
 0x195   :  { %v1669_v14 = vsel %vm311_vm3, %v1668_v12, 0.0  ;;  %v1139_v12 = vrot.slane %v86_v16, %v9098_v52 }
 0x196   :  { %1670 = vadd.xlane.f32.xlu1 %v1669_v14  ;;  %v913_v14 = vcombine.low %v756_v35, %v760_v42  ;;  %v6867_v42 = vld [vmem:[%s11512_s8] ss:$0 sm:$0xff] }
 0x197   :  { %v1286_v28 = vcombine.low %v1135_v40, %v1139_v12 }
 0x198   :  { %v921_v34 = vrot.slane %v913_v14, %v8670_v9 }
 0x1ed   :  { %v1557_v15 = vpop.xlane.xlu1 %1556 }
 0x1ee   :  { %v1558_v3 = vmul.f32 0.015625, %v1557_v15  ;;  %v914_v15 = vcombine.low %v764_v43, %v768_v44  ;;  %v1300_v44 = vrot.slane %v1286_v28, %v8670_v9 }
 0x1f0   :  { %v1559_v22 = vadd.f32 1e-05, %v1558_v3  ;;  %v930_v3 = vcombine.low %v772_v46, %v776_v5  ;;  %v928_v39 = vrot.slane %v914_v15, %v8670_v9 }
 0x1f1   :  { %v725_v24 = vpop.xlane.xlu1 %724 }
 0x1f2   :  { %8529 = vrsqrt.f32 %v1559_v22  ;;  %v726_v31 = vmul.f32 0.0002, %v725_v24  ;;  %v931_v22 = vcombine.low %v780_v62, %v784_v63  ;;  %v1268_v24 = vcombine.low %v1111_v41, %v1115_v30 }
 0x1f3   :  { %v938_v52 = vrot.slane %v930_v3, %v8670_v9 }
 0x1f4   :  { %v727_v33 = vadd.f32 1e-05, %v726_v31  ;;  %v1269_v31 = vcombine.low %v1119_v17, %v1123_v56  ;;  %v945_v10 = vrot.slane %v931_v22, %v8670_v9  ;;  %v1276_v16 = vrot.slane %v1268_v24, %v8670_v9 }
 0x1f6   :  { %8531 = vrsqrt.f32 %v727_v33  ;;  %v1285_v33 = vcombine.low %v1127_v2, %v1131_v13  ;;  %v1283_v35 = vrot.slane %v1269_v31, %v8670_v9  ;;  %v946_v62 = vcombine.low %v938_v52, %v945_v10  ;;  %v7626_v10 = vld [vmem:[%s11506_s13 + $0x64] ss:$8 sps:$4 sm:$0xff]  }
 0x1f8   :  { %v1293_v43 = vrot.slane %v1285_v33, %v8670_v9  ;;  %v1284_v30 = vcombine.low %v1276_v16, %v1283_v35  ;;  %v7621_v35 = vld [vmem:[%s11506_s13 + $0x360] ss:$8 sps:$4 sm:$0xff]  }
 0x1fa   :  { %v1301_v17 = vcombine.low %v1293_v43, %v1300_v44  ;;  %v7629_v43 = vld [vmem:[%s11506_s13 + $0x354] ss:$8 sps:$4 sm:$0xff]  }
 0x1fb   :  { %v7632_v44 = vld [vmem:[%s11506_s13 + $0x54] ss:$8 sps:$4 sm:$0xff]  }
 0x1ff   :  { %v8530_v53 = vpop.eup %8529 }
 0x200   :  { %v1561_v49 = vmul.f32 %v8530_v53, %v8995_v61  ;;  %v929_v53 = vcombine.low %v921_v34, %v928_v39  ;;  %v7618_v34 = vld [vmem:[%s11506_s13 + $0x70] ss:$8 sps:$4 sm:$0xff]  }
 0x202   :  { %v1568_v41 = vmul.f32 %v6866_v21, %v1561_v49  ;;  %v7623_v49 = vld [vmem:[%s11506_s13 + $0x364] ss:$8 sps:$4 sm:$0xff]  }
 0x203   :  { %v8532_v46 = vpop.eup %8531 }
 0x204   :  { %v9337_v61 = vrot.slane %v8532_v46, %v8849_v57  ;;  %v1575_v5 = vadd.f32 %v6867_v42, %v1568_v41  ;;  %v7624_v42 = vld [vmem:[%s11506_s13 + $0x60] ss:$8 sps:$4 sm:$0xff]   ;;  %v7627_v41 = vld [vmem:[%s11506_s13 + $0x350] ss:$8 sps:$4 sm:$0xff]  }
 0x206   :  { %v738_v56 = vmul.f32 %v9337_v61, %v8865_v0  ;;  %8533 = vtanh.f32 %v1575_v5  ;;  %v739_v63 = vmul.f32 %v9337_v61, %v8869_v1  ;;  %v740_v2 = vmul.f32 %v9337_v61, %v8884_v11  ;;  %v7635_v5 = vld [vmem:[%s11506_s13 + $0x344] ss:$8 sps:$4 sm:$0xff]  }
 0x207   :  { %v741_v13 = vmul.f32 %v9337_v61, %v8898_v29  ;;  %v742_v57 = vmul.f32 %v9337_v61, %v8910_v47  ;;  %v743_v40 = vmul.f32 %v9337_v61, %v8925_v8  ;;  %v744_v12 = vmul.f32 %v9337_v61, %v8941_v27 }
 0x208   :  { %v1093_v0 = vmul.f32 %v929_v53, %v738_v56  ;;  %v1094_v14 = vmul.f32 %v946_v62, %v739_v63  ;;  %v1095_v15 = vmul.f32 %v9145_v25, %v740_v2  ;;  %v745_v1 = vmul.f32 %v9337_v61, %v8955_v50  ;;  %v7630_v53 = vld [vmem:[%s11506_s13 + $0x50] ss:$8 sps:$4 sm:$0xff]   ;;  %v7638_v62 = vld [vmem:[%s11506_s13 + $0x44] ss:$8 sps:$4 sm:$0xff]   ;;  %v7636_v56 = vld [vmem:[%s11506_s13 + $0x40] ss:$8 sps:$4 sm:$0xff]  }
 0x209   :  { %v1096_v11 = vmul.f32 %v9173_v54, %v741_v13  ;;  %v1097_v29 = vmul.f32 %v9199_v19, %v742_v57  ;;  %v1098_v3 = vmul.f32 %v9223_v55, %v743_v40  ;;  %v1099_v47 = vmul.f32 %v9241_v32, %v744_v12  ;;  %v7641_v63 = vld [vmem:[%s11506_s13 + $0x334] ss:$8 sps:$4 sm:$0xff]   ;;  %v7639_v13 = vld [vmem:[%s11506_s13 + $0x330] ss:$8 sps:$4 sm:$0xff]   ;;  %v7648_v40 = vld [vmem:[%s11506_s13 + $0x20] ss:$8 sps:$4 sm:$0xff]  }
 0x20a   :  { %v1448_v22 = vadd.f32 %v1284_v30, %v1093_v0  ;;  %v9360_v8 = vadd.f32 %v1301_v17, %v1094_v14  ;;  %v9363_v27 = vadd.f32 %v9155_v37, %v1095_v15  ;;  %v1100_v24 = vmul.f32 %v9250_v48, %v745_v1  ;;  %v7633_v17 = vld [vmem:[%s11506_s13 + $0x340] ss:$8 sps:$4 sm:$0xff]   ;;  %v7653_v12 = vld [vmem:[%s11506_s13 + $0x314] ss:$8 sps:$4 sm:$0xff]   ;;  %v7651_v14 = vld [vmem:[%s11506_s13 + $0x310] ss:$8 sps:$4 sm:$0xff]  }
 0x20b   :  { %v9367_v25 = vadd.f32 %v9186_v4, %v1096_v11  ;;  %v9370_v50 = vadd.f32 %v9213_v51, %v1097_v29  ;;  %v9373_v54 = vadd.f32 %v9231_v36, %v1098_v3  ;;  %v9376_v19 = vadd.f32 %v9246_v18, %v1099_v47  ;;  %v7615_v18 = vld [vmem:[%s11506_s13 + $0x370] ss:$8 sps:$4 sm:$0xff]   ;;  %v7656_v0 = vld [vmem:[%s11506_s13 + $0x14] ss:$8 sps:$4 sm:$0xff]   ;;  %v7659_v1 = vld [vmem:[%s11506_s13 + $0x304] ss:$8 sps:$4 sm:$0xff]  }
 0x20c   :  { %v1701_v55 = vcombine.high %v1448_v22, %v1448_v22  ;;  %v1718_v32 = vcombine.high %v9360_v8, %v9360_v8  ;;  %v9385_v4 = vrot.slane %v1448_v22, %v8670_v9  ;;  %v9419_v46 = vadd.f32 %v9260_v58, %v1100_v24  ;;  %v7654_v15 = vld [vmem:[%s11506_s13 + $0x10] ss:$8 sps:$4 sm:$0xff]   ;;  %v7662_v11 = vld [vmem:[%s11506_s13 + $0x4] ss:$8 sps:$4 sm:$0xff]   ;;  %v7657_v29 = vld [vmem:[%s11506_s13 + $0x300] ss:$8 sps:$4 sm:$0xff]  }
 0x20d   :  { %v746_v30 = vmul.f32 %v9337_v61, %v8970_v20  ;;  %v747_v58 = vmul.f32 %v9337_v61, %v8982_v38  ;;  %v7644_v38 = vld [vmem:[%s11506_s13 + $0x34] ss:$8 sps:$4 sm:$0xff]   ;;  %v7660_v3 = vld [vmem:[%s11506_s13] ss:$8 sps:$4 sm:$0xff]   ;;  %v7663_v24 = vld [vmem:[%s11506_s13 + $0x3f0] ss:$8 sps:$4 sm:$0xff]  }
 0x20e   :  { %v1715_v37 = vrot.slane %v1701_v55, %v8670_v9  ;;  %v9382_v48 = vrot.slane %v1718_v32, %v8670_v9  ;;  %v1716_v33 = vcombine.high %v9385_v4, %v9385_v4  ;;  %v7665_v47 = vld [vmem:[%s11506_s13 + $0x3f4] ss:$8 sps:$4 sm:$0xff]   ;;  %v7666_v55 = vld [vmem:[%s11506_s13 + $0xf0] ss:$8 sps:$4 sm:$0xff]   ;;  %v7671_v32 = vld [vmem:[%s11506_s13 + $0x3e4] ss:$8 sps:$4 sm:$0xff]  }
 0x20f   :  { %v1101_v20 = vmul.f32 %v9278_v45, %v746_v30  ;;  %v1102_v61 = vmul.f32 %v9287_v60, %v747_v58  ;;  %v7642_v45 = vld [vmem:[%s11506_s13 + $0x30] ss:$8 sps:$4 sm:$0xff]   ;;  %v7647_v60 = vld [vmem:[%s11506_s13 + $0x324] ss:$8 sps:$4 sm:$0xff]   ;;  %v7668_v22 = vld [vmem:[%s11506_s13 + $0xf4] ss:$8 sps:$4 sm:$0xff]  }
 0x210   :  { %v1717_v51 = vcombine.high %v1715_v37, %v1715_v37  ;;  %v1734_v36 = vcombine.high %v9382_v48, %v9382_v48  ;;  %v1913_v21 = vpack.c.bf16 %v1715_v37, %v1715_v37  ;;  %v1912_v16 = vpack.c.bf16 %v1716_v33, %v1716_v33  ;;  %v7674_v37 = vld [vmem:[%s11506_s13 + $0xe4] ss:$8 sps:$4 sm:$0xff]   ;;  %v7675_v33 = vld [vmem:[%s11506_s13 + $0x3d0] ss:$8 sps:$4 sm:$0xff]  }
 0x211   :  { %v9449_v2 = vadd.f32 %v9285_v6, %v1101_v20  ;;  %v9455_v57 = vadd.f32 %v9291_v7, %v1102_v61  ;;  %v7650_v6 = vld [vmem:[%s11506_s13 + $0x24] ss:$8 sps:$4 sm:$0xff]   ;;  %v7645_v7 = vld [vmem:[%s11506_s13 + $0x320] ss:$8 sps:$4 sm:$0xff]   ;;  %v7699_v30 = vld [vmem:[%s11506_s13 + $0x390] ss:$8 sps:$4 sm:$0xff]  }
 0x212   :  { %v1914_v31 = vpack.c.bf16 %v1717_v51, %v1717_v51  ;;  %v1918_v52 = vpack.c.bf16 %v1734_v36, %v1734_v36  ;;  %v7669_v51 = vld [vmem:[%s11506_s13 + $0x3e0] ss:$8 sps:$4 sm:$0xff]   ;;  %v7702_v58 = vld [vmem:[%s11506_s13 + $0x90] ss:$8 sps:$4 sm:$0xff]  }
 0x213   :  { %v8534_v28 = vpop.eup %8533  ;;  %v7672_v36 = vld [vmem:[%s11506_s13 + $0xe0] ss:$8 sps:$4 sm:$0xff]  }
 0x214   :  { %5878 = vmatprep.mubr.bf16.mxu0 %v1914_v31  ;;  %v2576_v39 = vpack.c.bf16 %v8534_v28, %v8534_v28  ;;  %v7677_v31 = vld [vmem:[%s11506_s13 + $0x3d4] ss:$8 sps:$4 sm:$0xff]   ;;  %v7678_v28 = vld [vmem:[%s11506_s13 + $0xd0] ss:$8 sps:$4 sm:$0xff]   ;;  %v7705_v20 = vld [vmem:[%s11506_s13 + $0x380] ss:$8 sps:$4 sm:$0xff]  }
 0x215   :  { %5879 = vmatmul.mubr.bf16.vlgmr.msra.gmra.mxu0 %v1913_v21  ;;  %v7686_v21 = vld [vmem:[%s11506_s13 + $0xc4] ss:$8 sps:$4 sm:$0xff]   ;;  %v7708_v61 = vld [vmem:[%s11506_s13 + $0x80] ss:$8 sps:$4 sm:$0xff]  }
 0x216   :  { %5929 = vmatpush1.bf16.msra.mxu0 %v7615_v18  ;;  %6880 = vmatmul.mubr.msk.bf16.vlgmr.msra.gmra.mxu1 %vm2625_vm7, %v2576_v39  ;;  %v7680_v18 = vld [vmem:[%s11506_s13 + $0xd4] ss:$8 sps:$4 sm:$0xff]   ;;  %v7681_v39 = vld [vmem:[%s11506_s13 + $0x3c0] ss:$8 sps:$4 sm:$0xff]  }
 0x217   :  { %5806 = vmatpush1.bf16.msra.mxu1 %v7618_v34  ;;  %5960 = vmatprep.mubr.bf16.mxu0 %v1918_v52  ;;  %v7683_v34 = vld [vmem:[%s11506_s13 + $0x3c4] ss:$8 sps:$4 sm:$0xff]   ;;  %v7689_v52 = vld [vmem:[%s11506_s13 + $0x3b4] ss:$8 sps:$4 sm:$0xff]  }
 0x218   :  { %5837 = vmatprep.mubr.bf16.mxu1 %v1912_v16  ;;  %5930 = vmatprep.subr.bf16.mxu0 %v7623_v49  ;;  %v7684_v49 = vld [vmem:[%s11506_s13 + $0xc0] ss:$8 sps:$4 sm:$0xff]   ;;  %v7687_v16 = vld [vmem:[%s11506_s13 + $0x3b0] ss:$8 sps:$4 sm:$0xff]  }
 0x219   :  { %5807 = vmatprep.subr.bf16.mxu1 %v7626_v10  ;;  %v7692_v10 = vld [vmem:[%s11506_s13 + $0xb4] ss:$8 sps:$4 sm:$0xff]  }
 0x21a   :  { %5931 = vmatpush1.bf16.msra.mxu0 %v7621_v35  ;;  %v7690_v35 = vld [vmem:[%s11506_s13 + $0xb0] ss:$8 sps:$4 sm:$0xff]  }
 0x21b   :  { %5808 = vmatpush1.bf16.msra.mxu1 %v7624_v42  ;;  %5932 = vmatprep.subr.bf16.mxu0 %v7629_v43  ;;  %v7695_v42 = vld [vmem:[%s11506_s13 + $0x3a4] ss:$8 sps:$4 sm:$0xff]  }
 0x21c   :  { %5809 = vmatprep.subr.bf16.mxu1 %v7632_v44  ;;  %v7698_v43 = vld [vmem:[%s11506_s13 + $0xa4] ss:$8 sps:$4 sm:$0xff]   ;;  %v7693_v44 = vld [vmem:[%s11506_s13 + $0x3a0] ss:$8 sps:$4 sm:$0xff]  }
 0x21e   :  { %5933 = vmatpush1.bf16.msra.mxu0 %v7627_v41  ;;  %v7696_v41 = vld [vmem:[%s11506_s13 + $0xa0] ss:$8 sps:$4 sm:$0xff]  }
 0x21f   :  { %5810 = vmatpush1.bf16.msra.mxu1 %v7630_v53  ;;  %5934 = vmatprep.subr.bf16.mxu0 %v7635_v5  ;;  %v7701_v53 = vld [vmem:[%s11506_s13 + $0x394] ss:$8 sps:$4 sm:$0xff]  }
 0x220   :  { %5811 = vmatprep.subr.bf16.mxu1 %v7638_v62  ;;  %v7704_v5 = vld [vmem:[%s11506_s13 + $0x94] ss:$8 sps:$4 sm:$0xff]   ;;  %v1735_v62 = vcombine.high %v9363_v27, %v9363_v27 }
 0x222   :  { %5935 = vmatpush1.bf16.msra.mxu0 %v7633_v17  ;;  %v7707_v17 = vld [vmem:[%s11506_s13 + $0x384] ss:$8 sps:$4 sm:$0xff]  }
 0x223   :  { %5812 = vmatpush1.bf16.msra.mxu1 %v7636_v56  ;;  %5936 = vmatprep.subr.bf16.mxu0 %v7641_v63  ;;  %v7710_v56 = vld [vmem:[%s11506_s13 + $0x84] ss:$8 sps:$4 sm:$0xff]   ;;  %v9589_v63 = vrot.slane %v1735_v62, %v8670_v9 }
 0x224   :  { %5813 = vmatprep.subr.bf16.mxu1 %v7644_v38  ;;  %v9596_v38 = vrot.slane %v9360_v8, %v8670_v9  ;;  %v7711_v8 = vld [vmem:[%s11506_s13 + $0x570] ss:$8 sps:$4 sm:$0xff]   ;;  %v7770_v62 = vld [vmem:[%s11506_s13 + $0x2e4] ss:$8 sps:$4 sm:$0xff]  }
 0x226   :  { %5937 = vmatpush1.bf16.msra.mxu0 %v7639_v13  ;;  %v7713_v13 = vld [vmem:[%s11506_s13 + $0x574] ss:$8 sps:$4 sm:$0xff]  }
 0x227   :  { %5814 = vmatpush1.bf16.msra.mxu1 %v7642_v45  ;;  %5938 = vmatprep.subr.bf16.mxu0 %v7647_v60  ;;  %v7716_v45 = vld [vmem:[%s11506_s13 + $0x274] ss:$8 sps:$4 sm:$0xff]   ;;  %v1751_v60 = vcombine.high %v9589_v63, %v9589_v63 }
 0x228   :  { %5815 = vmatprep.subr.bf16.mxu1 %v7650_v6  ;;  %v1733_v6 = vcombine.high %v9596_v38, %v9596_v38 }
 0x22a   :  { %5939 = vmatpush1.bf16.msra.mxu0 %v7645_v7  ;;  %v1917_v7 = vpack.c.bf16 %v9382_v48, %v9382_v48  ;;  %v1916_v48 = vpack.c.bf16 %v1733_v6, %v1733_v6  ;;  %v7785_v6 = vld [vmem:[%s11506_s13 + $0x5b4] ss:$8 sps:$4 sm:$0xff]  }
 0x22b   :  { %5816 = vmatpush1.bf16.msra.mxu1 %v7648_v40  ;;  %5940 = vmatprep.subr.bf16.mxu0 %v7653_v12  ;;  %v7714_v40 = vld [vmem:[%s11506_s13 + $0x270] ss:$8 sps:$4 sm:$0xff]   ;;  %v1911_v12 = vpack.c.bf16 %v9385_v4, %v9385_v4  ;;  %v7720_v4 = vld [vmem:[%s11506_s13 + $0x260] ss:$8 sps:$4 sm:$0xff]  }
 0x22c   :  { %5817 = vmatprep.subr.bf16.mxu1 %v7656_v0  ;;  %v7719_v0 = vld [vmem:[%s11506_s13 + $0x564] ss:$8 sps:$4 sm:$0xff]  }
 0x22e   :  { %5941 = vmatpush1.bf16.msra.mxu0 %v7651_v14  ;;  %v1922_v14 = vpack.c.bf16 %v1751_v60, %v1751_v60  ;;  %v7777_v60 = vld [vmem:[%s11506_s13 + $0x5c0] ss:$8 sps:$4 sm:$0xff]  }
 0x22f   :  { %5818 = vmatpush1.bf16.msra.mxu1 %v7654_v15  ;;  %5942 = vmatprep.subr.bf16.mxu0 %v7659_v1  ;;  %v7722_v15 = vld [vmem:[%s11506_s13 + $0x264] ss:$8 sps:$4 sm:$0xff]   ;;  %v7717_v1 = vld [vmem:[%s11506_s13 + $0x560] ss:$8 sps:$4 sm:$0xff]  }
 0x230   :  { %5819 = vmatprep.subr.bf16.mxu1 %v7662_v11  ;;  %v7725_v11 = vld [vmem:[%s11506_s13 + $0x554] ss:$8 sps:$4 sm:$0xff]  }
 0x232   :  { %5943 = vmatpush1.bf16.msra.mxu0 %v7657_v29  ;;  %v7728_v29 = vld [vmem:[%s11506_s13 + $0x254] ss:$8 sps:$4 sm:$0xff]  }
 0x233   :  { %5820 = vmatpush1.bf16.msra.mxu1 %v7660_v3  ;;  %5944 = vmatprep.subr.bf16.mxu0 %v7665_v47  ;;  %v7723_v3 = vld [vmem:[%s11506_s13 + $0x550] ss:$8 sps:$4 sm:$0xff]  }
 0x234   :  { %5821 = vmatprep.subr.bf16.mxu1 %v7668_v22  ;;  %v7726_v47 = vld [vmem:[%s11506_s13 + $0x250] ss:$8 sps:$4 sm:$0xff]   ;;  %v7731_v22 = vld [vmem:[%s11506_s13 + $0x544] ss:$8 sps:$4 sm:$0xff]  }
 0x236   :  { %5945 = vmatpush2.bf16.msra.mxu0 %v7663_v24  ;;  %v7734_v24 = vld [vmem:[%s11506_s13 + $0x244] ss:$8 sps:$4 sm:$0xff]  }
 0x237   :  { %5822 = vmatpush2.bf16.msra.mxu1 %v7666_v55  ;;  %5946 = vmatprep.subr.bf16.mxu0 %v7671_v32  ;;  %v7729_v55 = vld [vmem:[%s11506_s13 + $0x540] ss:$8 sps:$4 sm:$0xff]  }
 0x238   :  { %5823 = vmatprep.subr.bf16.mxu1 %v7674_v37  ;;  %v7732_v32 = vld [vmem:[%s11506_s13 + $0x240] ss:$8 sps:$4 sm:$0xff]   ;;  %v7737_v37 = vld [vmem:[%s11506_s13 + $0x534] ss:$8 sps:$4 sm:$0xff]  }
 0x23a   :  { %5947 = vmatpush2.bf16.msra.mxu0 %v7669_v51  ;;  %v7740_v51 = vld [vmem:[%s11506_s13 + $0x234] ss:$8 sps:$4 sm:$0xff]  }
 0x23b   :  { %5824 = vmatpush2.bf16.msra.mxu1 %v7672_v36  ;;  %5948 = vmatprep.subr.bf16.mxu0 %v7677_v31  ;;  %v7735_v36 = vld [vmem:[%s11506_s13 + $0x530] ss:$8 sps:$4 sm:$0xff]  }
 0x23c   :  { %5825 = vmatprep.subr.bf16.mxu1 %v7680_v18  ;;  %v7738_v31 = vld [vmem:[%s11506_s13 + $0x230] ss:$8 sps:$4 sm:$0xff]   ;;  %v7743_v18 = vld [vmem:[%s11506_s13 + $0x524] ss:$8 sps:$4 sm:$0xff]  }
 0x23e   :  { %5949 = vmatpush2.bf16.msra.mxu0 %v7675_v33  ;;  %v7746_v33 = vld [vmem:[%s11506_s13 + $0x224] ss:$8 sps:$4 sm:$0xff]  }
 0x23f   :  { %5826 = vmatpush2.bf16.msra.mxu1 %v7678_v28  ;;  %5950 = vmatprep.subr.bf16.mxu0 %v7683_v34  ;;  %v7741_v28 = vld [vmem:[%s11506_s13 + $0x520] ss:$8 sps:$4 sm:$0xff]  }
 0x240   :  { %5827 = vmatprep.subr.bf16.mxu1 %v7686_v21  ;;  %v7744_v34 = vld [vmem:[%s11506_s13 + $0x220] ss:$8 sps:$4 sm:$0xff]   ;;  %v7749_v21 = vld [vmem:[%s11506_s13 + $0x514] ss:$8 sps:$4 sm:$0xff]  }
 0x242   :  { %5951 = vmatpush2.bf16.msra.mxu0 %v7681_v39  ;;  %v7752_v39 = vld [vmem:[%s11506_s13 + $0x214] ss:$8 sps:$4 sm:$0xff]  }
 0x243   :  { %5828 = vmatpush2.bf16.msra.mxu1 %v7684_v49  ;;  %5952 = vmatprep.subr.bf16.mxu0 %v7689_v52  ;;  %v7747_v49 = vld [vmem:[%s11506_s13 + $0x510] ss:$8 sps:$4 sm:$0xff]  }
 0x244   :  { %5829 = vmatprep.subr.bf16.mxu1 %v7692_v10  ;;  %v7750_v52 = vld [vmem:[%s11506_s13 + $0x210] ss:$8 sps:$4 sm:$0xff]   ;;  %v7755_v10 = vld [vmem:[%s11506_s13 + $0x504] ss:$8 sps:$4 sm:$0xff]  }
 0x246   :  { %5953 = vmatpush2.bf16.msra.mxu0 %v7687_v16  ;;  %v7758_v16 = vld [vmem:[%s11506_s13 + $0x204] ss:$8 sps:$4 sm:$0xff]  }
 0x247   :  { %5830 = vmatpush2.bf16.msra.mxu1 %v7690_v35  ;;  %5954 = vmatprep.subr.bf16.mxu0 %v7695_v42  ;;  %v7753_v35 = vld [vmem:[%s11506_s13 + $0x500] ss:$8 sps:$4 sm:$0xff]  }
 0x248   :  { %5831 = vmatprep.subr.bf16.mxu1 %v7698_v43  ;;  %v7756_v42 = vld [vmem:[%s11506_s13 + $0x200] ss:$8 sps:$4 sm:$0xff]   ;;  %v7761_v43 = vld [vmem:[%s11506_s13 + $0x5f4] ss:$8 sps:$4 sm:$0xff]  }
 0x24a   :  { %5955 = vmatpush2.bf16.msra.mxu0 %v7693_v44  ;;  %v7764_v44 = vld [vmem:[%s11506_s13 + $0x2f4] ss:$8 sps:$4 sm:$0xff]  }
 0x24b   :  { %5832 = vmatpush2.bf16.msra.mxu1 %v7696_v41  ;;  %5956 = vmatprep.subr.bf16.mxu0 %v7701_v53  ;;  %v7759_v41 = vld [vmem:[%s11506_s13 + $0x5f0] ss:$8 sps:$4 sm:$0xff]  }
 0x24c   :  { %5833 = vmatprep.subr.bf16.mxu1 %v7704_v5  ;;  %v7762_v53 = vld [vmem:[%s11506_s13 + $0x2f0] ss:$8 sps:$4 sm:$0xff]   ;;  %v7767_v5 = vld [vmem:[%s11506_s13 + $0x5e4] ss:$8 sps:$4 sm:$0xff]  }
 0x24e   :  { %5957 = vmatpush2.bf16.msra.mxu0 %v7699_v30  ;;  %v7765_v30 = vld [vmem:[%s11506_s13 + $0x5e0] ss:$8 sps:$4 sm:$0xff]  }
 0x24f   :  { %5834 = vmatpush2.bf16.msra.mxu1 %v7702_v58  ;;  %5958 = vmatprep.subr.bf16.mxu0 %v7707_v17  ;;  %v7768_v58 = vld [vmem:[%s11506_s13 + $0x2e0] ss:$8 sps:$4 sm:$0xff]   ;;  %v7773_v17 = vld [vmem:[%s11506_s13 + $0x5d4] ss:$8 sps:$4 sm:$0xff]  }
 0x250   :  { %5835 = vmatprep.subr.bf16.mxu1 %v7710_v56  ;;  %v7776_v56 = vld [vmem:[%s11506_s13 + $0x2d4] ss:$8 sps:$4 sm:$0xff]  }
 0x252   :  { %5959 = vmatpush2.bf16.msra.mxu0 %v7705_v20  ;;  %v7771_v20 = vld [vmem:[%s11506_s13 + $0x5d0] ss:$8 sps:$4 sm:$0xff]  }
 0x253   :  { %5836 = vmatpush2.bf16.msra.mxu1 %v7708_v61  ;;  %6010 = vmatprep.subr.bf16.mxu0 %v7713_v13  ;;  %v7774_v61 = vld [vmem:[%s11506_s13 + $0x2d0] ss:$8 sps:$4 sm:$0xff]   ;;  %v7779_v13 = vld [vmem:[%s11506_s13 + $0x5c4] ss:$8 sps:$4 sm:$0xff]  }
 0x254   :  { %5887 = vmatprep.subr.bf16.mxu1 %v7716_v45  ;;  %v7782_v45 = vld [vmem:[%s11506_s13 + $0x2c4] ss:$8 sps:$4 sm:$0xff]  }
 0x255   :  { %5961 = vmatmul.mubr.bf16.vlgmr.msra.gmra.mxu0 %v1917_v7  ;;  %v7788_v7 = vld [vmem:[%s11506_s13 + $0x2b4] ss:$8 sps:$4 sm:$0xff]  }
 0x256   :  { %5838 = vmatmul.mubr.bf16.vlgmr.msra.gmra.mxu1 %v1911_v12  ;;  %6011 = vmatpush1.bf16.msra.mxu0 %v7711_v8  ;;  %v7780_v8 = vld [vmem:[%s11506_s13 + $0x2c0] ss:$8 sps:$4 sm:$0xff]   ;;  %v7786_v12 = vld [vmem:[%s11506_s13 + $0x2b0] ss:$8 sps:$4 sm:$0xff]  }
 0x257   :  { %6042 = vmatprep.mubr.bf16.mxu0 %v1922_v14  ;;  %5888 = vmatpush1.bf16.msra.mxu1 %v7714_v40  ;;  %v7783_v40 = vld [vmem:[%s11506_s13 + $0x5b0] ss:$8 sps:$4 sm:$0xff]   ;;  %v7794_v14 = vld [vmem:[%s11506_s13 + $0x2a4] ss:$8 sps:$4 sm:$0xff]  }
 0x258   :  { %5919 = vmatprep.mubr.bf16.mxu1 %v1916_v48  ;;  %6012 = vmatprep.subr.bf16.mxu0 %v7719_v0  ;;  %v7791_v0 = vld [vmem:[%s11506_s13 + $0x5a4] ss:$8 sps:$4 sm:$0xff]   ;;  %v7792_v48 = vld [vmem:[%s11506_s13 + $0x2a0] ss:$8 sps:$4 sm:$0xff]  }
 0x259   :  { %5889 = vmatprep.subr.bf16.mxu1 %v7722_v15  ;;  %v7789_v15 = vld [vmem:[%s11506_s13 + $0x5a0] ss:$8 sps:$4 sm:$0xff]  }
 0x25a   :  { %6013 = vmatpush1.bf16.msra.mxu0 %v7717_v1  ;;  %v7797_v1 = vld [vmem:[%s11506_s13 + $0x594] ss:$8 sps:$4 sm:$0xff]  }
 0x25b   :  { %5890 = vmatpush1.bf16.msra.mxu1 %v7720_v4  ;;  %6014 = vmatprep.subr.bf16.mxu0 %v7725_v11  ;;  %v7800_v4 = vld [vmem:[%s11506_s13 + $0x294] ss:$8 sps:$4 sm:$0xff]   ;;  %v1752_v11 = vcombine.high %v9367_v25, %v9367_v25 }
 0x25c   :  { %5891 = vmatprep.subr.bf16.mxu1 %v7728_v29  ;;  %v7795_v29 = vld [vmem:[%s11506_s13 + $0x590] ss:$8 sps:$4 sm:$0xff]  }
 0x25e   :  { %6015 = vmatpush1.bf16.msra.mxu0 %v7723_v3  ;;  %v7798_v3 = vld [vmem:[%s11506_s13 + $0x290] ss:$8 sps:$4 sm:$0xff]  }
 0x25f   :  { %5892 = vmatpush1.bf16.msra.mxu1 %v7726_v47  ;;  %6016 = vmatprep.subr.bf16.mxu0 %v7731_v22  ;;  %v7803_v47 = vld [vmem:[%s11506_s13 + $0x584] ss:$8 sps:$4 sm:$0xff]  }
 0x260   :  { %5893 = vmatprep.subr.bf16.mxu1 %v7734_v24  ;;  %v7806_v22 = vld [vmem:[%s11506_s13 + $0x284] ss:$8 sps:$4 sm:$0xff]   ;;  %v9798_v24 = vrot.slane %v1752_v11, %v8670_v9  ;;  %v7861_v11 = vld [vmem:[%s11506_s13 + $0x7e0] ss:$8 sps:$4 sm:$0xff]  }
 0x262   :  { %6017 = vmatpush1.bf16.msra.mxu0 %v7729_v55  ;;  %v7801_v55 = vld [vmem:[%s11506_s13 + $0x580] ss:$8 sps:$4 sm:$0xff]  }
 0x263   :  { %5894 = vmatpush1.bf16.msra.mxu1 %v7732_v32  ;;  %6018 = vmatprep.subr.bf16.mxu0 %v7737_v37  ;;  %v9805_v32 = vrot.slane %v9363_v27, %v8670_v9  ;;  %v7804_v37 = vld [vmem:[%s11506_s13 + $0x280] ss:$8 sps:$4 sm:$0xff]   ;;  %v7807_v27 = vld [vmem:[%s11506_s13 + $0x770] ss:$8 sps:$4 sm:$0xff]  }
 0x264   :  { %5895 = vmatprep.subr.bf16.mxu1 %v7740_v51  ;;  %v7809_v51 = vld [vmem:[%s11506_s13 + $0x774] ss:$8 sps:$4 sm:$0xff]  }
 0x266   :  { %6019 = vmatpush1.bf16.msra.mxu0 %v7735_v36  ;;  %v7812_v36 = vld [vmem:[%s11506_s13 + $0x474] ss:$8 sps:$4 sm:$0xff]  }
 0x267   :  { %5896 = vmatpush1.bf16.msra.mxu1 %v7738_v31  ;;  %6020 = vmatprep.subr.bf16.mxu0 %v7743_v18  ;;  %v1768_v31 = vcombine.high %v9798_v24, %v9798_v24  ;;  %v1750_v18 = vcombine.high %v9805_v32, %v9805_v32 }
 0x268   :  { %5897 = vmatprep.subr.bf16.mxu1 %v7746_v33  ;;  %v1921_v33 = vpack.c.bf16 %v9589_v63, %v9589_v63 }
 0x269   :  { %v1920_v63 = vpack.c.bf16 %v1750_v18, %v1750_v18  ;;  %v7884_v18 = vld [vmem:[%s11506_s13 + $0x4b4] ss:$8 sps:$4 sm:$0xff]  }
 0x26a   :  { %6021 = vmatpush1.bf16.msra.mxu0 %v7741_v28  ;;  %v7810_v28 = vld [vmem:[%s11506_s13 + $0x470] ss:$8 sps:$4 sm:$0xff]  }
 0x26b   :  { %5898 = vmatpush1.bf16.msra.mxu1 %v7744_v34  ;;  %6022 = vmatprep.subr.bf16.mxu0 %v7749_v21  ;;  %v1915_v34 = vpack.c.bf16 %v9596_v38, %v9596_v38  ;;  %v7815_v21 = vld [vmem:[%s11506_s13 + $0x764] ss:$8 sps:$4 sm:$0xff]   ;;  %v7816_v38 = vld [vmem:[%s11506_s13 + $0x460] ss:$8 sps:$4 sm:$0xff]  }
 0x26c   :  { %5899 = vmatprep.subr.bf16.mxu1 %v7752_v39  ;;  %v1926_v39 = vpack.c.bf16 %v1768_v31, %v1768_v31  ;;  %v7876_v31 = vld [vmem:[%s11506_s13 + $0x4c0] ss:$8 sps:$4 sm:$0xff]  }
 0x26e   :  { %6023 = vmatpush1.bf16.msra.mxu0 %v7747_v49  ;;  %v7818_v49 = vld [vmem:[%s11506_s13 + $0x464] ss:$8 sps:$4 sm:$0xff]  }
 0x26f   :  { %5900 = vmatpush1.bf16.msra.mxu1 %v7750_v52  ;;  %6024 = vmatprep.subr.bf16.mxu0 %v7755_v10  ;;  %v7813_v52 = vld [vmem:[%s11506_s13 + $0x760] ss:$8 sps:$4 sm:$0xff]   ;;  %v7821_v10 = vld [vmem:[%s11506_s13 + $0x754] ss:$8 sps:$4 sm:$0xff]  }
 0x270   :  { %5901 = vmatprep.subr.bf16.mxu1 %v7758_v16  ;;  %v7824_v16 = vld [vmem:[%s11506_s13 + $0x454] ss:$8 sps:$4 sm:$0xff]  }
 0x272   :  { %6025 = vmatpush1.bf16.msra.mxu0 %v7753_v35  ;;  %v7819_v35 = vld [vmem:[%s11506_s13 + $0x750] ss:$8 sps:$4 sm:$0xff]  }
 0x273   :  { %5902 = vmatpush1.bf16.msra.mxu1 %v7756_v42  ;;  %6026 = vmatprep.subr.bf16.mxu0 %v7761_v43  ;;  %v7822_v42 = vld [vmem:[%s11506_s13 + $0x450] ss:$8 sps:$4 sm:$0xff]   ;;  %v7827_v43 = vld [vmem:[%s11506_s13 + $0x744] ss:$8 sps:$4 sm:$0xff]  }
 0x274   :  { %5903 = vmatprep.subr.bf16.mxu1 %v7764_v44  ;;  %v7830_v44 = vld [vmem:[%s11506_s13 + $0x444] ss:$8 sps:$4 sm:$0xff]  }
 0x276   :  { %6027 = vmatpush2.bf16.msra.mxu0 %v7759_v41  ;;  %v7825_v41 = vld [vmem:[%s11506_s13 + $0x740] ss:$8 sps:$4 sm:$0xff]  }
 0x277   :  { %5904 = vmatpush2.bf16.msra.mxu1 %v7762_v53  ;;  %6028 = vmatprep.subr.bf16.mxu0 %v7767_v5  ;;  %v7828_v53 = vld [vmem:[%s11506_s13 + $0x440] ss:$8 sps:$4 sm:$0xff]   ;;  %v7833_v5 = vld [vmem:[%s11506_s13 + $0x734] ss:$8 sps:$4 sm:$0xff]  }
 0x278   :  { %5905 = vmatprep.subr.bf16.mxu1 %v7770_v62  ;;  %v7836_v62 = vld [vmem:[%s11506_s13 + $0x434] ss:$8 sps:$4 sm:$0xff]  }
 0x27a   :  { %6029 = vmatpush2.bf16.msra.mxu0 %v7765_v30  ;;  %v7831_v30 = vld [vmem:[%s11506_s13 + $0x730] ss:$8 sps:$4 sm:$0xff]  }
 0x27b   :  { %5906 = vmatpush2.bf16.msra.mxu1 %v7768_v58  ;;  %6030 = vmatprep.subr.bf16.mxu0 %v7773_v17  ;;  %v7834_v58 = vld [vmem:[%s11506_s13 + $0x430] ss:$8 sps:$4 sm:$0xff]   ;;  %v7839_v17 = vld [vmem:[%s11506_s13 + $0x724] ss:$8 sps:$4 sm:$0xff]  }
 0x27c   :  { %5907 = vmatprep.subr.bf16.mxu1 %v7776_v56  ;;  %v7842_v56 = vld [vmem:[%s11506_s13 + $0x424] ss:$8 sps:$4 sm:$0xff]  }
 0x27e   :  { %6031 = vmatpush2.bf16.msra.mxu0 %v7771_v20  ;;  %v7837_v20 = vld [vmem:[%s11506_s13 + $0x720] ss:$8 sps:$4 sm:$0xff]  }
 0x27f   :  { %5908 = vmatpush2.bf16.msra.mxu1 %v7774_v61  ;;  %6032 = vmatprep.subr.bf16.mxu0 %v7779_v13  ;;  %v7840_v61 = vld [vmem:[%s11506_s13 + $0x420] ss:$8 sps:$4 sm:$0xff]   ;;  %v7845_v13 = vld [vmem:[%s11506_s13 + $0x714] ss:$8 sps:$4 sm:$0xff]  }
 0x280   :  { %5909 = vmatprep.subr.bf16.mxu1 %v7782_v45  ;;  %v7848_v45 = vld [vmem:[%s11506_s13 + $0x414] ss:$8 sps:$4 sm:$0xff]  }
 0x282   :  { %6033 = vmatpush2.bf16.msra.mxu0 %v7777_v60  ;;  %v7843_v60 = vld [vmem:[%s11506_s13 + $0x710] ss:$8 sps:$4 sm:$0xff]  }
 0x283   :  { %5910 = vmatpush2.bf16.msra.mxu1 %v7780_v8  ;;  %6034 = vmatprep.subr.bf16.mxu0 %v7785_v6  ;;  %v7846_v8 = vld [vmem:[%s11506_s13 + $0x410] ss:$8 sps:$4 sm:$0xff]   ;;  %v7851_v6 = vld [vmem:[%s11506_s13 + $0x704] ss:$8 sps:$4 sm:$0xff]  }
 0x284   :  { %5911 = vmatprep.subr.bf16.mxu1 %v7788_v7  ;;  %v7854_v7 = vld [vmem:[%s11506_s13 + $0x404] ss:$8 sps:$4 sm:$0xff]  }
 0x286   :  { %6035 = vmatpush2.bf16.msra.mxu0 %v7783_v40  ;;  %v7849_v40 = vld [vmem:[%s11506_s13 + $0x700] ss:$8 sps:$4 sm:$0xff]  }
 0x287   :  { %5912 = vmatpush2.bf16.msra.mxu1 %v7786_v12  ;;  %6036 = vmatprep.subr.bf16.mxu0 %v7791_v0  ;;  %v7852_v12 = vld [vmem:[%s11506_s13 + $0x400] ss:$8 sps:$4 sm:$0xff]   ;;  %v7857_v0 = vld [vmem:[%s11506_s13 + $0x7f4] ss:$8 sps:$4 sm:$0xff]  }
 0x288   :  { %5913 = vmatprep.subr.bf16.mxu1 %v7794_v14  ;;  %v7860_v14 = vld [vmem:[%s11506_s13 + $0x4f4] ss:$8 sps:$4 sm:$0xff]  }
 0x28a   :  { %6037 = vmatpush2.bf16.msra.mxu0 %v7789_v15  ;;  %v7855_v15 = vld [vmem:[%s11506_s13 + $0x7f0] ss:$8 sps:$4 sm:$0xff]  }
 0x28b   :  { %5914 = vmatpush2.bf16.msra.mxu1 %v7792_v48  ;;  %6038 = vmatprep.subr.bf16.mxu0 %v7797_v1  ;;  %v7858_v48 = vld [vmem:[%s11506_s13 + $0x4f0] ss:$8 sps:$4 sm:$0xff]   ;;  %v7863_v1 = vld [vmem:[%s11506_s13 + $0x7e4] ss:$8 sps:$4 sm:$0xff]  }
 0x28c   :  { %5915 = vmatprep.subr.bf16.mxu1 %v7800_v4  ;;  %v7866_v4 = vld [vmem:[%s11506_s13 + $0x4e4] ss:$8 sps:$4 sm:$0xff]  }
 0x28e   :  { %6039 = vmatpush2.bf16.msra.mxu0 %v7795_v29  ;;  %v7864_v29 = vld [vmem:[%s11506_s13 + $0x4e0] ss:$8 sps:$4 sm:$0xff]  }
 0x28f   :  { %5916 = vmatpush2.bf16.msra.mxu1 %v7798_v3  ;;  %6040 = vmatprep.subr.bf16.mxu0 %v7803_v47  ;;  %v7869_v3 = vld [vmem:[%s11506_s13 + $0x7d4] ss:$8 sps:$4 sm:$0xff]  }
 0x290   :  { %5917 = vmatprep.subr.bf16.mxu1 %v7806_v22  ;;  %v7872_v47 = vld [vmem:[%s11506_s13 + $0x4d4] ss:$8 sps:$4 sm:$0xff]   ;;  %v7867_v22 = vld [vmem:[%s11506_s13 + $0x7d0] ss:$8 sps:$4 sm:$0xff]  }
 0x292   :  { %6041 = vmatpush2.bf16.msra.mxu0 %v7801_v55  ;;  %v7870_v55 = vld [vmem:[%s11506_s13 + $0x4d0] ss:$8 sps:$4 sm:$0xff]  }
 0x293   :  { %5918 = vmatpush2.bf16.msra.mxu1 %v7804_v37  ;;  %6092 = vmatprep.subr.bf16.mxu0 %v7809_v51  ;;  %v7875_v37 = vld [vmem:[%s11506_s13 + $0x7c4] ss:$8 sps:$4 sm:$0xff]  }
 0x294   :  { %5969 = vmatprep.subr.bf16.mxu1 %v7812_v36  ;;  %v7878_v51 = vld [vmem:[%s11506_s13 + $0x4c4] ss:$8 sps:$4 sm:$0xff]   ;;  %v7873_v36 = vld [vmem:[%s11506_s13 + $0x7c0] ss:$8 sps:$4 sm:$0xff]  }
 0x295   :  { %6043 = vmatmul.mubr.bf16.vlgmr.msra.gmra.mxu0 %v1921_v33  ;;  %v7879_v33 = vld [vmem:[%s11506_s13 + $0x7b0] ss:$8 sps:$4 sm:$0xff]  }
 0x296   :  { %5920 = vmatmul.mubr.bf16.vlgmr.msra.gmra.mxu1 %v1915_v34  ;;  %6093 = vmatpush1.bf16.msra.mxu0 %v7807_v27  ;;  %v7881_v27 = vld [vmem:[%s11506_s13 + $0x7b4] ss:$8 sps:$4 sm:$0xff]   ;;  %v7887_v34 = vld [vmem:[%s11506_s13 + $0x7a4] ss:$8 sps:$4 sm:$0xff]  }
 0x297   :  { %6124 = vmatprep.mubr.bf16.mxu0 %v1926_v39  ;;  %5970 = vmatpush1.bf16.msra.mxu1 %v7810_v28  ;;  %v7882_v28 = vld [vmem:[%s11506_s13 + $0x4b0] ss:$8 sps:$4 sm:$0xff]   ;;  %v7885_v39 = vld [vmem:[%s11506_s13 + $0x7a0] ss:$8 sps:$4 sm:$0xff]  }
 0x298   :  { %6001 = vmatprep.mubr.bf16.mxu1 %v1920_v63  ;;  %6094 = vmatprep.subr.bf16.mxu0 %v7815_v21  ;;  %v7890_v21 = vld [vmem:[%s11506_s13 + $0x4a4] ss:$8 sps:$4 sm:$0xff]   ;;  %v7893_v63 = vld [vmem:[%s11506_s13 + $0x794] ss:$8 sps:$4 sm:$0xff]  }
 0x299   :  { %5971 = vmatprep.subr.bf16.mxu1 %v7818_v49  ;;  %v7888_v49 = vld [vmem:[%s11506_s13 + $0x4a0] ss:$8 sps:$4 sm:$0xff]  }
 0x29a   :  { %6095 = vmatpush1.bf16.msra.mxu0 %v7813_v52  ;;  %v7896_v52 = vld [vmem:[%s11506_s13 + $0x494] ss:$8 sps:$4 sm:$0xff]  }
 0x29b   :  { %5972 = vmatpush1.bf16.msra.mxu1 %v7816_v38  ;;  %6096 = vmatprep.subr.bf16.mxu0 %v7821_v10  ;;  %v1769_v38 = vcombine.high %v9370_v50, %v9370_v50  ;;  %v7891_v10 = vld [vmem:[%s11506_s13 + $0x790] ss:$8 sps:$4 sm:$0xff]  }
 0x29c   :  { %5973 = vmatprep.subr.bf16.mxu1 %v7824_v16  ;;  %v7894_v16 = vld [vmem:[%s11506_s13 + $0x490] ss:$8 sps:$4 sm:$0xff]  }
 0x29e   :  { %6097 = vmatpush1.bf16.msra.mxu0 %v7819_v35  ;;  %v7899_v35 = vld [vmem:[%s11506_s13 + $0x784] ss:$8 sps:$4 sm:$0xff]  }
 0x29f   :  { %5974 = vmatpush1.bf16.msra.mxu1 %v7822_v42  ;;  %6098 = vmatprep.subr.bf16.mxu0 %v7827_v43  ;;  %v7902_v42 = vld [vmem:[%s11506_s13 + $0x484] ss:$8 sps:$4 sm:$0xff]   ;;  %v10007_v43 = vrot.slane %v1769_v38, %v8670_v9  ;;  %v7948_v38 = vld [vmem:[%s11506_s13 + $0x600] ss:$8 sps:$4 sm:$0xff]  }
 0x2a0   :  { %5975 = vmatprep.subr.bf16.mxu1 %v7830_v44  ;;  %v7897_v44 = vld [vmem:[%s11506_s13 + $0x780] ss:$8 sps:$4 sm:$0xff]  }
 0x2a2   :  { %6099 = vmatpush1.bf16.msra.mxu0 %v7825_v41  ;;  %v10014_v41 = vrot.slane %v9367_v25, %v8670_v9  ;;  %v7903_v25 = vld [vmem:[%s11506_s13 + $0x970] ss:$8 sps:$4 sm:$0xff]  }
 0x2a3   :  { %5976 = vmatpush1.bf16.msra.mxu1 %v7828_v53  ;;  %6100 = vmatprep.subr.bf16.mxu0 %v7833_v5  ;;  %v7900_v53 = vld [vmem:[%s11506_s13 + $0x480] ss:$8 sps:$4 sm:$0xff]   ;;  %v7905_v5 = vld [vmem:[%s11506_s13 + $0x974] ss:$8 sps:$4 sm:$0xff]  }
 0x2a4   :  { %5977 = vmatprep.subr.bf16.mxu1 %v7836_v62  ;;  %v7908_v62 = vld [vmem:[%s11506_s13 + $0x674] ss:$8 sps:$4 sm:$0xff]  }
 0x2a6   :  { %6101 = vmatpush1.bf16.msra.mxu0 %v7831_v30  ;;  %v1785_v30 = vcombine.high %v10007_v43, %v10007_v43 }
 0x2a7   :  { %5978 = vmatpush1.bf16.msra.mxu1 %v7834_v58  ;;  %6102 = vmatprep.subr.bf16.mxu0 %v7839_v17  ;;  %v1767_v58 = vcombine.high %v10014_v41, %v10014_v41  ;;  %v1925_v17 = vpack.c.bf16 %v9798_v24, %v9798_v24  ;;  %v7914_v24 = vld [vmem:[%s11506_s13 + $0x664] ss:$8 sps:$4 sm:$0xff]  }
 0x2a8   :  { %5979 = vmatprep.subr.bf16.mxu1 %v7842_v56  ;;  %v7906_v56 = vld [vmem:[%s11506_s13 + $0x670] ss:$8 sps:$4 sm:$0xff]  }
 0x2aa   :  { %6103 = vmatpush1.bf16.msra.mxu0 %v7837_v20  ;;  %v1919_v20 = vpack.c.bf16 %v9805_v32, %v9805_v32  ;;  %v7909_v32 = vld [vmem:[%s11506_s13 + $0x960] ss:$8 sps:$4 sm:$0xff]  }
 0x2ab   :  { %5980 = vmatpush1.bf16.msra.mxu1 %v7840_v61  ;;  %6104 = vmatprep.subr.bf16.mxu0 %v7845_v13  ;;  %v7911_v61 = vld [vmem:[%s11506_s13 + $0x964] ss:$8 sps:$4 sm:$0xff]  }
 0x2ac   :  { %5981 = vmatprep.subr.bf16.mxu1 %v7848_v45  ;;  %v1930_v45 = vpack.c.bf16 %v1785_v30, %v1785_v30  ;;  %v7965_v30 = vld [vmem:[%s11506_s13 + $0x9d4] ss:$8 sps:$4 sm:$0xff]  }
 0x2ae   :  { %6105 = vmatpush1.bf16.msra.mxu0 %v7843_v60 }
 0x2af   :  { %5982 = vmatpush1.bf16.msra.mxu1 %v7846_v8  ;;  %6106 = vmatprep.subr.bf16.mxu0 %v7851_v6  ;;  %v1924_v8 = vpack.c.bf16 %v1767_v58, %v1767_v58  ;;  %v7963_v58 = vld [vmem:[%s11506_s13 + $0x9d0] ss:$8 sps:$4 sm:$0xff]  }
 0x2b0   :  { %5983 = vmatprep.subr.bf16.mxu1 %v7854_v7  ;;  %v7912_v7 = vld [vmem:[%s11506_s13 + $0x660] ss:$8 sps:$4 sm:$0xff]  }
 0x2b2   :  { %6107 = vmatpush1.bf16.msra.mxu0 %v7849_v40  ;;  %v7917_v40 = vld [vmem:[%s11506_s13 + $0x954] ss:$8 sps:$4 sm:$0xff]  }
 0x2b3   :  { %5984 = vmatpush1.bf16.msra.mxu1 %v7852_v12  ;;  %6108 = vmatprep.subr.bf16.mxu0 %v7857_v0  ;;  %v7920_v0 = vld [vmem:[%s11506_s13 + $0x654] ss:$8 sps:$4 sm:$0xff]  }
 0x2b4   :  { %5985 = vmatprep.subr.bf16.mxu1 %v7860_v14 }
 0x2b6   :  { %6109 = vmatpush2.bf16.msra.mxu0 %v7855_v15 }
 0x2b7   :  { %5986 = vmatpush2.bf16.msra.mxu1 %v7858_v48  ;;  %6110 = vmatprep.subr.bf16.mxu0 %v7863_v1  ;;  %v7915_v48 = vld [vmem:[%s11506_s13 + $0x950] ss:$8 sps:$4 sm:$0xff]  }
 0x2b8   :  { %5987 = vmatprep.subr.bf16.mxu1 %v7866_v4  ;;  %v7918_v4 = vld [vmem:[%s11506_s13 + $0x650] ss:$8 sps:$4 sm:$0xff]  }
 0x2ba   :  { %6111 = vmatpush2.bf16.msra.mxu0 %v7861_v11  ;;  %v7923_v11 = vld [vmem:[%s11506_s13 + $0x944] ss:$8 sps:$4 sm:$0xff]  }
 0x2bb   :  { %5988 = vmatpush2.bf16.msra.mxu1 %v7864_v29  ;;  %6112 = vmatprep.subr.bf16.mxu0 %v7869_v3  ;;  %v7926_v3 = vld [vmem:[%s11506_s13 + $0x644] ss:$8 sps:$4 sm:$0xff]  }
 0x2bc   :  { %5989 = vmatprep.subr.bf16.mxu1 %v7872_v47  ;;  %v7921_v47 = vld [vmem:[%s11506_s13 + $0x940] ss:$8 sps:$4 sm:$0xff]  }
 0x2be   :  { %6113 = vmatpush2.bf16.msra.mxu0 %v7867_v22  ;;  %v7924_v22 = vld [vmem:[%s11506_s13 + $0x640] ss:$8 sps:$4 sm:$0xff]  }
 0x2bf   :  { %5990 = vmatpush2.bf16.msra.mxu1 %v7870_v55  ;;  %6114 = vmatprep.subr.bf16.mxu0 %v7875_v37  ;;  %v7929_v55 = vld [vmem:[%s11506_s13 + $0x934] ss:$8 sps:$4 sm:$0xff]  }
 0x2c0   :  { %5991 = vmatprep.subr.bf16.mxu1 %v7878_v51  ;;  %v7932_v37 = vld [vmem:[%s11506_s13 + $0x634] ss:$8 sps:$4 sm:$0xff]   ;;  %v7927_v51 = vld [vmem:[%s11506_s13 + $0x930] ss:$8 sps:$4 sm:$0xff]  }
 0x2c2   :  { %6115 = vmatpush2.bf16.msra.mxu0 %v7873_v36  ;;  %v7930_v36 = vld [vmem:[%s11506_s13 + $0x630] ss:$8 sps:$4 sm:$0xff]  }
 0x2c3   :  { %5992 = vmatpush2.bf16.msra.mxu1 %v7876_v31  ;;  %6116 = vmatprep.subr.bf16.mxu0 %v7881_v27  ;;  %v7935_v31 = vld [vmem:[%s11506_s13 + $0x924] ss:$8 sps:$4 sm:$0xff]  }
 0x2c4   :  { %5993 = vmatprep.subr.bf16.mxu1 %v7884_v18  ;;  %v7938_v27 = vld [vmem:[%s11506_s13 + $0x624] ss:$8 sps:$4 sm:$0xff]   ;;  %v7933_v18 = vld [vmem:[%s11506_s13 + $0x920] ss:$8 sps:$4 sm:$0xff]  }
 0x2c6   :  { %6117 = vmatpush2.bf16.msra.mxu0 %v7879_v33  ;;  %v7936_v33 = vld [vmem:[%s11506_s13 + $0x620] ss:$8 sps:$4 sm:$0xff]  }
 0x2c7   :  { %5994 = vmatpush2.bf16.msra.mxu1 %v7882_v28  ;;  %6118 = vmatprep.subr.bf16.mxu0 %v7887_v34  ;;  %v7941_v28 = vld [vmem:[%s11506_s13 + $0x914] ss:$8 sps:$4 sm:$0xff]  }
 0x2c8   :  { %5995 = vmatprep.subr.bf16.mxu1 %v7890_v21  ;;  %v7944_v34 = vld [vmem:[%s11506_s13 + $0x614] ss:$8 sps:$4 sm:$0xff]   ;;  %v7939_v21 = vld [vmem:[%s11506_s13 + $0x910] ss:$8 sps:$4 sm:$0xff]  }
 0x2ca   :  { %6119 = vmatpush2.bf16.msra.mxu0 %v7885_v39  ;;  %v7942_v39 = vld [vmem:[%s11506_s13 + $0x610] ss:$8 sps:$4 sm:$0xff]  }
 0x2cb   :  { %5996 = vmatpush2.bf16.msra.mxu1 %v7888_v49  ;;  %6120 = vmatprep.subr.bf16.mxu0 %v7893_v63  ;;  %v7947_v49 = vld [vmem:[%s11506_s13 + $0x904] ss:$8 sps:$4 sm:$0xff]  }
 0x2cc   :  { %5997 = vmatprep.subr.bf16.mxu1 %v7896_v52  ;;  %v7950_v63 = vld [vmem:[%s11506_s13 + $0x604] ss:$8 sps:$4 sm:$0xff]   ;;  %v7945_v52 = vld [vmem:[%s11506_s13 + $0x900] ss:$8 sps:$4 sm:$0xff]  }
 0x2ce   :  { %6121 = vmatpush2.bf16.msra.mxu0 %v7891_v10  ;;  %v7953_v10 = vld [vmem:[%s11506_s13 + $0x9f4] ss:$8 sps:$4 sm:$0xff]  }
 0x2cf   :  { %5998 = vmatpush2.bf16.msra.mxu1 %v7894_v16  ;;  %6122 = vmatprep.subr.bf16.mxu0 %v7899_v35  ;;  %v7956_v16 = vld [vmem:[%s11506_s13 + $0x6f4] ss:$8 sps:$4 sm:$0xff]   ;;  %v7951_v35 = vld [vmem:[%s11506_s13 + $0x9f0] ss:$8 sps:$4 sm:$0xff]  }
 0x2d0   :  { %5999 = vmatprep.subr.bf16.mxu1 %v7902_v42  ;;  %v7954_v42 = vld [vmem:[%s11506_s13 + $0x6f0] ss:$8 sps:$4 sm:$0xff]  }
 0x2d2   :  { %6123 = vmatpush2.bf16.msra.mxu0 %v7897_v44  ;;  %v7959_v44 = vld [vmem:[%s11506_s13 + $0x9e4] ss:$8 sps:$4 sm:$0xff]  }
 0x2d3   :  { %6000 = vmatpush2.bf16.msra.mxu1 %v7900_v53  ;;  %6174 = vmatprep.subr.bf16.mxu0 %v7905_v5  ;;  %v7962_v53 = vld [vmem:[%s11506_s13 + $0x6e4] ss:$8 sps:$4 sm:$0xff]   ;;  %v7957_v5 = vld [vmem:[%s11506_s13 + $0x9e0] ss:$8 sps:$4 sm:$0xff]  }
 0x2d4   :  { %6051 = vmatprep.subr.bf16.mxu1 %v7908_v62  ;;  %v7960_v62 = vld [vmem:[%s11506_s13 + $0x6e0] ss:$8 sps:$4 sm:$0xff]  }
 0x2d5   :  { %6125 = vmatmul.mubr.bf16.vlgmr.msra.gmra.mxu0 %v1925_v17  ;;  %v10042_v13 = vpop.f32.mrf.mxu0  ;;  %v7966_v17 = vld [vmem:[%s11506_s13 + $0x6d0] ss:$8 sps:$4 sm:$0xff]  }
 0x2d6   :  { %6002 = vmatmul.mubr.bf16.vlgmr.msra.gmra.mxu1 %v1919_v20  ;;  %6175 = vmatpush1.bf16.msra.mxu0 %v7903_v25  ;;  %v10047_v60 = vpop.f32.mrf.mxu1  ;;  %v7968_v25 = vld [vmem:[%s11506_s13 + $0x6d4] ss:$8 sps:$4 sm:$0xff]   ;;  %v7974_v20 = vld [vmem:[%s11506_s13 + $0x6c4] ss:$8 sps:$4 sm:$0xff]  }
 0x2d7   :  { %6206 = vmatprep.mubr.bf16.mxu0 %v1930_v45  ;;  %6052 = vmatpush1.bf16.msra.mxu1 %v7906_v56  ;;  %v10052_v6 = vpop.f32.mrf.mxu0  ;;  %v7971_v56 = vld [vmem:[%s11506_s13 + $0x9c4] ss:$8 sps:$4 sm:$0xff]   ;;  %v7972_v45 = vld [vmem:[%s11506_s13 + $0x6c0] ss:$8 sps:$4 sm:$0xff]  }
 0x2d8   :  { %6083 = vmatprep.mubr.bf16.mxu1 %v1924_v8  ;;  %v10060_v12 = vpop.f32.mrf.mxu1  ;;  %6176 = vmatprep.subr.bf16.mxu0 %v7911_v61  ;;  %v7969_v61 = vld [vmem:[%s11506_s13 + $0x9c0] ss:$8 sps:$4 sm:$0xff]   ;;  %v7980_v8 = vld [vmem:[%s11506_s13 + $0x6b4] ss:$8 sps:$4 sm:$0xff]  }
 0x2d9   :  { %v5884_v14 = vpop.f32.mrf.mxu0  ;;  %6053 = vmatprep.subr.bf16.mxu1 %v7914_v24  ;;  %v7977_v24 = vld [vmem:[%s11506_s13 + $0x9b4] ss:$8 sps:$4 sm:$0xff]  }
 0x2da   :  { %6177 = vmatpush1.bf16.msra.mxu0 %v7909_v32  ;;  %v2667_v15 = vpop.f32.mrf.mxu1  ;;  %v7975_v32 = vld [vmem:[%s11506_s13 + $0x9b0] ss:$8 sps:$4 sm:$0xff]   ;;  %v7981_v14 = vld [vmem:[%s11506_s13 + $0x9a0] ss:$8 sps:$4 sm:$0xff]  }
 0x2db   :  { %6054 = vmatpush1.bf16.msra.mxu1 %v7912_v7  ;;  %v5885_v1 = vpop.f32.mrf.mxu0  ;;  %6178 = vmatprep.subr.bf16.mxu0 %v7917_v40  ;;  %v7978_v7 = vld [vmem:[%s11506_s13 + $0x6b0] ss:$8 sps:$4 sm:$0xff]   ;;  %v7983_v40 = vld [vmem:[%s11506_s13 + $0x9a4] ss:$8 sps:$4 sm:$0xff]   ;;  %v7984_v15 = vld [vmem:[%s11506_s13 + $0x6a0] ss:$8 sps:$4 sm:$0xff]  }
 0x2dc   :  { %v2668_v29 = vpop.f32.mrf.mxu1  ;;  %6055 = vmatprep.subr.bf16.mxu1 %v7920_v0  ;;  %v7986_v0 = vld [vmem:[%s11506_s13 + $0x6a4] ss:$8 sps:$4 sm:$0xff]   ;;  %v7992_v1 = vld [vmem:[%s11506_s13 + $0x694] ss:$8 sps:$4 sm:$0xff]  }
 0x2dd   :  { %v7990_v29 = vld [vmem:[%s11506_s13 + $0x690] ss:$8 sps:$4 sm:$0xff]  }
 0x2de   :  { %6179 = vmatpush1.bf16.msra.mxu0 %v7915_v48  ;;  %v7989_v48 = vld [vmem:[%s11506_s13 + $0x994] ss:$8 sps:$4 sm:$0xff]  }
 0x2df   :  { %6056 = vmatpush1.bf16.msra.mxu1 %v7918_v4  ;;  %6180 = vmatprep.subr.bf16.mxu0 %v7923_v11  ;;  %v1786_v4 = vcombine.high %v9373_v54, %v9373_v54  ;;  %v7987_v11 = vld [vmem:[%s11506_s13 + $0x990] ss:$8 sps:$4 sm:$0xff]  }
 0x2e0   :  { %6057 = vmatprep.subr.bf16.mxu1 %v7926_v3  ;;  %v7995_v3 = vld [vmem:[%s11506_s13 + $0x984] ss:$8 sps:$4 sm:$0xff]  }
 0x2e2   :  { %6181 = vmatpush1.bf16.msra.mxu0 %v7921_v47  ;;  %v7998_v47 = vld [vmem:[%s11506_s13 + $0x684] ss:$8 sps:$4 sm:$0xff]  }
 0x2e3   :  { %6058 = vmatpush1.bf16.msra.mxu1 %v7924_v22  ;;  %6182 = vmatprep.subr.bf16.mxu0 %v7929_v55  ;;  %v10224_v22 = vrot.slane %v1786_v4, %v8670_v9  ;;  %v7993_v55 = vld [vmem:[%s11506_s13 + $0x980] ss:$8 sps:$4 sm:$0xff]   ;;  %v8043_v4 = vld [vmem:[%s11506_s13 + $0xb04] ss:$8 sps:$4 sm:$0xff]  }
 0x2e4   :  { %6059 = vmatprep.subr.bf16.mxu1 %v7932_v37  ;;  %v10231_v37 = vrot.slane %v9370_v50, %v8670_v9  ;;  %v7999_v50 = vld [vmem:[%s11506_s13 + $0xb70] ss:$8 sps:$4 sm:$0xff]  }
 0x2e6   :  { %6183 = vmatpush1.bf16.msra.mxu0 %v7927_v51  ;;  %v7996_v51 = vld [vmem:[%s11506_s13 + $0x680] ss:$8 sps:$4 sm:$0xff]  }
 0x2e7   :  { %6060 = vmatpush1.bf16.msra.mxu1 %v7930_v36  ;;  %6184 = vmatprep.subr.bf16.mxu0 %v7935_v31  ;;  %v8001_v36 = vld [vmem:[%s11506_s13 + $0xb74] ss:$8 sps:$4 sm:$0xff]  }
 0x2e8   :  { %6061 = vmatprep.subr.bf16.mxu1 %v7938_v27  ;;  %v8004_v31 = vld [vmem:[%s11506_s13 + $0x874] ss:$8 sps:$4 sm:$0xff]   ;;  %v1802_v27 = vcombine.high %v10224_v22, %v10224_v22 }
 0x2ea   :  { %6185 = vmatpush1.bf16.msra.mxu0 %v7933_v18  ;;  %v1784_v18 = vcombine.high %v10231_v37, %v10231_v37 }
 0x2eb   :  { %6062 = vmatpush1.bf16.msra.mxu1 %v7936_v33  ;;  %6186 = vmatprep.subr.bf16.mxu0 %v7941_v28  ;;  %v1929_v33 = vpack.c.bf16 %v10007_v43, %v10007_v43  ;;  %v8002_v28 = vld [vmem:[%s11506_s13 + $0x870] ss:$8 sps:$4 sm:$0xff]   ;;  %v8010_v43 = vld [vmem:[%s11506_s13 + $0x864] ss:$8 sps:$4 sm:$0xff]  }
 0x2ec   :  { %6063 = vmatprep.subr.bf16.mxu1 %v7944_v34  ;;  %v1923_v34 = vpack.c.bf16 %v10014_v41, %v10014_v41  ;;  %v8005_v41 = vld [vmem:[%s11506_s13 + $0xb60] ss:$8 sps:$4 sm:$0xff]  }
 0x2ee   :  { %6187 = vmatpush1.bf16.msra.mxu0 %v7939_v21  ;;  %v8007_v21 = vld [vmem:[%s11506_s13 + $0xb64] ss:$8 sps:$4 sm:$0xff]  }
 0x2ef   :  { %6064 = vmatpush1.bf16.msra.mxu1 %v7942_v39  ;;  %6188 = vmatprep.subr.bf16.mxu0 %v7947_v49  ;;  %v1934_v49 = vpack.c.bf16 %v1802_v27, %v1802_v27  ;;  %v8058_v27 = vld [vmem:[%s11506_s13 + $0x8e4] ss:$8 sps:$4 sm:$0xff]  }
 0x2f0   :  { %6065 = vmatprep.subr.bf16.mxu1 %v7950_v63 }
 0x2f2   :  { %6189 = vmatpush1.bf16.msra.mxu0 %v7945_v52  ;;  %v1928_v52 = vpack.c.bf16 %v1784_v18, %v1784_v18  ;;  %v8056_v18 = vld [vmem:[%s11506_s13 + $0x8e0] ss:$8 sps:$4 sm:$0xff]  }
 0x2f3   :  { %6066 = vmatpush1.bf16.msra.mxu1 %v7948_v38  ;;  %6190 = vmatprep.subr.bf16.mxu0 %v7953_v10 }
 0x2f4   :  { %6067 = vmatprep.subr.bf16.mxu1 %v7956_v16  ;;  %v8008_v16 = vld [vmem:[%s11506_s13 + $0x860] ss:$8 sps:$4 sm:$0xff]  }
 0x2f6   :  { %6191 = vmatpush2.bf16.msra.mxu0 %v7951_v35  ;;  %v8013_v35 = vld [vmem:[%s11506_s13 + $0xb54] ss:$8 sps:$4 sm:$0xff]  }
 0x2f7   :  { %6068 = vmatpush2.bf16.msra.mxu1 %v7954_v42  ;;  %6192 = vmatprep.subr.bf16.mxu0 %v7959_v44 }
 0x2f8   :  { %6069 = vmatprep.subr.bf16.mxu1 %v7962_v53 }
 0x2fa   :  { %6193 = vmatpush2.bf16.msra.mxu0 %v7957_v5 }
 0x2fb   :  { %6070 = vmatpush2.bf16.msra.mxu1 %v7960_v62  ;;  %6194 = vmatprep.subr.bf16.mxu0 %v7965_v30  ;;  %v8011_v62 = vld [vmem:[%s11506_s13 + $0xb50] ss:$8 sps:$4 sm:$0xff]  }
 0x2fc   :  { %6071 = vmatprep.subr.bf16.mxu1 %v7968_v25  ;;  %v8014_v25 = vld [vmem:[%s11506_s13 + $0x850] ss:$8 sps:$4 sm:$0xff]  }
 0x2fe   :  { %6195 = vmatpush2.bf16.msra.mxu0 %v7963_v58 }
 0x2ff   :  { %6072 = vmatpush2.bf16.msra.mxu1 %v7966_v17  ;;  %6196 = vmatprep.subr.bf16.mxu0 %v7971_v56  ;;  %v8022_v17 = vld [vmem:[%s11506_s13 + $0x844] ss:$8 sps:$4 sm:$0xff]   ;;  %v8017_v56 = vld [vmem:[%s11506_s13 + $0xb40] ss:$8 sps:$4 sm:$0xff]  }
 0x300   :  { %6073 = vmatprep.subr.bf16.mxu1 %v7974_v20  ;;  %v8020_v20 = vld [vmem:[%s11506_s13 + $0x840] ss:$8 sps:$4 sm:$0xff]  }
 0x302   :  { %6197 = vmatpush2.bf16.msra.mxu0 %v7969_v61  ;;  %v8025_v61 = vld [vmem:[%s11506_s13 + $0xb34] ss:$8 sps:$4 sm:$0xff]  }
 0x303   :  { %6074 = vmatpush2.bf16.msra.mxu1 %v7972_v45  ;;  %6198 = vmatprep.subr.bf16.mxu0 %v7977_v24  ;;  %v8028_v45 = vld [vmem:[%s11506_s13 + $0x834] ss:$8 sps:$4 sm:$0xff]   ;;  %v8023_v24 = vld [vmem:[%s11506_s13 + $0xb30] ss:$8 sps:$4 sm:$0xff]  }
 0x304   :  { %6075 = vmatprep.subr.bf16.mxu1 %v7980_v8  ;;  %v8026_v8 = vld [vmem:[%s11506_s13 + $0x830] ss:$8 sps:$4 sm:$0xff]  }
 0x306   :  { %6199 = vmatpush2.bf16.msra.mxu0 %v7975_v32  ;;  %v8031_v32 = vld [vmem:[%s11506_s13 + $0xb24] ss:$8 sps:$4 sm:$0xff]  }
 0x307   :  { %6076 = vmatpush2.bf16.msra.mxu1 %v7978_v7  ;;  %6200 = vmatprep.subr.bf16.mxu0 %v7983_v40  ;;  %v8034_v7 = vld [vmem:[%s11506_s13 + $0x824] ss:$8 sps:$4 sm:$0xff]   ;;  %v8029_v40 = vld [vmem:[%s11506_s13 + $0xb20] ss:$8 sps:$4 sm:$0xff]  }
 0x308   :  { %6077 = vmatprep.subr.bf16.mxu1 %v7986_v0  ;;  %v8032_v0 = vld [vmem:[%s11506_s13 + $0x820] ss:$8 sps:$4 sm:$0xff]  }
 0x30a   :  { %6201 = vmatpush2.bf16.msra.mxu0 %v7981_v14  ;;  %v8037_v14 = vld [vmem:[%s11506_s13 + $0xb14] ss:$8 sps:$4 sm:$0xff]  }
 0x30b   :  { %6078 = vmatpush2.bf16.msra.mxu1 %v7984_v15  ;;  %6202 = vmatprep.subr.bf16.mxu0 %v7989_v48  ;;  %v8040_v15 = vld [vmem:[%s11506_s13 + $0x814] ss:$8 sps:$4 sm:$0xff]   ;;  %v8035_v48 = vld [vmem:[%s11506_s13 + $0xb10] ss:$8 sps:$4 sm:$0xff]  }
 0x30c   :  { %6079 = vmatprep.subr.bf16.mxu1 %v7992_v1  ;;  %v8038_v1 = vld [vmem:[%s11506_s13 + $0x810] ss:$8 sps:$4 sm:$0xff]  }
 0x30e   :  { %6203 = vmatpush2.bf16.msra.mxu0 %v7987_v11  ;;  %v8046_v11 = vld [vmem:[%s11506_s13 + $0x804] ss:$8 sps:$4 sm:$0xff]  }
 0x30f   :  { %6080 = vmatpush2.bf16.msra.mxu1 %v7990_v29  ;;  %6204 = vmatprep.subr.bf16.mxu0 %v7995_v3  ;;  %v8041_v29 = vld [vmem:[%s11506_s13 + $0xb00] ss:$8 sps:$4 sm:$0xff]  }
 0x310   :  { %6081 = vmatprep.subr.bf16.mxu1 %v7998_v47  ;;  %v8044_v3 = vld [vmem:[%s11506_s13 + $0x800] ss:$8 sps:$4 sm:$0xff]   ;;  %v8049_v47 = vld [vmem:[%s11506_s13 + $0xbf4] ss:$8 sps:$4 sm:$0xff]  }
 0x312   :  { %6205 = vmatpush2.bf16.msra.mxu0 %v7993_v55  ;;  %v8052_v55 = vld [vmem:[%s11506_s13 + $0x8f4] ss:$8 sps:$4 sm:$0xff]  }
 0x313   :  { %6082 = vmatpush2.bf16.msra.mxu1 %v7996_v51  ;;  %6256 = vmatprep.subr.bf16.mxu0 %v8001_v36  ;;  %v8047_v51 = vld [vmem:[%s11506_s13 + $0xbf0] ss:$8 sps:$4 sm:$0xff]  }
 0x314   :  { %6133 = vmatprep.subr.bf16.mxu1 %v8004_v31  ;;  %v8050_v36 = vld [vmem:[%s11506_s13 + $0x8f0] ss:$8 sps:$4 sm:$0xff]   ;;  %v8055_v31 = vld [vmem:[%s11506_s13 + $0xbe4] ss:$8 sps:$4 sm:$0xff]  }
 0x315   :  { %v10259_v39 = vpop.f32.mrf.mxu0  ;;  %6207 = vmatmul.mubr.bf16.vlgmr.msra.gmra.mxu0 %v1929_v33  ;;  %v8061_v33 = vld [vmem:[%s11506_s13 + $0xbd4] ss:$8 sps:$4 sm:$0xff]  }
 0x316   :  { %v5839_v63 = vpop.f32.mrf.mxu1  ;;  %6084 = vmatmul.mubr.bf16.vlgmr.msra.gmra.mxu1 %v1923_v34  ;;  %6257 = vmatpush1.bf16.msra.mxu0 %v7999_v50  ;;  %v8053_v50 = vld [vmem:[%s11506_s13 + $0xbe0] ss:$8 sps:$4 sm:$0xff]   ;;  %v8059_v34 = vld [vmem:[%s11506_s13 + $0xbd0] ss:$8 sps:$4 sm:$0xff]  }
 0x317   :  { %v10268_v38 = vadd.f32 %v5839_v63, %v10047_v60  ;;  %6288 = vmatprep.mubr.bf16.mxu0 %v1934_v49  ;;  %v10270_v10 = vpop.f32.mrf.mxu0  ;;  %6134 = vmatpush1.bf16.msra.mxu1 %v8002_v28  ;;  %v8016_v60 = vld [vmem:[%s11506_s13 + $0x854] ss:$8 sps:$4 sm:$0xff]   ;;  %v8067_v49 = vld [vmem:[%s11506_s13 + $0xbc4] ss:$8 sps:$4 sm:$0xff]   ;;  %v8065_v63 = vld [vmem:[%s11506_s13 + $0xbc0] ss:$8 sps:$4 sm:$0xff]  }
 0x318   :  { %6165 = vmatprep.mubr.bf16.mxu1 %v1928_v52  ;;  %v5841_v42 = vpop.f32.mrf.mxu1  ;;  %6258 = vmatprep.subr.bf16.mxu0 %v8007_v21  ;;  %v8064_v28 = vld [vmem:[%s11506_s13 + $0x8d4] ss:$8 sps:$4 sm:$0xff]   ;;  %v8062_v21 = vld [vmem:[%s11506_s13 + $0x8d0] ss:$8 sps:$4 sm:$0xff]   ;;  %v8068_v52 = vld [vmem:[%s11506_s13 + $0x8c0] ss:$8 sps:$4 sm:$0xff]  }
 0x319   :  { %v10282_v44 = vadd.f32 %v5841_v42, %v10060_v12  ;;  %v5966_v53 = vpop.f32.mrf.mxu0  ;;  %6135 = vmatprep.subr.bf16.mxu1 %v8010_v43  ;;  %v8019_v12 = vld [vmem:[%s11506_s13 + $0xb44] ss:$8 sps:$4 sm:$0xff]   ;;  %v8074_v42 = vld [vmem:[%s11506_s13 + $0x8b0] ss:$8 sps:$4 sm:$0xff]  }
 0x31a   :  { %v5843_v5 = vpop.f32.mrf.mxu1  ;;  %6259 = vmatpush1.bf16.msra.mxu0 %v8005_v41  ;;  %v8070_v43 = vld [vmem:[%s11506_s13 + $0x8c4] ss:$8 sps:$4 sm:$0xff]   ;;  %v8073_v41 = vld [vmem:[%s11506_s13 + $0xbb4] ss:$8 sps:$4 sm:$0xff]  }
 0x31b   :  { %v5967_v30 = vpop.f32.mrf.mxu0  ;;  %6136 = vmatpush1.bf16.msra.mxu1 %v8008_v16  ;;  %6260 = vmatprep.subr.bf16.mxu0 %v8013_v35  ;;  %v8076_v16 = vld [vmem:[%s11506_s13 + $0x8b4] ss:$8 sps:$4 sm:$0xff]   ;;  %v8071_v35 = vld [vmem:[%s11506_s13 + $0xbb0] ss:$8 sps:$4 sm:$0xff]   ;;  %v8082_v53 = vld [vmem:[%s11506_s13 + $0x8a4] ss:$8 sps:$4 sm:$0xff]  }
 0x31c   :  { %v5844_v58 = vpop.f32.mrf.mxu1  ;;  %6137 = vmatprep.subr.bf16.mxu1 %v8016_v60  ;;  %v8079_v60 = vld [vmem:[%s11506_s13 + $0xba4] ss:$8 sps:$4 sm:$0xff]   ;;  %v8077_v5 = vld [vmem:[%s11506_s13 + $0xba0] ss:$8 sps:$4 sm:$0xff]   ;;  %v8085_v30 = vld [vmem:[%s11506_s13 + $0xb94] ss:$8 sps:$4 sm:$0xff]  }
 0x31d   :  { %v8083_v58 = vld [vmem:[%s11506_s13 + $0xb90] ss:$8 sps:$4 sm:$0xff]  }
 0x31e   :  { %6261 = vmatpush1.bf16.msra.mxu0 %v8011_v62  ;;  %v8080_v62 = vld [vmem:[%s11506_s13 + $0x8a0] ss:$8 sps:$4 sm:$0xff]  }
 0x31f   :  { %6138 = vmatpush1.bf16.msra.mxu1 %v8014_v25  ;;  %6262 = vmatprep.subr.bf16.mxu0 %v8019_v12  ;;  %v8088_v25 = vld [vmem:[%s11506_s13 + $0x894] ss:$8 sps:$4 sm:$0xff]   ;;  %v1803_v12 = vcombine.high %v9376_v19, %v9376_v19 }
 0x320   :  { %6139 = vmatprep.subr.bf16.mxu1 %v8022_v17  ;;  %v8086_v17 = vld [vmem:[%s11506_s13 + $0x890] ss:$8 sps:$4 sm:$0xff]  }
 0x322   :  { %6263 = vmatpush1.bf16.msra.mxu0 %v8017_v56  ;;  %v8091_v56 = vld [vmem:[%s11506_s13 + $0xb84] ss:$8 sps:$4 sm:$0xff]  }
 0x323   :  { %6140 = vmatpush1.bf16.msra.mxu1 %v8020_v20  ;;  %6264 = vmatprep.subr.bf16.mxu0 %v8025_v61  ;;  %v8094_v20 = vld [vmem:[%s11506_s13 + $0x884] ss:$8 sps:$4 sm:$0xff]   ;;  %v10443_v61 = vrot.slane %v1803_v12, %v8670_v9  ;;  %v8134_v12 = vld [vmem:[%s11506_s13 + $0xa10] ss:$8 sps:$4 sm:$0xff]  }
 0x324   :  { %6141 = vmatprep.subr.bf16.mxu1 %v8028_v45  ;;  %v8089_v45 = vld [vmem:[%s11506_s13 + $0xb80] ss:$8 sps:$4 sm:$0xff]  }
 0x326   :  { %6265 = vmatpush1.bf16.msra.mxu0 %v8023_v24  ;;  %v10450_v24 = vrot.slane %v9373_v54, %v8670_v9  ;;  %v8095_v54 = vld [vmem:[%s11506_s13 + $0xd70] ss:$8 sps:$4 sm:$0xff]  }
 0x327   :  { %6142 = vmatpush1.bf16.msra.mxu1 %v8026_v8  ;;  %6266 = vmatprep.subr.bf16.mxu0 %v8031_v32  ;;  %v8092_v8 = vld [vmem:[%s11506_s13 + $0x880] ss:$8 sps:$4 sm:$0xff]   ;;  %v8097_v32 = vld [vmem:[%s11506_s13 + $0xd74] ss:$8 sps:$4 sm:$0xff]  }
 0x328   :  { %6143 = vmatprep.subr.bf16.mxu1 %v8034_v7  ;;  %v8100_v7 = vld [vmem:[%s11506_s13 + $0xa74] ss:$8 sps:$4 sm:$0xff]  }
 0x32a   :  { %6267 = vmatpush1.bf16.msra.mxu0 %v8029_v40  ;;  %v1819_v40 = vcombine.high %v10443_v61, %v10443_v61 }
 0x32b   :  { %6144 = vmatpush1.bf16.msra.mxu1 %v8032_v0  ;;  %6268 = vmatprep.subr.bf16.mxu0 %v8037_v14  ;;  %v1801_v0 = vcombine.high %v10450_v24, %v10450_v24  ;;  %v1933_v14 = vpack.c.bf16 %v10224_v22, %v10224_v22 }
 0x32c   :  { %6145 = vmatprep.subr.bf16.mxu1 %v8040_v15  ;;  %v8098_v15 = vld [vmem:[%s11506_s13 + $0xa70] ss:$8 sps:$4 sm:$0xff]   ;;  %v1938_v22 = vpack.c.bf16 %v1819_v40, %v1819_v40  ;;  %v8151_v40 = vld [vmem:[%s11506_s13 + $0xde4] ss:$8 sps:$4 sm:$0xff]  }
 0x32e   :  { %6269 = vmatpush1.bf16.msra.mxu0 %v8035_v48  ;;  %v1927_v48 = vpack.c.bf16 %v10231_v37, %v10231_v37  ;;  %v1932_v37 = vpack.c.bf16 %v1801_v0, %v1801_v0  ;;  %v8149_v0 = vld [vmem:[%s11506_s13 + $0xde0] ss:$8 sps:$4 sm:$0xff]  }
 0x32f   :  { %6146 = vmatpush1.bf16.msra.mxu1 %v8038_v1  ;;  %6270 = vmatprep.subr.bf16.mxu0 %v8043_v4  ;;  %v8103_v1 = vld [vmem:[%s11506_s13 + $0xd64] ss:$8 sps:$4 sm:$0xff]  }
 0x330   :  { %6147 = vmatprep.subr.bf16.mxu1 %v8046_v11  ;;  %v5881_v11 = vadd.f32 %v10042_v13, %v10268_v38  ;;  %v5883_v13 = vadd.f32 %v10052_v6, %v10282_v44  ;;  %v8104_v38 = vld [vmem:[%s11506_s13 + $0xa60] ss:$8 sps:$4 sm:$0xff]   ;;  %v8107_v44 = vld [vmem:[%s11506_s13 + $0xd50] ss:$8 sps:$4 sm:$0xff]  }
 0x332   :  { %6271 = vmatpush1.bf16.msra.mxu0 %v8041_v29  ;;  %v8106_v29 = vld [vmem:[%s11506_s13 + $0xa64] ss:$8 sps:$4 sm:$0xff]  }
 0x333   :  { %6148 = vmatpush1.bf16.msra.mxu1 %v8044_v3  ;;  %6272 = vmatprep.subr.bf16.mxu0 %v8049_v47  ;;  %v8101_v47 = vld [vmem:[%s11506_s13 + $0xd60] ss:$8 sps:$4 sm:$0xff]  }
 0x334   :  { %6149 = vmatprep.subr.bf16.mxu1 %v8052_v55 }
 0x336   :  { %6273 = vmatpush2.bf16.msra.mxu0 %v8047_v51 }
 0x337   :  { %6150 = vmatpush2.bf16.msra.mxu1 %v8050_v36  ;;  %6274 = vmatprep.subr.bf16.mxu0 %v8055_v31  ;;  %v8109_v36 = vld [vmem:[%s11506_s13 + $0xd54] ss:$8 sps:$4 sm:$0xff]  }
 0x338   :  { %6151 = vmatprep.subr.bf16.mxu1 %v8058_v27  ;;  %v8112_v27 = vld [vmem:[%s11506_s13 + $0xa54] ss:$8 sps:$4 sm:$0xff]  }
 0x33a   :  { %6275 = vmatpush2.bf16.msra.mxu0 %v8053_v50 }
 0x33b   :  { %6152 = vmatpush2.bf16.msra.mxu1 %v8056_v18  ;;  %6276 = vmatprep.subr.bf16.mxu0 %v8061_v33 }
 0x33c   :  { %6153 = vmatprep.subr.bf16.mxu1 %v8064_v28  ;;  %v8110_v28 = vld [vmem:[%s11506_s13 + $0xa50] ss:$8 sps:$4 sm:$0xff]  }
 0x33e   :  { %6277 = vmatpush2.bf16.msra.mxu0 %v8059_v34  ;;  %v8115_v34 = vld [vmem:[%s11506_s13 + $0xd44] ss:$8 sps:$4 sm:$0xff]  }
 0x33f   :  { %6154 = vmatpush2.bf16.msra.mxu1 %v8062_v21  ;;  %6278 = vmatprep.subr.bf16.mxu0 %v8067_v49  ;;  %v8118_v49 = vld [vmem:[%s11506_s13 + $0xa44] ss:$8 sps:$4 sm:$0xff]  }
 0x340   :  { %6155 = vmatprep.subr.bf16.mxu1 %v8070_v43  ;;  %v8113_v43 = vld [vmem:[%s11506_s13 + $0xd40] ss:$8 sps:$4 sm:$0xff]  }
 0x342   :  { %6279 = vmatpush2.bf16.msra.mxu0 %v8065_v63  ;;  %v8116_v63 = vld [vmem:[%s11506_s13 + $0xa40] ss:$8 sps:$4 sm:$0xff]  }
 0x343   :  { %6156 = vmatpush2.bf16.msra.mxu1 %v8068_v52  ;;  %6280 = vmatprep.subr.bf16.mxu0 %v8073_v41  ;;  %v8121_v52 = vld [vmem:[%s11506_s13 + $0xd34] ss:$8 sps:$4 sm:$0xff]  }
 0x344   :  { %6157 = vmatprep.subr.bf16.mxu1 %v8076_v16  ;;  %v8124_v41 = vld [vmem:[%s11506_s13 + $0xa34] ss:$8 sps:$4 sm:$0xff]   ;;  %v8119_v16 = vld [vmem:[%s11506_s13 + $0xd30] ss:$8 sps:$4 sm:$0xff]  }
 0x346   :  { %6281 = vmatpush2.bf16.msra.mxu0 %v8071_v35  ;;  %v8122_v35 = vld [vmem:[%s11506_s13 + $0xa30] ss:$8 sps:$4 sm:$0xff]  }
 0x347   :  { %6158 = vmatpush2.bf16.msra.mxu1 %v8074_v42  ;;  %6282 = vmatprep.subr.bf16.mxu0 %v8079_v60  ;;  %v8127_v42 = vld [vmem:[%s11506_s13 + $0xd24] ss:$8 sps:$4 sm:$0xff]  }
 0x348   :  { %6159 = vmatprep.subr.bf16.mxu1 %v8082_v53  ;;  %v8130_v60 = vld [vmem:[%s11506_s13 + $0xa24] ss:$8 sps:$4 sm:$0xff]   ;;  %v8125_v53 = vld [vmem:[%s11506_s13 + $0xd20] ss:$8 sps:$4 sm:$0xff]  }
 0x34a   :  { %6283 = vmatpush2.bf16.msra.mxu0 %v8077_v5  ;;  %v8128_v5 = vld [vmem:[%s11506_s13 + $0xa20] ss:$8 sps:$4 sm:$0xff]  }
 0x34b   :  { %6160 = vmatpush2.bf16.msra.mxu1 %v8080_v62  ;;  %6284 = vmatprep.subr.bf16.mxu0 %v8085_v30  ;;  %v8133_v62 = vld [vmem:[%s11506_s13 + $0xd14] ss:$8 sps:$4 sm:$0xff]  }
 0x34c   :  { %6161 = vmatprep.subr.bf16.mxu1 %v8088_v25  ;;  %v8136_v30 = vld [vmem:[%s11506_s13 + $0xa14] ss:$8 sps:$4 sm:$0xff]   ;;  %v8131_v25 = vld [vmem:[%s11506_s13 + $0xd10] ss:$8 sps:$4 sm:$0xff]  }
 0x34e   :  { %6285 = vmatpush2.bf16.msra.mxu0 %v8083_v58  ;;  %v8139_v58 = vld [vmem:[%s11506_s13 + $0xd04] ss:$8 sps:$4 sm:$0xff]  }
 0x34f   :  { %6162 = vmatpush2.bf16.msra.mxu1 %v8086_v17  ;;  %6286 = vmatprep.subr.bf16.mxu0 %v8091_v56  ;;  %v8142_v17 = vld [vmem:[%s11506_s13 + $0xa04] ss:$8 sps:$4 sm:$0xff]   ;;  %v8137_v56 = vld [vmem:[%s11506_s13 + $0xd00] ss:$8 sps:$4 sm:$0xff]  }
 0x350   :  { %6163 = vmatprep.subr.bf16.mxu1 %v8094_v20  ;;  %v8140_v20 = vld [vmem:[%s11506_s13 + $0xa00] ss:$8 sps:$4 sm:$0xff]  }
 0x352   :  { %6287 = vmatpush2.bf16.msra.mxu0 %v8089_v45  ;;  %v8145_v45 = vld [vmem:[%s11506_s13 + $0xdf4] ss:$8 sps:$4 sm:$0xff]  }
 0x353   :  { %6164 = vmatpush2.bf16.msra.mxu1 %v8092_v8  ;;  %6338 = vmatprep.subr.bf16.mxu0 %v8097_v32  ;;  %v8148_v8 = vld [vmem:[%s11506_s13 + $0xaf4] ss:$8 sps:$4 sm:$0xff]   ;;  %v8143_v32 = vld [vmem:[%s11506_s13 + $0xdf0] ss:$8 sps:$4 sm:$0xff]  }
 0x354   :  { %6215 = vmatprep.subr.bf16.mxu1 %v8100_v7  ;;  %v8146_v7 = vld [vmem:[%s11506_s13 + $0xaf0] ss:$8 sps:$4 sm:$0xff]  }
 0x355   :  { %v10478_v4 = vpop.f32.mrf.mxu0  ;;  %6289 = vmatmul.mubr.bf16.vlgmr.msra.gmra.mxu0 %v1933_v14  ;;  %v8152_v14 = vld [vmem:[%s11506_s13 + $0xae0] ss:$8 sps:$4 sm:$0xff]  }
 0x356   :  { %v5921_v3 = vpop.f32.mrf.mxu1  ;;  %6166 = vmatmul.mubr.bf16.vlgmr.msra.gmra.mxu1 %v1927_v48  ;;  %6339 = vmatpush1.bf16.msra.mxu0 %v8095_v54  ;;  %v8154_v54 = vld [vmem:[%s11506_s13 + $0xae4] ss:$8 sps:$4 sm:$0xff]   ;;  %v8160_v48 = vld [vmem:[%s11506_s13 + $0xad4] ss:$8 sps:$4 sm:$0xff]  }
 0x357   :  { %v10488_v55 = vadd.f32 %v5921_v3, %v5881_v11  ;;  %6370 = vmatprep.mubr.bf16.mxu0 %v1938_v22  ;;  %v10490_v51 = vpop.f32.mrf.mxu0  ;;  %6216 = vmatpush1.bf16.msra.mxu1 %v8098_v15  ;;  %v8157_v15 = vld [vmem:[%s11506_s13 + $0xdd4] ss:$8 sps:$4 sm:$0xff]   ;;  %v8158_v11 = vld [vmem:[%s11506_s13 + $0xad0] ss:$8 sps:$4 sm:$0xff]   ;;  %v8163_v22 = vld [vmem:[%s11506_s13 + $0xdc4] ss:$8 sps:$4 sm:$0xff]  }
 0x358   :  { %6247 = vmatprep.mubr.bf16.mxu1 %v1932_v37  ;;  %v5923_v31 = vpop.f32.mrf.mxu1  ;;  %6340 = vmatprep.subr.bf16.mxu0 %v8103_v1  ;;  %v8155_v1 = vld [vmem:[%s11506_s13 + $0xdd0] ss:$8 sps:$4 sm:$0xff]   ;;  %v8161_v3 = vld [vmem:[%s11506_s13 + $0xdc0] ss:$8 sps:$4 sm:$0xff]  }
 0x359   :  { %v10503_v50 = vadd.f32 %v5923_v31, %v5883_v13  ;;  %v6048_v18 = vpop.f32.mrf.mxu0  ;;  %6217 = vmatprep.subr.bf16.mxu1 %v8106_v29  ;;  %v8166_v29 = vld [vmem:[%s11506_s13 + $0xac4] ss:$8 sps:$4 sm:$0xff]   ;;  %v8164_v37 = vld [vmem:[%s11506_s13 + $0xac0] ss:$8 sps:$4 sm:$0xff]   ;;  %v8172_v13 = vld [vmem:[%s11506_s13 + $0xab4] ss:$8 sps:$4 sm:$0xff]  }
 0x35a   :  { %v5925_v6 = vpop.f32.mrf.mxu1  ;;  %6341 = vmatpush1.bf16.msra.mxu0 %v8101_v47  ;;  %v8169_v47 = vld [vmem:[%s11506_s13 + $0xdb4] ss:$8 sps:$4 sm:$0xff]   ;;  %v8175_v31 = vld [vmem:[%s11506_s13 + $0xda4] ss:$8 sps:$4 sm:$0xff]   ;;  %v8173_v18 = vld [vmem:[%s11506_s13 + $0xda0] ss:$8 sps:$4 sm:$0xff]  }
 0x35b   :  { %v6049_v33 = vpop.f32.mrf.mxu0  ;;  %6218 = vmatpush1.bf16.msra.mxu1 %v8104_v38  ;;  %6342 = vmatprep.subr.bf16.mxu0 %v8109_v36  ;;  %v8167_v38 = vld [vmem:[%s11506_s13 + $0xdb0] ss:$8 sps:$4 sm:$0xff]   ;;  %v8176_v6 = vld [vmem:[%s11506_s13 + $0xaa0] ss:$8 sps:$4 sm:$0xff]  }
 0x35c   :  { %v5926_v21 = vpop.f32.mrf.mxu1  ;;  %6219 = vmatprep.subr.bf16.mxu1 %v8112_v27  ;;  %v8170_v36 = vld [vmem:[%s11506_s13 + $0xab0] ss:$8 sps:$4 sm:$0xff]   ;;  %v8178_v27 = vld [vmem:[%s11506_s13 + $0xaa4] ss:$8 sps:$4 sm:$0xff]   ;;  %v8184_v33 = vld [vmem:[%s11506_s13 + $0xa94] ss:$8 sps:$4 sm:$0xff]  }
 0x35d   :  { %v8182_v21 = vld [vmem:[%s11506_s13 + $0xa90] ss:$8 sps:$4 sm:$0xff]  }
 0x35e   :  { %6343 = vmatpush1.bf16.msra.mxu0 %v8107_v44  ;;  %v8181_v44 = vld [vmem:[%s11506_s13 + $0xd94] ss:$8 sps:$4 sm:$0xff]  }
 0x35f   :  { %6220 = vmatpush1.bf16.msra.mxu1 %v8110_v28  ;;  %6344 = vmatprep.subr.bf16.mxu0 %v8115_v34  ;;  %v1820_v28 = vcombine.high %v9419_v46, %v9419_v46  ;;  %v8179_v34 = vld [vmem:[%s11506_s13 + $0xd90] ss:$8 sps:$4 sm:$0xff]  }
 0x360   :  { %6221 = vmatprep.subr.bf16.mxu1 %v8118_v49  ;;  %v8187_v49 = vld [vmem:[%s11506_s13 + $0xd84] ss:$8 sps:$4 sm:$0xff]  }
 0x362   :  { %6345 = vmatpush1.bf16.msra.mxu0 %v8113_v43  ;;  %v8190_v43 = vld [vmem:[%s11506_s13 + $0xa84] ss:$8 sps:$4 sm:$0xff]  }
 0x363   :  { %6222 = vmatpush1.bf16.msra.mxu1 %v8116_v63  ;;  %6346 = vmatprep.subr.bf16.mxu0 %v8121_v52  ;;  %v10664_v63 = vrot.slane %v1820_v28, %v8670_v9  ;;  %v8185_v52 = vld [vmem:[%s11506_s13 + $0xd80] ss:$8 sps:$4 sm:$0xff]   ;;  %v8235_v28 = vld [vmem:[%s11506_s13 + $0xf04] ss:$8 sps:$4 sm:$0xff]  }
 0x364   :  { %6223 = vmatprep.subr.bf16.mxu1 %v8124_v41  ;;  %v10671_v41 = vrot.slane %v9376_v19, %v8670_v9  ;;  %v8191_v19 = vld [vmem:[%s11506_s13 + $0xf70] ss:$8 sps:$4 sm:$0xff]  }
 0x366   :  { %6347 = vmatpush1.bf16.msra.mxu0 %v8119_v16  ;;  %v8188_v16 = vld [vmem:[%s11506_s13 + $0xa80] ss:$8 sps:$4 sm:$0xff]  }
 0x367   :  { %6224 = vmatpush1.bf16.msra.mxu1 %v8122_v35  ;;  %6348 = vmatprep.subr.bf16.mxu0 %v8127_v42  ;;  %v8193_v35 = vld [vmem:[%s11506_s13 + $0xf74] ss:$8 sps:$4 sm:$0xff]  }
 0x368   :  { %6225 = vmatprep.subr.bf16.mxu1 %v8130_v60  ;;  %v8196_v42 = vld [vmem:[%s11506_s13 + $0xc74] ss:$8 sps:$4 sm:$0xff]   ;;  %v1836_v60 = vcombine.high %v10664_v63, %v10664_v63 }
 0x36a   :  { %6349 = vmatpush1.bf16.msra.mxu0 %v8125_v53  ;;  %v1818_v53 = vcombine.high %v10671_v41, %v10671_v41 }
 0x36b   :  { %6226 = vmatpush1.bf16.msra.mxu1 %v8128_v5  ;;  %6350 = vmatprep.subr.bf16.mxu0 %v8133_v62  ;;  %v1937_v5 = vpack.c.bf16 %v10443_v61, %v10443_v61  ;;  %v8194_v62 = vld [vmem:[%s11506_s13 + $0xc70] ss:$8 sps:$4 sm:$0xff]   ;;  %v1942_v61 = vpack.c.bf16 %v1836_v60, %v1836_v60  ;;  %v8250_v60 = vld [vmem:[%s11506_s13 + $0xce4] ss:$8 sps:$4 sm:$0xff]  }
 0x36c   :  { %6227 = vmatprep.subr.bf16.mxu1 %v8136_v30  ;;  %v1931_v30 = vpack.c.bf16 %v10450_v24, %v10450_v24  ;;  %v1936_v24 = vpack.c.bf16 %v1818_v53, %v1818_v53  ;;  %v8248_v53 = vld [vmem:[%s11506_s13 + $0xce0] ss:$8 sps:$4 sm:$0xff]  }
 0x36e   :  { %6351 = vmatpush1.bf16.msra.mxu0 %v8131_v25  ;;  %v8199_v25 = vld [vmem:[%s11506_s13 + $0xf64] ss:$8 sps:$4 sm:$0xff]  }
 0x36f   :  { %6228 = vmatpush1.bf16.msra.mxu1 %v8134_v12  ;;  %6352 = vmatprep.subr.bf16.mxu0 %v8139_v58  ;;  %v5963_v58 = vadd.f32 %v10259_v39, %v10488_v55  ;;  %v5965_v39 = vadd.f32 %v10270_v10, %v10503_v50  ;;  %v8200_v55 = vld [vmem:[%s11506_s13 + $0xc60] ss:$8 sps:$4 sm:$0xff]   ;;  %v8203_v50 = vld [vmem:[%s11506_s13 + $0xf50] ss:$8 sps:$4 sm:$0xff]  }
 0x370   :  { %6229 = vmatprep.subr.bf16.mxu1 %v8142_v17  ;;  %v8202_v17 = vld [vmem:[%s11506_s13 + $0xc64] ss:$8 sps:$4 sm:$0xff]  }
 0x372   :  { %6353 = vmatpush1.bf16.msra.mxu0 %v8137_v56 }
 0x373   :  { %6230 = vmatpush1.bf16.msra.mxu1 %v8140_v20  ;;  %6354 = vmatprep.subr.bf16.mxu0 %v8145_v45  ;;  %v8197_v20 = vld [vmem:[%s11506_s13 + $0xf60] ss:$8 sps:$4 sm:$0xff]  }
 0x374   :  { %6231 = vmatprep.subr.bf16.mxu1 %v8148_v8 }
 0x376   :  { %6355 = vmatpush2.bf16.msra.mxu0 %v8143_v32  ;;  %v8205_v32 = vld [vmem:[%s11506_s13 + $0xf54] ss:$8 sps:$4 sm:$0xff]  }
 0x377   :  { %6232 = vmatpush2.bf16.msra.mxu1 %v8146_v7  ;;  %6356 = vmatprep.subr.bf16.mxu0 %v8151_v40  ;;  %v8208_v40 = vld [vmem:[%s11506_s13 + $0xc54] ss:$8 sps:$4 sm:$0xff]  }
 0x378   :  { %6233 = vmatprep.subr.bf16.mxu1 %v8154_v54 }
 0x37a   :  { %6357 = vmatpush2.bf16.msra.mxu0 %v8149_v0 }
 0x37b   :  { %6234 = vmatpush2.bf16.msra.mxu1 %v8152_v14  ;;  %6358 = vmatprep.subr.bf16.mxu0 %v8157_v15  ;;  %v8206_v15 = vld [vmem:[%s11506_s13 + $0xc50] ss:$8 sps:$4 sm:$0xff]  }
 0x37c   :  { %6235 = vmatprep.subr.bf16.mxu1 %v8160_v48  ;;  %v8211_v48 = vld [vmem:[%s11506_s13 + $0xf44] ss:$8 sps:$4 sm:$0xff]  }
 0x37e   :  { %6359 = vmatpush2.bf16.msra.mxu0 %v8155_v1 }
 0x37f   :  { %6236 = vmatpush2.bf16.msra.mxu1 %v8158_v11  ;;  %6360 = vmatprep.subr.bf16.mxu0 %v8163_v22  ;;  %v8214_v11 = vld [vmem:[%s11506_s13 + $0xc44] ss:$8 sps:$4 sm:$0xff]   ;;  %v8209_v22 = vld [vmem:[%s11506_s13 + $0xf40] ss:$8 sps:$4 sm:$0xff]  }
 0x380   :  { %6237 = vmatprep.subr.bf16.mxu1 %v8166_v29  ;;  %v8212_v29 = vld [vmem:[%s11506_s13 + $0xc40] ss:$8 sps:$4 sm:$0xff]  }
 0x382   :  { %6361 = vmatpush2.bf16.msra.mxu0 %v8161_v3  ;;  %v8217_v3 = vld [vmem:[%s11506_s13 + $0xf34] ss:$8 sps:$4 sm:$0xff]  }
 0x383   :  { %6238 = vmatpush2.bf16.msra.mxu1 %v8164_v37  ;;  %6362 = vmatprep.subr.bf16.mxu0 %v8169_v47  ;;  %v8220_v37 = vld [vmem:[%s11506_s13 + $0xc34] ss:$8 sps:$4 sm:$0xff]   ;;  %v8215_v47 = vld [vmem:[%s11506_s13 + $0xf30] ss:$8 sps:$4 sm:$0xff]  }
 0x384   :  { %6239 = vmatprep.subr.bf16.mxu1 %v8172_v13  ;;  %v8218_v13 = vld [vmem:[%s11506_s13 + $0xc30] ss:$8 sps:$4 sm:$0xff]  }
 0x386   :  { %6363 = vmatpush2.bf16.msra.mxu0 %v8167_v38  ;;  %v8223_v38 = vld [vmem:[%s11506_s13 + $0xf24] ss:$8 sps:$4 sm:$0xff]  }
 0x387   :  { %6240 = vmatpush2.bf16.msra.mxu1 %v8170_v36  ;;  %6364 = vmatprep.subr.bf16.mxu0 %v8175_v31  ;;  %v8226_v36 = vld [vmem:[%s11506_s13 + $0xc24] ss:$8 sps:$4 sm:$0xff]   ;;  %v8221_v31 = vld [vmem:[%s11506_s13 + $0xf20] ss:$8 sps:$4 sm:$0xff]  }
 0x388   :  { %6241 = vmatprep.subr.bf16.mxu1 %v8178_v27  ;;  %v8224_v27 = vld [vmem:[%s11506_s13 + $0xc20] ss:$8 sps:$4 sm:$0xff]  }
 0x38a   :  { %6365 = vmatpush2.bf16.msra.mxu0 %v8173_v18  ;;  %v8229_v18 = vld [vmem:[%s11506_s13 + $0xf14] ss:$8 sps:$4 sm:$0xff]  }
 0x38b   :  { %6242 = vmatpush2.bf16.msra.mxu1 %v8176_v6  ;;  %6366 = vmatprep.subr.bf16.mxu0 %v8181_v44  ;;  %v8232_v6 = vld [vmem:[%s11506_s13 + $0xc14] ss:$8 sps:$4 sm:$0xff]   ;;  %v8227_v44 = vld [vmem:[%s11506_s13 + $0xf10] ss:$8 sps:$4 sm:$0xff]  }
 0x38c   :  { %6243 = vmatprep.subr.bf16.mxu1 %v8184_v33  ;;  %v8230_v33 = vld [vmem:[%s11506_s13 + $0xc10] ss:$8 sps:$4 sm:$0xff]  }
 0x38e   :  { %6367 = vmatpush2.bf16.msra.mxu0 %v8179_v34  ;;  %v8238_v34 = vld [vmem:[%s11506_s13 + $0xc04] ss:$8 sps:$4 sm:$0xff]  }
 0x38f   :  { %6244 = vmatpush2.bf16.msra.mxu1 %v8182_v21  ;;  %6368 = vmatprep.subr.bf16.mxu0 %v8187_v49  ;;  %v8233_v21 = vld [vmem:[%s11506_s13 + $0xf00] ss:$8 sps:$4 sm:$0xff]  }
 0x390   :  { %6245 = vmatprep.subr.bf16.mxu1 %v8190_v43  ;;  %v8236_v49 = vld [vmem:[%s11506_s13 + $0xc00] ss:$8 sps:$4 sm:$0xff]   ;;  %v8241_v43 = vld [vmem:[%s11506_s13 + $0xff4] ss:$8 sps:$4 sm:$0xff]  }
 0x392   :  { %6369 = vmatpush2.bf16.msra.mxu0 %v8185_v52  ;;  %v8244_v52 = vld [vmem:[%s11506_s13 + $0xcf4] ss:$8 sps:$4 sm:$0xff]  }
 0x393   :  { %6246 = vmatpush2.bf16.msra.mxu1 %v8188_v16  ;;  %6420 = vmatprep.subr.bf16.mxu0 %v8193_v35  ;;  %v8239_v16 = vld [vmem:[%s11506_s13 + $0xff0] ss:$8 sps:$4 sm:$0xff]  }
 0x394   :  { %6297 = vmatprep.subr.bf16.mxu1 %v8196_v42  ;;  %v8242_v35 = vld [vmem:[%s11506_s13 + $0xcf0] ss:$8 sps:$4 sm:$0xff]   ;;  %v8247_v42 = vld [vmem:[%s11506_s13 + $0xfe4] ss:$8 sps:$4 sm:$0xff]  }
 0x395   :  { %v10699_v12 = vpop.f32.mrf.mxu0  ;;  %6371 = vmatmul.mubr.bf16.vlgmr.msra.gmra.mxu0 %v1937_v5  ;;  %v8253_v5 = vld [vmem:[%s11506_s13 + $0xfd4] ss:$8 sps:$4 sm:$0xff]  }
 0x396   :  { %v6003_v56 = vpop.f32.mrf.mxu1  ;;  %6248 = vmatmul.mubr.bf16.vlgmr.msra.gmra.mxu1 %v1931_v30  ;;  %6421 = vmatpush1.bf16.msra.mxu0 %v8191_v19  ;;  %v8245_v19 = vld [vmem:[%s11506_s13 + $0xfe0] ss:$8 sps:$4 sm:$0xff]   ;;  %v8251_v30 = vld [vmem:[%s11506_s13 + $0xfd0] ss:$8 sps:$4 sm:$0xff]  }
 0x397   :  { %v10709_v45 = vadd.f32 %v6003_v56, %v5963_v58  ;;  %6452 = vmatprep.mubr.bf16.mxu0 %v1942_v61  ;;  %v10711_v8 = vpop.f32.mrf.mxu0  ;;  %6298 = vmatpush1.bf16.msra.mxu1 %v8194_v62  ;;  %v8256_v62 = vld [vmem:[%s11506_s13 + $0xcd4] ss:$8 sps:$4 sm:$0xff]   ;;  %v8259_v58 = vld [vmem:[%s11506_s13 + $0xfc4] ss:$8 sps:$4 sm:$0xff]   ;;  %v8260_v56 = vld [vmem:[%s11506_s13 + $0xcc0] ss:$8 sps:$4 sm:$0xff]  }
 0x398   :  { %6329 = vmatprep.mubr.bf16.mxu1 %v1936_v24  ;;  %v6005_v7 = vpop.f32.mrf.mxu1  ;;  %6422 = vmatprep.subr.bf16.mxu0 %v8199_v25  ;;  %v8254_v25 = vld [vmem:[%s11506_s13 + $0xcd0] ss:$8 sps:$4 sm:$0xff]   ;;  %v8262_v61 = vld [vmem:[%s11506_s13 + $0xcc4] ss:$8 sps:$4 sm:$0xff]   ;;  %v8265_v24 = vld [vmem:[%s11506_s13 + $0xfb4] ss:$8 sps:$4 sm:$0xff]  }
 0x399   :  { %v10724_v54 = vadd.f32 %v6005_v7, %v5965_v39  ;;  %v6130_v0 = vpop.f32.mrf.mxu0  ;;  %6299 = vmatprep.subr.bf16.mxu1 %v8202_v17  ;;  %v8257_v17 = vld [vmem:[%s11506_s13 + $0xfc0] ss:$8 sps:$4 sm:$0xff]   ;;  %v8263_v39 = vld [vmem:[%s11506_s13 + $0xfb0] ss:$8 sps:$4 sm:$0xff]   ;;  %v8274_v7 = vld [vmem:[%s11506_s13 + $0xca4] ss:$8 sps:$4 sm:$0xff]  }
 0x39a   :  { %v6007_v10 = vpop.f32.mrf.mxu1  ;;  %6423 = vmatpush1.bf16.msra.mxu0 %v8197_v20  ;;  %v8268_v20 = vld [vmem:[%s11506_s13 + $0xcb4] ss:$8 sps:$4 sm:$0xff]   ;;  %v8272_v0 = vld [vmem:[%s11506_s13 + $0xca0] ss:$8 sps:$4 sm:$0xff]  }
 0x39b   :  { %v6131_v14 = vpop.f32.mrf.mxu0  ;;  %6300 = vmatpush1.bf16.msra.mxu1 %v8200_v55  ;;  %6424 = vmatprep.subr.bf16.mxu0 %v8205_v32  ;;  %v8266_v55 = vld [vmem:[%s11506_s13 + $0xcb0] ss:$8 sps:$4 sm:$0xff]   ;;  %v8271_v32 = vld [vmem:[%s11506_s13 + $0xfa4] ss:$8 sps:$4 sm:$0xff]   ;;  %v8277_v10 = vld [vmem:[%s11506_s13 + $0xf94] ss:$8 sps:$4 sm:$0xff]  }
 0x39c   :  { %v6008_v1 = vpop.f32.mrf.mxu1  ;;  %6301 = vmatprep.subr.bf16.mxu1 %v8208_v40  ;;  %v8269_v40 = vld [vmem:[%s11506_s13 + $0xfa0] ss:$8 sps:$4 sm:$0xff]   ;;  %v1837_v14 = vcombine.high %v9449_v2, %v9449_v2 }
 0x39d   :  { %v8283_v1 = vld [vmem:[%s11506_s13 + $0xf84] ss:$8 sps:$4 sm:$0xff]  }
 0x39e   :  { %6425 = vmatpush1.bf16.msra.mxu0 %v8203_v50  ;;  %v8280_v50 = vld [vmem:[%s11506_s13 + $0xc94] ss:$8 sps:$4 sm:$0xff]  }
 0x39f   :  { %6302 = vmatpush1.bf16.msra.mxu1 %v8206_v15  ;;  %6426 = vmatprep.subr.bf16.mxu0 %v8211_v48  ;;  %v8275_v15 = vld [vmem:[%s11506_s13 + $0xf90] ss:$8 sps:$4 sm:$0xff]  }
 0x3a0   :  { %6303 = vmatprep.subr.bf16.mxu1 %v8214_v11  ;;  %v8278_v48 = vld [vmem:[%s11506_s13 + $0xc90] ss:$8 sps:$4 sm:$0xff]   ;;  %v8286_v11 = vld [vmem:[%s11506_s13 + $0xc84] ss:$8 sps:$4 sm:$0xff]  }
 0x3a2   :  { %6427 = vmatpush1.bf16.msra.mxu0 %v8209_v22  ;;  %v10885_v22 = vrot.slane %v1837_v14, %v8670_v9  ;;  %v8334_v14 = vld [vmem:[%s11506_s13 + $0xe04] ss:$8 sps:$4 sm:$0xff]  }
 0x3a3   :  { %6304 = vmatpush1.bf16.msra.mxu1 %v8212_v29  ;;  %6428 = vmatprep.subr.bf16.mxu0 %v8217_v3  ;;  %v8281_v29 = vld [vmem:[%s11506_s13 + $0xf80] ss:$8 sps:$4 sm:$0xff]   ;;  %v10892_v3 = vrot.slane %v9419_v46, %v8670_v9  ;;  %v8287_v46 = vld [vmem:[%s11506_s13 + $0x1170] ss:$8 sps:$4 sm:$0xff]  }
 0x3a4   :  { %6305 = vmatprep.subr.bf16.mxu1 %v8220_v37  ;;  %v8284_v37 = vld [vmem:[%s11506_s13 + $0xc80] ss:$8 sps:$4 sm:$0xff]  }
 0x3a6   :  { %6429 = vmatpush1.bf16.msra.mxu0 %v8215_v47  ;;  %v8289_v47 = vld [vmem:[%s11506_s13 + $0x1174] ss:$8 sps:$4 sm:$0xff]  }
 0x3a7   :  { %6306 = vmatpush1.bf16.msra.mxu1 %v8218_v13  ;;  %6430 = vmatprep.subr.bf16.mxu0 %v8223_v38  ;;  %v8292_v13 = vld [vmem:[%s11506_s13 + $0xe74] ss:$8 sps:$4 sm:$0xff]   ;;  %v1853_v38 = vcombine.high %v10885_v22, %v10885_v22 }
 0x3a8   :  { %6307 = vmatprep.subr.bf16.mxu1 %v8226_v36  ;;  %v1835_v36 = vcombine.high %v10892_v3, %v10892_v3 }
 0x3aa   :  { %6431 = vmatpush1.bf16.msra.mxu0 %v8221_v31  ;;  %v1941_v31 = vpack.c.bf16 %v10664_v63, %v10664_v63  ;;  %v1946_v63 = vpack.c.bf16 %v1853_v38, %v1853_v38  ;;  %v8341_v38 = vld [vmem:[%s11506_s13 + $0x11e0] ss:$8 sps:$4 sm:$0xff]  }
 0x3ab   :  { %6308 = vmatpush1.bf16.msra.mxu1 %v8224_v27  ;;  %6432 = vmatprep.subr.bf16.mxu0 %v8229_v18  ;;  %v8290_v27 = vld [vmem:[%s11506_s13 + $0xe70] ss:$8 sps:$4 sm:$0xff]   ;;  %v1935_v18 = vpack.c.bf16 %v10671_v41, %v10671_v41  ;;  %v1940_v41 = vpack.c.bf16 %v1835_v36, %v1835_v36  ;;  %v8349_v36 = vld [vmem:[%s11506_s13 + $0x11d4] ss:$8 sps:$4 sm:$0xff]  }
 0x3ac   :  { %6309 = vmatprep.subr.bf16.mxu1 %v8232_v6  ;;  %v8295_v6 = vld [vmem:[%s11506_s13 + $0x1164] ss:$8 sps:$4 sm:$0xff]  }
 0x3ae   :  { %6433 = vmatpush1.bf16.msra.mxu0 %v8227_v44 }
 0x3af   :  { %6310 = vmatpush1.bf16.msra.mxu1 %v8230_v33  ;;  %6434 = vmatprep.subr.bf16.mxu0 %v8235_v28  ;;  %v6045_v33 = vadd.f32 %v10478_v4, %v10709_v45  ;;  %v8298_v28 = vld [vmem:[%s11506_s13 + $0xe64] ss:$8 sps:$4 sm:$0xff]   ;;  %v6047_v4 = vadd.f32 %v10490_v51, %v10724_v54  ;;  %v8296_v45 = vld [vmem:[%s11506_s13 + $0xe60] ss:$8 sps:$4 sm:$0xff]   ;;  %v8299_v54 = vld [vmem:[%s11506_s13 + $0x1150] ss:$8 sps:$4 sm:$0xff]  }
 0x3b0   :  { %6311 = vmatprep.subr.bf16.mxu1 %v8238_v34 }
 0x3b2   :  { %6435 = vmatpush1.bf16.msra.mxu0 %v8233_v21  ;;  %v8293_v21 = vld [vmem:[%s11506_s13 + $0x1160] ss:$8 sps:$4 sm:$0xff]  }
 0x3b3   :  { %6312 = vmatpush1.bf16.msra.mxu1 %v8236_v49  ;;  %6436 = vmatprep.subr.bf16.mxu0 %v8241_v43 }
 0x3b4   :  { %6313 = vmatprep.subr.bf16.mxu1 %v8244_v52  ;;  %v8301_v52 = vld [vmem:[%s11506_s13 + $0x1154] ss:$8 sps:$4 sm:$0xff]  }
 0x3b6   :  { %6437 = vmatpush2.bf16.msra.mxu0 %v8239_v16 }
 0x3b7   :  { %6314 = vmatpush2.bf16.msra.mxu1 %v8242_v35  ;;  %6438 = vmatprep.subr.bf16.mxu0 %v8247_v42  ;;  %v8304_v35 = vld [vmem:[%s11506_s13 + $0xe54] ss:$8 sps:$4 sm:$0xff]  }
 0x3b8   :  { %6315 = vmatprep.subr.bf16.mxu1 %v8250_v60 }
 0x3ba   :  { %6439 = vmatpush2.bf16.msra.mxu0 %v8245_v19 }
 0x3bb   :  { %6316 = vmatpush2.bf16.msra.mxu1 %v8248_v53  ;;  %6440 = vmatprep.subr.bf16.mxu0 %v8253_v5  ;;  %v8302_v53 = vld [vmem:[%s11506_s13 + $0xe50] ss:$8 sps:$4 sm:$0xff]   ;;  %v8307_v5 = vld [vmem:[%s11506_s13 + $0x1144] ss:$8 sps:$4 sm:$0xff]  }
 0x3bc   :  { %6317 = vmatprep.subr.bf16.mxu1 %v8256_v62 }
 0x3be   :  { %6441 = vmatpush2.bf16.msra.mxu0 %v8251_v30  ;;  %v8310_v30 = vld [vmem:[%s11506_s13 + $0xe44] ss:$8 sps:$4 sm:$0xff]  }
 0x3bf   :  { %6318 = vmatpush2.bf16.msra.mxu1 %v8254_v25  ;;  %6442 = vmatprep.subr.bf16.mxu0 %v8259_v58  ;;  %v8305_v25 = vld [vmem:[%s11506_s13 + $0x1140] ss:$8 sps:$4 sm:$0xff]  }
 0x3c0   :  { %6319 = vmatprep.subr.bf16.mxu1 %v8262_v61  ;;  %v8308_v58 = vld [vmem:[%s11506_s13 + $0xe40] ss:$8 sps:$4 sm:$0xff]   ;;  %v8313_v61 = vld [vmem:[%s11506_s13 + $0x1134] ss:$8 sps:$4 sm:$0xff]  }
 0x3c2   :  { %6443 = vmatpush2.bf16.msra.mxu0 %v8257_v17  ;;  %v8316_v17 = vld [vmem:[%s11506_s13 + $0xe34] ss:$8 sps:$4 sm:$0xff]  }
 0x3c3   :  { %6320 = vmatpush2.bf16.msra.mxu1 %v8260_v56  ;;  %6444 = vmatprep.subr.bf16.mxu0 %v8265_v24  ;;  %v8311_v56 = vld [vmem:[%s11506_s13 + $0x1130] ss:$8 sps:$4 sm:$0xff]  }
 0x3c4   :  { %6321 = vmatprep.subr.bf16.mxu1 %v8268_v20  ;;  %v8314_v24 = vld [vmem:[%s11506_s13 + $0xe30] ss:$8 sps:$4 sm:$0xff]   ;;  %v8319_v20 = vld [vmem:[%s11506_s13 + $0x1124] ss:$8 sps:$4 sm:$0xff]  }
 0x3c6   :  { %6445 = vmatpush2.bf16.msra.mxu0 %v8263_v39  ;;  %v8322_v39 = vld [vmem:[%s11506_s13 + $0xe24] ss:$8 sps:$4 sm:$0xff]  }
 0x3c7   :  { %6322 = vmatpush2.bf16.msra.mxu1 %v8266_v55  ;;  %6446 = vmatprep.subr.bf16.mxu0 %v8271_v32  ;;  %v8317_v55 = vld [vmem:[%s11506_s13 + $0x1120] ss:$8 sps:$4 sm:$0xff]  }
 0x3c8   :  { %6323 = vmatprep.subr.bf16.mxu1 %v8274_v7  ;;  %v8320_v32 = vld [vmem:[%s11506_s13 + $0xe20] ss:$8 sps:$4 sm:$0xff]   ;;  %v8325_v7 = vld [vmem:[%s11506_s13 + $0x1114] ss:$8 sps:$4 sm:$0xff]  }
 0x3ca   :  { %6447 = vmatpush2.bf16.msra.mxu0 %v8269_v40  ;;  %v8328_v40 = vld [vmem:[%s11506_s13 + $0xe14] ss:$8 sps:$4 sm:$0xff]  }
 0x3cb   :  { %6324 = vmatpush2.bf16.msra.mxu1 %v8272_v0  ;;  %6448 = vmatprep.subr.bf16.mxu0 %v8277_v10  ;;  %v8323_v0 = vld [vmem:[%s11506_s13 + $0x1110] ss:$8 sps:$4 sm:$0xff]  }
 0x3cc   :  { %6325 = vmatprep.subr.bf16.mxu1 %v8280_v50  ;;  %v8326_v10 = vld [vmem:[%s11506_s13 + $0xe10] ss:$8 sps:$4 sm:$0xff]   ;;  %v8331_v50 = vld [vmem:[%s11506_s13 + $0x1104] ss:$8 sps:$4 sm:$0xff]  }
 0x3ce   :  { %6449 = vmatpush2.bf16.msra.mxu0 %v8275_v15  ;;  %v8329_v15 = vld [vmem:[%s11506_s13 + $0x1100] ss:$8 sps:$4 sm:$0xff]  }
 0x3cf   :  { %6326 = vmatpush2.bf16.msra.mxu1 %v8278_v48  ;;  %6450 = vmatprep.subr.bf16.mxu0 %v8283_v1  ;;  %v8332_v48 = vld [vmem:[%s11506_s13 + $0xe00] ss:$8 sps:$4 sm:$0xff]   ;;  %v8337_v1 = vld [vmem:[%s11506_s13 + $0x11f4] ss:$8 sps:$4 sm:$0xff]  }
 0x3d0   :  { %6327 = vmatprep.subr.bf16.mxu1 %v8286_v11  ;;  %v8340_v11 = vld [vmem:[%s11506_s13 + $0xef4] ss:$8 sps:$4 sm:$0xff]  }
 0x3d2   :  { %6451 = vmatpush2.bf16.msra.mxu0 %v8281_v29  ;;  %v8335_v29 = vld [vmem:[%s11506_s13 + $0x11f0] ss:$8 sps:$4 sm:$0xff]  }
 0x3d3   :  { %6328 = vmatpush2.bf16.msra.mxu1 %v8284_v37  ;;  %6502 = vmatprep.subr.bf16.mxu0 %v8289_v47  ;;  %v8338_v37 = vld [vmem:[%s11506_s13 + $0xef0] ss:$8 sps:$4 sm:$0xff]   ;;  %v8343_v47 = vld [vmem:[%s11506_s13 + $0x11e4] ss:$8 sps:$4 sm:$0xff]  }
 0x3d4   :  { %6379 = vmatprep.subr.bf16.mxu1 %v8292_v13  ;;  %v8346_v13 = vld [vmem:[%s11506_s13 + $0xee4] ss:$8 sps:$4 sm:$0xff]  }
 0x3d5   :  { %v10920_v44 = vpop.f32.mrf.mxu0  ;;  %6453 = vmatmul.mubr.bf16.vlgmr.msra.gmra.mxu0 %v1941_v31  ;;  %v8352_v31 = vld [vmem:[%s11506_s13 + $0xed4] ss:$8 sps:$4 sm:$0xff]  }
 0x3d6   :  { %v6085_v34 = vpop.f32.mrf.mxu1  ;;  %6330 = vmatmul.mubr.bf16.vlgmr.msra.gmra.mxu1 %v1935_v18  ;;  %6503 = vmatpush1.bf16.msra.mxu0 %v8287_v46  ;;  %v8344_v46 = vld [vmem:[%s11506_s13 + $0xee0] ss:$8 sps:$4 sm:$0xff]   ;;  %v8350_v18 = vld [vmem:[%s11506_s13 + $0xed0] ss:$8 sps:$4 sm:$0xff]  }
 0x3d7   :  { %v10930_v49 = vadd.f32 %v6085_v34, %v6045_v33  ;;  %6534 = vmatprep.mubr.bf16.mxu0 %v1946_v63  ;;  %v10932_v43 = vpop.f32.mrf.mxu0  ;;  %6380 = vmatpush1.bf16.msra.mxu1 %v8290_v27  ;;  %v8347_v27 = vld [vmem:[%s11506_s13 + $0x11d0] ss:$8 sps:$4 sm:$0xff]   ;;  %v8358_v33 = vld [vmem:[%s11506_s13 + $0xec4] ss:$8 sps:$4 sm:$0xff]   ;;  %v8353_v63 = vld [vmem:[%s11506_s13 + $0x11c0] ss:$8 sps:$4 sm:$0xff]  }
 0x3d8   :  { %6411 = vmatprep.mubr.bf16.mxu1 %v1940_v41  ;;  %v6087_v16 = vpop.f32.mrf.mxu1  ;;  %6504 = vmatprep.subr.bf16.mxu0 %v8295_v6  ;;  %v8355_v6 = vld [vmem:[%s11506_s13 + $0x11c4] ss:$8 sps:$4 sm:$0xff]   ;;  %v8361_v34 = vld [vmem:[%s11506_s13 + $0x11b4] ss:$8 sps:$4 sm:$0xff]  }
 0x3d9   :  { %v10945_v42 = vadd.f32 %v6087_v16, %v6047_v4  ;;  %v6212_v60 = vpop.f32.mrf.mxu0  ;;  %6381 = vmatprep.subr.bf16.mxu1 %v8298_v28  ;;  %v8356_v28 = vld [vmem:[%s11506_s13 + $0xec0] ss:$8 sps:$4 sm:$0xff]   ;;  %v8364_v41 = vld [vmem:[%s11506_s13 + $0xeb4] ss:$8 sps:$4 sm:$0xff]   ;;  %v8362_v4 = vld [vmem:[%s11506_s13 + $0xeb0] ss:$8 sps:$4 sm:$0xff]  }
 0x3da   :  { %v6089_v51 = vpop.f32.mrf.mxu1  ;;  %6505 = vmatpush1.bf16.msra.mxu0 %v8293_v21  ;;  %v8359_v21 = vld [vmem:[%s11506_s13 + $0x11b0] ss:$8 sps:$4 sm:$0xff]   ;;  %v8365_v16 = vld [vmem:[%s11506_s13 + $0x11a0] ss:$8 sps:$4 sm:$0xff]   ;;  %v8373_v60 = vld [vmem:[%s11506_s13 + $0x1194] ss:$8 sps:$4 sm:$0xff]  }
 0x3db   :  { %v6213_v19 = vpop.f32.mrf.mxu0  ;;  %6382 = vmatpush1.bf16.msra.mxu1 %v8296_v45  ;;  %6506 = vmatprep.subr.bf16.mxu0 %v8301_v52  ;;  %v8367_v45 = vld [vmem:[%s11506_s13 + $0x11a4] ss:$8 sps:$4 sm:$0xff]   ;;  %v8376_v51 = vld [vmem:[%s11506_s13 + $0xe94] ss:$8 sps:$4 sm:$0xff]  }
 0x3dc   :  { %v6090_v62 = vpop.f32.mrf.mxu1  ;;  %6383 = vmatprep.subr.bf16.mxu1 %v8304_v35  ;;  %v8370_v52 = vld [vmem:[%s11506_s13 + $0xea4] ss:$8 sps:$4 sm:$0xff]   ;;  %v8368_v35 = vld [vmem:[%s11506_s13 + $0xea0] ss:$8 sps:$4 sm:$0xff]   ;;  %v8371_v19 = vld [vmem:[%s11506_s13 + $0x1190] ss:$8 sps:$4 sm:$0xff]  }
 0x3dd   :  { %v8382_v62 = vld [vmem:[%s11506_s13 + $0xe84] ss:$8 sps:$4 sm:$0xff]  }
 0x3de   :  { %6507 = vmatpush1.bf16.msra.mxu0 %v8299_v54  ;;  %v1854_v54 = vcombine.high %v9455_v57, %v9455_v57 }
 0x3df   :  { %6384 = vmatpush1.bf16.msra.mxu1 %v8302_v53  ;;  %6508 = vmatprep.subr.bf16.mxu0 %v8307_v5  ;;  %v8374_v53 = vld [vmem:[%s11506_s13 + $0xe90] ss:$8 sps:$4 sm:$0xff]   ;;  %v8379_v5 = vld [vmem:[%s11506_s13 + $0x1184] ss:$8 sps:$4 sm:$0xff]  }
 0x3e0   :  { %6385 = vmatprep.subr.bf16.mxu1 %v8310_v30  ;;  %v11106_v30 = vrot.slane %v1854_v54, %v8670_v9  ;;  %v8422_v54 = vld [vmem:[%s11506_s13 + $0x1010] ss:$8 sps:$4 sm:$0xff]  }
 0x3e2   :  { %6509 = vmatpush1.bf16.msra.mxu0 %v8305_v25  ;;  %v8377_v25 = vld [vmem:[%s11506_s13 + $0x1180] ss:$8 sps:$4 sm:$0xff]  }
 0x3e3   :  { %6386 = vmatpush1.bf16.msra.mxu1 %v8308_v58  ;;  %6510 = vmatprep.subr.bf16.mxu0 %v8313_v61  ;;  %v11113_v58 = vrot.slane %v9449_v2, %v8670_v9  ;;  %v8380_v61 = vld [vmem:[%s11506_s13 + $0xe80] ss:$8 sps:$4 sm:$0xff]   ;;  %v8383_v2 = vld [vmem:[%s11506_s13 + $0x1370] ss:$8 sps:$4 sm:$0xff]  }
 0x3e4   :  { %6387 = vmatprep.subr.bf16.mxu1 %v8316_v17  ;;  %v8385_v17 = vld [vmem:[%s11506_s13 + $0x1374] ss:$8 sps:$4 sm:$0xff]  }
 0x3e6   :  { %6511 = vmatpush1.bf16.msra.mxu0 %v8311_v56  ;;  %v8388_v56 = vld [vmem:[%s11506_s13 + $0x1074] ss:$8 sps:$4 sm:$0xff]  }
 0x3e7   :  { %6388 = vmatpush1.bf16.msra.mxu1 %v8314_v24  ;;  %6512 = vmatprep.subr.bf16.mxu0 %v8319_v20  ;;  %v1870_v24 = vcombine.high %v11106_v30, %v11106_v30  ;;  %v1852_v20 = vcombine.high %v11113_v58, %v11113_v58 }
 0x3e8   :  { %6389 = vmatprep.subr.bf16.mxu1 %v8322_v39  ;;  %v1945_v39 = vpack.c.bf16 %v10885_v22, %v10885_v22 }
 0x3e9   :  { %v1950_v22 = vpack.c.bf16 %v1870_v24, %v1870_v24  ;;  %v8432_v24 = vld [vmem:[%s11506_s13 + $0x10f0] ss:$8 sps:$4 sm:$0xff]  }
 0x3ea   :  { %6513 = vmatpush1.bf16.msra.mxu0 %v8317_v55  ;;  %v8386_v55 = vld [vmem:[%s11506_s13 + $0x1070] ss:$8 sps:$4 sm:$0xff]  }
 0x3eb   :  { %6390 = vmatpush1.bf16.msra.mxu1 %v8320_v32  ;;  %6514 = vmatprep.subr.bf16.mxu0 %v8325_v7  ;;  %v1939_v32 = vpack.c.bf16 %v10892_v3, %v10892_v3  ;;  %v8391_v7 = vld [vmem:[%s11506_s13 + $0x1364] ss:$8 sps:$4 sm:$0xff]   ;;  %v1944_v3 = vpack.c.bf16 %v1852_v20, %v1852_v20  ;;  %v8438_v20 = vld [vmem:[%s11513_s15 + $0x74] ss:$8 sps:$4 sm:$0xff]  }
 0x3ec   :  { %6391 = vmatprep.subr.bf16.mxu1 %v8328_v40 }
 0x3ee   :  { %6515 = vmatpush1.bf16.msra.mxu0 %v8323_v0  ;;  %v6127_v0 = vadd.f32 %v10699_v12, %v10930_v49  ;;  %v6129_v12 = vadd.f32 %v10711_v8, %v10945_v42  ;;  %v8392_v49 = vld [vmem:[%s11506_s13 + $0x1060] ss:$8 sps:$4 sm:$0xff]   ;;  %v8395_v42 = vld [vmem:[%s11506_s13 + $0x1350] ss:$8 sps:$4 sm:$0xff]  }
 0x3ef   :  { %6392 = vmatpush1.bf16.msra.mxu1 %v8326_v10  ;;  %6516 = vmatprep.subr.bf16.mxu0 %v8331_v50  ;;  %v8394_v10 = vld [vmem:[%s11506_s13 + $0x1064] ss:$8 sps:$4 sm:$0xff]  }
 0x3f0   :  { %6393 = vmatprep.subr.bf16.mxu1 %v8334_v14  ;;  %v8389_v14 = vld [vmem:[%s11506_s13 + $0x1360] ss:$8 sps:$4 sm:$0xff]  }
 0x3f2   :  { %6517 = vmatpush1.bf16.msra.mxu0 %v8329_v15 }
 0x3f3   :  { %6394 = vmatpush1.bf16.msra.mxu1 %v8332_v48  ;;  %6518 = vmatprep.subr.bf16.mxu0 %v8337_v1  ;;  %v8397_v1 = vld [vmem:[%s11506_s13 + $0x1354] ss:$8 sps:$4 sm:$0xff]  }
 0x3f4   :  { %6395 = vmatprep.subr.bf16.mxu1 %v8340_v11 }
 0x3f6   :  { %6519 = vmatpush2.bf16.msra.mxu0 %v8335_v29  ;;  %v8400_v29 = vld [vmem:[%s11506_s13 + $0x1054] ss:$8 sps:$4 sm:$0xff]  }
 0x3f7   :  { %6396 = vmatpush2.bf16.msra.mxu1 %v8338_v37  ;;  %6520 = vmatprep.subr.bf16.mxu0 %v8343_v47 }
 0x3f8   :  { %6397 = vmatprep.subr.bf16.mxu1 %v8346_v13 }
 0x3fa   :  { %6521 = vmatpush2.bf16.msra.mxu0 %v8341_v38  ;;  %v8398_v38 = vld [vmem:[%s11506_s13 + $0x1050] ss:$8 sps:$4 sm:$0xff]  }
 0x3fb   :  { %6398 = vmatpush2.bf16.msra.mxu1 %v8344_v46  ;;  %6522 = vmatprep.subr.bf16.mxu0 %v8349_v36  ;;  %v8403_v46 = vld [vmem:[%s11506_s13 + $0x1344] ss:$8 sps:$4 sm:$0xff]  }
 0x3fc   :  { %6399 = vmatprep.subr.bf16.mxu1 %v8352_v31  ;;  %v8406_v31 = vld [vmem:[%s11506_s13 + $0x1044] ss:$8 sps:$4 sm:$0xff]  }
 0x3fe   :  { %6523 = vmatpush2.bf16.msra.mxu0 %v8347_v27  ;;  %v8401_v27 = vld [vmem:[%s11506_s13 + $0x1340] ss:$8 sps:$4 sm:$0xff]  }
 0x3ff   :  { %6400 = vmatpush2.bf16.msra.mxu1 %v8350_v18  ;;  %6524 = vmatprep.subr.bf16.mxu0 %v8355_v6  ;;  %v8404_v18 = vld [vmem:[%s11506_s13 + $0x1040] ss:$8 sps:$4 sm:$0xff]   ;;  %v8409_v6 = vld [vmem:[%s11506_s13 + $0x1334] ss:$8 sps:$4 sm:$0xff]  }
 0x400   :  { %6401 = vmatprep.subr.bf16.mxu1 %v8358_v33  ;;  %v1671_v33 = vpop.xlane.xlu1 %1670 }
 0x402   :  { %6525 = vmatpush2.bf16.msra.mxu0 %v8353_v63  ;;  %v8412_v63 = vld [vmem:[%s11506_s13 + $0x1034] ss:$8 sps:$4 sm:$0xff]  }
 0x403   :  { %6402 = vmatpush2.bf16.msra.mxu1 %v8356_v28  ;;  %6526 = vmatprep.subr.bf16.mxu0 %v8361_v34  ;;  %v8407_v28 = vld [vmem:[%s11506_s13 + $0x1330] ss:$8 sps:$4 sm:$0xff]   ;;  %v1672_v34 = vmul.f32 0.0078125, %v1671_v33  ;;  %v8471_v33 = vld [vmem:[%s11506_s13 + $0x1094] ss:$8 sps:$4 sm:$0xff]  }
 0x404   :  { %6403 = vmatprep.subr.bf16.mxu1 %v8364_v41  ;;  %v8410_v41 = vld [vmem:[%s11506_s13 + $0x1030] ss:$8 sps:$4 sm:$0xff]  }
 0x406   :  { %6527 = vmatpush2.bf16.msra.mxu0 %v8359_v21  ;;  %v8415_v21 = vld [vmem:[%s11506_s13 + $0x1324] ss:$8 sps:$4 sm:$0xff]  }
 0x407   :  { %6404 = vmatpush2.bf16.msra.mxu1 %v8362_v4  ;;  %6528 = vmatprep.subr.bf16.mxu0 %v8367_v45  ;;  %v8418_v4 = vld [vmem:[%s11506_s13 + $0x1024] ss:$8 sps:$4 sm:$0xff]   ;;  %v8413_v45 = vld [vmem:[%s11506_s13 + $0x1320] ss:$8 sps:$4 sm:$0xff]  }
 0x408   :  { %6405 = vmatprep.subr.bf16.mxu1 %v8370_v52  ;;  %v1673_v52 = vadd.f32 1e-05, %v1672_v34  ;;  %v8474_v34 = vld [vmem:[%s11513_s15 + $0x14] ss:$8 sps:$4 sm:$0xff]  }
 0x40a   :  { %6529 = vmatpush2.bf16.msra.mxu0 %v8365_v16  ;;  %v8416_v16 = vld [vmem:[%s11506_s13 + $0x1020] ss:$8 sps:$4 sm:$0xff]   ;;  %8535 = vrsqrt.f32 %v1673_v52  ;;  %v8480_v52 = vld [vmem:[%s11513_s15 + $0x4] ss:$8 sps:$4 sm:$0xff]  }
 0x40b   :  { %6406 = vmatpush2.bf16.msra.mxu1 %v8368_v35  ;;  %6530 = vmatprep.subr.bf16.mxu0 %v8373_v60  ;;  %v8421_v35 = vld [vmem:[%s11506_s13 + $0x1314] ss:$8 sps:$4 sm:$0xff]  }
 0x40c   :  { %6407 = vmatprep.subr.bf16.mxu1 %v8376_v51  ;;  %v8424_v60 = vld [vmem:[%s11506_s13 + $0x1014] ss:$8 sps:$4 sm:$0xff]   ;;  %v8419_v51 = vld [vmem:[%s11506_s13 + $0x1310] ss:$8 sps:$4 sm:$0xff]  }
 0x40e   :  { %6531 = vmatpush2.bf16.msra.mxu0 %v8371_v19  ;;  %v8427_v19 = vld [vmem:[%s11506_s13 + $0x1304] ss:$8 sps:$4 sm:$0xff]  }
 0x40f   :  { %6408 = vmatpush2.bf16.msra.mxu1 %v8374_v53  ;;  %6532 = vmatprep.subr.bf16.mxu0 %v8379_v5  ;;  %v8430_v53 = vld [vmem:[%s11506_s13 + $0x1004] ss:$8 sps:$4 sm:$0xff]  }
 0x410   :  { %6409 = vmatprep.subr.bf16.mxu1 %v8382_v62  ;;  %v2575_v5 = vld [vmem:[%s11506_s13 + $0x1380] sm:$0xff] }
 0x411   :  { %v8425_v62 = vld [vmem:[%s11506_s13 + $0x1300] ss:$8 sps:$4 sm:$0xff]  }
 0x412   :  { %6533 = vmatpush2.bf16.msra.mxu0 %v8377_v25  ;;  %v8428_v25 = vld [vmem:[%s11506_s13 + $0x1000] ss:$8 sps:$4 sm:$0xff]  }
 0x413   :  { %6410 = vmatpush2.bf16.msra.mxu1 %v8380_v61  ;;  %6584 = vmatprep.subr.bf16.mxu0 %v8385_v17  ;;  %v7506_v61 = vcombine.high %v2575_v5, %v2575_v5  ;;  %v7505_v17 = vcombine.low %v2575_v5, %v2575_v5 }
 0x414   :  { %6461 = vmatprep.subr.bf16.mxu1 %v8388_v56  ;;  %v8434_v56 = vld [vmem:[%s11506_s13 + $0x10f4] ss:$8 sps:$4 sm:$0xff]  }
 0x415   :  { %v11141_v40 = vpop.f32.mrf.mxu0  ;;  %6535 = vmatmul.mubr.bf16.vlgmr.msra.gmra.mxu0 %v1945_v39  ;;  %v8441_v39 = vld [vmem:[%s11506_s13 + $0x10e4] ss:$8 sps:$4 sm:$0xff]  }
 0x416   :  { %v6167_v50 = vpop.f32.mrf.mxu1  ;;  %6412 = vmatmul.mubr.bf16.vlgmr.msra.gmra.mxu1 %v1939_v32  ;;  %6585 = vmatpush1.bf16.msra.mxu0 %v8383_v2  ;;  %v5800_v2 = vsel %vm5798_vm8, %v7505_v17, 0  ;;  %v1949_v32 = vpack.c.bf16 %v11106_v30, %v11106_v30  ;;  %v8442_v30 = vld [vmem:[%s11513_s15 + $0x60] ss:$8 sps:$4 sm:$0xff]  }
 0x417   :  { %v11151_v15 = vadd.f32 %v6167_v50, %v6127_v0  ;;  %7508 = vmatprep.mubr.msk.bf16.mxu0 %vm1586_vm4, %v1950_v22  ;;  %v11154_v48 = vpop.f32.mrf.mxu0  ;;  %6462 = vmatpush1.bf16.msra.mxu1 %v8386_v55  ;;  %v8436_v55 = vld [vmem:[%s11513_s15 + $0x70] ss:$8 sps:$4 sm:$0xff]   ;;  %v8444_v0 = vld [vmem:[%s11513_s15 + $0x64] ss:$8 sps:$4 sm:$0xff]   ;;  %v8536_v22 = vpop.eup %8535  ;;  %v11536_v50 = vmov 0  }
 0x418   :  { %6493 = vmatprep.mubr.bf16.mxu1 %v1944_v3  ;;  %v6169_v11 = vpop.f32.mrf.mxu1  ;;  %6586 = vmatprep.subr.bf16.mxu0 %v8391_v7  ;;  %v8439_v7 = vld [vmem:[%s11506_s13 + $0x10e0] ss:$8 sps:$4 sm:$0xff]   ;;  %v8445_v3 = vld [vmem:[%s11506_s13 + $0x10d0] ss:$8 sps:$4 sm:$0xff]  }
 0x419   :  { %v11167_v37 = vadd.f32 %v6169_v11, %v6129_v12  ;;  %v6294_v47 = vpop.f32.mrf.mxu0  ;;  %6463 = vmatprep.subr.bf16.mxu1 %v8394_v10  ;;  %v8447_v10 = vld [vmem:[%s11506_s13 + $0x10d4] ss:$8 sps:$4 sm:$0xff]   ;;  %v1675_v12 = vmul.f32 %v8536_v22, %v9294_v59  ;;  %v8448_v11 = vld [vmem:[%s11513_s15 + $0x50] ss:$8 sps:$4 sm:$0xff]   ;;  %v8451_v59 = vld [vmem:[%s11506_s13 + $0x10c0] ss:$8 sps:$4 sm:$0xff]  }
 0x41a   :  { %v6171_v8 = vpop.f32.mrf.mxu1  ;;  %6587 = vmatpush1.bf16.msra.mxu0 %v8389_v14  ;;  %v8450_v14 = vld [vmem:[%s11513_s15 + $0x54] ss:$8 sps:$4 sm:$0xff]   ;;  %v8498_v22 = vld [vmem:[%s11506_s13 + $0x1224] ss:$8 sps:$4 sm:$0xff]  }
 0x41b   :  { %v6295_v13 = vpop.f32.mrf.mxu0  ;;  %6464 = vmatpush1.bf16.msra.mxu1 %v8392_v49  ;;  %6588 = vmatprep.subr.bf16.mxu0 %v8397_v1  ;;  %v8453_v49 = vld [vmem:[%s11506_s13 + $0x10c4] ss:$8 sps:$4 sm:$0xff]   ;;  %v6870_v1 = vld [vmem:[%s11514_s11] ss:$0 sm:$0xff]  ;;  %v8459_v8 = vld [vmem:[%s11506_s13 + $0x10b4] ss:$8 sps:$4 sm:$0xff]  }
 0x41c   :  { %v6172_v36 = vpop.f32.mrf.mxu1  ;;  %6465 = vmatprep.subr.bf16.mxu1 %v8400_v29  ;;  %v8456_v29 = vld [vmem:[%s11513_s15 + $0x44] ss:$8 sps:$4 sm:$0xff]   ;;  %v1682_v47 = vmul.f32 %v6870_v1, %v1675_v12  ;;  %v8454_v13 = vld [vmem:[%s11513_s15 + $0x40] ss:$8 sps:$4 sm:$0xff]   ;;  %v8507_v12 = vld [vmem:[%s11506_s13 + $0x12f4] ss:$8 sps:$4 sm:$0xff]  }
 0x41d   :  { %v8510_v1 = vld [vmem:[%s11506_s13 + $0x12e4] ss:$8 sps:$4 sm:$0xff]  }
 0x41e   :  { %6589 = vmatpush1.bf16.msra.mxu0 %v8395_v42  ;;  %v6871_v42 = vld [vmem:[%s11515_s12] ss:$0 sm:$0xff] }
 0x41f   :  { %6466 = vmatpush1.bf16.msra.mxu1 %v8398_v38  ;;  %6590 = vmatprep.subr.bf16.mxu0 %v8403_v46  ;;  %v8457_v38 = vld [vmem:[%s11506_s13 + $0x10b0] ss:$8 sps:$4 sm:$0xff]   ;;  %v8462_v46 = vld [vmem:[%s11513_s15 + $0x34] ss:$8 sps:$4 sm:$0xff]   ;;  %v1689_v36 = vadd.f32 %v6871_v42, %v1682_v47  ;;  %v8516_v47 = vld [vmem:[%s11506_s13 + $0x12c4] ss:$8 sps:$4 sm:$0xff]  }
 0x420   :  { %6467 = vmatprep.subr.bf16.mxu1 %v8406_v31  ;;  %v8465_v31 = vld [vmem:[%s11506_s13 + $0x10a4] ss:$8 sps:$4 sm:$0xff]   ;;  %v8519_v42 = vld [vmem:[%s11506_s13 + $0x12b4] ss:$8 sps:$4 sm:$0xff]  }
 0x421   :  { %8537 = vtanh.f32 %v1689_v36  ;;  %v8525_v36 = vld [vmem:[%s11506_s13 + $0x1294] ss:$8 sps:$4 sm:$0xff]  }
 0x422   :  { %6591 = vmatpush1.bf16.msra.mxu0 %v8401_v27  ;;  %v8460_v27 = vld [vmem:[%s11513_s15 + $0x30] ss:$8 sps:$4 sm:$0xff]  }
 0x423   :  { %6468 = vmatpush1.bf16.msra.mxu1 %v8404_v18  ;;  %6592 = vmatprep.subr.bf16.mxu0 %v8409_v6  ;;  %v8463_v18 = vld [vmem:[%s11506_s13 + $0x10a0] ss:$8 sps:$4 sm:$0xff]   ;;  %v8468_v6 = vld [vmem:[%s11513_s15 + $0x24] ss:$8 sps:$4 sm:$0xff]  }
 0x424   :  { %6469 = vmatprep.subr.bf16.mxu1 %v8412_v63  ;;  %v8466_v63 = vld [vmem:[%s11513_s15 + $0x20] ss:$8 sps:$4 sm:$0xff]  }
 0x426   :  { %6593 = vmatpush1.bf16.msra.mxu0 %v8407_v28  ;;  %v8469_v28 = vld [vmem:[%s11506_s13 + $0x1090] ss:$8 sps:$4 sm:$0xff]  }
 0x427   :  { %6470 = vmatpush1.bf16.msra.mxu1 %v8410_v41  ;;  %6594 = vmatprep.subr.bf16.mxu0 %v8415_v21  ;;  %v8477_v41 = vld [vmem:[%s11506_s13 + $0x1084] ss:$8 sps:$4 sm:$0xff]   ;;  %v11334_v21 = vrot.slane %v9455_v57, %v8670_v9  ;;  %v8483_v9 = vld [vmem:[%s11506_s13 + $0x1274] ss:$8 sps:$4 sm:$0xff]  }
 0x428   :  { %6471 = vmatprep.subr.bf16.mxu1 %v8418_v4  ;;  %v8472_v4 = vld [vmem:[%s11513_s15 + $0x10] ss:$8 sps:$4 sm:$0xff]  }
 0x429   :  { %v1869_v57 = vcombine.high %v11334_v21, %v11334_v21 }
 0x42a   :  { %6595 = vmatpush1.bf16.msra.mxu0 %v8413_v45  ;;  %v8475_v45 = vld [vmem:[%s11506_s13 + $0x1080] ss:$8 sps:$4 sm:$0xff]  }
 0x42b   :  { %6472 = vmatpush1.bf16.msra.mxu1 %v8416_v16  ;;  %6596 = vmatprep.subr.bf16.mxu0 %v8421_v35  ;;  %v8478_v16 = vld [vmem:[%s11513_s15] ss:$8 sps:$4 sm:$0xff]   ;;  %v8481_v35 = vld [vmem:[%s11506_s13 + $0x1270] ss:$8 sps:$4 sm:$0xff]   ;;  %v1948_v5 = vpack.c.bf16 %v1869_v57, %v1869_v57 }
 0x42c   :  { %6473 = vmatprep.subr.bf16.mxu1 %v8424_v60 }
 0x42e   :  { %6597 = vmatpush1.bf16.msra.mxu0 %v8419_v51  ;;  %v8538_v60 = vpop.eup %8537  ;;  %v1943_v51 = vpack.c.bf16 %v11113_v58, %v11113_v58  ;;  %v6211_v58 = vadd.f32 %v10932_v43, %v11167_v37  ;;  %v8487_v43 = vld [vmem:[%s11506_s13 + $0x1250] ss:$8 sps:$4 sm:$0xff]  }
 0x42f   :  { %6474 = vmatpush1.bf16.msra.mxu1 %v8422_v54  ;;  %6598 = vmatprep.subr.bf16.mxu0 %v8427_v19  ;;  %v8486_v54 = vld [vmem:[%s11506_s13 + $0x1264] ss:$8 sps:$4 sm:$0xff]   ;;  %v6625_v17 = vpack.c.bf16 %v8538_v60, %v8538_v60 }
 0x430   :  { %6475 = vmatprep.subr.bf16.mxu1 %v8430_v53  ;;  %v6209_v53 = vadd.f32 %v10920_v44, %v11151_v15  ;;  %v8489_v44 = vld [vmem:[%s11506_s13 + $0x1254] ss:$8 sps:$4 sm:$0xff]  }
 0x432   :  { %6599 = vmatpush1.bf16.msra.mxu0 %v8425_v62 }
 0x433   :  { %6476 = vmatpush1.bf16.msra.mxu1 %v8428_v25  ;;  %7507 = vmatprep.subr.msk.bf16.mxu0 %vm5798_vm8, %v7506_v61 }
 0x434   :  { %6477 = vmatprep.subr.bf16.mxu1 %v8434_v56  ;;  %v8484_v56 = vld [vmem:[%s11506_s13 + $0x1260] ss:$8 sps:$4 sm:$0xff]  }
 0x436   :  { %6615 = vmatpush2.bf16.msra.mxu0 %v5800_v2 }
 0x437   :  { %6478 = vmatpush2.bf16.msra.mxu1 %v8432_v24  ;;  %6722 = vmatprep.subr.bf16.mxu0 %v8438_v20 }
 0x438   :  { %6479 = vmatprep.subr.bf16.mxu1 %v8441_v39 }
 0x439   :  { %6617 = vmatmul.mubr.bf16.vlgmr.msra.gmra.mxu0 %v1949_v32  ;;  %v8490_v32 = vld [vmem:[%s11506_s13 + $0x1240] ss:$8 sps:$4 sm:$0xff]  }
 0x43a   :  { %6723 = vmatpush1.bf16.msra.mxu0 %v8436_v55  ;;  %6754 = vmatprep.mubr.bf16.mxu0 %v11536_v50  ;;  %v8492_v55 = vld [vmem:[%s11506_s13 + $0x1244] ss:$8 sps:$4 sm:$0xff]   ;;  %v8499_v50 = vld [vmem:[%s11506_s13 + $0x1210] ss:$8 sps:$4 sm:$0xff]  }
 0x43b   :  { %6480 = vmatpush2.bf16.msra.mxu1 %v8439_v7  ;;  %6724 = vmatprep.subr.bf16.mxu0 %v8444_v0  ;;  %v8495_v7 = vld [vmem:[%s11506_s13 + $0x1234] ss:$8 sps:$4 sm:$0xff]   ;;  %v8493_v0 = vld [vmem:[%s11506_s13 + $0x1230] ss:$8 sps:$4 sm:$0xff]  }
 0x43c   :  { %6481 = vmatprep.subr.bf16.mxu1 %v8447_v10  ;;  %v8496_v10 = vld [vmem:[%s11506_s13 + $0x1220] ss:$8 sps:$4 sm:$0xff]  }
 0x43e   :  { %6725 = vmatpush1.bf16.msra.mxu0 %v8442_v30  ;;  %v8501_v30 = vld [vmem:[%s11506_s13 + $0x1214] ss:$8 sps:$4 sm:$0xff]  }
 0x43f   :  { %6482 = vmatpush2.bf16.msra.mxu1 %v8445_v3  ;;  %6726 = vmatprep.subr.bf16.mxu0 %v8450_v14  ;;  %v8504_v3 = vld [vmem:[%s11506_s13 + $0x1204] ss:$8 sps:$4 sm:$0xff]   ;;  %v8502_v14 = vld [vmem:[%s11506_s13 + $0x1200] ss:$8 sps:$4 sm:$0xff]  }
 0x440   :  { %6483 = vmatprep.subr.bf16.mxu1 %v8453_v49  ;;  %v8505_v49 = vld [vmem:[%s11506_s13 + $0x12f0] ss:$8 sps:$4 sm:$0xff]  }
 0x442   :  { %6727 = vmatpush1.bf16.msra.mxu0 %v8448_v11  ;;  %v8508_v11 = vld [vmem:[%s11506_s13 + $0x12e0] ss:$8 sps:$4 sm:$0xff]  }
 0x443   :  { %6484 = vmatpush2.bf16.msra.mxu1 %v8451_v59  ;;  %6728 = vmatprep.subr.bf16.mxu0 %v8456_v29  ;;  %v8513_v59 = vld [vmem:[%s11506_s13 + $0x12d4] ss:$8 sps:$4 sm:$0xff]   ;;  %v8511_v29 = vld [vmem:[%s11506_s13 + $0x12d0] ss:$8 sps:$4 sm:$0xff]  }
 0x444   :  { %6485 = vmatprep.subr.bf16.mxu1 %v8459_v8  ;;  %v8514_v8 = vld [vmem:[%s11506_s13 + $0x12c0] ss:$8 sps:$4 sm:$0xff]  }
 0x446   :  { %6729 = vmatpush1.bf16.msra.mxu0 %v8454_v13  ;;  %v8517_v13 = vld [vmem:[%s11506_s13 + $0x12b0] ss:$8 sps:$4 sm:$0xff]  }
 0x447   :  { %6486 = vmatpush2.bf16.msra.mxu1 %v8457_v38  ;;  %6730 = vmatprep.subr.bf16.mxu0 %v8462_v46  ;;  %v8522_v38 = vld [vmem:[%s11506_s13 + $0x12a4] ss:$8 sps:$4 sm:$0xff]   ;;  %v8520_v46 = vld [vmem:[%s11506_s13 + $0x12a0] ss:$8 sps:$4 sm:$0xff]  }
 0x448   :  { %6487 = vmatprep.subr.bf16.mxu1 %v8465_v31  ;;  %v8523_v31 = vld [vmem:[%s11506_s13 + $0x1290] ss:$8 sps:$4 sm:$0xff]  }
 0x44a   :  { %6731 = vmatpush1.bf16.msra.mxu0 %v8460_v27  ;;  %v8528_v27 = vld [vmem:[%s11506_s13 + $0x1284] ss:$8 sps:$4 sm:$0xff]  }
 0x44b   :  { %6488 = vmatpush2.bf16.msra.mxu1 %v8463_v18  ;;  %6732 = vmatprep.subr.bf16.mxu0 %v8468_v6  ;;  %v8526_v18 = vld [vmem:[%s11506_s13 + $0x1280] ss:$8 sps:$4 sm:$0xff]   ;;  %v1947_v6 = vpack.c.bf16 %v11334_v21, %v11334_v21 }
 0x44c   :  { %6489 = vmatprep.subr.bf16.mxu1 %v8471_v33 }
 0x44e   :  { %6733 = vmatpush1.bf16.msra.mxu0 %v8466_v63 }
 0x44f   :  { %6490 = vmatpush2.bf16.msra.mxu1 %v8469_v28  ;;  %6734 = vmatprep.subr.bf16.mxu0 %v8474_v34 }
 0x450   :  { %6491 = vmatprep.subr.bf16.mxu1 %v8477_v41 }
 0x452   :  { %6735 = vmatpush1.bf16.msra.mxu0 %v8472_v4 }
 0x453   :  { %6492 = vmatpush2.bf16.msra.mxu1 %v8475_v45  ;;  %6736 = vmatprep.subr.bf16.mxu0 %v8480_v52 }
 0x454   :  { %6543 = vmatprep.subr.bf16.mxu1 %v8483_v9 }
 0x455   :  { %v11361_v19 = vpop.f32.mrf.mxu0 }
 0x456   :  { %v6249_v62 = vpop.f32.mrf.mxu1  ;;  %6494 = vmatmul.mubr.bf16.vlgmr.msra.gmra.mxu1 %v1943_v51  ;;  %6737 = vmatpush1.bf16.msra.mxu0 %v8478_v16 }
 0x457   :  { %v11365_v25 = vadd.f32 %v6249_v62, %v6209_v53  ;;  %v11367_v61 = vpop.f32.mrf.mxu0  ;;  %6544 = vmatpush1.bf16.msra.mxu1 %v8481_v35  ;;  %6575 = vmatprep.mubr.bf16.mxu1 %v1948_v5 }
 0x458   :  { %v6251_v24 = vpop.f32.mrf.mxu1  ;;  %6545 = vmatprep.subr.bf16.mxu1 %v8486_v54 }
 0x459   :  { %v11377_v15 = vadd.f32 %v6251_v24, %v6211_v58  ;;  %v6376_v2 = vpop.f32.mrf.mxu0  ;;  %6755 = vmatmul.mubr.bf16.vlgmr.msra.gmra.mxu0 %v6625_v17  ;;  %v6291_v63 = vadd.f32 %v11141_v40, %v11365_v25 }
 0x45a   :  { %v6253_v20 = vpop.f32.mrf.mxu1 }
 0x45b   :  { %v6377_v39 = vpop.f32.mrf.mxu0  ;;  %6546 = vmatpush1.bf16.msra.mxu1 %v8484_v56  ;;  %v6293_v4 = vadd.f32 %v11154_v48, %v11377_v15 }
 0x45c   :  { %v6254_v37 = vpop.f32.mrf.mxu1  ;;  %6547 = vmatprep.subr.bf16.mxu1 %v8489_v44 }
 0x45f   :  { %6548 = vmatpush1.bf16.msra.mxu1 %v8487_v43 }
 0x460   :  { %6549 = vmatprep.subr.bf16.mxu1 %v8492_v55 }
 0x463   :  { %6550 = vmatpush1.bf16.msra.mxu1 %v8490_v32 }
 0x464   :  { %6551 = vmatprep.subr.bf16.mxu1 %v8495_v7 }
 0x467   :  { %6552 = vmatpush1.bf16.msra.mxu1 %v8493_v0 }
 0x468   :  { %6553 = vmatprep.subr.bf16.mxu1 %v8498_v22 }
 0x46b   :  { %6554 = vmatpush1.bf16.msra.mxu1 %v8496_v10 }
 0x46c   :  { %6555 = vmatprep.subr.bf16.mxu1 %v8501_v30 }
 0x46f   :  { %6556 = vmatpush1.bf16.msra.mxu1 %v8499_v50  ;;  %v6765_v50 = vld [vmem:[%s11516_s16] sm:$0x3] }
 0x470   :  { %6557 = vmatprep.subr.bf16.mxu1 %v8504_v3 }
 0x473   :  { %6558 = vmatpush1.bf16.msra.mxu1 %v8502_v14 }
 0x474   :  { %6559 = vmatprep.subr.bf16.mxu1 %v8507_v12 }
 0x477   :  { %6560 = vmatpush2.bf16.msra.mxu1 %v8505_v49 }
 0x478   :  { %6561 = vmatprep.subr.bf16.mxu1 %v8510_v1 }
 0x47b   :  { %6562 = vmatpush2.bf16.msra.mxu1 %v8508_v11  ;;  %v6770_v11 = vrot.slane %v6765_v50, %v9036_v23 }
 0x47c   :  { %6563 = vmatprep.subr.bf16.mxu1 %v8513_v59 }
 0x47f   :  { %6564 = vmatpush2.bf16.msra.mxu1 %v8511_v29 }
 0x480   :  { %6565 = vmatprep.subr.bf16.mxu1 %v8516_v47 }
 0x483   :  { %6566 = vmatpush2.bf16.msra.mxu1 %v8514_v8  ;;  %v6774_v8 = vrot.slane %v6765_v50, %v9042_v26 }
 0x484   :  { %6567 = vmatprep.subr.bf16.mxu1 %v8519_v42 }
 0x487   :  { %6568 = vmatpush2.bf16.msra.mxu1 %v8517_v13 }
 0x488   :  { %6569 = vmatprep.subr.bf16.mxu1 %v8522_v38 }
 0x48b   :  { %6570 = vmatpush2.bf16.msra.mxu1 %v8520_v46 }
 0x48c   :  { %6571 = vmatprep.subr.bf16.mxu1 %v8525_v36 }
 0x48f   :  { %6572 = vmatpush2.bf16.msra.mxu1 %v8523_v31 }
 0x490   :  { %6573 = vmatprep.subr.bf16.mxu1 %v8528_v27 }
 0x493   :  { %6574 = vmatpush2.bf16.msra.mxu1 %v8526_v18 }
 0x495   :  { %v6454_v33 = vpop.f32.mrf.mxu0 }
 0x496   :  { %v6331_v28 = vpop.f32.mrf.mxu1  ;;  %6576 = vmatmul.mubr.bf16.vlgmr.msra.gmra.mxu1 %v1947_v6 }
 0x497   :  { %v6332_v34 = vadd.f32 %v6331_v28, %v6291_v63  ;;  %v6456_v41 = vpop.f32.mrf.mxu0 }
 0x498   :  { %v6333_v45 = vpop.f32.mrf.mxu1 }
 0x499   :  { %v6334_v52 = vadd.f32 %v6333_v45, %v6293_v4  ;;  %v6458_v9 = vpop.f32.mrf.mxu0  ;;  %v6373_v21 = vadd.f32 %v11361_v19, %v6332_v34 }
 0x49a   :  { %v6335_v57 = vpop.f32.mrf.mxu1 }
 0x49b   :  { %v6459_v16 = vpop.f32.mrf.mxu0  ;;  %v6375_v40 = vadd.f32 %v11367_v61, %v6334_v52  ;;  %v26_v52 = vstv %s11517_s20 }
 0x49c   :  { %v6336_v35 = vpop.f32.mrf.mxu1  ;;  %27 = vst [vmem:[#allocation2] sm:$0x1] %v26_v52 }
 0x49d   :  { %v6779_v35 = vld [vmem:[%s11518_s17] sm:$0x3] }
 0x4d5   :  { %v6536_v60 = vpop.f32.mrf.mxu0 }
 0x4d6   :  { %v6413_v51 = vpop.f32.mrf.mxu1 }
 0x4d7   :  { %v6414_v54 = vadd.f32 %v6413_v51, %v6373_v21  ;;  %v6538_v53 = vpop.f32.mrf.mxu0  ;;  %v6806_v21 = vrot.slane %v6779_v35, %v9036_v23  ;;  %v6810_v51 = vrot.slane %v6779_v35, %v9042_v26 }
 0x4d8   :  { %v6415_v5 = vpop.f32.mrf.mxu1 }
 0x4d9   :  { %v6416_v62 = vadd.f32 %v6415_v5, %v6375_v40  ;;  %v6540_v25 = vpop.f32.mrf.mxu0  ;;  %v6455_v7 = vadd.f32 %v6454_v33, %v6414_v54 }
 0x4da   :  { %v6417_v58 = vpop.f32.mrf.mxu1  ;;  %v6830_v25 = vld [vmem:[%s11520_s19] sm:$0x3] }
 0x4db   :  { %v6541_v17 = vpop.f32.mrf.mxu0  ;;  %v6457_v0 = vadd.f32 %v6456_v41, %v6416_v62 }
 0x4dc   :  { %v6418_v48 = vpop.f32.mrf.mxu1 }
 0x4f9   :  { %v6618_v56 = vpop.f32.mrf.mxu0 }
 0x4fb   :  { %v6620_v24 = vpop.f32.mrf.mxu0 }
 0x4fd   :  { %v6622_v44 = vpop.f32.mrf.mxu0 }
 0x4fe   :  { %v6839_v44 = vrot.slane %v6830_v25, %v9042_v26 }
 0x4ff   :  { %v6623_v15 = vpop.f32.mrf.mxu0 }
 0x516   :  { %v6495_v2 = vpop.f32.mrf.mxu1 }
 0x517   :  { %v6496_v61 = vadd.f32 %v6495_v2, %v6455_v7 }
 0x518   :  { %v6497_v20 = vpop.f32.mrf.mxu1 }
 0x519   :  { %v6756_v39 = vpop.f32.mrf.mxu0  ;;  %v6498_v22 = vadd.f32 %v6497_v20, %v6457_v0  ;;  %v6537_v10 = vadd.f32 %v6536_v60, %v6496_v61  ;;  %v6780_v60 = vld [vmem:[%s11519_s18] sm:$0x3] }
 0x51a   :  { %v6499_v43 = vpop.f32.mrf.mxu1  ;;  %v6819_v5 = vrot.slane %v6780_v60, %v9036_v23  ;;  %v6823_v62 = vrot.slane %v6780_v60, %v9042_v26 }
 0x51b   :  { %v6758_v19 = vpop.f32.mrf.mxu0  ;;  %v6539_v14 = vadd.f32 %v6538_v53, %v6498_v22 }
 0x51c   :  { %v6500_v37 = vpop.f32.mrf.mxu1 }
 0x51d   :  { %v6760_v55 = vpop.f32.mrf.mxu0 }
 0x51e   :  { %v7525_v55 = vld [vmem:[#allocation2] ss:$0 sm:$0xff] }
 0x51f   :  { %v6761_v32 = vpop.f32.mrf.mxu0 }
 0x556   :  { %v6577_v30 = vpop.f32.mrf.mxu1 }
 0x557   :  { %v6578_v3 = vadd.f32 %v6577_v30, %v6537_v10 }
 0x558   :  { %v6579_v12 = vpop.f32.mrf.mxu1 }
 0x559   :  { %v6619_v49 = vadd.f32 %v6618_v56, %v6578_v3  ;;  %v6580_v1 = vadd.f32 %v6579_v12, %v6539_v14 }
 0x55a   :  { %v6581_v59 = vpop.f32.mrf.mxu1 }
 0x55b   :  { %v6763_v29 = vadd.f32 %v6756_v39, %v6619_v49  ;;  %v6621_v47 = vadd.f32 %v6620_v24, %v6580_v1  ;;  %v6835_v24 = vrot.slane %v6830_v25, %v9036_v23 }
 0x55c   :  { %v6582_v42 = vpop.f32.mrf.mxu1 }
 0x55d   :  { %v6764_v13 = vadd.f32 %v6758_v19, %v6621_v47  ;;  %v6777_v38 = vadd.f32 %v6770_v11, %v6763_v29 }
 0x55f   :  { %v6778_v46 = vadd.f32 %v6774_v8, %v6764_v13  ;;  %v6781_v36 = vsel %vm311_vm3, %v6777_v38, 0.0 }
 0x561   :  { %v6782_v31 = vsel %vm311_vm3, %v6778_v46, 0.0 }
 0x562   :  { %v6783_v27 = vadd.f32 %v6782_v31, %v6781_v36 }
 0x564   :  { %6784 = vadd.xlane.f32.xlu0 %v6783_v27 }
 0x5ed   :  { %v6785_v18 = vpop.xlane.xlu0 %6784 }
 0x5ee   :  { %v6787_v6 = vmul.f32 0.00390625, %v6785_v18 }
 0x5f0   :  { %v6788_v33 = vsub.f32 %v6777_v38, %v6787_v6  ;;  %v6789_v63 = vsub.f32 %v6778_v46, %v6787_v6 }
 0x5f2   :  { %v6790_v28 = vmul.f32 %v6788_v33, %v6788_v33  ;;  %v6791_v34 = vmul.f32 %v6789_v63, %v6789_v63 }
 0x5f4   :  { %v6792_v41 = vsel %vm311_vm3, %v6790_v28, 0.0  ;;  %v6793_v4 = vsel %vm311_vm3, %v6791_v34, 0.0 }
 0x5f5   :  { %v6794_v45 = vadd.f32 %v6793_v4, %v6792_v41 }
 0x5f7   :  { %6795 = vadd.xlane.f32.xlu1 %v6794_v45 }
 0x680   :  { %v6796_v9 = vpop.xlane.xlu1 %6795 }
 0x681   :  { %v6797_v57 = vmul.f32 0.00390625, %v6796_v9 }
 0x683   :  { %v6798_v16 = vadd.f32 1e-05, %v6797_v57 }
 0x685   :  { %8539 = vrsqrt.f32 %v6798_v16 }
 0x692   :  { %v8540_v54 = vpop.eup %8539 }
 0x693   :  { %v6800_v53 = vmul.f32 %v8540_v54, %v6788_v33  ;;  %v6801_v40 = vmul.f32 %v8540_v54, %v6789_v63 }
 0x695   :  { %v6813_v58 = vmul.f32 %v6806_v21, %v6800_v53  ;;  %v6814_v17 = vmul.f32 %v6810_v51, %v6801_v40 }
 0x697   :  { %v6826_v48 = vadd.f32 %v6819_v5, %v6813_v58  ;;  %v6827_v56 = vadd.f32 %v6823_v62, %v6814_v17 }
 0x699   :  { %v6828_v15 = vmax.f32 %v6826_v48, 0.0  ;;  %v6829_v2 = vmax.f32 %v6827_v56, 0.0 }
 0x69b   :  { %v6842_v20 = vmul.f32 %v6835_v24, %v6828_v15  ;;  %v6843_v39 = vmul.f32 %v6839_v44, %v6829_v2 }
 0x69d   :  { %v6844_v43 = vsel %vm311_vm3, %v6842_v20, 0.0  ;;  %v6845_v19 = vsel %vm311_vm3, %v6843_v39, 0.0 }
 0x69e   :  { %v6846_v37 = vadd.f32 %v6845_v19, %v6844_v43 }
 0x6a0   :  { %6847 = vadd.xlane.f32.xlu0 %v6846_v37 }
 0x729   :  { %v6848_v32 = vpop.xlane.xlu0 %6847 }
 0x72a   :  { %v6856_v7 = vadd.f32 %v7525_v55, %v6848_v32 }
 0x72c   :  { %6858 = vst.msk [vmem:[%s11521_s21] sm:$0x3] %vm6857_vm9, %v6856_v7 }

</bundles_post_ra>
